<compile_context>
chip_gen: v5e
topology: v5e:2x2
jax: 0.10.0
libtpu: 0.0.40
codegen_flags: <defaults>
</compile_context>

<pallas_src>
import numpy as np
import jax
import jax.numpy as jnp
from jax import lax
from jax.experimental import pallas as pl
from jax.experimental.pallas import tpu as pltpu

NEG_SLOPE = 0.01   # PyTorch nn.LeakyReLU default
CP = 128           # padded channel (lane) width -> lane-dense matmuls / stores
RES_OFF = CP // 2  # lane offset where the 1x1-conv residual branch rides


def _leaky(a):
    return jnp.where(a > 0, a, NEG_SLOPE * a)


# ----------------------------- Pallas kernel --------------------------------
def _content_kernel(xp_ref, w1_ref, w2_ref, o_ref, acc_ref, pad_ref, pool_ref):
    """Fused  conv1 -> lrelu -> conv2 -> lrelu -> pool  (+)  conv3 -> pool.

    xp_ref  : (B, H+2, W+2, Cin)  f32  zero-padded channels-last input
    w1_ref  : (9, Cin, CP)        bf16 conv1 taps in lanes [0, Cout);
                                       conv3 (1x1) on the centre tap in lanes
                                       [RES_OFF, RES_OFF + Cout)
    w2_ref  : (9, Cout, CP)       bf16 conv2 taps in lanes [0, Cout)
    o_ref   : (B, H/2, W/2, CP)   f32  pooled output; lanes [0, Cout) valid
    acc_ref : (B*H*W, CP)         f32  scratch matmul accumulator
    pad_ref : (B, H+2, W+2, Cout) f32  scratch zero-padded conv1 output
    pool_ref: (B*H*W, CP)         f32  scratch residual / pre-pool slab
    """
    B, Hp, Wp, Cin = xp_ref.shape
    H, W = Hp - 2, Wp - 2
    Ho, Wo = H // 2, W // 2
    Cout = pad_ref.shape[-1]
    M = B * H * W

    # ---- stage 1: conv1 (3x3) and conv3 (1x1) in the same tap accumulation --
    acc_ref[...] = jnp.zeros((M, CP), jnp.float32)
    for k in range(9):                              # static unroll, 9 taps
        kh, kw = k // 3, k % 3
        patch = xp_ref[:, kh:kh + H, kw:kw + W, :].reshape(M, Cin)
        acc_ref[...] += jnp.dot(patch.astype(jnp.bfloat16), w1_ref[k],
                                preferred_element_type=jnp.float32)
    acc1 = acc_ref[...]

    # residual (conv3 output) lives in lanes [RES_OFF, RES_OFF+Cout); park it
    # in pool_ref so both branches share one slab through the max-pool.
    lane = lax.broadcasted_iota(jnp.int32, (M, CP), 1)
    pool_ref[...] = jnp.where((lane >= RES_OFF) & (lane < RES_OFF + Cout),
                              acc1, 0.0)

    # LeakyReLU, then lay conv1's output out zero-padded for conv2's taps.
    out1 = _leaky(acc1[:, :Cout])                   # (M, Cout) f32
    pad_ref[...] = jnp.zeros(pad_ref.shape, pad_ref.dtype)
    pad_ref[:, 1:H + 1, 1:W + 1, :] = out1.reshape(B, H, W, Cout)

    # ---- stage 2: conv2 (3x3) ------------------------------------------------
    acc_ref[...] = jnp.zeros((M, CP), jnp.float32)
    for k in range(9):
        kh, kw = k // 3, k % 3
        patch = pad_ref[:, kh:kh + H, kw:kw + W, :].reshape(M, Cout)
        acc_ref[...] += jnp.dot(patch.astype(jnp.bfloat16), w2_ref[k],
                                preferred_element_type=jnp.float32)
    # lanes >= Cout of acc2 are exactly zero, so LeakyReLU leaves the parked
    # residual lanes untouched when the two slabs are added.
    pool_ref[...] = pool_ref[...] + _leaky(acc_ref[...])

    # ---- fused 2x2 max-pool (pure VPU) ----------------------------------------
    # pool_ref rows are ordered (b, h, w): the 2x2 window's w-pair are adjacent
    # rows -> stride-2 row loads; the h-pair is handled by a leading-dim split.
    w_even = pool_ref[pl.ds(0, M // 2, stride=2), :]
    w_odd = pool_ref[pl.ds(1, M // 2, stride=2), :]
    hmax = jnp.maximum(w_even, w_odd).reshape(B, Ho, 2, Wo, CP)
    pooled = jnp.maximum(hmax[:, :, 0], hmax[:, :, 1])        # (B, Ho, Wo, CP)

    # add the pooled residual lanes into the main lanes.  RES_OFF == CP // 2,
    # so a half rotation of the lane axis lines the two groups up exactly.
    pooled2 = pooled.reshape(B * Ho * Wo, CP)
    swapped = jnp.concatenate([pooled2[:, RES_OFF:], pooled2[:, :RES_OFF]],
                              axis=1)
    o_ref[...] = (pooled2 + swapped).reshape(B, Ho, Wo, CP)


# ------------------------------- wrapper -------------------------------------
def content_forward(x_nchw, w1, w2, w3):
    """Forward of `Content` with spectrally-normalised weights already applied.

    x_nchw: (B, Cin, H, W); w1: (Cout, Cin, 3, 3); w2: (Cout, Cout, 3, 3);
    w3: (Cout, Cin, 1, 1).  Returns (B, Cout, H//2, W//2) in NCHW, f32.
    """
    B, Cin, H, W = x_nchw.shape
    Cout = w1.shape[0]
    assert H % 2 == 0 and W % 2 == 0
    assert Cout <= RES_OFF, "residual rides in the upper half of the 128 lanes"
    Ho, Wo = H // 2, W // 2
    M = B * H * W

    # ---- layout glue (plain JAX): NCHW -> channels-last, zero spatial pad ----
    x_cl = jnp.transpose(x_nchw, (0, 2, 3, 1)).astype(jnp.float32)
    xp = jnp.pad(x_cl, ((0, 0), (1, 1), (1, 1), (0, 0)))

    # ---- weights: (Cout, Cin, 3, 3) -> (9, Cin, 128), lane-padded, bf16 ------
    w1_t = jnp.transpose(w1, (2, 3, 1, 0)).reshape(9, Cin, Cout)
    w1_aug = jnp.zeros((9, Cin, CP), jnp.float32).at[:, :, :Cout].set(w1_t)
    w3_t = jnp.transpose(w3[:, :, 0, 0], (1, 0))                 # (Cin, Cout)
    w1_aug = w1_aug.at[4, :, RES_OFF:RES_OFF + Cout].set(w3_t)   # centre tap
    w2_t = jnp.transpose(w2, (2, 3, 1, 0)).reshape(9, Cout, Cout)
    w2_aug = jnp.zeros((9, Cout, CP), jnp.float32).at[:, :, :Cout].set(w2_t)

    pooled = pl.pallas_call(
        _content_kernel,
        out_shape=jax.ShapeDtypeStruct((B, Ho, Wo, CP), jnp.float32),
        in_specs=[
            pl.BlockSpec(memory_space=pltpu.MemorySpace.VMEM),
            pl.BlockSpec(memory_space=pltpu.MemorySpace.VMEM),
            pl.BlockSpec(memory_space=pltpu.MemorySpace.VMEM),
        ],
        out_specs=pl.BlockSpec(memory_space=pltpu.MemorySpace.VMEM),
        scratch_shapes=[
            pltpu.VMEM((M, CP), jnp.float32),                   # matmul accumulator
            pltpu.VMEM((B, H + 2, W + 2, Cout), jnp.float32),   # padded conv1 output
            pltpu.VMEM((M, CP), jnp.float32),                   # residual / pre-pool slab
        ],
    )(xp, w1_aug.astype(jnp.bfloat16), w2_aug.astype(jnp.bfloat16))

    # glue: drop lane padding, back to NCHW
    return jnp.transpose(pooled[..., :Cout], (0, 3, 1, 2))


# -------------------- parameter setup (spectral norm) ------------------------
def _spectral_normalize(w, n_iter=50, eps=1e-12):
    """Deterministic power-iteration estimate of sigma; returns w / sigma."""
    # TODO(synk): PyTorch's spectral_norm keeps a persistent random u and does
    # one iteration per forward; here sigma is re-derived deterministically.
    wm = w.reshape(w.shape[0], -1)
    u = jnp.full((wm.shape[0],), 1.0 / np.sqrt(wm.shape[0]), jnp.float32)
    v = jnp.zeros((wm.shape[1],), jnp.float32)
    for _ in range(n_iter):
        v = wm.T @ u
        v = v / (jnp.linalg.norm(v) + eps)
        u = wm @ v
        u = u / (jnp.linalg.norm(u) + eps)
    sigma = u @ (wm @ v)
    return w / sigma


# ----------------------------- pure-JAX reference ----------------------------
def _reference_forward(x, w1, w2, w3):
    dn = ('NCHW', 'OIHW', 'NCHW')

    def conv(a, w, p):
        return lax.conv_general_dilated(
            a, w, window_strides=(1, 1), padding=[(p, p), (p, p)],
            dimension_numbers=dn, precision=lax.Precision.HIGHEST)

    def pool(a):
        return lax.reduce_window(a, -jnp.inf, lax.max,
                                 (1, 1, 2, 2), (1, 1, 2, 2), 'VALID')

    res = pool(conv(x, w3, 0))
    out = _leaky(conv(x, w1, 1))
    out = _leaky(conv(out, w2, 1))
    return pool(out) + res


if __name__ == "__main__":
    B, Cin, Cout, H, W = 2, 4, 8, 16, 16
    key = jax.random.PRNGKey(0)
    k_x, k1, k2, k3 = jax.random.split(key, 4)

    def bf16_round(a):  # keep the bf16 MXU operands and the f32 reference aligned
        return a.astype(jnp.bfloat16).astype(jnp.float32)

    x = bf16_round(jax.random.normal(k_x, (B, Cin, H, W), jnp.float32))
    w1 = bf16_round(_spectral_normalize(
        0.2 * jax.random.normal(k1, (Cout, Cin, 3, 3), jnp.float32)))
    w2 = bf16_round(_spectral_normalize(
        0.2 * jax.random.normal(k2, (Cout, Cout, 3, 3), jnp.float32)))
    w3 = bf16_round(_spectral_normalize(
        0.2 * jax.random.normal(k3, (Cout, Cin, 1, 1), jnp.float32)))

    out = jax.block_until_ready(content_forward(x, w1, w2, w3))
    ref = jax.block_until_ready(_reference_forward(x, w1, w2, w3))

    assert out.shape == (B, Cout, H // 2, W // 2), out.shape
    np.testing.assert_allclose(np.asarray(out), np.asarray(ref),
                               rtol=1e-2, atol=1e-2)
    print("KERNEL_OK")
</pallas_src>

<mosaic_0001>
module attributes {stable_mosaic.version = 11 : i64} {
  func.func @_content_kernel(%arg0: memref<2x18x18x4xf32, #tpu.memory_space<vmem>>, %arg1: memref<9x4x128xbf16, #tpu.memory_space<vmem>>, %arg2: memref<9x8x128xbf16, #tpu.memory_space<vmem>>, %arg3: memref<2x8x8x128xf32, #tpu.memory_space<vmem>>, %arg4: memref<512x128xf32, #tpu.memory_space<vmem>>, %arg5: memref<2x18x18x8xf32, #tpu.memory_space<vmem>>, %arg6: memref<512x128xf32, #tpu.memory_space<vmem>>) attributes {dimension_semantics = [], scalar_prefetch = 0 : i64, scratch_operands = 3 : i64, tpu.core_type = #tpu.core_type<tc>} {
    %cst = arith.constant 0.000000e+00 : f32
    %0 = vector.broadcast %cst : f32 to vector<512x128xf32>
    %c0 = arith.constant 0 : index
    %c0_0 = arith.constant 0 : index
    %1 = vector.load %arg4[%c0, %c0_0] : memref<512x128xf32, #tpu.memory_space<vmem>>, vector<512x128xf32>
    tpu.vector_store %arg4[%c0, %c0_0], %0 {strides = array<i32>} : memref<512x128xf32, #tpu.memory_space<vmem>>, vector<512x128xf32>,
    %c0_1 = arith.constant 0 : index
    %c0_2 = arith.constant 0 : index
    %c0_3 = arith.constant 0 : index
    %c0_4 = arith.constant 0 : index
    %2 = vector.load %arg0[%c0_1, %c0_2, %c0_3, %c0_4] : memref<2x18x18x4xf32, #tpu.memory_space<vmem>>, vector<2x16x16x4xf32>
    %3 = vector.shape_cast %2 : vector<2x16x16x4xf32> to vector<512x4xf32>
    %c0_5 = arith.constant 0 : index
    %c0_6 = arith.constant 0 : index
    %4 = vector.load %arg4[%c0_5, %c0_6] : memref<512x128xf32, #tpu.memory_space<vmem>>, vector<512x128xf32>
    %5 = arith.truncf %3 : vector<512x4xf32> to vector<512x4xbf16>
    %c0_7 = arith.constant 0 : index
    %c0_8 = arith.constant 0 : index
    %c0_9 = arith.constant 0 : index
    %6 = vector.load %arg1[%c0_7, %c0_8, %c0_9] : memref<9x4x128xbf16, #tpu.memory_space<vmem>>, vector<1x4x128xbf16>
    %7 = vector.shape_cast %6 : vector<1x4x128xbf16> to vector<4x128xbf16>
    %cst_10 = arith.constant dense<0.000000e+00> : vector<512x128xf32>
    %8 = tpu.matmul %5, %7, %cst_10 {dimension_numbers = #tpu.dot_dimension_numbers<[1], [0], [0], [1], [0, 0, 1, 1], [], []>} : vector<512x4xbf16>, vector<4x128xbf16>, vector<512x128xf32> -> vector<512x128xf32>
    %9 = arith.addf %4, %8 : vector<512x128xf32>
    %c0_11 = arith.constant 0 : index
    %c0_12 = arith.constant 0 : index
    %10 = vector.load %arg4[%c0_11, %c0_12] : memref<512x128xf32, #tpu.memory_space<vmem>>, vector<512x128xf32>
    tpu.vector_store %arg4[%c0_11, %c0_12], %9 {strides = array<i32>} : memref<512x128xf32, #tpu.memory_space<vmem>>, vector<512x128xf32>,
    %c0_13 = arith.constant 0 : index
    %c0_14 = arith.constant 0 : index
    %c1 = arith.constant 1 : index
    %c0_15 = arith.constant 0 : index
    %11 = vector.load %arg0[%c0_13, %c0_14, %c1, %c0_15] : memref<2x18x18x4xf32, #tpu.memory_space<vmem>>, vector<2x16x16x4xf32>
    %12 = vector.shape_cast %11 : vector<2x16x16x4xf32> to vector<512x4xf32>
    %c0_16 = arith.constant 0 : index
    %c0_17 = arith.constant 0 : index
    %13 = vector.load %arg4[%c0_16, %c0_17] : memref<512x128xf32, #tpu.memory_space<vmem>>, vector<512x128xf32>
    %14 = arith.truncf %12 : vector<512x4xf32> to vector<512x4xbf16>
    %c1_18 = arith.constant 1 : index
    %c0_19 = arith.constant 0 : index
    %c0_20 = arith.constant 0 : index
    %15 = vector.load %arg1[%c1_18, %c0_19, %c0_20] : memref<9x4x128xbf16, #tpu.memory_space<vmem>>, vector<1x4x128xbf16>
    %16 = vector.shape_cast %15 : vector<1x4x128xbf16> to vector<4x128xbf16>
    %cst_21 = arith.constant dense<0.000000e+00> : vector<512x128xf32>
    %17 = tpu.matmul %14, %16, %cst_21 {dimension_numbers = #tpu.dot_dimension_numbers<[1], [0], [0], [1], [0, 0, 1, 1], [], []>} : vector<512x4xbf16>, vector<4x128xbf16>, vector<512x128xf32> -> vector<512x128xf32>
    %18 = arith.addf %13, %17 : vector<512x128xf32>
    %c0_22 = arith.constant 0 : index
    %c0_23 = arith.constant 0 : index
    %19 = vector.load %arg4[%c0_22, %c0_23] : memref<512x128xf32, #tpu.memory_space<vmem>>, vector<512x128xf32>
    tpu.vector_store %arg4[%c0_22, %c0_23], %18 {strides = array<i32>} : memref<512x128xf32, #tpu.memory_space<vmem>>, vector<512x128xf32>,
    %c0_24 = arith.constant 0 : index
    %c0_25 = arith.constant 0 : index
    %c2 = arith.constant 2 : index
    %c0_26 = arith.constant 0 : index
    %20 = vector.load %arg0[%c0_24, %c0_25, %c2, %c0_26] : memref<2x18x18x4xf32, #tpu.memory_space<vmem>>, vector<2x16x16x4xf32>
    %21 = vector.shape_cast %20 : vector<2x16x16x4xf32> to vector<512x4xf32>
    %c0_27 = arith.constant 0 : index
    %c0_28 = arith.constant 0 : index
    %22 = vector.load %arg4[%c0_27, %c0_28] : memref<512x128xf32, #tpu.memory_space<vmem>>, vector<512x128xf32>
    %23 = arith.truncf %21 : vector<512x4xf32> to vector<512x4xbf16>
    %c2_29 = arith.constant 2 : index
    %c0_30 = arith.constant 0 : index
    %c0_31 = arith.constant 0 : index
    %24 = vector.load %arg1[%c2_29, %c0_30, %c0_31] : memref<9x4x128xbf16, #tpu.memory_space<vmem>>, vector<1x4x128xbf16>
    %25 = vector.shape_cast %24 : vector<1x4x128xbf16> to vector<4x128xbf16>
    %cst_32 = arith.constant dense<0.000000e+00> : vector<512x128xf32>
    %26 = tpu.matmul %23, %25, %cst_32 {dimension_numbers = #tpu.dot_dimension_numbers<[1], [0], [0], [1], [0, 0, 1, 1], [], []>} : vector<512x4xbf16>, vector<4x128xbf16>, vector<512x128xf32> -> vector<512x128xf32>
    %27 = arith.addf %22, %26 : vector<512x128xf32>
    %c0_33 = arith.constant 0 : index
    %c0_34 = arith.constant 0 : index
    %28 = vector.load %arg4[%c0_33, %c0_34] : memref<512x128xf32, #tpu.memory_space<vmem>>, vector<512x128xf32>
    tpu.vector_store %arg4[%c0_33, %c0_34], %27 {strides = array<i32>} : memref<512x128xf32, #tpu.memory_space<vmem>>, vector<512x128xf32>,
    %c0_35 = arith.constant 0 : index
    %c1_36 = arith.constant 1 : index
    %c0_37 = arith.constant 0 : index
    %c0_38 = arith.constant 0 : index
    %29 = vector.load %arg0[%c0_35, %c1_36, %c0_37, %c0_38] : memref<2x18x18x4xf32, #tpu.memory_space<vmem>>, vector<2x16x16x4xf32>
    %30 = vector.shape_cast %29 : vector<2x16x16x4xf32> to vector<512x4xf32>
    %c0_39 = arith.constant 0 : index
    %c0_40 = arith.constant 0 : index
    %31 = vector.load %arg4[%c0_39, %c0_40] : memref<512x128xf32, #tpu.memory_space<vmem>>, vector<512x128xf32>
    %32 = arith.truncf %30 : vector<512x4xf32> to vector<512x4xbf16>
    %c3 = arith.constant 3 : index
    %c0_41 = arith.constant 0 : index
    %c0_42 = arith.constant 0 : index
    %33 = vector.load %arg1[%c3, %c0_41, %c0_42] : memref<9x4x128xbf16, #tpu.memory_space<vmem>>, vector<1x4x128xbf16>
    %34 = vector.shape_cast %33 : vector<1x4x128xbf16> to vector<4x128xbf16>
    %cst_43 = arith.constant dense<0.000000e+00> : vector<512x128xf32>
    %35 = tpu.matmul %32, %34, %cst_43 {dimension_numbers = #tpu.dot_dimension_numbers<[1], [0], [0], [1], [0, 0, 1, 1], [], []>} : vector<512x4xbf16>, vector<4x128xbf16>, vector<512x128xf32> -> vector<512x128xf32>
    %36 = arith.addf %31, %35 : vector<512x128xf32>
    %c0_44 = arith.constant 0 : index
    %c0_45 = arith.constant 0 : index
    %37 = vector.load %arg4[%c0_44, %c0_45] : memref<512x128xf32, #tpu.memory_space<vmem>>, vector<512x128xf32>
    tpu.vector_store %arg4[%c0_44, %c0_45], %36 {strides = array<i32>} : memref<512x128xf32, #tpu.memory_space<vmem>>, vector<512x128xf32>,
    %c0_46 = arith.constant 0 : index
    %c1_47 = arith.constant 1 : index
    %c1_48 = arith.constant 1 : index
    %c0_49 = arith.constant 0 : index
    %38 = vector.load %arg0[%c0_46, %c1_47, %c1_48, %c0_49] : memref<2x18x18x4xf32, #tpu.memory_space<vmem>>, vector<2x16x16x4xf32>
    %39 = vector.shape_cast %38 : vector<2x16x16x4xf32> to vector<512x4xf32>
    %c0_50 = arith.constant 0 : index
    %c0_51 = arith.constant 0 : index
    %40 = vector.load %arg4[%c0_50, %c0_51] : memref<512x128xf32, #tpu.memory_space<vmem>>, vector<512x128xf32>
    %41 = arith.truncf %39 : vector<512x4xf32> to vector<512x4xbf16>
    %c4 = arith.constant 4 : index
    %c0_52 = arith.constant 0 : index
    %c0_53 = arith.constant 0 : index
    %42 = vector.load %arg1[%c4, %c0_52, %c0_53] : memref<9x4x128xbf16, #tpu.memory_space<vmem>>, vector<1x4x128xbf16>
    %43 = vector.shape_cast %42 : vector<1x4x128xbf16> to vector<4x128xbf16>
    %cst_54 = arith.constant dense<0.000000e+00> : vector<512x128xf32>
    %44 = tpu.matmul %41, %43, %cst_54 {dimension_numbers = #tpu.dot_dimension_numbers<[1], [0], [0], [1], [0, 0, 1, 1], [], []>} : vector<512x4xbf16>, vector<4x128xbf16>, vector<512x128xf32> -> vector<512x128xf32>
    %45 = arith.addf %40, %44 : vector<512x128xf32>
    %c0_55 = arith.constant 0 : index
    %c0_56 = arith.constant 0 : index
    %46 = vector.load %arg4[%c0_55, %c0_56] : memref<512x128xf32, #tpu.memory_space<vmem>>, vector<512x128xf32>
    tpu.vector_store %arg4[%c0_55, %c0_56], %45 {strides = array<i32>} : memref<512x128xf32, #tpu.memory_space<vmem>>, vector<512x128xf32>,
    %c0_57 = arith.constant 0 : index
    %c1_58 = arith.constant 1 : index
    %c2_59 = arith.constant 2 : index
    %c0_60 = arith.constant 0 : index
    %47 = vector.load %arg0[%c0_57, %c1_58, %c2_59, %c0_60] : memref<2x18x18x4xf32, #tpu.memory_space<vmem>>, vector<2x16x16x4xf32>
    %48 = vector.shape_cast %47 : vector<2x16x16x4xf32> to vector<512x4xf32>
    %c0_61 = arith.constant 0 : index
    %c0_62 = arith.constant 0 : index
    %49 = vector.load %arg4[%c0_61, %c0_62] : memref<512x128xf32, #tpu.memory_space<vmem>>, vector<512x128xf32>
    %50 = arith.truncf %48 : vector<512x4xf32> to vector<512x4xbf16>
    %c5 = arith.constant 5 : index
    %c0_63 = arith.constant 0 : index
    %c0_64 = arith.constant 0 : index
    %51 = vector.load %arg1[%c5, %c0_63, %c0_64] : memref<9x4x128xbf16, #tpu.memory_space<vmem>>, vector<1x4x128xbf16>
    %52 = vector.shape_cast %51 : vector<1x4x128xbf16> to vector<4x128xbf16>
    %cst_65 = arith.constant dense<0.000000e+00> : vector<512x128xf32>
    %53 = tpu.matmul %50, %52, %cst_65 {dimension_numbers = #tpu.dot_dimension_numbers<[1], [0], [0], [1], [0, 0, 1, 1], [], []>} : vector<512x4xbf16>, vector<4x128xbf16>, vector<512x128xf32> -> vector<512x128xf32>
    %54 = arith.addf %49, %53 : vector<512x128xf32>
    %c0_66 = arith.constant 0 : index
    %c0_67 = arith.constant 0 : index
    %55 = vector.load %arg4[%c0_66, %c0_67] : memref<512x128xf32, #tpu.memory_space<vmem>>, vector<512x128xf32>
    tpu.vector_store %arg4[%c0_66, %c0_67], %54 {strides = array<i32>} : memref<512x128xf32, #tpu.memory_space<vmem>>, vector<512x128xf32>,
    %c0_68 = arith.constant 0 : index
    %c2_69 = arith.constant 2 : index
    %c0_70 = arith.constant 0 : index
    %c0_71 = arith.constant 0 : index
    %56 = vector.load %arg0[%c0_68, %c2_69, %c0_70, %c0_71] : memref<2x18x18x4xf32, #tpu.memory_space<vmem>>, vector<2x16x16x4xf32>
    %57 = vector.shape_cast %56 : vector<2x16x16x4xf32> to vector<512x4xf32>
    %c0_72 = arith.constant 0 : index
    %c0_73 = arith.constant 0 : index
    %58 = vector.load %arg4[%c0_72, %c0_73] : memref<512x128xf32, #tpu.memory_space<vmem>>, vector<512x128xf32>
    %59 = arith.truncf %57 : vector<512x4xf32> to vector<512x4xbf16>
    %c6 = arith.constant 6 : index
    %c0_74 = arith.constant 0 : index
    %c0_75 = arith.constant 0 : index
    %60 = vector.load %arg1[%c6, %c0_74, %c0_75] : memref<9x4x128xbf16, #tpu.memory_space<vmem>>, vector<1x4x128xbf16>
    %61 = vector.shape_cast %60 : vector<1x4x128xbf16> to vector<4x128xbf16>
    %cst_76 = arith.constant dense<0.000000e+00> : vector<512x128xf32>
    %62 = tpu.matmul %59, %61, %cst_76 {dimension_numbers = #tpu.dot_dimension_numbers<[1], [0], [0], [1], [0, 0, 1, 1], [], []>} : vector<512x4xbf16>, vector<4x128xbf16>, vector<512x128xf32> -> vector<512x128xf32>
    %63 = arith.addf %58, %62 : vector<512x128xf32>
    %c0_77 = arith.constant 0 : index
    %c0_78 = arith.constant 0 : index
    %64 = vector.load %arg4[%c0_77, %c0_78] : memref<512x128xf32, #tpu.memory_space<vmem>>, vector<512x128xf32>
    tpu.vector_store %arg4[%c0_77, %c0_78], %63 {strides = array<i32>} : memref<512x128xf32, #tpu.memory_space<vmem>>, vector<512x128xf32>,
    %c0_79 = arith.constant 0 : index
    %c2_80 = arith.constant 2 : index
    %c1_81 = arith.constant 1 : index
    %c0_82 = arith.constant 0 : index
    %65 = vector.load %arg0[%c0_79, %c2_80, %c1_81, %c0_82] : memref<2x18x18x4xf32, #tpu.memory_space<vmem>>, vector<2x16x16x4xf32>
    %66 = vector.shape_cast %65 : vector<2x16x16x4xf32> to vector<512x4xf32>
    %c0_83 = arith.constant 0 : index
    %c0_84 = arith.constant 0 : index
    %67 = vector.load %arg4[%c0_83, %c0_84] : memref<512x128xf32, #tpu.memory_space<vmem>>, vector<512x128xf32>
    %68 = arith.truncf %66 : vector<512x4xf32> to vector<512x4xbf16>
    %c7 = arith.constant 7 : index
    %c0_85 = arith.constant 0 : index
    %c0_86 = arith.constant 0 : index
    %69 = vector.load %arg1[%c7, %c0_85, %c0_86] : memref<9x4x128xbf16, #tpu.memory_space<vmem>>, vector<1x4x128xbf16>
    %70 = vector.shape_cast %69 : vector<1x4x128xbf16> to vector<4x128xbf16>
    %cst_87 = arith.constant dense<0.000000e+00> : vector<512x128xf32>
    %71 = tpu.matmul %68, %70, %cst_87 {dimension_numbers = #tpu.dot_dimension_numbers<[1], [0], [0], [1], [0, 0, 1, 1], [], []>} : vector<512x4xbf16>, vector<4x128xbf16>, vector<512x128xf32> -> vector<512x128xf32>
    %72 = arith.addf %67, %71 : vector<512x128xf32>
    %c0_88 = arith.constant 0 : index
    %c0_89 = arith.constant 0 : index
    %73 = vector.load %arg4[%c0_88, %c0_89] : memref<512x128xf32, #tpu.memory_space<vmem>>, vector<512x128xf32>
    tpu.vector_store %arg4[%c0_88, %c0_89], %72 {strides = array<i32>} : memref<512x128xf32, #tpu.memory_space<vmem>>, vector<512x128xf32>,
    %c0_90 = arith.constant 0 : index
    %c2_91 = arith.constant 2 : index
    %c2_92 = arith.constant 2 : index
    %c0_93 = arith.constant 0 : index
    %74 = vector.load %arg0[%c0_90, %c2_91, %c2_92, %c0_93] : memref<2x18x18x4xf32, #tpu.memory_space<vmem>>, vector<2x16x16x4xf32>
    %75 = vector.shape_cast %74 : vector<2x16x16x4xf32> to vector<512x4xf32>
    %c0_94 = arith.constant 0 : index
    %c0_95 = arith.constant 0 : index
    %76 = vector.load %arg4[%c0_94, %c0_95] : memref<512x128xf32, #tpu.memory_space<vmem>>, vector<512x128xf32>
    %77 = arith.truncf %75 : vector<512x4xf32> to vector<512x4xbf16>
    %c8 = arith.constant 8 : index
    %c0_96 = arith.constant 0 : index
    %c0_97 = arith.constant 0 : index
    %78 = vector.load %arg1[%c8, %c0_96, %c0_97] : memref<9x4x128xbf16, #tpu.memory_space<vmem>>, vector<1x4x128xbf16>
    %79 = vector.shape_cast %78 : vector<1x4x128xbf16> to vector<4x128xbf16>
    %cst_98 = arith.constant dense<0.000000e+00> : vector<512x128xf32>
    %80 = tpu.matmul %77, %79, %cst_98 {dimension_numbers = #tpu.dot_dimension_numbers<[1], [0], [0], [1], [0, 0, 1, 1], [], []>} : vector<512x4xbf16>, vector<4x128xbf16>, vector<512x128xf32> -> vector<512x128xf32>
    %81 = arith.addf %76, %80 : vector<512x128xf32>
    %c0_99 = arith.constant 0 : index
    %c0_100 = arith.constant 0 : index
    %82 = vector.load %arg4[%c0_99, %c0_100] : memref<512x128xf32, #tpu.memory_space<vmem>>, vector<512x128xf32>
    tpu.vector_store %arg4[%c0_99, %c0_100], %81 {strides = array<i32>} : memref<512x128xf32, #tpu.memory_space<vmem>>, vector<512x128xf32>,
    %c0_101 = arith.constant 0 : index
    %c0_102 = arith.constant 0 : index
    %83 = vector.load %arg4[%c0_101, %c0_102] : memref<512x128xf32, #tpu.memory_space<vmem>>, vector<512x128xf32>
    %84 = tpu.iota {dimensions = array<i32: 1>} : vector<512x128xi32>
    %c64_i32 = arith.constant 64 : i32
    %85 = vector.broadcast %c64_i32 : i32 to vector<512x128xi32>
    %86 = arith.cmpi sge, %84, %85 : vector<512x128xi32>
    %c72_i32 = arith.constant 72 : i32
    %87 = vector.broadcast %c72_i32 : i32 to vector<512x128xi32>
    %88 = arith.cmpi slt, %84, %87 : vector<512x128xi32>
    %89 = arith.andi %86, %88 : vector<512x128xi1>
    %cst_103 = arith.constant 0.000000e+00 : f32
    %90 = vector.broadcast %cst_103 : f32 to vector<512x128xf32>
    %91 = arith.select %89, %83, %90 : vector<512x128xi1>, vector<512x128xf32>
    %c0_104 = arith.constant 0 : index
    %c0_105 = arith.constant 0 : index
    %92 = vector.load %arg6[%c0_104, %c0_105] : memref<512x128xf32, #tpu.memory_space<vmem>>, vector<512x128xf32>
    tpu.vector_store %arg6[%c0_104, %c0_105], %91 {strides = array<i32>} : memref<512x128xf32, #tpu.memory_space<vmem>>, vector<512x128xf32>,
    %93 = vector.extract_strided_slice %83 {offsets = [0, 0], sizes = [512, 8], strides = [1, 1]} : vector<512x128xf32> to vector<512x8xf32>
    %cst_106 = arith.constant 0.000000e+00 : f32
    %94 = vector.broadcast %cst_106 : f32 to vector<512x8xf32>
    %95 = arith.cmpf ogt, %93, %94 : vector<512x8xf32>
    %cst_107 = arith.constant 0.00999999977 : f32
    %96 = vector.broadcast %cst_107 : f32 to vector<512x8xf32>
    %97 = arith.mulf %96, %93 : vector<512x8xf32>
    %98 = arith.select %95, %93, %97 : vector<512x8xi1>, vector<512x8xf32>
    %cst_108 = arith.constant 0.000000e+00 : f32
    %99 = vector.broadcast %cst_108 : f32 to vector<2x18x18x8xf32>
    %c0_109 = arith.constant 0 : index
    %c0_110 = arith.constant 0 : index
    %c0_111 = arith.constant 0 : index
    %c0_112 = arith.constant 0 : index
    %100 = vector.load %arg5[%c0_109, %c0_110, %c0_111, %c0_112] : memref<2x18x18x8xf32, #tpu.memory_space<vmem>>, vector<2x18x18x8xf32>
    tpu.vector_store %arg5[%c0_109, %c0_110, %c0_111, %c0_112], %99 {strides = array<i32>} : memref<2x18x18x8xf32, #tpu.memory_space<vmem>>, vector<2x18x18x8xf32>,
    %101 = vector.shape_cast %98 : vector<512x8xf32> to vector<2x16x16x8xf32>
    %c0_113 = arith.constant 0 : index
    %c1_114 = arith.constant 1 : index
    %c1_115 = arith.constant 1 : index
    %c0_116 = arith.constant 0 : index
    %102 = vector.load %arg5[%c0_113, %c1_114, %c1_115, %c0_116] : memref<2x18x18x8xf32, #tpu.memory_space<vmem>>, vector<2x16x16x8xf32>
    tpu.vector_store %arg5[%c0_113, %c1_114, %c1_115, %c0_116], %101 {strides = array<i32>} : memref<2x18x18x8xf32, #tpu.memory_space<vmem>>, vector<2x16x16x8xf32>,
    %cst_117 = arith.constant 0.000000e+00 : f32
    %103 = vector.broadcast %cst_117 : f32 to vector<512x128xf32>
    %c0_118 = arith.constant 0 : index
    %c0_119 = arith.constant 0 : index
    %104 = vector.load %arg4[%c0_118, %c0_119] : memref<512x128xf32, #tpu.memory_space<vmem>>, vector<512x128xf32>
    tpu.vector_store %arg4[%c0_118, %c0_119], %103 {strides = array<i32>} : memref<512x128xf32, #tpu.memory_space<vmem>>, vector<512x128xf32>,
    %c0_120 = arith.constant 0 : index
    %c0_121 = arith.constant 0 : index
    %c0_122 = arith.constant 0 : index
    %c0_123 = arith.constant 0 : index
    %105 = vector.load %arg5[%c0_120, %c0_121, %c0_122, %c0_123] : memref<2x18x18x8xf32, #tpu.memory_space<vmem>>, vector<2x16x16x8xf32>
    %106 = vector.shape_cast %105 : vector<2x16x16x8xf32> to vector<512x8xf32>
    %c0_124 = arith.constant 0 : index
    %c0_125 = arith.constant 0 : index
    %107 = vector.load %arg4[%c0_124, %c0_125] : memref<512x128xf32, #tpu.memory_space<vmem>>, vector<512x128xf32>
    %108 = arith.truncf %106 : vector<512x8xf32> to vector<512x8xbf16>
    %c0_126 = arith.constant 0 : index
    %c0_127 = arith.constant 0 : index
    %c0_128 = arith.constant 0 : index
    %109 = vector.load %arg2[%c0_126, %c0_127, %c0_128] : memref<9x8x128xbf16, #tpu.memory_space<vmem>>, vector<1x8x128xbf16>
    %110 = vector.shape_cast %109 : vector<1x8x128xbf16> to vector<8x128xbf16>
    %cst_129 = arith.constant dense<0.000000e+00> : vector<512x128xf32>
    %111 = tpu.matmul %108, %110, %cst_129 {dimension_numbers = #tpu.dot_dimension_numbers<[1], [0], [0], [1], [0, 0, 1, 1], [], []>} : vector<512x8xbf16>, vector<8x128xbf16>, vector<512x128xf32> -> vector<512x128xf32>
    %112 = arith.addf %107, %111 : vector<512x128xf32>
    %c0_130 = arith.constant 0 : index
    %c0_131 = arith.constant 0 : index
    %113 = vector.load %arg4[%c0_130, %c0_131] : memref<512x128xf32, #tpu.memory_space<vmem>>, vector<512x128xf32>
    tpu.vector_store %arg4[%c0_130, %c0_131], %112 {strides = array<i32>} : memref<512x128xf32, #tpu.memory_space<vmem>>, vector<512x128xf32>,
    %c0_132 = arith.constant 0 : index
    %c0_133 = arith.constant 0 : index
    %c1_134 = arith.constant 1 : index
    %c0_135 = arith.constant 0 : index
    %114 = vector.load %arg5[%c0_132, %c0_133, %c1_134, %c0_135] : memref<2x18x18x8xf32, #tpu.memory_space<vmem>>, vector<2x16x16x8xf32>
    %115 = vector.shape_cast %114 : vector<2x16x16x8xf32> to vector<512x8xf32>
    %c0_136 = arith.constant 0 : index
    %c0_137 = arith.constant 0 : index
    %116 = vector.load %arg4[%c0_136, %c0_137] : memref<512x128xf32, #tpu.memory_space<vmem>>, vector<512x128xf32>
    %117 = arith.truncf %115 : vector<512x8xf32> to vector<512x8xbf16>
    %c1_138 = arith.constant 1 : index
    %c0_139 = arith.constant 0 : index
    %c0_140 = arith.constant 0 : index
    %118 = vector.load %arg2[%c1_138, %c0_139, %c0_140] : memref<9x8x128xbf16, #tpu.memory_space<vmem>>, vector<1x8x128xbf16>
    %119 = vector.shape_cast %118 : vector<1x8x128xbf16> to vector<8x128xbf16>
    %cst_141 = arith.constant dense<0.000000e+00> : vector<512x128xf32>
    %120 = tpu.matmul %117, %119, %cst_141 {dimension_numbers = #tpu.dot_dimension_numbers<[1], [0], [0], [1], [0, 0, 1, 1], [], []>} : vector<512x8xbf16>, vector<8x128xbf16>, vector<512x128xf32> -> vector<512x128xf32>
    %121 = arith.addf %116, %120 : vector<512x128xf32>
    %c0_142 = arith.constant 0 : index
    %c0_143 = arith.constant 0 : index
    %122 = vector.load %arg4[%c0_142, %c0_143] : memref<512x128xf32, #tpu.memory_space<vmem>>, vector<512x128xf32>
    tpu.vector_store %arg4[%c0_142, %c0_143], %121 {strides = array<i32>} : memref<512x128xf32, #tpu.memory_space<vmem>>, vector<512x128xf32>,
    %c0_144 = arith.constant 0 : index
    %c0_145 = arith.constant 0 : index
    %c2_146 = arith.constant 2 : index
    %c0_147 = arith.constant 0 : index
    %123 = vector.load %arg5[%c0_144, %c0_145, %c2_146, %c0_147] : memref<2x18x18x8xf32, #tpu.memory_space<vmem>>, vector<2x16x16x8xf32>
    %124 = vector.shape_cast %123 : vector<2x16x16x8xf32> to vector<512x8xf32>
    %c0_148 = arith.constant 0 : index
    %c0_149 = arith.constant 0 : index
    %125 = vector.load %arg4[%c0_148, %c0_149] : memref<512x128xf32, #tpu.memory_space<vmem>>, vector<512x128xf32>
    %126 = arith.truncf %124 : vector<512x8xf32> to vector<512x8xbf16>
    %c2_150 = arith.constant 2 : index
    %c0_151 = arith.constant 0 : index
    %c0_152 = arith.constant 0 : index
    %127 = vector.load %arg2[%c2_150, %c0_151, %c0_152] : memref<9x8x128xbf16, #tpu.memory_space<vmem>>, vector<1x8x128xbf16>
    %128 = vector.shape_cast %127 : vector<1x8x128xbf16> to vector<8x128xbf16>
    %cst_153 = arith.constant dense<0.000000e+00> : vector<512x128xf32>
    %129 = tpu.matmul %126, %128, %cst_153 {dimension_numbers = #tpu.dot_dimension_numbers<[1], [0], [0], [1], [0, 0, 1, 1], [], []>} : vector<512x8xbf16>, vector<8x128xbf16>, vector<512x128xf32> -> vector<512x128xf32>
    %130 = arith.addf %125, %129 : vector<512x128xf32>
    %c0_154 = arith.constant 0 : index
    %c0_155 = arith.constant 0 : index
    %131 = vector.load %arg4[%c0_154, %c0_155] : memref<512x128xf32, #tpu.memory_space<vmem>>, vector<512x128xf32>
    tpu.vector_store %arg4[%c0_154, %c0_155], %130 {strides = array<i32>} : memref<512x128xf32, #tpu.memory_space<vmem>>, vector<512x128xf32>,
    %c0_156 = arith.constant 0 : index
    %c1_157 = arith.constant 1 : index
    %c0_158 = arith.constant 0 : index
    %c0_159 = arith.constant 0 : index
    %132 = vector.load %arg5[%c0_156, %c1_157, %c0_158, %c0_159] : memref<2x18x18x8xf32, #tpu.memory_space<vmem>>, vector<2x16x16x8xf32>
    %133 = vector.shape_cast %132 : vector<2x16x16x8xf32> to vector<512x8xf32>
    %c0_160 = arith.constant 0 : index
    %c0_161 = arith.constant 0 : index
    %134 = vector.load %arg4[%c0_160, %c0_161] : memref<512x128xf32, #tpu.memory_space<vmem>>, vector<512x128xf32>
    %135 = arith.truncf %133 : vector<512x8xf32> to vector<512x8xbf16>
    %c3_162 = arith.constant 3 : index
    %c0_163 = arith.constant 0 : index
    %c0_164 = arith.constant 0 : index
    %136 = vector.load %arg2[%c3_162, %c0_163, %c0_164] : memref<9x8x128xbf16, #tpu.memory_space<vmem>>, vector<1x8x128xbf16>
    %137 = vector.shape_cast %136 : vector<1x8x128xbf16> to vector<8x128xbf16>
    %cst_165 = arith.constant dense<0.000000e+00> : vector<512x128xf32>
    %138 = tpu.matmul %135, %137, %cst_165 {dimension_numbers = #tpu.dot_dimension_numbers<[1], [0], [0], [1], [0, 0, 1, 1], [], []>} : vector<512x8xbf16>, vector<8x128xbf16>, vector<512x128xf32> -> vector<512x128xf32>
    %139 = arith.addf %134, %138 : vector<512x128xf32>
    %c0_166 = arith.constant 0 : index
    %c0_167 = arith.constant 0 : index
    %140 = vector.load %arg4[%c0_166, %c0_167] : memref<512x128xf32, #tpu.memory_space<vmem>>, vector<512x128xf32>
    tpu.vector_store %arg4[%c0_166, %c0_167], %139 {strides = array<i32>} : memref<512x128xf32, #tpu.memory_space<vmem>>, vector<512x128xf32>,
    %c0_168 = arith.constant 0 : index
    %c1_169 = arith.constant 1 : index
    %c1_170 = arith.constant 1 : index
    %c0_171 = arith.constant 0 : index
    %141 = vector.load %arg5[%c0_168, %c1_169, %c1_170, %c0_171] : memref<2x18x18x8xf32, #tpu.memory_space<vmem>>, vector<2x16x16x8xf32>
    %142 = vector.shape_cast %141 : vector<2x16x16x8xf32> to vector<512x8xf32>
    %c0_172 = arith.constant 0 : index
    %c0_173 = arith.constant 0 : index
    %143 = vector.load %arg4[%c0_172, %c0_173] : memref<512x128xf32, #tpu.memory_space<vmem>>, vector<512x128xf32>
    %144 = arith.truncf %142 : vector<512x8xf32> to vector<512x8xbf16>
    %c4_174 = arith.constant 4 : index
    %c0_175 = arith.constant 0 : index
    %c0_176 = arith.constant 0 : index
    %145 = vector.load %arg2[%c4_174, %c0_175, %c0_176] : memref<9x8x128xbf16, #tpu.memory_space<vmem>>, vector<1x8x128xbf16>
    %146 = vector.shape_cast %145 : vector<1x8x128xbf16> to vector<8x128xbf16>
    %cst_177 = arith.constant dense<0.000000e+00> : vector<512x128xf32>
    %147 = tpu.matmul %144, %146, %cst_177 {dimension_numbers = #tpu.dot_dimension_numbers<[1], [0], [0], [1], [0, 0, 1, 1], [], []>} : vector<512x8xbf16>, vector<8x128xbf16>, vector<512x128xf32> -> vector<512x128xf32>
    %148 = arith.addf %143, %147 : vector<512x128xf32>
    %c0_178 = arith.constant 0 : index
    %c0_179 = arith.constant 0 : index
    %149 = vector.load %arg4[%c0_178, %c0_179] : memref<512x128xf32, #tpu.memory_space<vmem>>, vector<512x128xf32>
    tpu.vector_store %arg4[%c0_178, %c0_179], %148 {strides = array<i32>} : memref<512x128xf32, #tpu.memory_space<vmem>>, vector<512x128xf32>,
    %c0_180 = arith.constant 0 : index
    %c1_181 = arith.constant 1 : index
    %c2_182 = arith.constant 2 : index
    %c0_183 = arith.constant 0 : index
    %150 = vector.load %arg5[%c0_180, %c1_181, %c2_182, %c0_183] : memref<2x18x18x8xf32, #tpu.memory_space<vmem>>, vector<2x16x16x8xf32>
    %151 = vector.shape_cast %150 : vector<2x16x16x8xf32> to vector<512x8xf32>
    %c0_184 = arith.constant 0 : index
    %c0_185 = arith.constant 0 : index
    %152 = vector.load %arg4[%c0_184, %c0_185] : memref<512x128xf32, #tpu.memory_space<vmem>>, vector<512x128xf32>
    %153 = arith.truncf %151 : vector<512x8xf32> to vector<512x8xbf16>
    %c5_186 = arith.constant 5 : index
    %c0_187 = arith.constant 0 : index
    %c0_188 = arith.constant 0 : index
    %154 = vector.load %arg2[%c5_186, %c0_187, %c0_188] : memref<9x8x128xbf16, #tpu.memory_space<vmem>>, vector<1x8x128xbf16>
    %155 = vector.shape_cast %154 : vector<1x8x128xbf16> to vector<8x128xbf16>
    %cst_189 = arith.constant dense<0.000000e+00> : vector<512x128xf32>
    %156 = tpu.matmul %153, %155, %cst_189 {dimension_numbers = #tpu.dot_dimension_numbers<[1], [0], [0], [1], [0, 0, 1, 1], [], []>} : vector<512x8xbf16>, vector<8x128xbf16>, vector<512x128xf32> -> vector<512x128xf32>
    %157 = arith.addf %152, %156 : vector<512x128xf32>
    %c0_190 = arith.constant 0 : index
    %c0_191 = arith.constant 0 : index
    %158 = vector.load %arg4[%c0_190, %c0_191] : memref<512x128xf32, #tpu.memory_space<vmem>>, vector<512x128xf32>
    tpu.vector_store %arg4[%c0_190, %c0_191], %157 {strides = array<i32>} : memref<512x128xf32, #tpu.memory_space<vmem>>, vector<512x128xf32>,
    %c0_192 = arith.constant 0 : index
    %c2_193 = arith.constant 2 : index
    %c0_194 = arith.constant 0 : index
    %c0_195 = arith.constant 0 : index
    %159 = vector.load %arg5[%c0_192, %c2_193, %c0_194, %c0_195] : memref<2x18x18x8xf32, #tpu.memory_space<vmem>>, vector<2x16x16x8xf32>
    %160 = vector.shape_cast %159 : vector<2x16x16x8xf32> to vector<512x8xf32>
    %c0_196 = arith.constant 0 : index
    %c0_197 = arith.constant 0 : index
    %161 = vector.load %arg4[%c0_196, %c0_197] : memref<512x128xf32, #tpu.memory_space<vmem>>, vector<512x128xf32>
    %162 = arith.truncf %160 : vector<512x8xf32> to vector<512x8xbf16>
    %c6_198 = arith.constant 6 : index
    %c0_199 = arith.constant 0 : index
    %c0_200 = arith.constant 0 : index
    %163 = vector.load %arg2[%c6_198, %c0_199, %c0_200] : memref<9x8x128xbf16, #tpu.memory_space<vmem>>, vector<1x8x128xbf16>
    %164 = vector.shape_cast %163 : vector<1x8x128xbf16> to vector<8x128xbf16>
    %cst_201 = arith.constant dense<0.000000e+00> : vector<512x128xf32>
    %165 = tpu.matmul %162, %164, %cst_201 {dimension_numbers = #tpu.dot_dimension_numbers<[1], [0], [0], [1], [0, 0, 1, 1], [], []>} : vector<512x8xbf16>, vector<8x128xbf16>, vector<512x128xf32> -> vector<512x128xf32>
    %166 = arith.addf %161, %165 : vector<512x128xf32>
    %c0_202 = arith.constant 0 : index
    %c0_203 = arith.constant 0 : index
    %167 = vector.load %arg4[%c0_202, %c0_203] : memref<512x128xf32, #tpu.memory_space<vmem>>, vector<512x128xf32>
    tpu.vector_store %arg4[%c0_202, %c0_203], %166 {strides = array<i32>} : memref<512x128xf32, #tpu.memory_space<vmem>>, vector<512x128xf32>,
    %c0_204 = arith.constant 0 : index
    %c2_205 = arith.constant 2 : index
    %c1_206 = arith.constant 1 : index
    %c0_207 = arith.constant 0 : index
    %168 = vector.load %arg5[%c0_204, %c2_205, %c1_206, %c0_207] : memref<2x18x18x8xf32, #tpu.memory_space<vmem>>, vector<2x16x16x8xf32>
    %169 = vector.shape_cast %168 : vector<2x16x16x8xf32> to vector<512x8xf32>
    %c0_208 = arith.constant 0 : index
    %c0_209 = arith.constant 0 : index
    %170 = vector.load %arg4[%c0_208, %c0_209] : memref<512x128xf32, #tpu.memory_space<vmem>>, vector<512x128xf32>
    %171 = arith.truncf %169 : vector<512x8xf32> to vector<512x8xbf16>
    %c7_210 = arith.constant 7 : index
    %c0_211 = arith.constant 0 : index
    %c0_212 = arith.constant 0 : index
    %172 = vector.load %arg2[%c7_210, %c0_211, %c0_212] : memref<9x8x128xbf16, #tpu.memory_space<vmem>>, vector<1x8x128xbf16>
    %173 = vector.shape_cast %172 : vector<1x8x128xbf16> to vector<8x128xbf16>
    %cst_213 = arith.constant dense<0.000000e+00> : vector<512x128xf32>
    %174 = tpu.matmul %171, %173, %cst_213 {dimension_numbers = #tpu.dot_dimension_numbers<[1], [0], [0], [1], [0, 0, 1, 1], [], []>} : vector<512x8xbf16>, vector<8x128xbf16>, vector<512x128xf32> -> vector<512x128xf32>
    %175 = arith.addf %170, %174 : vector<512x128xf32>
    %c0_214 = arith.constant 0 : index
    %c0_215 = arith.constant 0 : index
    %176 = vector.load %arg4[%c0_214, %c0_215] : memref<512x128xf32, #tpu.memory_space<vmem>>, vector<512x128xf32>
    tpu.vector_store %arg4[%c0_214, %c0_215], %175 {strides = array<i32>} : memref<512x128xf32, #tpu.memory_space<vmem>>, vector<512x128xf32>,
    %c0_216 = arith.constant 0 : index
    %c2_217 = arith.constant 2 : index
    %c2_218 = arith.constant 2 : index
    %c0_219 = arith.constant 0 : index
    %177 = vector.load %arg5[%c0_216, %c2_217, %c2_218, %c0_219] : memref<2x18x18x8xf32, #tpu.memory_space<vmem>>, vector<2x16x16x8xf32>
    %178 = vector.shape_cast %177 : vector<2x16x16x8xf32> to vector<512x8xf32>
    %c0_220 = arith.constant 0 : index
    %c0_221 = arith.constant 0 : index
    %179 = vector.load %arg4[%c0_220, %c0_221] : memref<512x128xf32, #tpu.memory_space<vmem>>, vector<512x128xf32>
    %180 = arith.truncf %178 : vector<512x8xf32> to vector<512x8xbf16>
    %c8_222 = arith.constant 8 : index
    %c0_223 = arith.constant 0 : index
    %c0_224 = arith.constant 0 : index
    %181 = vector.load %arg2[%c8_222, %c0_223, %c0_224] : memref<9x8x128xbf16, #tpu.memory_space<vmem>>, vector<1x8x128xbf16>
    %182 = vector.shape_cast %181 : vector<1x8x128xbf16> to vector<8x128xbf16>
    %cst_225 = arith.constant dense<0.000000e+00> : vector<512x128xf32>
    %183 = tpu.matmul %180, %182, %cst_225 {dimension_numbers = #tpu.dot_dimension_numbers<[1], [0], [0], [1], [0, 0, 1, 1], [], []>} : vector<512x8xbf16>, vector<8x128xbf16>, vector<512x128xf32> -> vector<512x128xf32>
    %184 = arith.addf %179, %183 : vector<512x128xf32>
    %c0_226 = arith.constant 0 : index
    %c0_227 = arith.constant 0 : index
    %185 = vector.load %arg4[%c0_226, %c0_227] : memref<512x128xf32, #tpu.memory_space<vmem>>, vector<512x128xf32>
    tpu.vector_store %arg4[%c0_226, %c0_227], %184 {strides = array<i32>} : memref<512x128xf32, #tpu.memory_space<vmem>>, vector<512x128xf32>,
    %c0_228 = arith.constant 0 : index
    %c0_229 = arith.constant 0 : index
    %186 = vector.load %arg6[%c0_228, %c0_229] : memref<512x128xf32, #tpu.memory_space<vmem>>, vector<512x128xf32>
    %c0_230 = arith.constant 0 : index
    %c0_231 = arith.constant 0 : index
    %187 = vector.load %arg4[%c0_230, %c0_231] : memref<512x128xf32, #tpu.memory_space<vmem>>, vector<512x128xf32>
    %cst_232 = arith.constant 0.000000e+00 : f32
    %188 = vector.broadcast %cst_232 : f32 to vector<512x128xf32>
    %189 = arith.cmpf ogt, %187, %188 : vector<512x128xf32>
    %cst_233 = arith.constant 0.00999999977 : f32
    %190 = vector.broadcast %cst_233 : f32 to vector<512x128xf32>
    %191 = arith.mulf %190, %187 : vector<512x128xf32>
    %192 = arith.select %189, %187, %191 : vector<512x128xi1>, vector<512x128xf32>
    %193 = arith.addf %186, %192 : vector<512x128xf32>
    %c0_234 = arith.constant 0 : index
    %c0_235 = arith.constant 0 : index
    %194 = vector.load %arg6[%c0_234, %c0_235] : memref<512x128xf32, #tpu.memory_space<vmem>>, vector<512x128xf32>
    tpu.vector_store %arg6[%c0_234, %c0_235], %193 {strides = array<i32>} : memref<512x128xf32, #tpu.memory_space<vmem>>, vector<512x128xf32>,
    %c0_236 = arith.constant 0 : index
    %c0_237 = arith.constant 0 : index
    %195 = tpu.strided_load %arg6[%c0_236, %c0_237] {strides = array<i32: 2, 1>} : memref<512x128xf32, #tpu.memory_space<vmem>>, vector<256x128xf32>
    %c1_238 = arith.constant 1 : index
    %c0_239 = arith.constant 0 : index
    %196 = tpu.strided_load %arg6[%c1_238, %c0_239] {strides = array<i32: 2, 1>} : memref<512x128xf32, #tpu.memory_space<vmem>>, vector<256x128xf32>
    %197 = arith.maximumf %195, %196 : vector<256x128xf32>
    %198 = vector.shape_cast %197 : vector<256x128xf32> to vector<2x8x2x8x128xf32>
    %199 = vector.extract_strided_slice %198 {offsets = [0, 0, 0, 0, 0], sizes = [2, 8, 1, 8, 128], strides = [1, 1, 1, 1, 1]} : vector<2x8x2x8x128xf32> to vector<2x8x1x8x128xf32>
    %200 = vector.shape_cast %199 : vector<2x8x1x8x128xf32> to vector<2x8x8x128xf32>
    %201 = vector.extract_strided_slice %198 {offsets = [0, 0, 1, 0, 0], sizes = [2, 8, 1, 8, 128], strides = [1, 1, 1, 1, 1]} : vector<2x8x2x8x128xf32> to vector<2x8x1x8x128xf32>
    %202 = vector.shape_cast %201 : vector<2x8x1x8x128xf32> to vector<2x8x8x128xf32>
    %203 = arith.maximumf %200, %202 : vector<2x8x8x128xf32>
    %204 = vector.shape_cast %203 : vector<2x8x8x128xf32> to vector<128x128xf32>
    %205 = vector.extract_strided_slice %204 {offsets = [0, 64], sizes = [128, 64], strides = [1, 1]} : vector<128x128xf32> to vector<128x64xf32>
    %206 = vector.extract_strided_slice %204 {offsets = [0, 0], sizes = [128, 64], strides = [1, 1]} : vector<128x128xf32> to vector<128x64xf32>
    %207 = tpu.concatenate %205, %206 in 1 : vector<128x64xf32>, vector<128x64xf32> -> vector<128x128xf32>
    %208 = arith.addf %204, %207 : vector<128x128xf32>
    %209 = vector.shape_cast %208 : vector<128x128xf32> to vector<2x8x8x128xf32>
    %c0_240 = arith.constant 0 : index
    %c0_241 = arith.constant 0 : index
    %c0_242 = arith.constant 0 : index
    %c0_243 = arith.constant 0 : index
    %210 = vector.load %arg3[%c0_240, %c0_241, %c0_242, %c0_243] : memref<2x8x8x128xf32, #tpu.memory_space<vmem>>, vector<2x8x8x128xf32>
    tpu.vector_store %arg3[%c0_240, %c0_241, %c0_242, %c0_243], %209 {strides = array<i32>} : memref<2x8x8x128xf32, #tpu.memory_space<vmem>>, vector<2x8x8x128xf32>,
    return
  }
}

</mosaic_0001>

<bundles_post_ra>
// kernel: tpu_custom_call.1
= control target key start
LH: loop header
LB: loop body
LE: loop exit
PB: predicated region body
PF: predicated region fallthrough
CT: control target
= control target key end

     0   :  { %vm338_vm0 = vcmask 1041408   ;;  %vm241_vm1 = vcmask 31744   ;;  %s16693_s0 = inlined_call_operand.vmem [shape: f32[2,18,18,4], index: 0, kind: input, shape index: {}]   ;;  %s16694_s1 = inlined_call_operand.vmem [shape: bf16[9,4,128], index: 1, kind: input, shape index: {}]   ;;  %s16695_s2 = inlined_call_operand.vmem [shape: bf16[9,8,128], index: 2, kind: input, shape index: {}]   ;;  %s16696_s3 = inlined_call_operand.hbm [shape: f32[2,8,8,128], index: 3, kind: output, shape index: {}]  }
   0x1   :  { %v240_v0 = vld [vmem:[%s16694_s1] sm:$0x3]  ;;  %v11525_v1 = vld [vmem:[%s16694_s1 + $0x2] sm:$0x3]  ;;  %v81_v5 = vld [vmem:[%s16693_s0 + $0x8] sm:$0xff] }
   0x2   :  { %v80_v2 = vld [vmem:[%s16693_s0] sm:$0xff]  ;;  %v340_v3 = vsel %vm338_vm0, %v240_v0, 0  ;;  %v898_v4 = vsel %vm338_vm0, %v11525_v1, 0  ;;  %v112_v6 = vld [vmem:[%s16693_s0 + $0x1b0] sm:$0xff]  ;;  %v113_v7 = vld [vmem:[%s16693_s0 + $0x1b8] sm:$0xff] }
   0x3   :  { %349 = vmatpush.bf16.msra.mxu0 %v340_v3  ;;  %12469 = vmatpush.bf16.msra.mxu2 %v340_v3  ;;  %v208_v8 = vpack.c.bf16 %v81_v5, %v80_v2  ;;  %v224_v9 = vpack.c.bf16 %v113_v7, %v112_v6  ;;  %v671_v10 = vld [vmem:[%s16693_s0 + $0x1b1] sm:$0xff]  ;;  %v672_v11 = vld [vmem:[%s16693_s0 + $0x1b9] sm:$0xff]  ;;  %v11558_v12 = vld [vmem:[%s16694_s1 + $0x4] sm:$0x3] }
   0x4   :  { %12470 = vmatpush.bf16.msra.mxu3 %v898_v4  ;;  %907 = vmatpush.bf16.msra.mxu1 %v898_v4  ;;  %v783_v13 = vpack.c.bf16 %v672_v11, %v671_v10  ;;  %v1456_v14 = vsel %vm338_vm0, %v11558_v12, 0  ;;  %v639_v15 = vld [vmem:[%s16693_s0 + $0x1] sm:$0xff]  ;;  %v640_v16 = vld [vmem:[%s16693_s0 + $0x9] sm:$0xff] }
   0x5   :  { %v11655_v17 = vld [vmem:[%s16694_s1 + $0x6] sm:$0x3]  ;;  %v767_v18 = vpack.c.bf16 %v640_v16, %v639_v15  ;;  %v11752_v20 = vld [vmem:[%s16694_s1 + $0x8] sm:$0x3] }
   0x6   :  { %v2015_v19 = vsel %vm338_vm0, %v11655_v17, 0  ;;  %11493 = vmatmul.msk.bf16.vlgmr.msra.gmra.mxu0 %vm241_vm1, %v208_v8  ;;  %11509 = vmatmul.msk.bf16.vlgmr.msra.gmra.mxu2 %vm241_vm1, %v224_v9  ;;  %v2573_v21 = vsel %vm338_vm0, %v11752_v20, 0 }
   0x7   :  { %1465 = vmatpush.bf16.msrb.mxu2 %v1456_v14  ;;  %11542 = vmatmul.msk.bf16.vlgmr.msra.gmra.mxu3 %vm241_vm1, %v783_v13 }
   0x8   :  { %11526 = vmatmul.msk.bf16.vlgmr.msra.gmra.mxu1 %vm241_vm1, %v767_v18  ;;  %2024 = vmatpush.bf16.msrb.mxu3 %v2015_v19 }
   0x9   :  { %2582 = vmatpush.bf16.msrb.mxu0 %v2573_v21 }
   0xa   :  { %8 = vsyncpa [#allocation6], 0  ;;  %v82_v22 = vld [vmem:[%s16693_s0 + $0x18] sm:$0xff]  ;;  %v83_v23 = vld [vmem:[%s16693_s0 + $0x20] sm:$0xff]  ;;  %vm5990_vm2 = vcmask 1043456   ;;  %vm5494_vm3 = vcmask 64512  }
   0xb   :  { %v114_v24 = vld [vmem:[%s16693_s0 + $0x1c8] sm:$0xff]  ;;  %v115_v25 = vld [vmem:[%s16693_s0 + $0x1d0] sm:$0xff]  ;;  %v641_v28 = vld [vmem:[%s16693_s0 + $0x19] sm:$0xff]  ;;  %v12599_v30 = vpack.c.bf16 %v83_v23, %v82_v22  ;;  %vm5497_vm9 = vcmask 58368   ;;  %s12504_s16 = smov [#allocation5]   ;;  %s11481_s20 = sshll.u32 %s16696_s3, 4  ;;  %s11482_s20 = int_to_ptr.hbm [resolvable:$true] %s11481_s20 }
   0xc   :  { %v673_v26 = vld [vmem:[%s16693_s0 + $0x1c9] sm:$0xff]  ;;  %v674_v27 = vld [vmem:[%s16693_s0 + $0x1d1] sm:$0xff]  ;;  %v642_v29 = vld [vmem:[%s16693_s0 + $0x21] sm:$0xff]  ;;  %v225_v31 = vpack.c.bf16 %v115_v25, %v114_v24  ;;  %s11479_s17 = sshll.u32 %s12504_s16, 4  ;;  %s12505_s21 = smov 128   ;;  %s11480_s17 = int_to_ptr.vmem [resolvable:$true] %s11479_s17 }
   0xd   :  { %v784_v32 = vpack.c.bf16 %v674_v27, %v673_v26  ;;  %v12601_v33 = vpack.c.bf16 %v642_v29, %v641_v28  ;;  %v84_v34 = vld [vmem:[%s16693_s0 + $0x30] sm:$0xff]  ;;  %v85_v35 = vld [vmem:[%s16693_s0 + $0x38] sm:$0xff]  ;;  %v116_v36 = vld [vmem:[%s16693_s0 + $0x1e0] sm:$0xff]  ;;  %s12506_s22 = smov 8  }
   0xe   :  { %v117_v37 = vld [vmem:[%s16693_s0 + $0x1e8] sm:$0xff]  ;;  %v643_v40 = vld [vmem:[%s16693_s0 + $0x31] sm:$0xff]  ;;  %v644_v41 = vld [vmem:[%s16693_s0 + $0x39] sm:$0xff]  ;;  %v12633_v42 = vpack.c.bf16 %v85_v35, %v84_v34 }
   0xf   :  { %v675_v38 = vld [vmem:[%s16693_s0 + $0x1e1] sm:$0xff]  ;;  %v676_v39 = vld [vmem:[%s16693_s0 + $0x1e9] sm:$0xff]  ;;  %v226_v43 = vpack.c.bf16 %v117_v37, %v116_v36  ;;  %v12635_v45 = vpack.c.bf16 %v644_v41, %v643_v40  ;;  %v118_v48 = vld [vmem:[%s16693_s0 + $0x1f8] sm:$0xff] }
  0x10   :  { %v785_v44 = vpack.c.bf16 %v676_v39, %v675_v38  ;;  %v86_v46 = vld [vmem:[%s16693_s0 + $0x48] sm:$0xff]  ;;  %v87_v47 = vld [vmem:[%s16693_s0 + $0x50] sm:$0xff]  ;;  %v119_v49 = vld [vmem:[%s16693_s0 + $0x200] sm:$0xff] }
  0x11   :  { %v677_v50 = vld [vmem:[%s16693_s0 + $0x1f9] sm:$0xff]  ;;  %v678_v51 = vld [vmem:[%s16693_s0 + $0x201] sm:$0xff]  ;;  %v645_v52 = vld [vmem:[%s16693_s0 + $0x49] sm:$0xff]  ;;  %v12667_v54 = vpack.c.bf16 %v87_v47, %v86_v46  ;;  %v227_v55 = vpack.c.bf16 %v119_v49, %v118_v48 }
  0x12   :  { %v646_v53 = vld [vmem:[%s16693_s0 + $0x51] sm:$0xff]  ;;  %v786_v56 = vpack.c.bf16 %v678_v51, %v677_v50  ;;  %v88_v58 = vld [vmem:[%s16693_s0 + $0x60] sm:$0xff]  ;;  %v89_v59 = vld [vmem:[%s16693_s0 + $0x68] sm:$0xff] }
  0x13   :  { %v12669_v57 = vpack.c.bf16 %v646_v53, %v645_v52  ;;  %v120_v60 = vld [vmem:[%s16693_s0 + $0x210] sm:$0xff]  ;;  %v121_v61 = vld [vmem:[%s16693_s0 + $0x218] sm:$0xff]  ;;  %v647_v0 = vld [vmem:[%s16693_s0 + $0x61] sm:$0xff]  ;;  %v12701_v2 = vpack.c.bf16 %v89_v59, %v88_v58 }
  0x14   :  { %v679_v62 = vld [vmem:[%s16693_s0 + $0x211] sm:$0xff]  ;;  %v680_v63 = vld [vmem:[%s16693_s0 + $0x219] sm:$0xff]  ;;  %v648_v1 = vld [vmem:[%s16693_s0 + $0x69] sm:$0xff]  ;;  %v228_v3 = vpack.c.bf16 %v121_v61, %v120_v60 }
  0x15   :  { %v787_v4 = vpack.c.bf16 %v680_v63, %v679_v62  ;;  %v12703_v5 = vpack.c.bf16 %v648_v1, %v647_v0  ;;  %v90_v6 = vld [vmem:[%s16693_s0 + $0x78] sm:$0xff]  ;;  %v91_v7 = vld [vmem:[%s16693_s0 + $0x80] sm:$0xff]  ;;  %v122_v8 = vld [vmem:[%s16693_s0 + $0x228] sm:$0xff] }
  0x16   :  { %11494 = vmatmul.msk.bf16.gmra.mxu0 %vm241_vm1, %v12599_v30  ;;  %11510 = vmatmul.msk.bf16.gmra.mxu2 %vm241_vm1, %v225_v31  ;;  %v123_v9 = vld [vmem:[%s16693_s0 + $0x230] sm:$0xff]  ;;  %v649_v12 = vld [vmem:[%s16693_s0 + $0x79] sm:$0xff]  ;;  %v650_v13 = vld [vmem:[%s16693_s0 + $0x81] sm:$0xff]  ;;  %v12735_v14 = vpack.c.bf16 %v91_v7, %v90_v6 }
  0x17   :  { %11543 = vmatmul.msk.bf16.gmra.mxu3 %vm241_vm1, %v784_v32  ;;  %v681_v10 = vld [vmem:[%s16693_s0 + $0x229] sm:$0xff]  ;;  %v682_v11 = vld [vmem:[%s16693_s0 + $0x231] sm:$0xff]  ;;  %v229_v15 = vpack.c.bf16 %v123_v9, %v122_v8  ;;  %v12737_v17 = vpack.c.bf16 %v650_v13, %v649_v12  ;;  %v124_v20 = vld [vmem:[%s16693_s0 + $0x240] sm:$0xff] }
  0x18   :  { %11527 = vmatmul.msk.bf16.gmra.mxu1 %vm241_vm1, %v12601_v33  ;;  %v788_v16 = vpack.c.bf16 %v682_v11, %v681_v10  ;;  %v92_v18 = vld [vmem:[%s16693_s0 + $0x90] sm:$0xff]  ;;  %v93_v19 = vld [vmem:[%s16693_s0 + $0x98] sm:$0xff]  ;;  %v125_v21 = vld [vmem:[%s16693_s0 + $0x248] sm:$0xff] }
  0x19   :  { %v683_v22 = vld [vmem:[%s16693_s0 + $0x241] sm:$0xff]  ;;  %v684_v23 = vld [vmem:[%s16693_s0 + $0x249] sm:$0xff]  ;;  %v651_v24 = vld [vmem:[%s16693_s0 + $0x91] sm:$0xff]  ;;  %v12769_v26 = vpack.c.bf16 %v93_v19, %v92_v18  ;;  %v230_v27 = vpack.c.bf16 %v125_v21, %v124_v20 }
  0x1a   :  { %v652_v25 = vld [vmem:[%s16693_s0 + $0x99] sm:$0xff]  ;;  %v789_v28 = vpack.c.bf16 %v684_v23, %v683_v22  ;;  %v94_v31 = vld [vmem:[%s16693_s0 + $0xa8] sm:$0xff]  ;;  %v95_v32 = vld [vmem:[%s16693_s0 + $0xb0] sm:$0xff] }
  0x1b   :  { %v12771_v29 = vpack.c.bf16 %v652_v25, %v651_v24  ;;  %v126_v34 = vld [vmem:[%s16693_s0 + $0x258] sm:$0xff]  ;;  %v127_v35 = vld [vmem:[%s16693_s0 + $0x260] sm:$0xff]  ;;  %v653_v38 = vld [vmem:[%s16693_s0 + $0xa9] sm:$0xff]  ;;  %v12803_v40 = vpack.c.bf16 %v95_v32, %v94_v31 }
  0x1c   :  { %v685_v36 = vld [vmem:[%s16693_s0 + $0x259] sm:$0xff]  ;;  %v686_v37 = vld [vmem:[%s16693_s0 + $0x261] sm:$0xff]  ;;  %v654_v39 = vld [vmem:[%s16693_s0 + $0xb1] sm:$0xff]  ;;  %v231_v41 = vpack.c.bf16 %v127_v35, %v126_v34 }
  0x1d   :  { %v11849_v46 = vld [vmem:[%s16694_s1 + $0xa] sm:$0x3]  ;;  %v96_v48 = vld [vmem:[%s16693_s0 + $0xc0] sm:$0xff]  ;;  %v128_v50 = vld [vmem:[%s16693_s0 + $0x270] sm:$0xff] }
  0x1e   :  { %v3131_v47 = vsel %vm338_vm0, %v11849_v46, 0  ;;  %v97_v49 = vld [vmem:[%s16693_s0 + $0xc8] sm:$0xff]  ;;  %v129_v51 = vld [vmem:[%s16693_s0 + $0x278] sm:$0xff]  ;;  %v99_v10 = vld [vmem:[%s16693_s0 + $0xe0] sm:$0xff] }
  0x1f   :  { %3140 = vmatpush.bf16.msrb.mxu1 %v3131_v47  ;;  %v687_v52 = vld [vmem:[%s16693_s0 + $0x271] sm:$0xff]  ;;  %v688_v53 = vld [vmem:[%s16693_s0 + $0x279] sm:$0xff]  ;;  %v12841_v58 = vpack.c.bf16 %v97_v49, %v96_v48  ;;  %v232_v59 = vpack.c.bf16 %v129_v51, %v128_v50  ;;  %v130_v11 = vld [vmem:[%s16693_s0 + $0x288] sm:$0xff] }
  0x20   :  { %v791_v61 = vpack.c.bf16 %v688_v53, %v687_v52  ;;  %v98_v9 = vld [vmem:[%s16693_s0 + $0xd8] sm:$0xff]  ;;  %v131_v12 = vld [vmem:[%s16693_s0 + $0x290] sm:$0xff]  ;;  %v658_v18 = vld [vmem:[%s16693_s0 + $0xe1] sm:$0xff] }
  0x21   :  { %v689_v13 = vld [vmem:[%s16693_s0 + $0x289] sm:$0xff]  ;;  %v12881_v21 = vpack.c.bf16 %v99_v10, %v98_v9  ;;  %v233_v22 = vpack.c.bf16 %v131_v12, %v130_v11  ;;  %v691_v47 = vld [vmem:[%s16693_s0 + $0x2a1] sm:$0xff]  ;;  %v659_v49 = vld [vmem:[%s16693_s0 + $0xf1] sm:$0xff] }
  0x22   :  { %v133_v46 = vld [vmem:[%s16693_s0 + $0x2a8] sm:$0xff]  ;;  %v660_v50 = vld [vmem:[%s16693_s0 + $0xf9] sm:$0xff] }
  0x23   :  { %v692_v48 = vld [vmem:[%s16693_s0 + $0x2a9] sm:$0xff] }
  0x24   :  { %v102_v12 = vld [vmem:[%s16693_s0 + $0x108] sm:$0xff] }
  0x26   :  { %11495 = vmatmul.msk.bf16.gmra.mxu0 %vm241_vm1, %v12633_v42  ;;  %11511 = vmatmul.msk.bf16.gmra.mxu2 %vm241_vm1, %v226_v43  ;;  %v790_v43 = vpack.c.bf16 %v686_v37, %v685_v36 }
  0x27   :  { %11544 = vmatmul.msk.bf16.gmra.mxu3 %vm241_vm1, %v785_v44  ;;  %v12805_v44 = vpack.c.bf16 %v654_v39, %v653_v38  ;;  %v100_v39 = vld [vmem:[%s16693_s0 + $0xf0] sm:$0xff] }
  0x28   :  { %11528 = vmatmul.msk.bf16.gmra.mxu1 %vm241_vm1, %v12635_v45 }
  0x36   :  { %11496 = vmatmul.msk.bf16.gmra.mxu0 %vm241_vm1, %v12667_v54  ;;  %11512 = vmatmul.msk.bf16.gmra.mxu2 %vm241_vm1, %v227_v55  ;;  %v655_v55 = vld [vmem:[%s16693_s0 + $0xc1] sm:$0xff] }
  0x37   :  { %11545 = vmatmul.msk.bf16.gmra.mxu3 %vm241_vm1, %v786_v56  ;;  %v656_v56 = vld [vmem:[%s16693_s0 + $0xc9] sm:$0xff] }
  0x38   :  { %11529 = vmatmul.msk.bf16.gmra.mxu1 %vm241_vm1, %v12669_v57  ;;  %v12843_v62 = vpack.c.bf16 %v656_v56, %v655_v55 }
  0x46   :  { %11497 = vmatmul.msk.bf16.gmra.mxu0 %vm241_vm1, %v12701_v2  ;;  %11513 = vmatmul.msk.bf16.gmra.mxu2 %vm241_vm1, %v228_v3 }
  0x47   :  { %11546 = vmatmul.msk.bf16.gmra.mxu3 %vm241_vm1, %v787_v4 }
  0x48   :  { %11530 = vmatmul.msk.bf16.gmra.mxu1 %vm241_vm1, %v12703_v5 }
  0x56   :  { %11498 = vmatmul.msk.bf16.gmra.mxu0 %vm241_vm1, %v12735_v14  ;;  %11514 = vmatmul.msk.bf16.gmra.mxu2 %vm241_vm1, %v229_v15  ;;  %v690_v15 = vld [vmem:[%s16693_s0 + $0x291] sm:$0xff] }
  0x57   :  { %11547 = vmatmul.msk.bf16.gmra.mxu3 %vm241_vm1, %v788_v16  ;;  %v657_v16 = vld [vmem:[%s16693_s0 + $0xd9] sm:$0xff]  ;;  %v792_v25 = vpack.c.bf16 %v690_v15, %v689_v13  ;;  %v103_v13 = vld [vmem:[%s16693_s0 + $0x110] sm:$0xff] }
  0x58   :  { %11531 = vmatmul.msk.bf16.gmra.mxu1 %vm241_vm1, %v12737_v17  ;;  %v134_v15 = vld [vmem:[%s16693_s0 + $0x2b8] sm:$0xff] }
  0x66   :  { %11499 = vmatmul.msk.bf16.gmra.mxu0 %vm241_vm1, %v12769_v26  ;;  %11515 = vmatmul.msk.bf16.gmra.mxu2 %vm241_vm1, %v230_v27  ;;  %v12885_v27 = vpack.c.bf16 %v658_v18, %v657_v16  ;;  %v135_v16 = vld [vmem:[%s16693_s0 + $0x2c0] sm:$0xff] }
  0x67   :  { %11548 = vmatmul.msk.bf16.gmra.mxu3 %vm241_vm1, %v789_v28  ;;  %v693_v18 = vld [vmem:[%s16693_s0 + $0x2b9] sm:$0xff] }
  0x68   :  { %11532 = vmatmul.msk.bf16.gmra.mxu1 %vm241_vm1, %v12771_v29 }
  0x76   :  { %11500 = vmatmul.msk.bf16.gmra.mxu0 %vm241_vm1, %v12803_v40  ;;  %11516 = vmatmul.msk.bf16.gmra.mxu2 %vm241_vm1, %v231_v41  ;;  %v101_v41 = vld [vmem:[%s16693_s0 + $0xf8] sm:$0xff] }
  0x77   :  { %11549 = vmatmul.msk.bf16.gmra.mxu3 %vm241_vm1, %v790_v43  ;;  %v132_v43 = vld [vmem:[%s16693_s0 + $0x2a0] sm:$0xff]  ;;  %v12923_v53 = vpack.c.bf16 %v101_v41, %v100_v39 }
  0x78   :  { %11533 = vmatmul.msk.bf16.gmra.mxu1 %vm241_vm1, %v12805_v44  ;;  %v234_v55 = vpack.c.bf16 %v133_v46, %v132_v43 }
  0x83   :  { %v351_v60 = vpop.f32.mrf.mxu0 }
  0x85   :  { %v909_v63 = vpop.f32.mrf.mxu1 }
  0x86   :  { %v12845_v0 = vadd.f32 %v909_v63, %v351_v60  ;;  %11501 = vmatmul.msk.bf16.gmra.mxu0 %vm241_vm1, %v12841_v58  ;;  %11517 = vmatmul.msk.bf16.gmra.mxu2 %vm241_vm1, %v232_v59  ;;  %v793_v60 = vpack.c.bf16 %v692_v48, %v691_v47 }
  0x87   :  { %11550 = vmatmul.msk.bf16.gmra.mxu3 %vm241_vm1, %v791_v61  ;;  %v12927_v61 = vpack.c.bf16 %v660_v50, %v659_v49 }
  0x88   :  { %11534 = vmatmul.msk.bf16.gmra.mxu1 %vm241_vm1, %v12843_v62 }
  0x89   :  { %v431_v1 = vpop.f32.mrf.mxu2 }
  0x8a   :  { %v989_v3 = vpop.f32.mrf.mxu3 }
  0x8b   :  { %v12853_v4 = vadd.f32 %v989_v3, %v431_v1  ;;  %v353_v6 = vpop.f32.mrf.mxu0 }
  0x8d   :  { %v911_v7 = vpop.f32.mrf.mxu1 }
  0x8e   :  { %v12855_v8 = vadd.f32 %v911_v7, %v353_v6 }
  0x91   :  { %v433_v19 = vpop.f32.mrf.mxu2 }
  0x92   :  { %v991_v20 = vpop.f32.mrf.mxu3 }
  0x93   :  { %v12883_v23 = vadd.f32 %v991_v20, %v433_v19  ;;  %v356_v24 = vpop.f32.mrf.mxu0  ;;  %v694_v19 = vld [vmem:[%s16693_s0 + $0x2c1] sm:$0xff]  ;;  %v661_v20 = vld [vmem:[%s16693_s0 + $0x109] sm:$0xff] }
  0x95   :  { %v914_v28 = vpop.f32.mrf.mxu1 }
  0x96   :  { %v12887_v31 = vadd.f32 %v914_v28, %v356_v24  ;;  %11502 = vmatmul.msk.bf16.gmra.mxu0 %vm241_vm1, %v12881_v21  ;;  %11518 = vmatmul.msk.bf16.gmra.mxu2 %vm241_vm1, %v233_v22  ;;  %v662_v22 = vld [vmem:[%s16693_s0 + $0x111] sm:$0xff]  ;;  %v12965_v28 = vpack.c.bf16 %v103_v13, %v102_v12 }
  0x97   :  { %11551 = vmatmul.msk.bf16.gmra.mxu3 %vm241_vm1, %v792_v25  ;;  %v12969_v39 = vpack.c.bf16 %v662_v22, %v661_v20 }
  0x98   :  { %11535 = vmatmul.msk.bf16.gmra.mxu1 %vm241_vm1, %v12885_v27 }
  0x99   :  { %v436_v32 = vpop.f32.mrf.mxu2 }
  0x9a   :  { %v994_v34 = vpop.f32.mrf.mxu3 }
  0x9b   :  { %v12895_v35 = vadd.f32 %v994_v34, %v436_v32  ;;  %v358_v36 = vpop.f32.mrf.mxu0  ;;  %v235_v32 = vpack.c.bf16 %v135_v16, %v134_v15 }
  0x9d   :  { %v916_v37 = vpop.f32.mrf.mxu1 }
  0x9e   :  { %v12897_v38 = vadd.f32 %v916_v37, %v358_v36  ;;  %v794_v37 = vpack.c.bf16 %v694_v19, %v693_v18 }
  0xa1   :  { %v438_v51 = vpop.f32.mrf.mxu2 }
  0xa2   :  { %v996_v52 = vpop.f32.mrf.mxu3 }
  0xa3   :  { %v12925_v56 = vadd.f32 %v996_v52, %v438_v51  ;;  %v361_v59 = vpop.f32.mrf.mxu0  ;;  %v104_v52 = vld [vmem:[%s16693_s0 + $0x120] sm:$0xff] }
  0xa5   :  { %16711 = vst [vmem:[#allocation8_spill] sm:$0xff] %v12925_v56  ;;  %v919_v63 = vpop.f32.mrf.mxu1 }
  0xa6   :  { %v12929_v1 = vadd.f32 %v919_v63, %v361_v59  ;;  %11503 = vmatmul.msk.bf16.gmra.mxu0 %vm241_vm1, %v12923_v53  ;;  %11519 = vmatmul.msk.bf16.gmra.mxu2 %vm241_vm1, %v234_v55  ;;  %v105_v55 = vld [vmem:[%s16693_s0 + $0x128] sm:$0xff]  ;;  %v136_v59 = vld [vmem:[%s16693_s0 + $0x2d0] sm:$0xff] }
  0xa7   :  { %11552 = vmatmul.msk.bf16.gmra.mxu3 %vm241_vm1, %v793_v60  ;;  %v137_v60 = vld [vmem:[%s16693_s0 + $0x2d8] sm:$0xff]  ;;  %v13007_v13 = vpack.c.bf16 %v105_v55, %v104_v52  ;;  %v139_v52 = vld [vmem:[%s16693_s0 + $0x2f0] sm:$0xff] }
  0xa8   :  { %11536 = vmatmul.msk.bf16.gmra.mxu1 %vm241_vm1, %v12927_v61  ;;  %v695_v63 = vld [vmem:[%s16693_s0 + $0x2d1] sm:$0xff]  ;;  %v236_v15 = vpack.c.bf16 %v137_v60, %v136_v59  ;;  %v697_v55 = vld [vmem:[%s16693_s0 + $0x2e9] sm:$0xff]  ;;  %v665_v60 = vld [vmem:[%s16693_s0 + $0x139] sm:$0xff] }
  0xa9   :  { %v441_v3 = vpop.f32.mrf.mxu2  ;;  %v698_v59 = vld [vmem:[%s16693_s0 + $0x2f1] sm:$0xff] }
  0xaa   :  { %v999_v6 = vpop.f32.mrf.mxu3 }
  0xab   :  { %v12937_v7 = vadd.f32 %v999_v6, %v441_v3  ;;  %v363_v9 = vpop.f32.mrf.mxu0  ;;  %v696_v3 = vld [vmem:[%s16693_s0 + $0x2d9] sm:$0xff]  ;;  %v663_v6 = vld [vmem:[%s16693_s0 + $0x121] sm:$0xff] }
  0xac   :  { %v795_v19 = vpack.c.bf16 %v696_v3, %v695_v63  ;;  %v666_v63 = vld [vmem:[%s16693_s0 + $0x141] sm:$0xff] }
  0xad   :  { %16712 = vst [vmem:[#allocation9_spill] sm:$0xff] %v12937_v7  ;;  %v921_v10 = vpop.f32.mrf.mxu1 }
  0xae   :  { %v12939_v11 = vadd.f32 %v921_v10, %v363_v9  ;;  %v664_v9 = vld [vmem:[%s16693_s0 + $0x129] sm:$0xff] }
  0xaf   :  { %v13011_v20 = vpack.c.bf16 %v664_v9, %v663_v6 }
  0xb1   :  { %v443_v24 = vpop.f32.mrf.mxu2 }
  0xb2   :  { %v1001_v25 = vpop.f32.mrf.mxu3 }
  0xb3   :  { %v12967_v34 = vadd.f32 %v1001_v25, %v443_v24  ;;  %v366_v36 = vpop.f32.mrf.mxu0 }
  0xb5   :  { %16713 = vst [vmem:[#allocation10_spill] sm:$0xff] %v12967_v34  ;;  %v924_v41 = vpop.f32.mrf.mxu1 }
  0xb6   :  { %v12971_v43 = vadd.f32 %v924_v41, %v366_v36  ;;  %11504 = vmatmul.msk.bf16.gmra.mxu0 %vm241_vm1, %v12965_v28  ;;  %11520 = vmatmul.msk.bf16.gmra.mxu2 %vm241_vm1, %v235_v32 }
  0xb7   :  { %11553 = vmatmul.msk.bf16.gmra.mxu3 %vm241_vm1, %v794_v37 }
  0xb8   :  { %11537 = vmatmul.msk.bf16.gmra.mxu1 %vm241_vm1, %v12969_v39 }
  0xb9   :  { %v446_v46 = vpop.f32.mrf.mxu2 }
  0xba   :  { %v1004_v47 = vpop.f32.mrf.mxu3 }
  0xbb   :  { %v12979_v48 = vadd.f32 %v1004_v47, %v446_v46  ;;  %v368_v49 = vpop.f32.mrf.mxu0  ;;  %v106_v47 = vld [vmem:[%s16693_s0 + $0x138] sm:$0xff] }
  0xbd   :  { %16714 = vst [vmem:[#allocation11_spill] sm:$0xff] %v12979_v48  ;;  %v926_v50 = vpop.f32.mrf.mxu1 }
  0xbe   :  { %v12981_v51 = vadd.f32 %v926_v50, %v368_v49  ;;  %v107_v49 = vld [vmem:[%s16693_s0 + $0x140] sm:$0xff]  ;;  %v138_v50 = vld [vmem:[%s16693_s0 + $0x2e8] sm:$0xff] }
  0xbf   :  { %v13049_v9 = vpack.c.bf16 %v107_v49, %v106_v47 }
  0xc1   :  { %v448_v10 = vpop.f32.mrf.mxu2 }
  0xc2   :  { %v1006_v12 = vpop.f32.mrf.mxu3 }
  0xc3   :  { %v13009_v16 = vadd.f32 %v1006_v12, %v448_v10  ;;  %v371_v18 = vpop.f32.mrf.mxu0  ;;  %v237_v10 = vpack.c.bf16 %v139_v52, %v138_v50  ;;  %v108_v52 = vld [vmem:[%s16693_s0 + $0x150] sm:$0xff] }
  0xc5   :  { %16715 = vst [vmem:[#allocation12_spill] sm:$0xff] %v13009_v16  ;;  %v929_v22 = vpop.f32.mrf.mxu1 }
  0xc6   :  { %v13013_v24 = vadd.f32 %v929_v22, %v371_v18  ;;  %11505 = vmatmul.msk.bf16.gmra.mxu0 %vm241_vm1, %v13007_v13  ;;  %11521 = vmatmul.msk.bf16.gmra.mxu2 %vm241_vm1, %v236_v15  ;;  %v796_v18 = vpack.c.bf16 %v698_v59, %v697_v55  ;;  %v109_v55 = vld [vmem:[%s16693_s0 + $0x158] sm:$0xff]  ;;  %v140_v59 = vld [vmem:[%s16693_s0 + $0x300] sm:$0xff] }
  0xc7   :  { %11554 = vmatmul.msk.bf16.gmra.mxu3 %vm241_vm1, %v795_v19  ;;  %v13053_v19 = vpack.c.bf16 %v666_v63, %v665_v60  ;;  %v141_v60 = vld [vmem:[%s16693_s0 + $0x308] sm:$0xff] }
  0xc8   :  { %11538 = vmatmul.msk.bf16.gmra.mxu1 %vm241_vm1, %v13011_v20  ;;  %v699_v63 = vld [vmem:[%s16693_s0 + $0x301] sm:$0xff] }
  0xc9   :  { %v451_v25 = vpop.f32.mrf.mxu2 }
  0xca   :  { %v1009_v32 = vpop.f32.mrf.mxu3 }
  0xcb   :  { %v13021_v36 = vadd.f32 %v1009_v32, %v451_v25  ;;  %v373_v37 = vpop.f32.mrf.mxu0 }
  0xcd   :  { %16716 = vst [vmem:[#allocation13_spill] sm:$0xff] %v13021_v36  ;;  %v931_v41 = vpop.f32.mrf.mxu1 }
  0xce   :  { %v13023_v46 = vadd.f32 %v931_v41, %v373_v37 }
  0xd1   :  { %v453_v3 = vpop.f32.mrf.mxu2 }
  0xd2   :  { %v1011_v6 = vpop.f32.mrf.mxu3 }
  0xd3   :  { %v13051_v12 = vadd.f32 %v1011_v6, %v453_v3  ;;  %v376_v15 = vpop.f32.mrf.mxu0  ;;  %v700_v3 = vld [vmem:[%s16693_s0 + $0x309] sm:$0xff]  ;;  %v667_v6 = vld [vmem:[%s16693_s0 + $0x151] sm:$0xff] }
  0xd5   :  { %16717 = vst [vmem:[#allocation14_spill] sm:$0xff] %v13051_v12  ;;  %v934_v22 = vpop.f32.mrf.mxu1 }
  0xd6   :  { %v13055_v25 = vadd.f32 %v934_v22, %v376_v15  ;;  %11506 = vmatmul.msk.bf16.gmra.mxu0 %vm241_vm1, %v13049_v9  ;;  %11522 = vmatmul.msk.bf16.gmra.mxu2 %vm241_vm1, %v237_v10  ;;  %v668_v10 = vld [vmem:[%s16693_s0 + $0x159] sm:$0xff]  ;;  %v13091_v22 = vpack.c.bf16 %v109_v55, %v108_v52  ;;  %v11946_v52 = vld [vmem:[%s16694_s1 + $0xc] sm:$0x3]  ;;  %v12043_v55 = vld [vmem:[%s16694_s1 + $0xe] sm:$0x3] }
  0xd7   :  { %11555 = vmatmul.msk.bf16.gmra.mxu3 %vm241_vm1, %v796_v18 }
  0xd8   :  { %11539 = vmatmul.msk.bf16.gmra.mxu1 %vm241_vm1, %v13053_v19 }
  0xd9   :  { %v456_v32 = vpop.f32.mrf.mxu2 }
  0xda   :  { %v1014_v37 = vpop.f32.mrf.mxu3 }
  0xdb   :  { %v13063_v41 = vadd.f32 %v1014_v37, %v456_v32  ;;  %v378_v47 = vpop.f32.mrf.mxu0  ;;  %v238_v32 = vpack.c.bf16 %v141_v60, %v140_v59  ;;  %v4248_v59 = vsel %vm338_vm0, %v12043_v55, 0  ;;  %v143_v55 = vld [vmem:[%s16693_s0 + $0x320] sm:$0xff] }
  0xdc   :  { %4257 = vmatpush.bf16.msra.mxu3 %v4248_v59  ;;  %v702_v59 = vld [vmem:[%s16693_s0 + $0x321] sm:$0xff] }
  0xdd   :  { %16718 = vst [vmem:[#allocation15_spill] sm:$0xff] %v13063_v41  ;;  %v936_v49 = vpop.f32.mrf.mxu1  ;;  %v13095_v41 = vpack.c.bf16 %v668_v10, %v667_v6 }
  0xde   :  { %v13065_v50 = vadd.f32 %v936_v49, %v378_v47  ;;  %v797_v49 = vpack.c.bf16 %v700_v3, %v699_v63 }
  0xe1   :  { %v458_v15 = vpop.f32.mrf.mxu2 }
  0xe2   :  { %v1016_v18 = vpop.f32.mrf.mxu3 }
  0xe3   :  { %v13093_v37 = vadd.f32 %v1016_v18, %v458_v15  ;;  %v381_v47 = vpop.f32.mrf.mxu0  ;;  %v12140_v18 = vld [vmem:[%s16694_s1 + $0x10] sm:$0x3] }
  0xe5   :  { %16719 = vst [vmem:[#allocation16_spill] sm:$0xff] %v13093_v37  ;;  %v939_v12 = vpop.f32.mrf.mxu1 }
  0xe6   :  { %v13097_v36 = vadd.f32 %v939_v12, %v381_v47  ;;  %11507 = vmatmul.msk.bf16.gmra.mxu0 %vm241_vm1, %v13091_v22  ;;  %11523 = vmatmul.msk.bf16.gmra.mxu2 %vm241_vm1, %v238_v32  ;;  %v3690_v12 = vsel %vm338_vm0, %v11946_v52, 0  ;;  %v110_v32 = vld [vmem:[%s16693_s0 + $0x168] sm:$0xff]  ;;  %v111_v47 = vld [vmem:[%s16693_s0 + $0x170] sm:$0xff]  ;;  %v142_v52 = vld [vmem:[%s16693_s0 + $0x318] sm:$0xff] }
  0xe7   :  { %11556 = vmatmul.msk.bf16.gmra.mxu3 %vm241_vm1, %v797_v49  ;;  %3699 = vmatpush.bf16.msra.mxu2 %v3690_v12  ;;  %v4806_v49 = vsel %vm338_vm0, %v12140_v18, 0  ;;  %v701_v12 = vld [vmem:[%s16693_s0 + $0x319] sm:$0xff]  ;;  %v13145_v18 = vpack.c.bf16 %v111_v47, %v110_v32 }
  0xe8   :  { %11540 = vmatmul.msk.bf16.gmra.mxu1 %vm241_vm1, %v13095_v41  ;;  %4815 = vmatpush.bf16.msra.mxu0 %v4806_v49  ;;  %v798_v16 = vpack.c.bf16 %v702_v59, %v701_v12 }
  0xe9   :  { %v461_v60 = vpop.f32.mrf.mxu2 }
  0xea   :  { %v1019_v63 = vpop.f32.mrf.mxu3 }
  0xeb   :  { %v13113_v3 = vadd.f32 %v1019_v63, %v461_v60  ;;  %v383_v6 = vpop.f32.mrf.mxu0  ;;  %v669_v60 = vld [vmem:[%s16693_s0 + $0x169] sm:$0xff]  ;;  %v670_v63 = vld [vmem:[%s16693_s0 + $0x171] sm:$0xff] }
  0xec   :  { %v13149_v48 = vpack.c.bf16 %v670_v63, %v669_v60  ;;  %v11786_v60 = vld [vmem:[%s16693_s0 + $0x22] sm:$0xff] }
  0xed   :  { %16720 = vst [vmem:[#allocation17_spill] sm:$0xff] %v13113_v3  ;;  %v941_v10 = vpop.f32.mrf.mxu1  ;;  %v239_v3 = vpack.c.bf16 %v143_v55, %v142_v52 }
  0xee   :  { %v13115_v15 = vadd.f32 %v941_v10, %v383_v6 }
  0xf1   :  { %v463_v6 = vpop.f32.mrf.mxu2 }
  0xf2   :  { %v1021_v10 = vpop.f32.mrf.mxu3 }
  0xf3   :  { %v13147_v37 = vadd.f32 %v1021_v10, %v463_v6  ;;  %v386_v49 = vpop.f32.mrf.mxu0 }
  0xf5   :  { %16721 = vst [vmem:[#allocation18_spill] sm:$0xff] %v13147_v37  ;;  %v944_v34 = vpop.f32.mrf.mxu1 }
  0xf6   :  { %v13151_v7 = vadd.f32 %v944_v34, %v386_v49  ;;  %11508 = vmatmul.msk.bf16.gmra.mxu0 %vm241_vm1, %v13145_v18  ;;  %11524 = vmatmul.msk.bf16.gmra.mxu2 %vm241_vm1, %v239_v3  ;;  %v1197_v34 = vld [vmem:[%s16693_s0 + $0x2] sm:$0xff]  ;;  %v1198_v3 = vld [vmem:[%s16693_s0 + $0xa] sm:$0xff] }
  0xf7   :  { %11557 = vmatmul.msk.bf16.gmra.mxu3 %vm241_vm1, %v798_v16  ;;  %v11785_v16 = vld [vmem:[%s16693_s0 + $0x1a] sm:$0xff]  ;;  %v1325_v10 = vpack.c.bf16 %v1198_v3, %v1197_v34 }
  0xf8   :  { %11541 = vmatmul.msk.bf16.gmra.mxu1 %vm241_vm1, %v13149_v48 }
  0xf9   :  { %v466_v32 = vpop.f32.mrf.mxu2 }
  0xfa   :  { %v1024_v47 = vpop.f32.mrf.mxu3 }
  0xfb   :  { %v13159_v52 = vadd.f32 %v1024_v47, %v466_v32  ;;  %v388_v55 = vpop.f32.mrf.mxu0  ;;  %v3000_v47 = vpack.c.bf16 %v11786_v60, %v11785_v16  ;;  %v11787_v60 = vld [vmem:[%s16693_s0 + $0x32] sm:$0xff] }
  0xfd   :  { %16722 = vst [vmem:[#allocation19_spill] sm:$0xff] %v13159_v52  ;;  %v946_v12 = vpop.f32.mrf.mxu1 }
  0xfe   :  { %v13161_v59 = vadd.f32 %v946_v12, %v388_v55 }
 0x101   :  { %v468_v63 = vpop.f32.mrf.mxu2 }
 0x102   :  { %v1026_v6 = vpop.f32.mrf.mxu3 }
 0x103   :  { %v13175_v49 = vadd.f32 %v1026_v6, %v468_v63  ;;  %v391_v32 = vpop.f32.mrf.mxu0 }
 0x105   :  { %16723 = vst [vmem:[#allocation20_spill] sm:$0xff] %v13175_v49  ;;  %v949_v55 = vpop.f32.mrf.mxu1 }
 0x106   :  { %v13177_v12 = vadd.f32 %v949_v55, %v391_v32  ;;  %11559 = vmatmul.msk.bf16.vlgmr.msrb.gmra.mxu2 %vm241_vm1, %v1325_v10  ;;  %11753 = vmatmul.msk.bf16.vlgmr.msrb.gmra.mxu0 %vm241_vm1, %v12601_v33  ;;  %v11788_v33 = vld [vmem:[%s16693_s0 + $0x3a] sm:$0xff] }
 0x107   :  { %11656 = vmatmul.msk.bf16.vlgmr.msrb.gmra.mxu3 %vm241_vm1, %v12599_v30  ;;  %v3001_v55 = vpack.c.bf16 %v11788_v33, %v11787_v60 }
 0x108   :  { %11850 = vmatmul.msk.bf16.vlgmr.msrb.gmra.mxu1 %vm241_vm1, %v3000_v47 }
 0x109   :  { %v471_v52 = vpop.f32.mrf.mxu2 }
 0x10a   :  { %v1029_v37 = vpop.f32.mrf.mxu3 }
 0x10b   :  { %v13185_v34 = vadd.f32 %v1029_v37, %v471_v52  ;;  %v393_v3 = vpop.f32.mrf.mxu0 }
 0x10d   :  { %16724 = vst [vmem:[#allocation21_spill] sm:$0xff] %v13185_v34  ;;  %v951_v63 = vpop.f32.mrf.mxu1 }
 0x10e   :  { %v13187_v16 = vadd.f32 %v951_v63, %v393_v3 }
 0x111   :  { %v473_v6 = vpop.f32.mrf.mxu2 }
 0x112   :  { %v1031_v30 = vpop.f32.mrf.mxu3 }
 0x113   :  { %v13195_v10 = vadd.f32 %v1031_v30, %v473_v6  ;;  %v396_v32 = vpop.f32.mrf.mxu0 }
 0x115   :  { %16725 = vst [vmem:[#allocation22_spill] sm:$0xff] %v13195_v10  ;;  %v954_v37 = vpop.f32.mrf.mxu1 }
 0x116   :  { %v13197_v52 = vadd.f32 %v954_v37, %v396_v32  ;;  %11560 = vmatmul.msk.bf16.gmra.mxu2 %vm241_vm1, %v3000_v47  ;;  %11754 = vmatmul.msk.bf16.gmra.mxu0 %vm241_vm1, %v12635_v45  ;;  %v11789_v47 = vld [vmem:[%s16693_s0 + $0x4a] sm:$0xff]  ;;  %v11790_v45 = vld [vmem:[%s16693_s0 + $0x52] sm:$0xff] }
 0x117   :  { %11657 = vmatmul.msk.bf16.gmra.mxu3 %vm241_vm1, %v12633_v42  ;;  %v3002_v10 = vpack.c.bf16 %v11790_v45, %v11789_v47 }
 0x118   :  { %11851 = vmatmul.msk.bf16.gmra.mxu1 %vm241_vm1, %v3001_v55 }
 0x119   :  { %v476_v3 = vpop.f32.mrf.mxu2 }
 0x11a   :  { %v1034_v63 = vpop.f32.mrf.mxu3 }
 0x11b   :  { %v13205_v34 = vadd.f32 %v1034_v63, %v476_v3  ;;  %v398_v6 = vpop.f32.mrf.mxu0 }
 0x11d   :  { %16726 = vst [vmem:[#allocation23_spill] sm:$0xff] %v13205_v34  ;;  %v956_v30 = vpop.f32.mrf.mxu1 }
 0x11e   :  { %v13207_v60 = vadd.f32 %v956_v30, %v398_v6 }
 0x121   :  { %v478_v33 = vpop.f32.mrf.mxu2 }
 0x122   :  { %v1036_v42 = vpop.f32.mrf.mxu3 }
 0x123   :  { %v13215_v32 = vadd.f32 %v1036_v42, %v478_v33  ;;  %v401_v37 = vpop.f32.mrf.mxu0 }
 0x125   :  { %16727 = vst [vmem:[#allocation24_spill] sm:$0xff] %v13215_v32  ;;  %v959_v3 = vpop.f32.mrf.mxu1 }
 0x126   :  { %v13217_v63 = vadd.f32 %v959_v3, %v401_v37  ;;  %11561 = vmatmul.msk.bf16.gmra.mxu2 %vm241_vm1, %v3001_v55  ;;  %11755 = vmatmul.msk.bf16.gmra.mxu0 %vm241_vm1, %v12669_v57  ;;  %v11791_v55 = vld [vmem:[%s16693_s0 + $0x62] sm:$0xff]  ;;  %v11792_v57 = vld [vmem:[%s16693_s0 + $0x6a] sm:$0xff] }
 0x127   :  { %11658 = vmatmul.msk.bf16.gmra.mxu3 %vm241_vm1, %v12667_v54  ;;  %v3003_v32 = vpack.c.bf16 %v11792_v57, %v11791_v55 }
 0x128   :  { %11852 = vmatmul.msk.bf16.gmra.mxu1 %vm241_vm1, %v3002_v10 }
 0x129   :  { %v481_v6 = vpop.f32.mrf.mxu2 }
 0x12a   :  { %v1039_v30 = vpop.f32.mrf.mxu3 }
 0x12b   :  { %v13225_v34 = vadd.f32 %v1039_v30, %v481_v6  ;;  %v403_v33 = vpop.f32.mrf.mxu0 }
 0x12d   :  { %16728 = vst [vmem:[#allocation25_spill] sm:$0xff] %v13225_v34  ;;  %v961_v42 = vpop.f32.mrf.mxu1 }
 0x12e   :  { %v13227_v47 = vadd.f32 %v961_v42, %v403_v33 }
 0x131   :  { %v483_v45 = vpop.f32.mrf.mxu2 }
 0x132   :  { %v1041_v54 = vpop.f32.mrf.mxu3 }
 0x133   :  { %v13235_v37 = vadd.f32 %v1041_v54, %v483_v45  ;;  %v406_v3 = vpop.f32.mrf.mxu0 }
 0x135   :  { %16729 = vst [vmem:[#allocation26_spill] sm:$0xff] %v13235_v37  ;;  %v964_v6 = vpop.f32.mrf.mxu1 }
 0x136   :  { %v13237_v30 = vadd.f32 %v964_v6, %v406_v3  ;;  %11562 = vmatmul.msk.bf16.gmra.mxu2 %vm241_vm1, %v3002_v10  ;;  %11756 = vmatmul.msk.bf16.gmra.mxu0 %vm241_vm1, %v12703_v5  ;;  %v11793_v10 = vld [vmem:[%s16693_s0 + $0x7a] sm:$0xff]  ;;  %v11794_v5 = vld [vmem:[%s16693_s0 + $0x82] sm:$0xff] }
 0x137   :  { %11659 = vmatmul.msk.bf16.gmra.mxu3 %vm241_vm1, %v12701_v2  ;;  %v3004_v37 = vpack.c.bf16 %v11794_v5, %v11793_v10 }
 0x138   :  { %11853 = vmatmul.msk.bf16.gmra.mxu1 %vm241_vm1, %v3003_v32 }
 0x139   :  { %v486_v33 = vpop.f32.mrf.mxu2 }
 0x13a   :  { %v1044_v42 = vpop.f32.mrf.mxu3 }
 0x13b   :  { %v13245_v34 = vadd.f32 %v1044_v42, %v486_v33  ;;  %v408_v45 = vpop.f32.mrf.mxu0 }
 0x13d   :  { %16730 = vst [vmem:[#allocation27_spill] sm:$0xff] %v13245_v34  ;;  %v966_v54 = vpop.f32.mrf.mxu1 }
 0x13e   :  { %v13247_v55 = vadd.f32 %v966_v54, %v408_v45 }
 0x141   :  { %v488_v57 = vpop.f32.mrf.mxu2 }
 0x142   :  { %v1046_v2 = vpop.f32.mrf.mxu3 }
 0x143   :  { %v13255_v3 = vadd.f32 %v1046_v2, %v488_v57  ;;  %v411_v6 = vpop.f32.mrf.mxu0 }
 0x145   :  { %16731 = vst [vmem:[#allocation28_spill] sm:$0xff] %v13255_v3  ;;  %v969_v33 = vpop.f32.mrf.mxu1 }
 0x146   :  { %v13257_v42 = vadd.f32 %v969_v33, %v411_v6  ;;  %11563 = vmatmul.msk.bf16.gmra.mxu2 %vm241_vm1, %v3003_v32  ;;  %11757 = vmatmul.msk.bf16.gmra.mxu0 %vm241_vm1, %v12737_v17  ;;  %v11795_v32 = vld [vmem:[%s16693_s0 + $0x92] sm:$0xff]  ;;  %v11796_v17 = vld [vmem:[%s16693_s0 + $0x9a] sm:$0xff] }
 0x147   :  { %11660 = vmatmul.msk.bf16.gmra.mxu3 %vm241_vm1, %v12735_v14  ;;  %v3005_v3 = vpack.c.bf16 %v11796_v17, %v11795_v32 }
 0x148   :  { %11854 = vmatmul.msk.bf16.gmra.mxu1 %vm241_vm1, %v3004_v37 }
 0x149   :  { %v491_v45 = vpop.f32.mrf.mxu2 }
 0x14a   :  { %v1049_v54 = vpop.f32.mrf.mxu3 }
 0x14b   :  { %v13265_v34 = vadd.f32 %v1049_v54, %v491_v45  ;;  %v413_v57 = vpop.f32.mrf.mxu0 }
 0x14d   :  { %16732 = vst [vmem:[#allocation29_spill] sm:$0xff] %v13265_v34  ;;  %v971_v2 = vpop.f32.mrf.mxu1 }
 0x14e   :  { %v13267_v10 = vadd.f32 %v971_v2, %v413_v57 }
 0x151   :  { %v493_v5 = vpop.f32.mrf.mxu2 }
 0x152   :  { %v1051_v14 = vpop.f32.mrf.mxu3 }
 0x153   :  { %v13275_v6 = vadd.f32 %v1051_v14, %v493_v5  ;;  %v416_v33 = vpop.f32.mrf.mxu0 }
 0x155   :  { %16733 = vst [vmem:[#allocation30_spill] sm:$0xff] %v13275_v6  ;;  %v974_v45 = vpop.f32.mrf.mxu1 }
 0x156   :  { %v13277_v54 = vadd.f32 %v974_v45, %v416_v33  ;;  %11564 = vmatmul.msk.bf16.gmra.mxu2 %vm241_vm1, %v3004_v37  ;;  %11758 = vmatmul.msk.bf16.gmra.mxu0 %vm241_vm1, %v12771_v29  ;;  %v11797_v37 = vld [vmem:[%s16693_s0 + $0xaa] sm:$0xff]  ;;  %v11798_v29 = vld [vmem:[%s16693_s0 + $0xb2] sm:$0xff] }
 0x157   :  { %11661 = vmatmul.msk.bf16.gmra.mxu3 %vm241_vm1, %v12769_v26  ;;  %v3006_v6 = vpack.c.bf16 %v11798_v29, %v11797_v37 }
 0x158   :  { %11855 = vmatmul.msk.bf16.gmra.mxu1 %vm241_vm1, %v3005_v3 }
 0x159   :  { %v496_v57 = vpop.f32.mrf.mxu2 }
 0x15a   :  { %v1054_v2 = vpop.f32.mrf.mxu3 }
 0x15b   :  { %v13285_v34 = vadd.f32 %v1054_v2, %v496_v57  ;;  %v418_v5 = vpop.f32.mrf.mxu0 }
 0x15d   :  { %16734 = vst [vmem:[#allocation31_spill] sm:$0xff] %v13285_v34  ;;  %v976_v14 = vpop.f32.mrf.mxu1 }
 0x15e   :  { %v13287_v32 = vadd.f32 %v976_v14, %v418_v5 }
 0x161   :  { %v498_v17 = vpop.f32.mrf.mxu2 }
 0x162   :  { %v1056_v26 = vpop.f32.mrf.mxu3 }
 0x163   :  { %v13295_v33 = vadd.f32 %v1056_v26, %v498_v17  ;;  %v421_v45 = vpop.f32.mrf.mxu0 }
 0x165   :  { %16735 = vst [vmem:[#allocation32_spill] sm:$0xff] %v13295_v33  ;;  %v979_v57 = vpop.f32.mrf.mxu1 }
 0x166   :  { %v13297_v2 = vadd.f32 %v979_v57, %v421_v45  ;;  %11565 = vmatmul.msk.bf16.gmra.mxu2 %vm241_vm1, %v3005_v3  ;;  %11759 = vmatmul.msk.bf16.gmra.mxu0 %vm241_vm1, %v12805_v44  ;;  %v11799_v3 = vld [vmem:[%s16693_s0 + $0xc2] sm:$0xff]  ;;  %v11800_v44 = vld [vmem:[%s16693_s0 + $0xca] sm:$0xff] }
 0x167   :  { %11662 = vmatmul.msk.bf16.gmra.mxu3 %vm241_vm1, %v12803_v40  ;;  %v3007_v33 = vpack.c.bf16 %v11800_v44, %v11799_v3 }
 0x168   :  { %11856 = vmatmul.msk.bf16.gmra.mxu1 %vm241_vm1, %v3006_v6 }
 0x169   :  { %v501_v5 = vpop.f32.mrf.mxu2 }
 0x16a   :  { %v1059_v14 = vpop.f32.mrf.mxu3 }
 0x16b   :  { %v13305_v34 = vadd.f32 %v1059_v14, %v501_v5  ;;  %v423_v17 = vpop.f32.mrf.mxu0  ;;  %v5893_v14 = vld [vmem:[%s16695_s2] sm:$0xf] }
 0x16d   :  { %16736 = vst [vmem:[#allocation33_spill] sm:$0xff] %v13305_v34  ;;  %v981_v26 = vpop.f32.mrf.mxu1 }
 0x16e   :  { %v13307_v37 = vadd.f32 %v981_v26, %v423_v17  ;;  %v5992_v26 = vsel %vm5990_vm2, %v5893_v14, 0 }
 0x16f   :  { %6001 = vmatpush.bf16.msra.mxu1 %v5992_v26 }
 0x171   :  { %v503_v29 = vpop.f32.mrf.mxu2 }
 0x172   :  { %v1061_v40 = vpop.f32.mrf.mxu3 }
 0x173   :  { %v13315_v45 = vadd.f32 %v1061_v40, %v503_v29  ;;  %v426_v57 = vpop.f32.mrf.mxu0 }
 0x175   :  { %16737 = vst [vmem:[#allocation34_spill] sm:$0xff] %v13315_v45  ;;  %v984_v5 = vpop.f32.mrf.mxu1 }
 0x176   :  { %v13320_v17 = vadd.f32 %v984_v5, %v426_v57  ;;  %11566 = vmatmul.msk.bf16.gmra.mxu2 %vm241_vm1, %v3006_v6  ;;  %11760 = vmatmul.msk.bf16.gmra.mxu0 %vm241_vm1, %v12843_v62  ;;  %v11801_v6 = vld [vmem:[%s16693_s0 + $0xda] sm:$0xff]  ;;  %v11802_v62 = vld [vmem:[%s16693_s0 + $0xe2] sm:$0xff] }
 0x177   :  { %11663 = vmatmul.msk.bf16.gmra.mxu3 %vm241_vm1, %v12841_v58  ;;  %v3008_v34 = vpack.c.bf16 %v11802_v62, %v11801_v6 }
 0x178   :  { %11857 = vmatmul.msk.bf16.gmra.mxu1 %vm241_vm1, %v3007_v33 }
 0x179   :  { %v506_v3 = vpop.f32.mrf.mxu2 }
 0x17a   :  { %v1064_v44 = vpop.f32.mrf.mxu3 }
 0x17b   :  { %v13329_v29 = vadd.f32 %v1064_v44, %v506_v3  ;;  %v428_v40 = vpop.f32.mrf.mxu0 }
 0x17d   :  { %16738 = vst [vmem:[#allocation35_spill] sm:$0xff] %v13329_v29  ;;  %v986_v57 = vpop.f32.mrf.mxu1 }
 0x17e   :  { %v13331_v5 = vadd.f32 %v986_v57, %v428_v40 }
 0x181   :  { %v508_v58 = vpop.f32.mrf.mxu2 }
 0x182   :  { %v1066_v14 = vpop.f32.mrf.mxu3 }
 0x183   :  { %v13339_v45 = vadd.f32 %v1066_v14, %v508_v58  ;;  %v2584_v26 = vpop.f32.mrf.mxu0 }
 0x185   :  { %16739 = vst [vmem:[#allocation36_spill] sm:$0xff] %v13339_v45  ;;  %v3142_v3 = vpop.f32.mrf.mxu1 }
 0x186   :  { %11567 = vmatmul.msk.bf16.gmra.mxu2 %vm241_vm1, %v3007_v33  ;;  %11761 = vmatmul.msk.bf16.gmra.mxu0 %vm241_vm1, %v12885_v27  ;;  %v11803_v33 = vld [vmem:[%s16693_s0 + $0xf2] sm:$0xff] }
 0x187   :  { %11664 = vmatmul.msk.bf16.gmra.mxu3 %vm241_vm1, %v12881_v21  ;;  %v11804_v21 = vld [vmem:[%s16693_s0 + $0xfa] sm:$0xff] }
 0x188   :  { %11858 = vmatmul.msk.bf16.gmra.mxu1 %vm241_vm1, %v3008_v34 }
 0x189   :  { %v1467_v44 = vpop.f32.mrf.mxu2 }
 0x18a   :  { %v1627_v40 = vadd.f32 %v1467_v44, %v12845_v0  ;;  %v2026_v57 = vpop.f32.mrf.mxu3  ;;  %v3009_v44 = vpack.c.bf16 %v11804_v21, %v11803_v33 }
 0x18b   :  { %v2586_v29 = vpop.f32.mrf.mxu0 }
 0x18c   :  { %v2186_v58 = vadd.f32 %v2026_v57, %v1627_v40 }
 0x18d   :  { %v3144_v14 = vpop.f32.mrf.mxu1 }
 0x18e   :  { %v2744_v45 = vadd.f32 %v2584_v26, %v2186_v58 }
 0x190   :  { %v13348_v6 = vadd.f32 %v3142_v3, %v2744_v45 }
 0x191   :  { %v1469_v27 = vpop.f32.mrf.mxu2 }
 0x192   :  { %v1628_v62 = vadd.f32 %v1469_v27, %v12855_v8  ;;  %v2028_v49 = vpop.f32.mrf.mxu3 }
 0x193   :  { %v2589_v0 = vpop.f32.mrf.mxu0 }
 0x194   :  { %v2187_v56 = vadd.f32 %v2028_v49, %v1628_v62 }
 0x195   :  { %v3147_v40 = vpop.f32.mrf.mxu1 }
 0x196   :  { %11568 = vmatmul.msk.bf16.gmra.mxu2 %vm241_vm1, %v3008_v34  ;;  %11762 = vmatmul.msk.bf16.gmra.mxu0 %vm241_vm1, %v12927_v61  ;;  %v2745_v45 = vadd.f32 %v2586_v29, %v2187_v56  ;;  %v11805_v56 = vld [vmem:[%s16693_s0 + $0x10a] sm:$0xff] }
 0x197   :  { %11665 = vmatmul.msk.bf16.gmra.mxu3 %vm241_vm1, %v12923_v53  ;;  %v11806_v53 = vld [vmem:[%s16693_s0 + $0x112] sm:$0xff] }
 0x198   :  { %11859 = vmatmul.msk.bf16.gmra.mxu1 %vm241_vm1, %v3009_v44  ;;  %v13363_v26 = vadd.f32 %v3144_v14, %v2745_v45  ;;  %v3010_v27 = vpack.c.bf16 %v11806_v53, %v11805_v56 }
 0x199   :  { %v1472_v3 = vpop.f32.mrf.mxu2 }
 0x19a   :  { %v1629_v8 = vadd.f32 %v1472_v3, %v12887_v31  ;;  %v2031_v57 = vpop.f32.mrf.mxu3 }
 0x19b   :  { %v2591_v58 = vpop.f32.mrf.mxu0 }
 0x19c   :  { %v2188_v49 = vadd.f32 %v2031_v57, %v1629_v8 }
 0x19d   :  { %v3149_v33 = vpop.f32.mrf.mxu1 }
 0x19e   :  { %v2746_v21 = vadd.f32 %v2589_v0, %v2188_v49 }
 0x1a0   :  { %v13366_v34 = vadd.f32 %v3147_v40, %v2746_v21 }
 0x1a1   :  { %v1474_v61 = vpop.f32.mrf.mxu2 }
 0x1a2   :  { %v1630_v29 = vadd.f32 %v1474_v61, %v12897_v38  ;;  %v2033_v14 = vpop.f32.mrf.mxu3 }
 0x1a3   :  { %v2594_v31 = vpop.f32.mrf.mxu0 }
 0x1a4   :  { %v2189_v62 = vadd.f32 %v2033_v14, %v1630_v29 }
 0x1a5   :  { %v3152_v45 = vpop.f32.mrf.mxu1 }
 0x1a6   :  { %11569 = vmatmul.msk.bf16.gmra.mxu2 %vm241_vm1, %v3009_v44  ;;  %11763 = vmatmul.msk.bf16.gmra.mxu0 %vm241_vm1, %v12969_v39  ;;  %v2747_v0 = vadd.f32 %v2591_v58, %v2189_v62  ;;  %v11807_v39 = vld [vmem:[%s16693_s0 + $0x122] sm:$0xff] }
 0x1a7   :  { %11666 = vmatmul.msk.bf16.gmra.mxu3 %vm241_vm1, %v12965_v28  ;;  %v11808_v28 = vld [vmem:[%s16693_s0 + $0x12a] sm:$0xff] }
 0x1a8   :  { %11860 = vmatmul.msk.bf16.gmra.mxu1 %vm241_vm1, %v3010_v27  ;;  %v13381_v40 = vadd.f32 %v3149_v33, %v2747_v0  ;;  %v3011_v61 = vpack.c.bf16 %v11808_v28, %v11807_v39 }
 0x1a9   :  { %v1477_v3 = vpop.f32.mrf.mxu2 }
 0x1aa   :  { %v1631_v38 = vadd.f32 %v1477_v3, %v12929_v1  ;;  %v2036_v8 = vpop.f32.mrf.mxu3 }
 0x1ab   :  { %v2596_v57 = vpop.f32.mrf.mxu0 }
 0x1ac   :  { %v2190_v49 = vadd.f32 %v2036_v8, %v1631_v38 }
 0x1ad   :  { %v3154_v21 = vpop.f32.mrf.mxu1 }
 0x1ae   :  { %v2748_v56 = vadd.f32 %v2594_v31, %v2190_v49 }
 0x1b0   :  { %v13384_v44 = vadd.f32 %v3152_v45, %v2748_v56 }
 0x1b1   :  { %v1479_v58 = vpop.f32.mrf.mxu2 }
 0x1b2   :  { %v1632_v33 = vadd.f32 %v1479_v58, %v12939_v11  ;;  %v2038_v53 = vpop.f32.mrf.mxu3 }
 0x1b3   :  { %v2599_v1 = vpop.f32.mrf.mxu0 }
 0x1b4   :  { %v2191_v29 = vadd.f32 %v2038_v53, %v1632_v33 }
 0x1b5   :  { %v3157_v14 = vpop.f32.mrf.mxu1 }
 0x1b6   :  { %11570 = vmatmul.msk.bf16.gmra.mxu2 %vm241_vm1, %v3010_v27  ;;  %11764 = vmatmul.msk.bf16.gmra.mxu0 %vm241_vm1, %v13011_v20  ;;  %v2749_v31 = vadd.f32 %v2596_v57, %v2191_v29  ;;  %v11809_v20 = vld [vmem:[%s16693_s0 + $0x13a] sm:$0xff] }
 0x1b7   :  { %11667 = vmatmul.msk.bf16.gmra.mxu3 %vm241_vm1, %v13007_v13  ;;  %v11810_v13 = vld [vmem:[%s16693_s0 + $0x142] sm:$0xff] }
 0x1b8   :  { %11861 = vmatmul.msk.bf16.gmra.mxu1 %vm241_vm1, %v3011_v61  ;;  %v13399_v62 = vadd.f32 %v3154_v21, %v2749_v31  ;;  %v3012_v39 = vpack.c.bf16 %v11810_v13, %v11809_v20 }
 0x1b9   :  { %v1482_v45 = vpop.f32.mrf.mxu2 }
 0x1ba   :  { %v1633_v11 = vadd.f32 %v1482_v45, %v12971_v43  ;;  %v2041_v0 = vpop.f32.mrf.mxu3 }
 0x1bb   :  { %v2601_v3 = vpop.f32.mrf.mxu0 }
 0x1bc   :  { %v2192_v38 = vadd.f32 %v2041_v0, %v1633_v11 }
 0x1bd   :  { %v3159_v8 = vpop.f32.mrf.mxu1 }
 0x1be   :  { %v2750_v49 = vadd.f32 %v2599_v1, %v2192_v38 }
 0x1c0   :  { %v13402_v27 = vadd.f32 %v3157_v14, %v2750_v49 }
 0x1c1   :  { %v1484_v57 = vpop.f32.mrf.mxu2 }
 0x1c2   :  { %v1634_v21 = vadd.f32 %v1484_v57, %v12981_v51  ;;  %v2043_v56 = vpop.f32.mrf.mxu3 }
 0x1c3   :  { %v2604_v43 = vpop.f32.mrf.mxu0 }
 0x1c4   :  { %v2193_v28 = vadd.f32 %v2043_v56, %v1634_v21 }
 0x1c5   :  { %v3162_v58 = vpop.f32.mrf.mxu1 }
 0x1c6   :  { %11571 = vmatmul.msk.bf16.gmra.mxu2 %vm241_vm1, %v3011_v61  ;;  %11765 = vmatmul.msk.bf16.gmra.mxu0 %vm241_vm1, %v13053_v19  ;;  %v2751_v33 = vadd.f32 %v2601_v3, %v2193_v28  ;;  %v11811_v19 = vld [vmem:[%s16693_s0 + $0x152] sm:$0xff] }
 0x1c7   :  { %11668 = vmatmul.msk.bf16.gmra.mxu3 %vm241_vm1, %v13049_v9  ;;  %v11812_v9 = vld [vmem:[%s16693_s0 + $0x15a] sm:$0xff] }
 0x1c8   :  { %11862 = vmatmul.msk.bf16.gmra.mxu1 %vm241_vm1, %v3012_v39  ;;  %v13417_v53 = vadd.f32 %v3159_v8, %v2751_v33  ;;  %v3013_v8 = vpack.c.bf16 %v11812_v9, %v11811_v19 }
 0x1c9   :  { %v1487_v1 = vpop.f32.mrf.mxu2 }
 0x1ca   :  { %v1635_v51 = vadd.f32 %v1487_v1, %v13013_v24  ;;  %v2046_v29 = vpop.f32.mrf.mxu3 }
 0x1cb   :  { %v2606_v14 = vpop.f32.mrf.mxu0 }
 0x1cc   :  { %v2194_v31 = vadd.f32 %v2046_v29, %v1635_v51 }
 0x1cd   :  { %v3164_v45 = vpop.f32.mrf.mxu1 }
 0x1ce   :  { %v2752_v11 = vadd.f32 %v2604_v43, %v2194_v31 }
 0x1d0   :  { %v13420_v61 = vadd.f32 %v3162_v58, %v2752_v11 }
 0x1d1   :  { %v1489_v0 = vpop.f32.mrf.mxu2 }
 0x1d2   :  { %v1636_v3 = vadd.f32 %v1489_v0, %v13023_v46  ;;  %v2048_v38 = vpop.f32.mrf.mxu3 }
 0x1d3   :  { %v2609_v24 = vpop.f32.mrf.mxu0 }
 0x1d4   :  { %v2195_v49 = vadd.f32 %v2048_v38, %v1636_v3 }
 0x1d5   :  { %v3167_v20 = vpop.f32.mrf.mxu1 }
 0x1d6   :  { %11572 = vmatmul.msk.bf16.gmra.mxu2 %vm241_vm1, %v3012_v39  ;;  %11766 = vmatmul.msk.bf16.gmra.mxu0 %vm241_vm1, %v13095_v41  ;;  %v2753_v13 = vadd.f32 %v2606_v14, %v2195_v49  ;;  %v11813_v41 = vld [vmem:[%s16693_s0 + $0x16a] sm:$0xff] }
 0x1d7   :  { %11669 = vmatmul.msk.bf16.gmra.mxu3 %vm241_vm1, %v13091_v22  ;;  %v11814_v22 = vld [vmem:[%s16693_s0 + $0x172] sm:$0xff] }
 0x1d8   :  { %11863 = vmatmul.msk.bf16.gmra.mxu1 %vm241_vm1, %v3013_v8  ;;  %v13435_v57 = vadd.f32 %v3164_v45, %v2753_v13  ;;  %v3014_v14 = vpack.c.bf16 %v11814_v22, %v11813_v41  ;;  %v11815_v13 = vld [vmem:[%s16693_s0 + $0x182] sm:$0xff] }
 0x1d9   :  { %v1492_v21 = vpop.f32.mrf.mxu2 }
 0x1da   :  { %v1637_v46 = vadd.f32 %v1492_v21, %v13055_v25  ;;  %v2051_v56 = vpop.f32.mrf.mxu3  ;;  %v11816_v21 = vld [vmem:[%s16693_s0 + $0x18a] sm:$0xff] }
 0x1db   :  { %v2611_v43 = vpop.f32.mrf.mxu0  ;;  %v3015_v41 = vpack.c.bf16 %v11816_v21, %v11815_v13 }
 0x1dc   :  { %v2196_v28 = vadd.f32 %v2051_v56, %v1637_v46 }
 0x1dd   :  { %v3169_v58 = vpop.f32.mrf.mxu1 }
 0x1de   :  { %v2754_v33 = vadd.f32 %v2609_v24, %v2196_v28 }
 0x1e0   :  { %v13438_v39 = vadd.f32 %v3167_v20, %v2754_v33 }
 0x1e1   :  { %v1494_v1 = vpop.f32.mrf.mxu2 }
 0x1e2   :  { %v1638_v51 = vadd.f32 %v1494_v1, %v13065_v50  ;;  %v2053_v29 = vpop.f32.mrf.mxu3 }
 0x1e3   :  { %v2614_v25 = vpop.f32.mrf.mxu0 }
 0x1e4   :  { %v2197_v31 = vadd.f32 %v2053_v29, %v1638_v51 }
 0x1e5   :  { %v3172_v45 = vpop.f32.mrf.mxu1 }
 0x1e6   :  { %11573 = vmatmul.msk.bf16.gmra.mxu2 %vm241_vm1, %v3013_v8  ;;  %11767 = vmatmul.msk.bf16.gmra.mxu0 %vm241_vm1, %v13149_v48  ;;  %v2755_v11 = vadd.f32 %v2611_v43, %v2197_v31  ;;  %v11621_v48 = vld [vmem:[%s16693_s0 + $0x180] sm:$0xff]  ;;  %v11719_v8 = vld [vmem:[%s16693_s0 + $0x189] sm:$0xff] }
 0x1e7   :  { %11670 = vmatmul.msk.bf16.gmra.mxu3 %vm241_vm1, %v13145_v18  ;;  %v11718_v18 = vld [vmem:[%s16693_s0 + $0x181] sm:$0xff] }
 0x1e8   :  { %11864 = vmatmul.msk.bf16.gmra.mxu1 %vm241_vm1, %v3014_v14  ;;  %v13453_v19 = vadd.f32 %v3169_v58, %v2755_v11  ;;  %v2457_v28 = vpack.c.bf16 %v11719_v8, %v11718_v18  ;;  %v11818_v18 = vld [vmem:[%s16693_s0 + $0x1d2] sm:$0xff] }
 0x1e9   :  { %v1497_v9 = vpop.f32.mrf.mxu2 }
 0x1ea   :  { %v1639_v50 = vadd.f32 %v1497_v9, %v13097_v36  ;;  %v2056_v0 = vpop.f32.mrf.mxu3  ;;  %v11622_v36 = vld [vmem:[%s16693_s0 + $0x188] sm:$0xff] }
 0x1eb   :  { %v2616_v3 = vpop.f32.mrf.mxu0  ;;  %v1899_v33 = vpack.c.bf16 %v11622_v36, %v11621_v48  ;;  %v11817_v48 = vld [vmem:[%s16693_s0 + $0x1ca] sm:$0xff] }
 0x1ec   :  { %v2198_v38 = vadd.f32 %v2056_v0, %v1639_v50  ;;  %v1230_v0 = vld [vmem:[%s16693_s0 + $0x1ba] sm:$0xff] }
 0x1ed   :  { %v3174_v24 = vpop.f32.mrf.mxu1 }
 0x1ee   :  { %v2756_v49 = vadd.f32 %v2614_v25, %v2198_v38  ;;  %v11721_v38 = vld [vmem:[%s16693_s0 + $0x1d1] sm:$0xff] }
 0x1f0   :  { %v13465_v20 = vadd.f32 %v3172_v45, %v2756_v49  ;;  %v11624_v49 = vld [vmem:[%s16693_s0 + $0x1d0] sm:$0xff] }
 0x1f1   :  { %v1499_v46 = vpop.f32.mrf.mxu2 }
 0x1f2   :  { %v1640_v56 = vadd.f32 %v1499_v46, %v13115_v15  ;;  %v2058_v43 = vpop.f32.mrf.mxu3 }
 0x1f3   :  { %v2619_v58 = vpop.f32.mrf.mxu0 }
 0x1f4   :  { %v2199_v22 = vadd.f32 %v2058_v43, %v1640_v56 }
 0x1f5   :  { %v3177_v1 = vpop.f32.mrf.mxu1 }
 0x1f6   :  { %11574 = vmatmul.msk.bf16.gmra.mxu2 %vm241_vm1, %v3014_v14  ;;  %11768 = vmatmul.msk.bf16.gmra.mxu0 %vm241_vm1, %v2457_v28  ;;  %v2757_v51 = vadd.f32 %v2616_v3, %v2199_v22  ;;  %v1229_v14 = vld [vmem:[%s16693_s0 + $0x1b2] sm:$0xff]  ;;  %v11623_v3 = vld [vmem:[%s16693_s0 + $0x1c8] sm:$0xff]  ;;  %v3016_v28 = vpack.c.bf16 %v11818_v18, %v11817_v48 }
 0x1f7   :  { %11671 = vmatmul.msk.bf16.gmra.mxu3 %vm241_vm1, %v1899_v33  ;;  %v1341_v21 = vpack.c.bf16 %v1230_v0, %v1229_v14  ;;  %v1900_v43 = vpack.c.bf16 %v11624_v49, %v11623_v3  ;;  %v11819_v0 = vld [vmem:[%s16693_s0 + $0x1e2] sm:$0xff]  ;;  %v11820_v3 = vld [vmem:[%s16693_s0 + $0x1ea] sm:$0xff] }
 0x1f8   :  { %11865 = vmatmul.msk.bf16.gmra.mxu1 %vm241_vm1, %v3015_v41  ;;  %v13481_v29 = vadd.f32 %v3174_v24, %v2757_v51 }
 0x1f9   :  { %v1502_v25 = vpop.f32.mrf.mxu2 }
 0x1fa   :  { %v1641_v15 = vadd.f32 %v1502_v25, %v13151_v7  ;;  %v2061_v31 = vpop.f32.mrf.mxu3  ;;  %v11720_v7 = vld [vmem:[%s16693_s0 + $0x1c9] sm:$0xff] }
 0x1fb   :  { %v2621_v45 = vpop.f32.mrf.mxu0  ;;  %v2458_v46 = vpack.c.bf16 %v11721_v38, %v11720_v7 }
 0x1fc   :  { %v2200_v11 = vadd.f32 %v2061_v31, %v1641_v15 }
 0x1fd   :  { %v3179_v9 = vpop.f32.mrf.mxu1 }
 0x1fe   :  { %v2758_v50 = vadd.f32 %v2619_v58, %v2200_v11 }
 0x200   :  { %v13499_v24 = vadd.f32 %v3177_v1, %v2758_v50  ;;  %v11625_v50 = vld [vmem:[%s16693_s0 + $0x1e0] sm:$0xff] }
 0x201   :  { %v1504_v8 = vpop.f32.mrf.mxu2 }
 0x202   :  { %v1642_v36 = vadd.f32 %v1504_v8, %v13161_v59  ;;  %v2063_v13 = vpop.f32.mrf.mxu3 }
 0x203   :  { %v2624_v56 = vpop.f32.mrf.mxu0 }
 0x204   :  { %v2201_v58 = vadd.f32 %v2063_v13, %v1642_v36  ;;  %v3017_v36 = vpack.c.bf16 %v11820_v3, %v11819_v0 }
 0x205   :  { %v3182_v33 = vpop.f32.mrf.mxu1 }
 0x206   :  { %11575 = vmatmul.msk.bf16.gmra.mxu2 %vm241_vm1, %v1341_v21  ;;  %11769 = vmatmul.msk.bf16.gmra.mxu0 %vm241_vm1, %v2458_v46  ;;  %v2759_v41 = vadd.f32 %v2621_v45, %v2201_v58  ;;  %v11722_v45 = vld [vmem:[%s16693_s0 + $0x1e1] sm:$0xff] }
 0x207   :  { %11672 = vmatmul.msk.bf16.gmra.mxu3 %vm241_vm1, %v1900_v43 }
 0x208   :  { %11866 = vmatmul.msk.bf16.gmra.mxu1 %vm241_vm1, %v3016_v28  ;;  %v13515_v22 = vadd.f32 %v3179_v9, %v2759_v41  ;;  %v11723_v9 = vld [vmem:[%s16693_s0 + $0x1e9] sm:$0xff] }
 0x209   :  { %v1507_v59 = vpop.f32.mrf.mxu2  ;;  %v2459_v48 = vpack.c.bf16 %v11723_v9, %v11722_v45 }
 0x20a   :  { %v1643_v1 = vadd.f32 %v1507_v59, %v13177_v12  ;;  %v2066_v51 = vpop.f32.mrf.mxu3  ;;  %v11626_v12 = vld [vmem:[%s16693_s0 + $0x1e8] sm:$0xff] }
 0x20b   :  { %v2626_v25 = vpop.f32.mrf.mxu0  ;;  %v1901_v8 = vpack.c.bf16 %v11626_v12, %v11625_v50 }
 0x20c   :  { %v2202_v15 = vadd.f32 %v2066_v51, %v1643_v1  ;;  %v11724_v51 = vld [vmem:[%s16693_s0 + $0x1f9] sm:$0xff] }
 0x20d   :  { %v3184_v31 = vpop.f32.mrf.mxu1 }
 0x20e   :  { %v2760_v11 = vadd.f32 %v2624_v56, %v2202_v15 }
 0x210   :  { %v13527_v14 = vadd.f32 %v3182_v33, %v2760_v11  ;;  %v11822_v11 = vld [vmem:[%s16693_s0 + $0x202] sm:$0xff] }
 0x211   :  { %v1509_v7 = vpop.f32.mrf.mxu2 }
 0x212   :  { %v1644_v38 = vadd.f32 %v1509_v7, %v13187_v16  ;;  %v2068_v49 = vpop.f32.mrf.mxu3 }
 0x213   :  { %v2629_v18 = vpop.f32.mrf.mxu0 }
 0x214   :  { %v2203_v13 = vadd.f32 %v2068_v49, %v1644_v38 }
 0x215   :  { %v3187_v21 = vpop.f32.mrf.mxu1 }
 0x216   :  { %11576 = vmatmul.msk.bf16.gmra.mxu2 %vm241_vm1, %v3016_v28  ;;  %11770 = vmatmul.msk.bf16.gmra.mxu0 %vm241_vm1, %v2459_v48  ;;  %v2761_v46 = vadd.f32 %v2626_v25, %v2203_v13  ;;  %v11627_v28 = vld [vmem:[%s16693_s0 + $0x1f8] sm:$0xff]  ;;  %v11725_v25 = vld [vmem:[%s16693_s0 + $0x201] sm:$0xff] }
 0x217   :  { %11673 = vmatmul.msk.bf16.gmra.mxu3 %vm241_vm1, %v1901_v8  ;;  %v2460_v12 = vpack.c.bf16 %v11725_v25, %v11724_v51 }
 0x218   :  { %11867 = vmatmul.msk.bf16.gmra.mxu1 %vm241_vm1, %v3017_v36  ;;  %v13543_v56 = vadd.f32 %v3184_v31, %v2761_v46  ;;  %v11821_v31 = vld [vmem:[%s16693_s0 + $0x1fa] sm:$0xff] }
 0x219   :  { %v1512_v43 = vpop.f32.mrf.mxu2  ;;  %v3018_v7 = vpack.c.bf16 %v11822_v11, %v11821_v31 }
 0x21a   :  { %v1645_v16 = vadd.f32 %v1512_v43, %v13197_v52  ;;  %v2071_v58 = vpop.f32.mrf.mxu3  ;;  %v11628_v52 = vld [vmem:[%s16693_s0 + $0x200] sm:$0xff] }
 0x21b   :  { %v2631_v33 = vpop.f32.mrf.mxu0  ;;  %v1902_v3 = vpack.c.bf16 %v11628_v52, %v11627_v28 }
 0x21c   :  { %v2204_v41 = vadd.f32 %v2071_v58, %v1645_v16  ;;  %v11726_v58 = vld [vmem:[%s16693_s0 + $0x211] sm:$0xff] }
 0x21d   :  { %v3189_v59 = vpop.f32.mrf.mxu1 }
 0x21e   :  { %v2762_v1 = vadd.f32 %v2629_v18, %v2204_v41 }
 0x220   :  { %v13555_v15 = vadd.f32 %v3187_v21, %v2762_v1  ;;  %v11824_v1 = vld [vmem:[%s16693_s0 + $0x21a] sm:$0xff] }
 0x221   :  { %v1514_v50 = vpop.f32.mrf.mxu2 }
 0x222   :  { %v1646_v45 = vadd.f32 %v1514_v50, %v13207_v60  ;;  %v2073_v9 = vpop.f32.mrf.mxu3 }
 0x223   :  { %v2634_v0 = vpop.f32.mrf.mxu0 }
 0x224   :  { %v2205_v38 = vadd.f32 %v2073_v9, %v1646_v45 }
 0x225   :  { %v3192_v49 = vpop.f32.mrf.mxu1 }
 0x226   :  { %11577 = vmatmul.msk.bf16.gmra.mxu2 %vm241_vm1, %v3017_v36  ;;  %11771 = vmatmul.msk.bf16.gmra.mxu0 %vm241_vm1, %v2460_v12  ;;  %v2763_v48 = vadd.f32 %v2631_v33, %v2205_v38  ;;  %v11629_v36 = vld [vmem:[%s16693_s0 + $0x210] sm:$0xff]  ;;  %v11727_v33 = vld [vmem:[%s16693_s0 + $0x219] sm:$0xff] }
 0x227   :  { %11674 = vmatmul.msk.bf16.gmra.mxu3 %vm241_vm1, %v1902_v3  ;;  %v2461_v52 = vpack.c.bf16 %v11727_v33, %v11726_v58 }
 0x228   :  { %11868 = vmatmul.msk.bf16.gmra.mxu1 %vm241_vm1, %v3018_v7  ;;  %v13571_v18 = vadd.f32 %v3189_v59, %v2763_v48  ;;  %v11823_v59 = vld [vmem:[%s16693_s0 + $0x212] sm:$0xff] }
 0x229   :  { %v1517_v8 = vpop.f32.mrf.mxu2  ;;  %v3019_v50 = vpack.c.bf16 %v11824_v1, %v11823_v59 }
 0x22a   :  { %v1647_v60 = vadd.f32 %v1517_v8, %v13217_v63  ;;  %v2076_v13 = vpop.f32.mrf.mxu3  ;;  %v11630_v63 = vld [vmem:[%s16693_s0 + $0x218] sm:$0xff] }
 0x22b   :  { %v2636_v21 = vpop.f32.mrf.mxu0  ;;  %v1903_v11 = vpack.c.bf16 %v11630_v63, %v11629_v36 }
 0x22c   :  { %v2206_v46 = vadd.f32 %v2076_v13, %v1647_v60  ;;  %v11728_v13 = vld [vmem:[%s16693_s0 + $0x229] sm:$0xff] }
 0x22d   :  { %v3194_v43 = vpop.f32.mrf.mxu1 }
 0x22e   :  { %v2764_v16 = vadd.f32 %v2634_v0, %v2206_v46 }
 0x230   :  { %v13583_v41 = vadd.f32 %v3192_v49, %v2764_v16  ;;  %v11826_v16 = vld [vmem:[%s16693_s0 + $0x232] sm:$0xff] }
 0x231   :  { %v1519_v28 = vpop.f32.mrf.mxu2 }
 0x232   :  { %v1648_v51 = vadd.f32 %v1519_v28, %v13227_v47  ;;  %v2078_v25 = vpop.f32.mrf.mxu3 }
 0x233   :  { %v2639_v31 = vpop.f32.mrf.mxu0 }
 0x234   :  { %v2207_v45 = vadd.f32 %v2078_v25, %v1648_v51 }
 0x235   :  { %v3197_v9 = vpop.f32.mrf.mxu1 }
 0x236   :  { %11578 = vmatmul.msk.bf16.gmra.mxu2 %vm241_vm1, %v3018_v7  ;;  %11772 = vmatmul.msk.bf16.gmra.mxu0 %vm241_vm1, %v2461_v52  ;;  %v2765_v12 = vadd.f32 %v2636_v21, %v2207_v45  ;;  %v11631_v7 = vld [vmem:[%s16693_s0 + $0x228] sm:$0xff]  ;;  %v11729_v21 = vld [vmem:[%s16693_s0 + $0x231] sm:$0xff] }
 0x237   :  { %11675 = vmatmul.msk.bf16.gmra.mxu3 %vm241_vm1, %v1903_v11  ;;  %v2462_v63 = vpack.c.bf16 %v11729_v21, %v11728_v13 }
 0x238   :  { %11869 = vmatmul.msk.bf16.gmra.mxu1 %vm241_vm1, %v3019_v50  ;;  %v13599_v0 = vadd.f32 %v3194_v43, %v2765_v12  ;;  %v11825_v43 = vld [vmem:[%s16693_s0 + $0x22a] sm:$0xff] }
 0x239   :  { %v1522_v3 = vpop.f32.mrf.mxu2  ;;  %v3020_v28 = vpack.c.bf16 %v11826_v16, %v11825_v43 }
 0x23a   :  { %v1649_v47 = vadd.f32 %v1522_v3, %v13237_v30  ;;  %v2081_v38 = vpop.f32.mrf.mxu3  ;;  %v11632_v30 = vld [vmem:[%s16693_s0 + $0x230] sm:$0xff] }
 0x23b   :  { %v2641_v49 = vpop.f32.mrf.mxu0  ;;  %v1904_v1 = vpack.c.bf16 %v11632_v30, %v11631_v7 }
 0x23c   :  { %v2208_v48 = vadd.f32 %v2081_v38, %v1649_v47  ;;  %v11730_v38 = vld [vmem:[%s16693_s0 + $0x241] sm:$0xff] }
 0x23d   :  { %v3199_v8 = vpop.f32.mrf.mxu1 }
 0x23e   :  { %v2766_v60 = vadd.f32 %v2639_v31, %v2208_v48 }
 0x240   :  { %v13611_v46 = vadd.f32 %v3197_v9, %v2766_v60  ;;  %v11828_v60 = vld [vmem:[%s16693_s0 + $0x24a] sm:$0xff] }
 0x241   :  { %v1524_v36 = vpop.f32.mrf.mxu2 }
 0x242   :  { %v1650_v58 = vadd.f32 %v1524_v36, %v13247_v55  ;;  %v2083_v33 = vpop.f32.mrf.mxu3 }
 0x243   :  { %v2644_v59 = vpop.f32.mrf.mxu0 }
 0x244   :  { %v2209_v51 = vadd.f32 %v2083_v33, %v1650_v58 }
 0x245   :  { %v3202_v25 = vpop.f32.mrf.mxu1 }
 0x246   :  { %11579 = vmatmul.msk.bf16.gmra.mxu2 %vm241_vm1, %v3019_v50  ;;  %11773 = vmatmul.msk.bf16.gmra.mxu0 %vm241_vm1, %v2462_v63  ;;  %v2767_v52 = vadd.f32 %v2641_v49, %v2209_v51  ;;  %v11633_v50 = vld [vmem:[%s16693_s0 + $0x240] sm:$0xff]  ;;  %v11731_v49 = vld [vmem:[%s16693_s0 + $0x249] sm:$0xff] }
 0x247   :  { %11676 = vmatmul.msk.bf16.gmra.mxu3 %vm241_vm1, %v1904_v1  ;;  %v2463_v30 = vpack.c.bf16 %v11731_v49, %v11730_v38 }
 0x248   :  { %11870 = vmatmul.msk.bf16.gmra.mxu1 %vm241_vm1, %v3020_v28  ;;  %v13627_v31 = vadd.f32 %v3199_v8, %v2767_v52  ;;  %v11827_v8 = vld [vmem:[%s16693_s0 + $0x242] sm:$0xff] }
 0x249   :  { %v1527_v11 = vpop.f32.mrf.mxu2  ;;  %v3021_v36 = vpack.c.bf16 %v11828_v60, %v11827_v8 }
 0x24a   :  { %v1651_v55 = vadd.f32 %v1527_v11, %v13257_v42  ;;  %v2086_v45 = vpop.f32.mrf.mxu3  ;;  %v11634_v42 = vld [vmem:[%s16693_s0 + $0x248] sm:$0xff] }
 0x24b   :  { %v2646_v9 = vpop.f32.mrf.mxu0  ;;  %v1905_v16 = vpack.c.bf16 %v11634_v42, %v11633_v50 }
 0x24c   :  { %v2210_v12 = vadd.f32 %v2086_v45, %v1651_v55  ;;  %v11732_v45 = vld [vmem:[%s16693_s0 + $0x259] sm:$0xff] }
 0x24d   :  { %v3204_v3 = vpop.f32.mrf.mxu1 }
 0x24e   :  { %v2768_v47 = vadd.f32 %v2644_v59, %v2210_v12 }
 0x250   :  { %v13639_v48 = vadd.f32 %v3202_v25, %v2768_v47  ;;  %v11830_v47 = vld [vmem:[%s16693_s0 + $0x262] sm:$0xff] }
 0x251   :  { %v1529_v7 = vpop.f32.mrf.mxu2 }
 0x252   :  { %v1652_v13 = vadd.f32 %v1529_v7, %v13267_v10  ;;  %v2088_v21 = vpop.f32.mrf.mxu3 }
 0x253   :  { %v2649_v43 = vpop.f32.mrf.mxu0 }
 0x254   :  { %v2211_v58 = vadd.f32 %v2088_v21, %v1652_v13 }
 0x255   :  { %v3207_v33 = vpop.f32.mrf.mxu1 }
 0x256   :  { %11580 = vmatmul.msk.bf16.gmra.mxu2 %vm241_vm1, %v3020_v28  ;;  %11774 = vmatmul.msk.bf16.gmra.mxu0 %vm241_vm1, %v2463_v30  ;;  %v2769_v63 = vadd.f32 %v2646_v9, %v2211_v58  ;;  %v11635_v28 = vld [vmem:[%s16693_s0 + $0x258] sm:$0xff]  ;;  %v11733_v9 = vld [vmem:[%s16693_s0 + $0x261] sm:$0xff] }
 0x257   :  { %11677 = vmatmul.msk.bf16.gmra.mxu3 %vm241_vm1, %v1905_v16  ;;  %v2464_v42 = vpack.c.bf16 %v11733_v9, %v11732_v45 }
 0x258   :  { %11871 = vmatmul.msk.bf16.gmra.mxu1 %vm241_vm1, %v3021_v36  ;;  %v13655_v59 = vadd.f32 %v3204_v3, %v2769_v63  ;;  %v11829_v3 = vld [vmem:[%s16693_s0 + $0x25a] sm:$0xff] }
 0x259   :  { %v1532_v1 = vpop.f32.mrf.mxu2  ;;  %v3022_v7 = vpack.c.bf16 %v11830_v47, %v11829_v3 }
 0x25a   :  { %v1653_v10 = vadd.f32 %v1532_v1, %v13277_v54  ;;  %v2091_v51 = vpop.f32.mrf.mxu3  ;;  %v11636_v54 = vld [vmem:[%s16693_s0 + $0x260] sm:$0xff] }
 0x25b   :  { %v2651_v25 = vpop.f32.mrf.mxu0  ;;  %v1906_v60 = vpack.c.bf16 %v11636_v54, %v11635_v28 }
 0x25c   :  { %v2212_v52 = vadd.f32 %v2091_v51, %v1653_v10  ;;  %v11734_v51 = vld [vmem:[%s16693_s0 + $0x271] sm:$0xff] }
 0x25d   :  { %v3209_v11 = vpop.f32.mrf.mxu1 }
 0x25e   :  { %v2770_v55 = vadd.f32 %v2649_v43, %v2212_v52 }
 0x260   :  { %v13667_v12 = vadd.f32 %v3207_v33, %v2770_v55  ;;  %v11832_v55 = vld [vmem:[%s16693_s0 + $0x27a] sm:$0xff] }
 0x261   :  { %v1534_v50 = vpop.f32.mrf.mxu2 }
 0x262   :  { %v1654_v38 = vadd.f32 %v1534_v50, %v13287_v32  ;;  %v2093_v49 = vpop.f32.mrf.mxu3 }
 0x263   :  { %v2654_v8 = vpop.f32.mrf.mxu0 }
 0x264   :  { %v2213_v13 = vadd.f32 %v2093_v49, %v1654_v38 }
 0x265   :  { %v3212_v21 = vpop.f32.mrf.mxu1 }
 0x266   :  { %11581 = vmatmul.msk.bf16.gmra.mxu2 %vm241_vm1, %v3021_v36  ;;  %11775 = vmatmul.msk.bf16.gmra.mxu0 %vm241_vm1, %v2464_v42  ;;  %v2771_v30 = vadd.f32 %v2651_v25, %v2213_v13  ;;  %v11637_v36 = vld [vmem:[%s16693_s0 + $0x270] sm:$0xff]  ;;  %v11735_v25 = vld [vmem:[%s16693_s0 + $0x279] sm:$0xff] }
 0x267   :  { %11678 = vmatmul.msk.bf16.gmra.mxu3 %vm241_vm1, %v1906_v60  ;;  %v2465_v54 = vpack.c.bf16 %v11735_v25, %v11734_v51 }
 0x268   :  { %11872 = vmatmul.msk.bf16.gmra.mxu1 %vm241_vm1, %v3022_v7  ;;  %v13683_v43 = vadd.f32 %v3209_v11, %v2771_v30  ;;  %v11831_v11 = vld [vmem:[%s16693_s0 + $0x272] sm:$0xff] }
 0x269   :  { %v1537_v16 = vpop.f32.mrf.mxu2  ;;  %v3023_v50 = vpack.c.bf16 %v11832_v55, %v11831_v11 }
 0x26a   :  { %v1655_v32 = vadd.f32 %v1537_v16, %v13297_v2  ;;  %v2096_v58 = vpop.f32.mrf.mxu3  ;;  %v11638_v2 = vld [vmem:[%s16693_s0 + $0x278] sm:$0xff] }
 0x26b   :  { %v2656_v33 = vpop.f32.mrf.mxu0  ;;  %v1907_v47 = vpack.c.bf16 %v11638_v2, %v11637_v36 }
 0x26c   :  { %v2214_v63 = vadd.f32 %v2096_v58, %v1655_v32  ;;  %v11736_v58 = vld [vmem:[%s16693_s0 + $0x289] sm:$0xff] }
 0x26d   :  { %v3214_v1 = vpop.f32.mrf.mxu1 }
 0x26e   :  { %v2772_v10 = vadd.f32 %v2654_v8, %v2214_v63 }
 0x270   :  { %v13695_v52 = vadd.f32 %v3212_v21, %v2772_v10  ;;  %v11834_v10 = vld [vmem:[%s16693_s0 + $0x292] sm:$0xff] }
 0x271   :  { %v1539_v28 = vpop.f32.mrf.mxu2 }
 0x272   :  { %v1656_v45 = vadd.f32 %v1539_v28, %v13307_v37  ;;  %v2098_v9 = vpop.f32.mrf.mxu3 }
 0x273   :  { %v2659_v3 = vpop.f32.mrf.mxu0 }
 0x274   :  { %v2215_v38 = vadd.f32 %v2098_v9, %v1656_v45 }
 0x275   :  { %v3217_v49 = vpop.f32.mrf.mxu1 }
 0x276   :  { %11582 = vmatmul.msk.bf16.gmra.mxu2 %vm241_vm1, %v3022_v7  ;;  %11776 = vmatmul.msk.bf16.gmra.mxu0 %vm241_vm1, %v2465_v54  ;;  %v2773_v42 = vadd.f32 %v2656_v33, %v2215_v38  ;;  %v11639_v7 = vld [vmem:[%s16693_s0 + $0x288] sm:$0xff]  ;;  %v11737_v33 = vld [vmem:[%s16693_s0 + $0x291] sm:$0xff] }
 0x277   :  { %11679 = vmatmul.msk.bf16.gmra.mxu3 %vm241_vm1, %v1907_v47  ;;  %v2466_v2 = vpack.c.bf16 %v11737_v33, %v11736_v58 }
 0x278   :  { %11873 = vmatmul.msk.bf16.gmra.mxu1 %vm241_vm1, %v3023_v50  ;;  %v13711_v8 = vadd.f32 %v3214_v1, %v2773_v42  ;;  %v11833_v1 = vld [vmem:[%s16693_s0 + $0x28a] sm:$0xff] }
 0x279   :  { %v1542_v60 = vpop.f32.mrf.mxu2  ;;  %v3024_v28 = vpack.c.bf16 %v11834_v10, %v11833_v1 }
 0x27a   :  { %v1657_v37 = vadd.f32 %v1542_v60, %v13320_v17  ;;  %v2101_v13 = vpop.f32.mrf.mxu3  ;;  %v11640_v17 = vld [vmem:[%s16693_s0 + $0x290] sm:$0xff] }
 0x27b   :  { %v2661_v21 = vpop.f32.mrf.mxu0  ;;  %v1908_v55 = vpack.c.bf16 %v11640_v17, %v11639_v7 }
 0x27c   :  { %v2216_v30 = vadd.f32 %v2101_v13, %v1657_v37  ;;  %v11738_v13 = vld [vmem:[%s16693_s0 + $0x2a1] sm:$0xff] }
 0x27d   :  { %v3219_v16 = vpop.f32.mrf.mxu1 }
 0x27e   :  { %v2774_v32 = vadd.f32 %v2659_v3, %v2216_v30 }
 0x280   :  { %v13723_v63 = vadd.f32 %v3217_v49, %v2774_v32  ;;  %v11836_v32 = vld [vmem:[%s16693_s0 + $0x2aa] sm:$0xff] }
 0x281   :  { %v1544_v36 = vpop.f32.mrf.mxu2 }
 0x282   :  { %v1658_v51 = vadd.f32 %v1544_v36, %v13331_v5  ;;  %v2103_v25 = vpop.f32.mrf.mxu3 }
 0x283   :  { %v2664_v11 = vpop.f32.mrf.mxu0 }
 0x284   :  { %v2217_v45 = vadd.f32 %v2103_v25, %v1658_v51 }
 0x285   :  { %v3222_v9 = vpop.f32.mrf.mxu1 }
 0x286   :  { %11583 = vmatmul.msk.bf16.gmra.mxu2 %vm241_vm1, %v3023_v50  ;;  %11777 = vmatmul.msk.bf16.gmra.mxu0 %vm241_vm1, %v2466_v2  ;;  %v2775_v54 = vadd.f32 %v2661_v21, %v2217_v45  ;;  %v11641_v50 = vld [vmem:[%s16693_s0 + $0x2a0] sm:$0xff]  ;;  %v11739_v21 = vld [vmem:[%s16693_s0 + $0x2a9] sm:$0xff] }
 0x287   :  { %11680 = vmatmul.msk.bf16.gmra.mxu3 %vm241_vm1, %v1908_v55  ;;  %v2467_v17 = vpack.c.bf16 %v11739_v21, %v11738_v13  ;;  %v16740_v13 = vld [vmem:[#allocation8_spill] sm:$0xff] }
 0x288   :  { %11874 = vmatmul.msk.bf16.gmra.mxu1 %vm241_vm1, %v3024_v28  ;;  %v13739_v3 = vadd.f32 %v3219_v16, %v2775_v54  ;;  %v11835_v16 = vld [vmem:[%s16693_s0 + $0x2a2] sm:$0xff] }
 0x289   :  { %v1547_v47 = vpop.f32.mrf.mxu2  ;;  %v3025_v36 = vpack.c.bf16 %v11836_v32, %v11835_v16 }
 0x28a   :  { %v1659_v5 = vadd.f32 %v1547_v47, %v12853_v4  ;;  %v2106_v38 = vpop.f32.mrf.mxu3  ;;  %v11642_v4 = vld [vmem:[%s16693_s0 + $0x2a8] sm:$0xff] }
 0x28b   :  { %v2666_v49 = vpop.f32.mrf.mxu0  ;;  %v1909_v10 = vpack.c.bf16 %v11642_v4, %v11641_v50 }
 0x28c   :  { %v2218_v42 = vadd.f32 %v2106_v38, %v1659_v5  ;;  %v11740_v38 = vld [vmem:[%s16693_s0 + $0x2b9] sm:$0xff] }
 0x28d   :  { %v3224_v60 = vpop.f32.mrf.mxu1 }
 0x28e   :  { %v2776_v37 = vadd.f32 %v2664_v11, %v2218_v42 }
 0x290   :  { %v13751_v30 = vadd.f32 %v3222_v9, %v2776_v37  ;;  %v11838_v37 = vld [vmem:[%s16693_s0 + $0x2c2] sm:$0xff] }
 0x291   :  { %v1549_v7 = vpop.f32.mrf.mxu2 }
 0x292   :  { %v1660_v58 = vadd.f32 %v1549_v7, %v12883_v23  ;;  %v2108_v33 = vpop.f32.mrf.mxu3 }
 0x293   :  { %v2669_v1 = vpop.f32.mrf.mxu0 }
 0x294   :  { %v2219_v51 = vadd.f32 %v2108_v33, %v1660_v58 }
 0x295   :  { %v3227_v25 = vpop.f32.mrf.mxu1 }
 0x296   :  { %11584 = vmatmul.msk.bf16.gmra.mxu2 %vm241_vm1, %v3024_v28  ;;  %11778 = vmatmul.msk.bf16.gmra.mxu0 %vm241_vm1, %v2467_v17  ;;  %v2777_v2 = vadd.f32 %v2666_v49, %v2219_v51  ;;  %v11643_v28 = vld [vmem:[%s16693_s0 + $0x2b8] sm:$0xff]  ;;  %v11741_v49 = vld [vmem:[%s16693_s0 + $0x2c1] sm:$0xff] }
 0x297   :  { %11681 = vmatmul.msk.bf16.gmra.mxu3 %vm241_vm1, %v1909_v10  ;;  %v2468_v16 = vpack.c.bf16 %v11741_v49, %v11740_v38  ;;  %v11646_v38 = vld [vmem:[%s16693_s0 + $0x2d8] sm:$0xff] }
 0x298   :  { %11875 = vmatmul.msk.bf16.gmra.mxu1 %vm241_vm1, %v3025_v36  ;;  %v13767_v11 = vadd.f32 %v3224_v60, %v2777_v2  ;;  %v11837_v60 = vld [vmem:[%s16693_s0 + $0x2ba] sm:$0xff]  ;;  %v11839_v49 = vld [vmem:[%s16693_s0 + $0x2d2] sm:$0xff] }
 0x299   :  { %v1552_v55 = vpop.f32.mrf.mxu2  ;;  %v3026_v58 = vpack.c.bf16 %v11838_v37, %v11837_v60  ;;  %v16742_v37 = vld [vmem:[#allocation10_spill] sm:$0xff] }
 0x29a   :  { %v1661_v23 = vadd.f32 %v1552_v55, %v12895_v35  ;;  %v2111_v45 = vpop.f32.mrf.mxu3  ;;  %v11644_v35 = vld [vmem:[%s16693_s0 + $0x2c0] sm:$0xff] }
 0x29b   :  { %v2671_v9 = vpop.f32.mrf.mxu0  ;;  %v1910_v7 = vpack.c.bf16 %v11644_v35, %v11643_v28  ;;  %v11840_v35 = vld [vmem:[%s16693_s0 + $0x2da] sm:$0xff] }
 0x29c   :  { %v2220_v54 = vadd.f32 %v2111_v45, %v1661_v23 }
 0x29d   :  { %v3229_v47 = vpop.f32.mrf.mxu1 }
 0x29e   :  { %v2778_v5 = vadd.f32 %v2669_v1, %v2220_v54 }
 0x2a0   :  { %v13779_v42 = vadd.f32 %v3227_v25, %v2778_v5  ;;  %v16741_v25 = vld [vmem:[#allocation9_spill] sm:$0xff] }
 0x2a1   :  { %v1554_v50 = vpop.f32.mrf.mxu2 }
 0x2a2   :  { %v1662_v21 = vadd.f32 %v1554_v50, %v16740_v13  ;;  %v2113_v4 = vpop.f32.mrf.mxu3 }
 0x2a3   :  { %v2674_v32 = vpop.f32.mrf.mxu0 }
 0x2a4   :  { %v2221_v33 = vadd.f32 %v2113_v4, %v1662_v21 }
 0x2a5   :  { %v3232_v17 = vpop.f32.mrf.mxu1 }
 0x2a6   :  { %11585 = vmatmul.msk.bf16.gmra.mxu2 %vm241_vm1, %v3025_v36  ;;  %11779 = vmatmul.msk.bf16.gmra.mxu0 %vm241_vm1, %v2468_v16  ;;  %v2779_v1 = vadd.f32 %v2671_v9, %v2221_v33  ;;  %v11645_v36 = vld [vmem:[%s16693_s0 + $0x2d0] sm:$0xff] }
 0x2a7   :  { %11682 = vmatmul.msk.bf16.gmra.mxu3 %vm241_vm1, %v1910_v7  ;;  %v11742_v9 = vld [vmem:[%s16693_s0 + $0x2d1] sm:$0xff]  ;;  %v1911_v16 = vpack.c.bf16 %v11646_v38, %v11645_v36 }
 0x2a8   :  { %11876 = vmatmul.msk.bf16.gmra.mxu1 %vm241_vm1, %v3026_v58  ;;  %v13795_v10 = vadd.f32 %v3229_v47, %v2779_v1  ;;  %v11743_v47 = vld [vmem:[%s16693_s0 + $0x2d9] sm:$0xff]  ;;  %v11648_v38 = vld [vmem:[%s16693_s0 + $0x2f0] sm:$0xff] }
 0x2a9   :  { %v1557_v51 = vpop.f32.mrf.mxu2  ;;  %v2469_v21 = vpack.c.bf16 %v11743_v47, %v11742_v9 }
 0x2aa   :  { %v1663_v2 = vadd.f32 %v1557_v51, %v16741_v25  ;;  %v2116_v55 = vpop.f32.mrf.mxu3  ;;  %v16743_v25 = vld [vmem:[#allocation11_spill] sm:$0xff] }
 0x2ab   :  { %v2676_v23 = vpop.f32.mrf.mxu0 }
 0x2ac   :  { %v2222_v45 = vadd.f32 %v2116_v55, %v1663_v2 }
 0x2ad   :  { %v3234_v54 = vpop.f32.mrf.mxu1 }
 0x2ae   :  { %v2780_v5 = vadd.f32 %v2674_v32, %v2222_v45  ;;  %v3027_v32 = vpack.c.bf16 %v11840_v35, %v11839_v49  ;;  %v11841_v49 = vld [vmem:[%s16693_s0 + $0x2ea] sm:$0xff]  ;;  %v11842_v35 = vld [vmem:[%s16693_s0 + $0x2f2] sm:$0xff] }
 0x2b0   :  { %v13807_v28 = vadd.f32 %v3232_v17, %v2780_v5 }
 0x2b1   :  { %v1559_v60 = vpop.f32.mrf.mxu2 }
 0x2b2   :  { %v1664_v50 = vadd.f32 %v1559_v60, %v16742_v37  ;;  %v2118_v13 = vpop.f32.mrf.mxu3  ;;  %v16744_v37 = vld [vmem:[#allocation12_spill] sm:$0xff] }
 0x2b3   :  { %v2679_v4 = vpop.f32.mrf.mxu0 }
 0x2b4   :  { %v2223_v7 = vadd.f32 %v2118_v13, %v1664_v50 }
 0x2b5   :  { %v3237_v33 = vpop.f32.mrf.mxu1 }
 0x2b6   :  { %11586 = vmatmul.msk.bf16.gmra.mxu2 %vm241_vm1, %v3026_v58  ;;  %11780 = vmatmul.msk.bf16.gmra.mxu0 %vm241_vm1, %v2469_v21  ;;  %v2781_v17 = vadd.f32 %v2676_v23, %v2223_v7  ;;  %v11647_v58 = vld [vmem:[%s16693_s0 + $0x2e8] sm:$0xff]  ;;  %v3028_v7 = vpack.c.bf16 %v11842_v35, %v11841_v49 }
 0x2b7   :  { %11683 = vmatmul.msk.bf16.gmra.mxu3 %vm241_vm1, %v1911_v16  ;;  %v11744_v23 = vld [vmem:[%s16693_s0 + $0x2e9] sm:$0xff]  ;;  %v1912_v16 = vpack.c.bf16 %v11648_v38, %v11647_v58 }
 0x2b8   :  { %11877 = vmatmul.msk.bf16.gmra.mxu1 %vm241_vm1, %v3027_v32  ;;  %v13823_v1 = vadd.f32 %v3234_v54, %v2781_v17  ;;  %v11745_v54 = vld [vmem:[%s16693_s0 + $0x2f1] sm:$0xff]  ;;  %v11650_v35 = vld [vmem:[%s16693_s0 + $0x308] sm:$0xff] }
 0x2b9   :  { %v1562_v51 = vpop.f32.mrf.mxu2  ;;  %v2470_v21 = vpack.c.bf16 %v11745_v54, %v11744_v23 }
 0x2ba   :  { %v1665_v2 = vadd.f32 %v1562_v51, %v16743_v25  ;;  %v2121_v55 = vpop.f32.mrf.mxu3 }
 0x2bb   :  { %v2681_v45 = vpop.f32.mrf.mxu0 }
 0x2bc   :  { %v2224_v5 = vadd.f32 %v2121_v55, %v1665_v2  ;;  %v16745_v55 = vld [vmem:[#allocation13_spill] sm:$0xff] }
 0x2bd   :  { %v3239_v36 = vpop.f32.mrf.mxu1 }
 0x2be   :  { %v2782_v9 = vadd.f32 %v2679_v4, %v2224_v5 }
 0x2c0   :  { %v13835_v47 = vadd.f32 %v3237_v33, %v2782_v9 }
 0x2c1   :  { %v1564_v60 = vpop.f32.mrf.mxu2 }
 0x2c2   :  { %v1666_v50 = vadd.f32 %v1564_v60, %v16744_v37  ;;  %v2123_v13 = vpop.f32.mrf.mxu3  ;;  %v11843_v60 = vld [vmem:[%s16693_s0 + $0x302] sm:$0xff]  ;;  %v11844_v37 = vld [vmem:[%s16693_s0 + $0x30a] sm:$0xff] }
 0x2c3   :  { %v2684_v4 = vpop.f32.mrf.mxu0 }
 0x2c4   :  { %v2225_v33 = vadd.f32 %v2123_v13, %v1666_v50  ;;  %v16748_v13 = vld [vmem:[#allocation14_spill] sm:$0xff] }
 0x2c5   :  { %v3242_v17 = vpop.f32.mrf.mxu1 }
 0x2c6   :  { %11587 = vmatmul.msk.bf16.gmra.mxu2 %vm241_vm1, %v3027_v32  ;;  %11781 = vmatmul.msk.bf16.gmra.mxu0 %vm241_vm1, %v2470_v21  ;;  %v2783_v51 = vadd.f32 %v2681_v45, %v2225_v33  ;;  %v11649_v32 = vld [vmem:[%s16693_s0 + $0x300] sm:$0xff] }
 0x2c7   :  { %11684 = vmatmul.msk.bf16.gmra.mxu3 %vm241_vm1, %v1912_v16  ;;  %v11746_v45 = vld [vmem:[%s16693_s0 + $0x301] sm:$0xff] }
 0x2c8   :  { %11878 = vmatmul.msk.bf16.gmra.mxu1 %vm241_vm1, %v3028_v7  ;;  %v13851_v25 = vadd.f32 %v3239_v36, %v2783_v51  ;;  %v11747_v36 = vld [vmem:[%s16693_s0 + $0x309] sm:$0xff]  ;;  %v3029_v51 = vpack.c.bf16 %v11844_v37, %v11843_v60  ;;  %v11749_v60 = vld [vmem:[%s16693_s0 + $0x321] sm:$0xff] }
 0x2c9   :  { %v1567_v2 = vpop.f32.mrf.mxu2  ;;  %v2471_v16 = vpack.c.bf16 %v11747_v36, %v11746_v45 }
 0x2ca   :  { %v1667_v5 = vadd.f32 %v1567_v2, %v16745_v55  ;;  %v2126_v9 = vpop.f32.mrf.mxu3 }
 0x2cb   :  { %v2686_v23 = vpop.f32.mrf.mxu0 }
 0x2cc   :  { %v2226_v58 = vadd.f32 %v2126_v9, %v1667_v5 }
 0x2cd   :  { %v13854_v54 = vpop.f32.mrf.mxu1 }
 0x2ce   :  { %16746 = vst [vmem:[#allocation8_spill] sm:$0xff] %v13854_v54  ;;  %v2784_v38 = vadd.f32 %v2684_v4, %v2226_v58  ;;  %v16750_v58 = vld [vmem:[#allocation15_spill] sm:$0xff] }
 0x2d0   :  { %v13865_v49 = vadd.f32 %v3242_v17, %v2784_v38  ;;  %v1913_v17 = vpack.c.bf16 %v11650_v35, %v11649_v32 }
 0x2d1   :  { %v1569_v50 = vpop.f32.mrf.mxu2 }
 0x2d2   :  { %16747 = vst [vmem:[#allocation9_spill] sm:$0xff] %v13865_v49  ;;  %v1668_v21 = vadd.f32 %v1569_v50, %v16748_v13  ;;  %v2128_v4 = vpop.f32.mrf.mxu3  ;;  %v11652_v13 = vld [vmem:[%s16693_s0 + $0x320] sm:$0xff] }
 0x2d3   :  { %v2689_v33 = vpop.f32.mrf.mxu0 }
 0x2d4   :  { %v2227_v2 = vadd.f32 %v2128_v4, %v1668_v21  ;;  %v11845_v21 = vld [vmem:[%s16693_s0 + $0x31a] sm:$0xff]  ;;  %v11846_v4 = vld [vmem:[%s16693_s0 + $0x322] sm:$0xff] }
 0x2d5   :  { %v3247_v55 = vpop.f32.mrf.mxu1 }
 0x2d6   :  { %11588 = vmatmul.msk.bf16.gmra.mxu2 %vm241_vm1, %v3028_v7  ;;  %11782 = vmatmul.msk.bf16.gmra.mxu0 %vm241_vm1, %v2471_v16  ;;  %v13879_v5 = vadd.f32 %v2686_v23, %v2227_v2  ;;  %v11651_v7 = vld [vmem:[%s16693_s0 + $0x318] sm:$0xff] }
 0x2d7   :  { %11685 = vmatmul.msk.bf16.gmra.mxu3 %vm241_vm1, %v1913_v17  ;;  %v11748_v23 = vld [vmem:[%s16693_s0 + $0x319] sm:$0xff] }
 0x2d8   :  { %16749 = vst [vmem:[#allocation10_spill] sm:$0xff] %v13879_v5  ;;  %11879 = vmatmul.msk.bf16.gmra.mxu1 %vm241_vm1, %v3029_v51 }
 0x2d9   :  { %v1572_v9 = vpop.f32.mrf.mxu2 }
 0x2da   :  { %v1669_v38 = vadd.f32 %v1572_v9, %v16750_v58  ;;  %v2131_v50 = vpop.f32.mrf.mxu3  ;;  %v2472_v9 = vpack.c.bf16 %v11749_v60, %v11748_v23 }
 0x2db   :  { %v2691_v45 = vpop.f32.mrf.mxu0 }
 0x2dc   :  { %v2228_v36 = vadd.f32 %v2131_v50, %v1669_v38  ;;  %v3030_v38 = vpack.c.bf16 %v11846_v4, %v11845_v21  ;;  %v11751_v21 = vld [vmem:[%s16693_s0 + $0x339] sm:$0xff] }
 0x2dd   :  { %v13884_v32 = vpop.f32.mrf.mxu1 }
 0x2de   :  { %16751 = vst [vmem:[#allocation11_spill] sm:$0xff] %v13884_v32  ;;  %v2786_v35 = vadd.f32 %v2689_v33, %v2228_v36  ;;  %v16753_v33 = vld [vmem:[#allocation16_spill] sm:$0xff] }
 0x2e0   :  { %v13895_v37 = vadd.f32 %v3247_v55, %v2786_v35  ;;  %v1914_v55 = vpack.c.bf16 %v11652_v13, %v11651_v7 }
 0x2e1   :  { %v1574_v16 = vpop.f32.mrf.mxu2 }
 0x2e2   :  { %16752 = vst [vmem:[#allocation12_spill] sm:$0xff] %v13895_v37  ;;  %v1670_v17 = vadd.f32 %v1574_v16, %v16753_v33  ;;  %v2133_v2 = vpop.f32.mrf.mxu3  ;;  %v16755_v37 = vld [vmem:[#allocation17_spill] sm:$0xff] }
 0x2e3   :  { %v2694_v58 = vpop.f32.mrf.mxu0 }
 0x2e4   :  { %v2229_v50 = vadd.f32 %v2133_v2, %v1670_v17  ;;  %v11848_v17 = vld [vmem:[%s16693_s0 + $0x33a] sm:$0xff] }
 0x2e5   :  { %v3252_v36 = vpop.f32.mrf.mxu1 }
 0x2e6   :  { %11589 = vmatmul.msk.bf16.gmra.mxu2 %vm241_vm1, %v3029_v51  ;;  %11783 = vmatmul.msk.bf16.gmra.mxu0 %vm241_vm1, %v2472_v9  ;;  %v13909_v35 = vadd.f32 %v2691_v45, %v2229_v50  ;;  %v11653_v51 = vld [vmem:[%s16693_s0 + $0x330] sm:$0xff] }
 0x2e7   :  { %11686 = vmatmul.msk.bf16.gmra.mxu3 %vm241_vm1, %v1914_v55  ;;  %v11750_v45 = vld [vmem:[%s16693_s0 + $0x331] sm:$0xff] }
 0x2e8   :  { %16754 = vst [vmem:[#allocation13_spill] sm:$0xff] %v13909_v35  ;;  %11880 = vmatmul.msk.bf16.gmra.mxu1 %vm241_vm1, %v3030_v38  ;;  %v16758_v9 = vld [vmem:[#allocation18_spill] sm:$0xff]  ;;  %v2473_v50 = vpack.c.bf16 %v11751_v21, %v11750_v45  ;;  %v16760_v35 = vld [vmem:[#allocation19_spill] sm:$0xff] }
 0x2e9   :  { %v1577_v32 = vpop.f32.mrf.mxu2 }
 0x2ea   :  { %v1671_v16 = vadd.f32 %v1577_v32, %v16755_v37  ;;  %v2136_v33 = vpop.f32.mrf.mxu3  ;;  %v11654_v32 = vld [vmem:[%s16693_s0 + $0x338] sm:$0xff] }
 0x2eb   :  { %v2696_v23 = vpop.f32.mrf.mxu0  ;;  %v11847_v37 = vld [vmem:[%s16693_s0 + $0x332] sm:$0xff] }
 0x2ec   :  { %v2230_v60 = vadd.f32 %v2136_v33, %v1671_v16  ;;  %v3031_v33 = vpack.c.bf16 %v11848_v17, %v11847_v37  ;;  %v12076_v37 = vld [vmem:[%s16693_s0 + $0x32] sm:$0xff] }
 0x2ed   :  { %v13914_v7 = vpop.f32.mrf.mxu1  ;;  %v11979_v17 = vld [vmem:[%s16693_s0 + $0x31] sm:$0xff] }
 0x2ee   :  { %16756 = vst [vmem:[#allocation14_spill] sm:$0xff] %v13914_v7  ;;  %v2788_v13 = vadd.f32 %v2694_v58, %v2230_v60 }
 0x2f0   :  { %v13925_v4 = vadd.f32 %v3252_v36, %v2788_v13  ;;  %v1915_v36 = vpack.c.bf16 %v11654_v32, %v11653_v51 }
 0x2f1   :  { %v1579_v2 = vpop.f32.mrf.mxu2 }
 0x2f2   :  { %16757 = vst [vmem:[#allocation15_spill] sm:$0xff] %v13925_v4  ;;  %v1672_v58 = vadd.f32 %v1579_v2, %v16758_v9  ;;  %v2138_v55 = vpop.f32.mrf.mxu3 }
 0x2f3   :  { %v2699_v16 = vpop.f32.mrf.mxu0 }
 0x2f4   :  { %v2231_v60 = vadd.f32 %v2138_v55, %v1672_v58  ;;  %v11980_v58 = vld [vmem:[%s16693_s0 + $0x39] sm:$0xff] }
 0x2f5   :  { %v3257_v13 = vpop.f32.mrf.mxu1 }
 0x2f6   :  { %11590 = vmatmul.msk.bf16.gmra.mxu2 %vm241_vm1, %v3030_v38  ;;  %11784 = vmatmul.msk.bf16.gmra.mxu0 %vm241_vm1, %v2473_v50  ;;  %v13939_v7 = vadd.f32 %v2696_v23, %v2231_v60  ;;  %v11882_v38 = vld [vmem:[%s16693_s0 + $0x30] sm:$0xff]  ;;  %v11883_v23 = vld [vmem:[%s16693_s0 + $0x38] sm:$0xff]  ;;  %v16763_v50 = vld [vmem:[#allocation20_spill] sm:$0xff] }
 0x2f7   :  { %11687 = vmatmul.msk.bf16.gmra.mxu3 %vm241_vm1, %v1915_v36 }
 0x2f8   :  { %16759 = vst [vmem:[#allocation16_spill] sm:$0xff] %v13939_v7  ;;  %11881 = vmatmul.msk.bf16.gmra.mxu1 %vm241_vm1, %v3031_v33  ;;  %v3559_v33 = vpack.c.bf16 %v11883_v23, %v11882_v38 }
 0x2f9   :  { %v1582_v4 = vpop.f32.mrf.mxu2 }
 0x2fa   :  { %v1673_v2 = vadd.f32 %v1582_v4, %v16760_v35  ;;  %v2141_v9 = vpop.f32.mrf.mxu3  ;;  %v12077_v35 = vld [vmem:[%s16693_s0 + $0x3a] sm:$0xff] }
 0x2fb   :  { %v2701_v45 = vpop.f32.mrf.mxu0  ;;  %v4675_v60 = vpack.c.bf16 %v12077_v35, %v12076_v37  ;;  %v11884_v37 = vld [vmem:[%s16693_s0 + $0x48] sm:$0xff] }
 0x2fc   :  { %v2232_v21 = vadd.f32 %v2141_v9, %v1673_v2  ;;  %v4117_v9 = vpack.c.bf16 %v11980_v58, %v11979_v17  ;;  %v12078_v35 = vld [vmem:[%s16693_s0 + $0x4a] sm:$0xff] }
 0x2fd   :  { %v13944_v51 = vpop.f32.mrf.mxu1  ;;  %v11982_v17 = vld [vmem:[%s16693_s0 + $0x51] sm:$0xff] }
 0x2fe   :  { %16761 = vst [vmem:[#allocation17_spill] sm:$0xff] %v13944_v51  ;;  %v2790_v32 = vadd.f32 %v2699_v16, %v2232_v21 }
 0x300   :  { %v13958_v4 = vadd.f32 %v3257_v13, %v2790_v32 }
 0x301   :  { %v1584_v55 = vpop.f32.mrf.mxu2 }
 0x302   :  { %16762 = vst [vmem:[#allocation18_spill] sm:$0xff] %v13958_v4  ;;  %v1674_v16 = vadd.f32 %v1584_v55, %v16763_v50  ;;  %v2143_v36 = vpop.f32.mrf.mxu3  ;;  %v16765_v4 = vld [vmem:[#allocation21_spill] sm:$0xff] }
 0x303   :  { %v2704_v2 = vpop.f32.mrf.mxu0 }
 0x304   :  { %v2233_v21 = vadd.f32 %v2143_v36, %v1674_v16  ;;  %v16768_v16 = vld [vmem:[#allocation22_spill] sm:$0xff] }
 0x305   :  { %v3262_v51 = vpop.f32.mrf.mxu1 }
 0x306   :  { %11947 = vmatmul.msk.bf16.vlgmr.msra.gmra.mxu2 %vm241_vm1, %v3559_v33  ;;  %12141 = vmatmul.msk.bf16.vlgmr.msra.gmra.mxu0 %vm241_vm1, %v4675_v60  ;;  %v13969_v13 = vadd.f32 %v2701_v45, %v2233_v21  ;;  %v11885_v45 = vld [vmem:[%s16693_s0 + $0x50] sm:$0xff] }
 0x307   :  { %12044 = vmatmul.msk.bf16.vlgmr.msra.gmra.mxu3 %vm241_vm1, %v4117_v9  ;;  %v3560_v60 = vpack.c.bf16 %v11885_v45, %v11884_v37 }
 0x308   :  { %16764 = vst [vmem:[#allocation19_spill] sm:$0xff] %v13969_v13 }
 0x309   :  { %v1587_v32 = vpop.f32.mrf.mxu2 }
 0x30a   :  { %v1675_v7 = vadd.f32 %v1587_v32, %v16765_v4  ;;  %v2146_v54 = vpop.f32.mrf.mxu3  ;;  %v12079_v4 = vld [vmem:[%s16693_s0 + $0x52] sm:$0xff] }
 0x30b   :  { %v2706_v55 = vpop.f32.mrf.mxu0 }
 0x30c   :  { %v2234_v50 = vadd.f32 %v2146_v54, %v1675_v7  ;;  %v11981_v7 = vld [vmem:[%s16693_s0 + $0x49] sm:$0xff] }
 0x30d   :  { %v13973_v38 = vpop.f32.mrf.mxu1  ;;  %v4118_v21 = vpack.c.bf16 %v11982_v17, %v11981_v7  ;;  %v11984_v7 = vld [vmem:[%s16693_s0 + $0x69] sm:$0xff] }
 0x30e   :  { %16766 = vst [vmem:[#allocation20_spill] sm:$0xff] %v13973_v38  ;;  %v2792_v23 = vadd.f32 %v2704_v2, %v2234_v50  ;;  %v4676_v2 = vpack.c.bf16 %v12079_v4, %v12078_v35  ;;  %v16770_v38 = vld [vmem:[#allocation23_spill] sm:$0xff]  ;;  %v11886_v35 = vld [vmem:[%s16693_s0 + $0x60] sm:$0xff] }
 0x30f   :  { %v12080_v4 = vld [vmem:[%s16693_s0 + $0x62] sm:$0xff] }
 0x310   :  { %v13987_v54 = vadd.f32 %v3262_v51, %v2792_v23 }
 0x311   :  { %v1589_v58 = vpop.f32.mrf.mxu2 }
 0x312   :  { %16767 = vst [vmem:[#allocation21_spill] sm:$0xff] %v13987_v54  ;;  %v1676_v36 = vadd.f32 %v1589_v58, %v16768_v16  ;;  %v2148_v33 = vpop.f32.mrf.mxu3 }
 0x313   :  { %v2709_v9 = vpop.f32.mrf.mxu0 }
 0x314   :  { %v2235_v32 = vadd.f32 %v2148_v33, %v1676_v36  ;;  %v16773_v36 = vld [vmem:[#allocation24_spill] sm:$0xff] }
 0x315   :  { %v3267_v50 = vpop.f32.mrf.mxu1 }
 0x316   :  { %11948 = vmatmul.msk.bf16.gmra.mxu2 %vm241_vm1, %v3560_v60  ;;  %12142 = vmatmul.msk.bf16.gmra.mxu0 %vm241_vm1, %v4676_v2  ;;  %v13998_v51 = vadd.f32 %v2706_v55, %v2235_v32  ;;  %v11887_v55 = vld [vmem:[%s16693_s0 + $0x68] sm:$0xff] }
 0x317   :  { %12045 = vmatmul.msk.bf16.gmra.mxu3 %vm241_vm1, %v4118_v21  ;;  %v3561_v2 = vpack.c.bf16 %v11887_v55, %v11886_v35 }
 0x318   :  { %16769 = vst [vmem:[#allocation22_spill] sm:$0xff] %v13998_v51 }
 0x319   :  { %v1592_v23 = vpop.f32.mrf.mxu2 }
 0x31a   :  { %v1677_v54 = vadd.f32 %v1592_v23, %v16770_v38  ;;  %v2151_v13 = vpop.f32.mrf.mxu3  ;;  %v12081_v38 = vld [vmem:[%s16693_s0 + $0x6a] sm:$0xff] }
 0x31b   :  { %v2711_v58 = vpop.f32.mrf.mxu0 }
 0x31c   :  { %v2236_v16 = vadd.f32 %v2151_v13, %v1677_v54  ;;  %v11983_v54 = vld [vmem:[%s16693_s0 + $0x61] sm:$0xff] }
 0x31d   :  { %v14002_v37 = vpop.f32.mrf.mxu1  ;;  %v4119_v32 = vpack.c.bf16 %v11984_v7, %v11983_v54  ;;  %v11986_v54 = vld [vmem:[%s16693_s0 + $0x81] sm:$0xff] }
 0x31e   :  { %16771 = vst [vmem:[#allocation23_spill] sm:$0xff] %v14002_v37  ;;  %v2794_v45 = vadd.f32 %v2709_v9, %v2236_v16  ;;  %v4677_v9 = vpack.c.bf16 %v12081_v38, %v12080_v4  ;;  %v16775_v37 = vld [vmem:[#allocation25_spill] sm:$0xff]  ;;  %v11888_v4 = vld [vmem:[%s16693_s0 + $0x78] sm:$0xff] }
 0x31f   :  { %v12082_v38 = vld [vmem:[%s16693_s0 + $0x7a] sm:$0xff] }
 0x320   :  { %v14016_v13 = vadd.f32 %v3267_v50, %v2794_v45 }
 0x321   :  { %v1594_v17 = vpop.f32.mrf.mxu2 }
 0x322   :  { %16772 = vst [vmem:[#allocation37_spill] sm:$0xff] %v14016_v13  ;;  %v1678_v33 = vadd.f32 %v1594_v17, %v16773_v36  ;;  %v2153_v60 = vpop.f32.mrf.mxu3 }
 0x323   :  { %v2714_v21 = vpop.f32.mrf.mxu0 }
 0x324   :  { %v2237_v23 = vadd.f32 %v2153_v60, %v1678_v33  ;;  %v16778_v33 = vld [vmem:[#allocation26_spill] sm:$0xff] }
 0x325   :  { %v3272_v16 = vpop.f32.mrf.mxu1 }
 0x326   :  { %11949 = vmatmul.msk.bf16.gmra.mxu2 %vm241_vm1, %v3561_v2  ;;  %12143 = vmatmul.msk.bf16.gmra.mxu0 %vm241_vm1, %v4677_v9  ;;  %v14027_v50 = vadd.f32 %v2711_v58, %v2237_v23  ;;  %v11889_v58 = vld [vmem:[%s16693_s0 + $0x80] sm:$0xff] }
 0x327   :  { %12046 = vmatmul.msk.bf16.gmra.mxu3 %vm241_vm1, %v4119_v32  ;;  %v3562_v9 = vpack.c.bf16 %v11889_v58, %v11888_v4 }
 0x328   :  { %16774 = vst [vmem:[#allocation24_spill] sm:$0xff] %v14027_v50 }
 0x329   :  { %v1597_v45 = vpop.f32.mrf.mxu2 }
 0x32a   :  { %v1679_v13 = vadd.f32 %v1597_v45, %v16775_v37  ;;  %v2156_v51 = vpop.f32.mrf.mxu3  ;;  %v12083_v37 = vld [vmem:[%s16693_s0 + $0x82] sm:$0xff] }
 0x32b   :  { %v2716_v17 = vpop.f32.mrf.mxu0 }
 0x32c   :  { %v2238_v36 = vadd.f32 %v2156_v51, %v1679_v13  ;;  %v11985_v13 = vld [vmem:[%s16693_s0 + $0x79] sm:$0xff] }
 0x32d   :  { %v14031_v35 = vpop.f32.mrf.mxu1  ;;  %v4120_v23 = vpack.c.bf16 %v11986_v54, %v11985_v13  ;;  %v11988_v13 = vld [vmem:[%s16693_s0 + $0x99] sm:$0xff] }
 0x32e   :  { %16776 = vst [vmem:[#allocation25_spill] sm:$0xff] %v14031_v35  ;;  %v2796_v55 = vadd.f32 %v2714_v21, %v2238_v36  ;;  %v4678_v21 = vpack.c.bf16 %v12083_v37, %v12082_v38  ;;  %v16780_v35 = vld [vmem:[#allocation27_spill] sm:$0xff]  ;;  %v11890_v38 = vld [vmem:[%s16693_s0 + $0x90] sm:$0xff] }
 0x32f   :  { %v12084_v37 = vld [vmem:[%s16693_s0 + $0x92] sm:$0xff] }
 0x330   :  { %v14045_v51 = vadd.f32 %v3272_v16, %v2796_v55 }
 0x331   :  { %v1599_v7 = vpop.f32.mrf.mxu2 }
 0x332   :  { %16777 = vst [vmem:[#allocation38_spill] sm:$0xff] %v14045_v51  ;;  %v1680_v60 = vadd.f32 %v1599_v7, %v16778_v33  ;;  %v2158_v2 = vpop.f32.mrf.mxu3 }
 0x333   :  { %v2719_v32 = vpop.f32.mrf.mxu0 }
 0x334   :  { %v2239_v45 = vadd.f32 %v2158_v2, %v1680_v60  ;;  %v16783_v60 = vld [vmem:[#allocation28_spill] sm:$0xff] }
 0x335   :  { %v3277_v36 = vpop.f32.mrf.mxu1 }
 0x336   :  { %11950 = vmatmul.msk.bf16.gmra.mxu2 %vm241_vm1, %v3562_v9  ;;  %12144 = vmatmul.msk.bf16.gmra.mxu0 %vm241_vm1, %v4678_v21  ;;  %v14056_v16 = vadd.f32 %v2716_v17, %v2239_v45  ;;  %v11891_v17 = vld [vmem:[%s16693_s0 + $0x98] sm:$0xff] }
 0x337   :  { %12047 = vmatmul.msk.bf16.gmra.mxu3 %vm241_vm1, %v4120_v23  ;;  %v3563_v21 = vpack.c.bf16 %v11891_v17, %v11890_v38 }
 0x338   :  { %16779 = vst [vmem:[#allocation26_spill] sm:$0xff] %v14056_v16 }
 0x339   :  { %v1602_v55 = vpop.f32.mrf.mxu2 }
 0x33a   :  { %v1681_v51 = vadd.f32 %v1602_v55, %v16780_v35  ;;  %v2161_v50 = vpop.f32.mrf.mxu3  ;;  %v12085_v35 = vld [vmem:[%s16693_s0 + $0x9a] sm:$0xff] }
 0x33b   :  { %v2721_v7 = vpop.f32.mrf.mxu0 }
 0x33c   :  { %v2240_v33 = vadd.f32 %v2161_v50, %v1681_v51  ;;  %v11987_v51 = vld [vmem:[%s16693_s0 + $0x91] sm:$0xff] }
 0x33d   :  { %v14060_v4 = vpop.f32.mrf.mxu1  ;;  %v4121_v45 = vpack.c.bf16 %v11988_v13, %v11987_v51  ;;  %v11990_v51 = vld [vmem:[%s16693_s0 + $0xb1] sm:$0xff] }
 0x33e   :  { %16781 = vst [vmem:[#allocation27_spill] sm:$0xff] %v14060_v4  ;;  %v2798_v58 = vadd.f32 %v2719_v32, %v2240_v33  ;;  %v4679_v32 = vpack.c.bf16 %v12085_v35, %v12084_v37  ;;  %v16785_v4 = vld [vmem:[#allocation29_spill] sm:$0xff] }
 0x33f   :  { %v11892_v37 = vld [vmem:[%s16693_s0 + $0xa8] sm:$0xff] }
 0x340   :  { %v14074_v50 = vadd.f32 %v3277_v36, %v2798_v58  ;;  %v12086_v35 = vld [vmem:[%s16693_s0 + $0xaa] sm:$0xff] }
 0x341   :  { %v1604_v54 = vpop.f32.mrf.mxu2 }
 0x342   :  { %16782 = vst [vmem:[#allocation39_spill] sm:$0xff] %v14074_v50  ;;  %v1682_v2 = vadd.f32 %v1604_v54, %v16783_v60  ;;  %v2163_v9 = vpop.f32.mrf.mxu3 }
 0x343   :  { %v2724_v23 = vpop.f32.mrf.mxu0 }
 0x344   :  { %v2241_v55 = vadd.f32 %v2163_v9, %v1682_v2  ;;  %v16788_v2 = vld [vmem:[#allocation30_spill] sm:$0xff] }
 0x345   :  { %v3282_v33 = vpop.f32.mrf.mxu1 }
 0x346   :  { %11951 = vmatmul.msk.bf16.gmra.mxu2 %vm241_vm1, %v3563_v21  ;;  %12145 = vmatmul.msk.bf16.gmra.mxu0 %vm241_vm1, %v4679_v32  ;;  %v14085_v36 = vadd.f32 %v2721_v7, %v2241_v55  ;;  %v11893_v7 = vld [vmem:[%s16693_s0 + $0xb0] sm:$0xff] }
 0x347   :  { %12048 = vmatmul.msk.bf16.gmra.mxu3 %vm241_vm1, %v4121_v45  ;;  %v3564_v32 = vpack.c.bf16 %v11893_v7, %v11892_v37  ;;  %v11894_v7 = vld [vmem:[%s16693_s0 + $0xc0] sm:$0xff] }
 0x348   :  { %16784 = vst [vmem:[#allocation28_spill] sm:$0xff] %v14085_v36 }
 0x349   :  { %v1607_v58 = vpop.f32.mrf.mxu2 }
 0x34a   :  { %v1683_v50 = vadd.f32 %v1607_v58, %v16785_v4  ;;  %v2166_v16 = vpop.f32.mrf.mxu3  ;;  %v12087_v4 = vld [vmem:[%s16693_s0 + $0xb2] sm:$0xff] }
 0x34b   :  { %v2726_v54 = vpop.f32.mrf.mxu0 }
 0x34c   :  { %v2242_v60 = vadd.f32 %v2166_v16, %v1683_v50  ;;  %v11989_v50 = vld [vmem:[%s16693_s0 + $0xa9] sm:$0xff] }
 0x34d   :  { %v14089_v38 = vpop.f32.mrf.mxu1  ;;  %v4122_v55 = vpack.c.bf16 %v11990_v51, %v11989_v50  ;;  %v11992_v50 = vld [vmem:[%s16693_s0 + $0xc9] sm:$0xff] }
 0x34e   :  { %16786 = vst [vmem:[#allocation29_spill] sm:$0xff] %v14089_v38  ;;  %v2800_v17 = vadd.f32 %v2724_v23, %v2242_v60  ;;  %v4680_v23 = vpack.c.bf16 %v12087_v4, %v12086_v35  ;;  %v16790_v38 = vld [vmem:[#allocation31_spill] sm:$0xff]  ;;  %v11895_v35 = vld [vmem:[%s16693_s0 + $0xc8] sm:$0xff] }
 0x350   :  { %v14103_v16 = vadd.f32 %v3282_v33, %v2800_v17 }
 0x351   :  { %v1609_v13 = vpop.f32.mrf.mxu2 }
 0x352   :  { %16787 = vst [vmem:[#allocation40_spill] sm:$0xff] %v14103_v16  ;;  %v1684_v9 = vadd.f32 %v1609_v13, %v16788_v2  ;;  %v2168_v21 = vpop.f32.mrf.mxu3 }
 0x353   :  { %v2729_v45 = vpop.f32.mrf.mxu0 }
 0x354   :  { %v2243_v58 = vadd.f32 %v2168_v21, %v1684_v9  ;;  %v16793_v9 = vld [vmem:[#allocation32_spill] sm:$0xff] }
 0x355   :  { %v3287_v60 = vpop.f32.mrf.mxu1 }
 0x356   :  { %11952 = vmatmul.msk.bf16.gmra.mxu2 %vm241_vm1, %v3564_v32  ;;  %12146 = vmatmul.msk.bf16.gmra.mxu0 %vm241_vm1, %v4680_v23  ;;  %v14114_v33 = vadd.f32 %v2726_v54, %v2243_v58  ;;  %v12088_v54 = vld [vmem:[%s16693_s0 + $0xc2] sm:$0xff]  ;;  %v3565_v23 = vpack.c.bf16 %v11895_v35, %v11894_v7 }
 0x357   :  { %12049 = vmatmul.msk.bf16.gmra.mxu3 %vm241_vm1, %v4122_v55  ;;  %v16795_v35 = vld [vmem:[#allocation33_spill] sm:$0xff] }
 0x358   :  { %16789 = vst [vmem:[#allocation30_spill] sm:$0xff] %v14114_v33 }
 0x359   :  { %v1612_v17 = vpop.f32.mrf.mxu2 }
 0x35a   :  { %v1685_v16 = vadd.f32 %v1612_v17, %v16790_v38  ;;  %v2171_v36 = vpop.f32.mrf.mxu3  ;;  %v12089_v38 = vld [vmem:[%s16693_s0 + $0xca] sm:$0xff]  ;;  %v12502_v17 = vmov 0.0  }
 0x35b   :  { %v2731_v13 = vpop.f32.mrf.mxu0  ;;  %5499 = vst.msk [vmem:[#allocation3 + $0x18] sm:$0xff] %vm5494_vm3, %v12502_v17 }
 0x35c   :  { %v2244_v2 = vadd.f32 %v2171_v36, %v1685_v16  ;;  %v11991_v16 = vld [vmem:[%s16693_s0 + $0xc1] sm:$0xff]  ;;  %5500 = vst.msk [vmem:[#allocation3 + $0x20] sm:$0xff] %vm5494_vm3, %v12502_v17 }
 0x35d   :  { %v14130_v4 = vpop.f32.mrf.mxu1  ;;  %v4123_v55 = vpack.c.bf16 %v11992_v50, %v11991_v16  ;;  %5495 = vst.msk [vmem:[#allocation3] sm:$0xff] %vm5494_vm3, %v12502_v17 }
 0x35e   :  { %v2802_v37 = vadd.f32 %v2729_v45, %v2244_v2  ;;  %16791 = vst [vmem:[#allocation31_spill] sm:$0xff] %v14130_v4  ;;  %v4681_v45 = vpack.c.bf16 %v12089_v38, %v12088_v54 }
 0x35f   :  { %5496 = vst.msk [vmem:[#allocation3 + $0x8] sm:$0xff] %vm5494_vm3, %v12502_v17 }
 0x360   :  { %v14132_v36 = vadd.f32 %v3287_v60, %v2802_v37  ;;  %5502 = vst.msk [vmem:[#allocation3 + $0x30] sm:$0xff] %vm5494_vm3, %v12502_v17 }
 0x361   :  { %v1614_v51 = vpop.f32.mrf.mxu2  ;;  %5503 = vst.msk [vmem:[#allocation3 + $0x38] sm:$0xff] %vm5494_vm3, %v12502_v17 }
 0x362   :  { %16792 = vst [vmem:[#allocation41_spill] sm:$0xff] %v14132_v36  ;;  %v1686_v21 = vadd.f32 %v1614_v51, %v16793_v9  ;;  %v2173_v32 = vpop.f32.mrf.mxu3  ;;  %v11896_v51 = vld [vmem:[%s16693_s0 + $0xd8] sm:$0xff] }
 0x363   :  { %v2734_v60 = vpop.f32.mrf.mxu0  ;;  %5505 = vst.msk [vmem:[#allocation3 + $0x48] sm:$0xff] %vm5494_vm3, %v12502_v17 }
 0x364   :  { %v2245_v58 = vadd.f32 %v2173_v32, %v1686_v21  ;;  %5506 = vst.msk [vmem:[#allocation3 + $0x50] sm:$0xff] %vm5494_vm3, %v12502_v17  ;;  %v5733_v16 = vld [vmem:[#allocation3] sm:$0xff] }
 0x365   :  { %v3292_v7 = vpop.f32.mrf.mxu1  ;;  %5508 = vst.msk [vmem:[#allocation3 + $0x60] sm:$0xff] %vm5494_vm3, %v12502_v17  ;;  %v11897_v32 = vld [vmem:[%s16693_s0 + $0xe0] sm:$0xff] }
 0x366   :  { %11953 = vmatmul.msk.bf16.gmra.mxu2 %vm241_vm1, %v3565_v23  ;;  %12147 = vmatmul.msk.bf16.gmra.mxu0 %vm241_vm1, %v4681_v45  ;;  %v14147_v2 = vadd.f32 %v2731_v13, %v2245_v58  ;;  %5509 = vst.msk [vmem:[#allocation3 + $0x68] sm:$0xff] %vm5494_vm3, %v12502_v17  ;;  %v5734_v9 = vld [vmem:[#allocation3 + $0x8] sm:$0xff]  ;;  %v12090_v23 = vld [vmem:[%s16693_s0 + $0xda] sm:$0xff] }
 0x367   :  { %12050 = vmatmul.msk.bf16.gmra.mxu3 %vm241_vm1, %v4123_v55  ;;  %5511 = vst.msk [vmem:[#allocation3 + $0x78] sm:$0xff] %vm5494_vm3, %v12502_v17  ;;  %v12091_v45 = vld [vmem:[%s16693_s0 + $0xe2] sm:$0xff]  ;;  %v5861_v55 = vpack.c.bf16 %v5734_v9, %v5733_v16  ;;  %v16801_v9 = vld [vmem:[#allocation35_spill] sm:$0xff] }
 0x368   :  { %16794 = vst [vmem:[#allocation32_spill] sm:$0xff] %v14147_v2 }
 0x369   :  { %v1617_v37 = vpop.f32.mrf.mxu2  ;;  %5512 = vst.msk [vmem:[#allocation3 + $0x80] sm:$0xff] %vm5494_vm3, %v12502_v17  ;;  %12173 = vmatmul.msk.bf16.vlgmr.msra.gmra.mxu1 %vm5494_vm3, %v5861_v55 }
 0x36a   :  { %v1687_v54 = vadd.f32 %v1617_v37, %v16795_v35  ;;  %v2176_v13 = vpop.f32.mrf.mxu3  ;;  %v11994_v37 = vld [vmem:[%s16693_s0 + $0xe1] sm:$0xff]  ;;  %5514 = vst.msk [vmem:[#allocation3 + $0x90] sm:$0xff] %vm5494_vm3, %v12502_v17 }
 0x36b   :  { %v14172_v21 = vpop.f32.mrf.mxu0  ;;  %5515 = vst.msk [vmem:[#allocation3 + $0x98] sm:$0xff] %vm5494_vm3, %v12502_v17 }
 0x36c   :  { %v2246_v38 = vadd.f32 %v2176_v13, %v1687_v54  ;;  %16796 = vst [vmem:[#allocation33_spill] sm:$0xff] %v14172_v21  ;;  %v3566_v54 = vpack.c.bf16 %v11897_v32, %v11896_v51  ;;  %v4682_v13 = vpack.c.bf16 %v12091_v45, %v12090_v23  ;;  %v12096_v21 = vld [vmem:[%s16693_s0 + $0x122] sm:$0xff] }
 0x36d   :  { %5517 = vst.msk [vmem:[#allocation3 + $0xa8] sm:$0xff] %vm5494_vm3, %v12502_v17  ;;  %v14204_v16 = vpop.f32.mrf.mxu1 }
 0x36e   :  { %v2804_v50 = vadd.f32 %v2734_v60, %v2246_v38  ;;  %v11993_v60 = vld [vmem:[%s16693_s0 + $0xd9] sm:$0xff]  ;;  %16800 = vst [vmem:[#allocation45_spill] sm:$0xff] %v14204_v16 }
 0x36f   :  { %v4124_v38 = vpack.c.bf16 %v11994_v37, %v11993_v60  ;;  %5518 = vst.msk [vmem:[#allocation3 + $0xb0] sm:$0xff] %vm5494_vm3, %v12502_v17  ;;  %v11898_v37 = vld [vmem:[%s16693_s0 + $0xf0] sm:$0xff] }
 0x370   :  { %v14185_v58 = vadd.f32 %v3292_v7, %v2804_v50  ;;  %5520 = vst.msk [vmem:[#allocation3 + $0xc0] sm:$0xff] %vm5494_vm3, %v12502_v17 }
 0x371   :  { %v14195_v35 = vpop.f32.mrf.mxu2  ;;  %5521 = vst.msk [vmem:[#allocation3 + $0xc8] sm:$0xff] %vm5494_vm3, %v12502_v17 }
 0x372   :  { %16797 = vst [vmem:[#allocation42_spill] sm:$0xff] %v14185_v58  ;;  %v14200_v7 = vpop.f32.mrf.mxu3 }
 0x373   :  { %16798 = vst [vmem:[#allocation43_spill] sm:$0xff] %v14195_v35  ;;  %v2739_v50 = vpop.f32.mrf.mxu0  ;;  %v12097_v35 = vld [vmem:[%s16693_s0 + $0x12a] sm:$0xff] }
 0x374   :  { %16799 = vst [vmem:[#allocation44_spill] sm:$0xff] %v14200_v7 }
 0x375   :  { %5523 = vst.msk [vmem:[#allocation3 + $0xd8] sm:$0xff] %vm5494_vm3, %v12502_v17  ;;  %v3297_v55 = vpop.f32.mrf.mxu1 }
 0x376   :  { %11954 = vmatmul.msk.bf16.gmra.mxu2 %vm241_vm1, %v3566_v54  ;;  %12148 = vmatmul.msk.bf16.gmra.mxu0 %vm241_vm1, %v4682_v13  ;;  %5524 = vst.msk [vmem:[#allocation3 + $0xe0] sm:$0xff] %vm5494_vm3, %v12502_v17  ;;  %v11899_v54 = vld [vmem:[%s16693_s0 + $0xf8] sm:$0xff] }
 0x377   :  { %12051 = vmatmul.msk.bf16.gmra.mxu3 %vm241_vm1, %v4124_v38  ;;  %5526 = vst.msk [vmem:[#allocation3 + $0xf0] sm:$0xff] %vm5494_vm3, %v12502_v17  ;;  %v12092_v13 = vld [vmem:[%s16693_s0 + $0xf2] sm:$0xff]  ;;  %v12093_v38 = vld [vmem:[%s16693_s0 + $0xfa] sm:$0xff] }
 0x378   :  { %5527 = vst.msk [vmem:[#allocation3 + $0xf8] sm:$0xff] %vm5494_vm3, %v12502_v17 }
 0x379   :  { %v1622_v51 = vpop.f32.mrf.mxu2  ;;  %5529 = vst.msk [vmem:[#allocation3 + $0x108] sm:$0xff] %vm5494_vm3, %v12502_v17 }
 0x37a   :  { %v1689_v32 = vadd.f32 %v1622_v51, %v16801_v9  ;;  %v2181_v23 = vpop.f32.mrf.mxu3  ;;  %5530 = vst.msk [vmem:[#allocation3 + $0x110] sm:$0xff] %vm5494_vm3, %v12502_v17  ;;  %v11995_v51 = vld [vmem:[%s16693_s0 + $0xf1] sm:$0xff]  ;;  %v11996_v9 = vld [vmem:[%s16693_s0 + $0xf9] sm:$0xff] }
 0x37b   :  { %5532 = vst.msk [vmem:[#allocation3 + $0x120] sm:$0xff] %vm5494_vm3, %v12502_v17  ;;  %v4125_v16 = vpack.c.bf16 %v11996_v9, %v11995_v51  ;;  %v16806_v9 = vmov 0 }
 0x37c   :  { %v2248_v45 = vadd.f32 %v2181_v23, %v1689_v32  ;;  %5533 = vst.msk [vmem:[#allocation3 + $0x128] sm:$0xff] %vm5494_vm3, %v12502_v17 }
 0x37d   :  { %5535 = vst.msk [vmem:[#allocation3 + $0x138] sm:$0xff] %vm5494_vm3, %v12502_v17 }
 0x37e   :  { %v2806_v60 = vadd.f32 %v2739_v50, %v2248_v45  ;;  %5536 = vst.msk [vmem:[#allocation3 + $0x140] sm:$0xff] %vm5494_vm3, %v12502_v17  ;;  %v3567_v45 = vpack.c.bf16 %v11899_v54, %v11898_v37 }
 0x37f   :  { %5538 = vst.msk [vmem:[#allocation3 + $0x150] sm:$0xff] %vm5494_vm3, %v12502_v17 }
 0x380   :  { %v14248_v50 = vadd.f32 %v3297_v55, %v2806_v60  ;;  %5539 = vst.msk [vmem:[#allocation3 + $0x158] sm:$0xff] %vm5494_vm3, %v12502_v17  ;;  %v4683_v55 = vpack.c.bf16 %v12093_v38, %v12092_v13  ;;  %v5169_v60 = vlaneseq }
 0x381   :  { %v14258_v32 = vpop.f32.mrf.mxu2  ;;  %5541 = vst.msk [vmem:[#allocation3 + $0x168] sm:$0xff] %vm5494_vm3, %v12502_v17 }
 0x382   :  { %16802 = vst [vmem:[#allocation35_spill] sm:$0xff] %v14248_v50  ;;  %v14262_v23 = vpop.f32.mrf.mxu3  ;;  %v14266_v50 = vpop.f32.mrf.mxu0  ;;  %v5170_v37 = vand.u32 127, %v5169_v60 }
 0x383   :  { %16803 = vst [vmem:[#allocation46_spill] sm:$0xff] %v14258_v32 }
 0x384   :  { %16804 = vst [vmem:[#allocation47_spill] sm:$0xff] %v14262_v23  ;;  %vm5171_vm4 = vcmp.ge.s32.totalorder %v5170_v37, 64  ;;  %vm5172_vm5 = vcmp.lt.s32.totalorder %v5170_v37, 72 }
 0x385   :  { %16805 = vst [vmem:[#allocation48_spill] sm:$0xff] %v14266_v50  ;;  %vm14292_vm6 = vmand %vm5171_vm4, %vm5172_vm5 }
 0x386   :  { %5542 = vst.msk [vmem:[#allocation3 + $0x170] sm:$0xff] %vm5494_vm3, %v12502_v17  ;;  %11955 = vmatmul.msk.bf16.gmra.mxu2 %vm241_vm1, %v3567_v45  ;;  %12149 = vmatmul.msk.bf16.gmra.mxu0 %vm241_vm1, %v4683_v55  ;;  %v16807_v9 = vsel %vm14292_vm6, 4294967295, %v16806_v9  ;;  %v12238_v45 = vld [vmem:[%s16695_s2 + $0x8] sm:$0xf] }
 0x387   :  { %5544 = vst.msk [vmem:[#allocation3 + $0x180] sm:$0xff] %vm5494_vm3, %v12502_v17  ;;  %12052 = vmatmul.msk.bf16.gmra.mxu3 %vm241_vm1, %v4125_v16  ;;  %v7108_v37 = vsel %vm5990_vm2, %v12238_v45, 0 }
 0x388   :  { %5545 = vst.msk [vmem:[#allocation3 + $0x188] sm:$0xff] %vm5494_vm3, %v12502_v17  ;;  %7117 = vmatpush.bf16.msrb.mxu3 %v7108_v37 }
 0x389   :  { %5547 = vst.msk [vmem:[#allocation3 + $0x198] sm:$0xff] %vm5494_vm3, %v12502_v17  ;;  %v3701_v54 = vpop.f32.mrf.mxu2 }
 0x38a   :  { %5548 = vst.msk [vmem:[#allocation3 + $0x1a0] sm:$0xff] %vm5494_vm3, %v12502_v17  ;;  %v3861_v13 = vadd.f32 %v3701_v54, %v13348_v6  ;;  %v4259_v38 = vpop.f32.mrf.mxu3  ;;  %v4817_v51 = vpop.f32.mrf.mxu0  ;;  %v12205_v6 = vld [vmem:[%s16695_s2 + $0x4] sm:$0xf]  ;;  %v11900_v54 = vld [vmem:[%s16693_s0 + $0x108] sm:$0xff] }
 0x38b   :  { %5550 = vst.msk [vmem:[#allocation3 + $0x1b0] sm:$0xff] %vm5494_vm3, %v12502_v17  ;;  %v6550_v60 = vsel %vm5990_vm2, %v12205_v6, 0 }
 0x38c   :  { %5551 = vst.msk [vmem:[#allocation3 + $0x1b8] sm:$0xff] %vm5494_vm3, %v12502_v17  ;;  %v4419_v16 = vadd.f32 %v4259_v38, %v3861_v13  ;;  %v11901_v13 = vld [vmem:[%s16693_s0 + $0x110] sm:$0xff]  ;;  %6559 = vmatpush.bf16.msrb.mxu2 %v6550_v60 }
 0x38d   :  { %5553 = vst.msk [vmem:[#allocation3 + $0x1c8] sm:$0xff] %vm5494_vm3, %v12502_v17  ;;  %v11997_v38 = vld [vmem:[%s16693_s0 + $0x109] sm:$0xff]  ;;  %v11998_v60 = vld [vmem:[%s16693_s0 + $0x111] sm:$0xff]  ;;  %v3568_v50 = vpack.c.bf16 %v11901_v13, %v11900_v54 }
 0x38e   :  { %5554 = vst.msk [vmem:[#allocation3 + $0x1d0] sm:$0xff] %vm5494_vm3, %v12502_v17  ;;  %v4977_v55 = vadd.f32 %v4817_v51, %v4419_v16  ;;  %v12094_v16 = vld [vmem:[%s16693_s0 + $0x10a] sm:$0xff]  ;;  %v12095_v51 = vld [vmem:[%s16693_s0 + $0x112] sm:$0xff]  ;;  %v4126_v32 = vpack.c.bf16 %v11998_v60, %v11997_v38 }
 0x38f   :  { %5556 = vst.msk [vmem:[#allocation3 + $0x1e0] sm:$0xff] %vm5494_vm3, %v12502_v17  ;;  %v4684_v23 = vpack.c.bf16 %v12095_v51, %v12094_v16 }
 0x390   :  { %16808 = vst [vmem:[#allocation49_spill] sm:$0xff] %v16807_v9  ;;  %v5174_v6 = vsel %vm14292_vm6, %v4977_v55, 0.0  ;;  %vm5302_vm7 = vcmp.gt.f32.partialorder %v4977_v55, 0.0  ;;  %v5366_v45 = vmul.f32 0.01, %v4977_v55 }
 0x391   :  { %5557 = vst.msk [vmem:[#allocation3 + $0x1e8] sm:$0xff] %vm5494_vm3, %v12502_v17  ;;  %v3703_v54 = vpop.f32.mrf.mxu2 }
 0x392   :  { %5559 = vst.msk [vmem:[#allocation3 + $0x1f8] sm:$0xff] %vm5494_vm3, %v12502_v17  ;;  %v5430_v37 = vsel %vm5302_vm7, %v4977_v55, %v5366_v45  ;;  %v4819_v55 = vpop.f32.mrf.mxu0 }
 0x393   :  { %5560 = vst.msk [vmem:[#allocation3 + $0x200] sm:$0xff] %vm5494_vm3, %v12502_v17 }
 0x394   :  { %5562 = vst.msk [vmem:[#allocation3 + $0x210] sm:$0xff] %vm5494_vm3, %v12502_v17 }
 0x395   :  { %5238 = vst [vmem:[#allocation4] sm:$0xff] %v5174_v6 }
 0x396   :  { %5563 = vst.msk [vmem:[#allocation3 + $0x218] sm:$0xff] %vm5494_vm3, %v12502_v17  ;;  %11956 = vmatmul.msk.bf16.gmra.mxu2 %vm241_vm1, %v3568_v50  ;;  %12150 = vmatmul.msk.bf16.gmra.mxu0 %vm241_vm1, %v4684_v23  ;;  %v3862_v50 = vadd.f32 %v3703_v54, %v13363_v26 }
 0x397   :  { %5605 = vst.msk [vmem:[#allocation3 + $0x19] sm:$0xff] %vm5494_vm3, %v5430_v37  ;;  %12053 = vmatmul.msk.bf16.gmra.mxu3 %vm241_vm1, %v4126_v32  ;;  %v4261_v32 = vpop.f32.mrf.mxu3  ;;  %v12271_v37 = vld [vmem:[%s16695_s2 + $0xc] sm:$0xf] }
 0x398   :  { %5565 = vst.msk [vmem:[#allocation3 + $0x228] sm:$0xff] %vm5494_vm3, %v12502_v17  ;;  %v4420_v23 = vadd.f32 %v4261_v32, %v3862_v50  ;;  %v7666_v54 = vsel %vm5990_vm2, %v12271_v37, 0  ;;  %v11999_v37 = vld [vmem:[%s16693_s0 + $0x121] sm:$0xff] }
 0x399   :  { %5566 = vst.msk [vmem:[#allocation3 + $0x230] sm:$0xff] %vm5494_vm3, %v12502_v17  ;;  %v3706_v16 = vpop.f32.mrf.mxu2  ;;  %7675 = vmatpush.bf16.msrb.mxu0 %v7666_v54 }
 0x39a   :  { %5568 = vst.msk [vmem:[#allocation3 + $0x240] sm:$0xff] %vm5494_vm3, %v12502_v17  ;;  %v14373_v26 = vpop.f32.mrf.mxu0  ;;  %v4978_v13 = vadd.f32 %v4819_v55, %v4420_v23  ;;  %v12304_v55 = vld [vmem:[%s16695_s2 + $0x10] sm:$0xf] }
 0x39b   :  { %5569 = vst.msk [vmem:[#allocation3 + $0x248] sm:$0xff] %vm5494_vm3, %v12502_v17  ;;  %v8224_v50 = vsel %vm5990_vm2, %v12304_v55, 0 }
 0x39c   :  { %5571 = vst.msk [vmem:[#allocation3 + $0x258] sm:$0xff] %vm5494_vm3, %v12502_v17  ;;  %v5367_v38 = vmul.f32 0.01, %v4978_v13  ;;  %vm5303_vm8 = vcmp.gt.f32.partialorder %v4978_v13, 0.0  ;;  %v5175_v6 = vsel %vm14292_vm6, %v4978_v13, 0.0  ;;  %8233 = vmatpush.bf16.msrb.mxu1 %v8224_v50  ;;  %v12000_v50 = vld [vmem:[%s16693_s0 + $0x129] sm:$0xff] }
 0x39d   :  { %5572 = vst.msk [vmem:[#allocation3 + $0x260] sm:$0xff] %vm5494_vm3, %v12502_v17  ;;  %v4127_v7 = vpack.c.bf16 %v12000_v50, %v11999_v37  ;;  %v12001_v37 = vld [vmem:[%s16693_s0 + $0x139] sm:$0xff] }
 0x39e   :  { %5574 = vst.msk [vmem:[#allocation3 + $0x270] sm:$0xff] %vm5494_vm3, %v12502_v17  ;;  %v5431_v45 = vsel %vm5303_vm8, %v4978_v13, %v5367_v38  ;;  %v5735_v13 = vld [vmem:[#allocation3 + $0x18] sm:$0xff] }
 0x39f   :  { %5575 = vst.msk [vmem:[#allocation3 + $0x278] sm:$0xff] %vm5494_vm3, %v12502_v17  ;;  %v14387_v51 = vpop.f32.mrf.mxu3  ;;  %v12098_v50 = vld [vmem:[%s16693_s0 + $0x13a] sm:$0xff] }
 0x3a0   :  { %5577 = vst.msk [vmem:[#allocation3 + $0x288] sm:$0xff] %vm5494_vm3, %v12502_v17 }
 0x3a1   :  { %5578 = vst.msk [vmem:[#allocation3 + $0x290] sm:$0xff] %vm5494_vm3, %v12502_v17  ;;  %v3708_v32 = vpop.f32.mrf.mxu2 }
 0x3a2   :  { %5580 = vst.msk [vmem:[#allocation3 + $0x2a0] sm:$0xff] %vm5494_vm3, %v12502_v17  ;;  %v14397_v60 = vpop.f32.mrf.mxu0 }
 0x3a3   :  { %5581 = vst.msk [vmem:[#allocation3 + $0x2a8] sm:$0xff] %vm5494_vm3, %v12502_v17 }
 0x3a4   :  { %5583 = vst.msk [vmem:[#allocation3 + $0x2b8] sm:$0xff] %vm5494_vm3, %v12502_v17 }
 0x3a5   :  { %5584 = vst.msk [vmem:[#allocation3 + $0x2c0] sm:$0xff] %vm5494_vm3, %v12502_v17 }
 0x3a6   :  { %5586 = vst.msk [vmem:[#allocation3 + $0x2d0] sm:$0xff] %vm5494_vm3, %v12502_v17 }
 0x3a7   :  { %5587 = vst.msk [vmem:[#allocation3 + $0x2d8] sm:$0xff] %vm5494_vm3, %v12502_v17  ;;  %v4266_v23 = vpop.f32.mrf.mxu3  ;;  %12054 = vmatmul.msk.bf16.gmra.mxu3 %vm241_vm1, %v4127_v7  ;;  %v11905_v7 = vld [vmem:[%s16693_s0 + $0x140] sm:$0xff] }
 0x3a8   :  { %5589 = vst.msk [vmem:[#allocation3 + $0x2e8] sm:$0xff] %vm5494_vm3, %v12502_v17 }
 0x3a9   :  { %5590 = vst.msk [vmem:[#allocation3 + $0x2f0] sm:$0xff] %vm5494_vm3, %v12502_v17 }
 0x3aa   :  { %5592 = vst.msk [vmem:[#allocation3 + $0x300] sm:$0xff] %vm5494_vm3, %v12502_v17  ;;  %v14422_v38 = vpop.f32.mrf.mxu0 }
 0x3ab   :  { %5593 = vst.msk [vmem:[#allocation3 + $0x308] sm:$0xff] %vm5494_vm3, %v12502_v17 }
 0x3ac   :  { %5595 = vst.msk [vmem:[#allocation3 + $0x318] sm:$0xff] %vm5494_vm3, %v12502_v17 }
 0x3ad   :  { %5596 = vst.msk [vmem:[#allocation3 + $0x320] sm:$0xff] %vm5494_vm3, %v12502_v17 }
 0x3ae   :  { %5598 = vst.msk [vmem:[#allocation3 + $0x330] sm:$0xff] %vm5494_vm3, %v12502_v17 }
 0x3af   :  { %5599 = vst.msk [vmem:[#allocation3 + $0x338] sm:$0xff] %vm5494_vm3, %v12502_v17 }
 0x3b0   :  { %5601 = vst.msk [vmem:[#allocation3 + $0x348] sm:$0xff] %vm5494_vm3, %v12502_v17 }
 0x3b1   :  { %5602 = vst.msk [vmem:[#allocation3 + $0x350] sm:$0xff] %vm5494_vm3, %v12502_v17 }
 0x3b2   :  { %5239 = vst [vmem:[#allocation4 + $0x8] sm:$0xff] %v5175_v6  ;;  %v11902_v6 = vld [vmem:[%s16693_s0 + $0x120] sm:$0xff] }
 0x3b3   :  { %5501 = vst.msk [vmem:[#allocation3 + $0x28] sm:$0x3] %vm5497_vm9, %v12502_v17 }
 0x3b4   :  { %5606 = vst.msk [vmem:[#allocation3 + $0x21] sm:$0xff] %vm5494_vm3, %v5431_v45  ;;  %v11903_v45 = vld [vmem:[%s16693_s0 + $0x128] sm:$0xff] }
 0x3b5   :  { %5498 = vst.msk [vmem:[#allocation3 + $0x10] sm:$0x3] %vm5497_vm9, %v12502_v17  ;;  %v3569_v54 = vpack.c.bf16 %v11903_v45, %v11902_v6  ;;  %v4685_v6 = vpack.c.bf16 %v12097_v35, %v12096_v21  ;;  %v4269_v45 = vpop.f32.mrf.mxu3  ;;  %v4829_v21 = vpop.f32.mrf.mxu0  ;;  %v11904_v35 = vld [vmem:[%s16693_s0 + $0x138] sm:$0xff] }
 0x3b6   :  { %5504 = vst.msk [vmem:[#allocation3 + $0x40] sm:$0x3] %vm5497_vm9, %v12502_v17  ;;  %v3570_v4 = vpack.c.bf16 %v11905_v7, %v11904_v35  ;;  %v11906_v35 = vld [vmem:[%s16693_s0 + $0x150] sm:$0xff] }
 0x3b7   :  { %5507 = vst.msk [vmem:[#allocation3 + $0x58] sm:$0x3] %vm5497_vm9, %v12502_v17  ;;  %11957 = vmatmul.msk.bf16.gmra.mxu2 %vm241_vm1, %v3569_v54  ;;  %12151 = vmatmul.msk.bf16.gmra.mxu0 %vm241_vm1, %v4685_v6  ;;  %v12099_v6 = vld [vmem:[%s16693_s0 + $0x142] sm:$0xff] }
 0x3b8   :  { %5510 = vst.msk [vmem:[#allocation3 + $0x70] sm:$0x3] %vm5497_vm9, %v12502_v17  ;;  %v4686_v33 = vpack.c.bf16 %v12099_v6, %v12098_v50  ;;  %v12101_v6 = vld [vmem:[%s16693_s0 + $0x15a] sm:$0xff] }
 0x3b9   :  { %5513 = vst.msk [vmem:[#allocation3 + $0x88] sm:$0x3] %vm5497_vm9, %v12502_v17 }
 0x3ba   :  { %5516 = vst.msk [vmem:[#allocation3 + $0xa0] sm:$0x3] %vm5497_vm9, %v12502_v17 }
 0x3bb   :  { %5519 = vst.msk [vmem:[#allocation3 + $0xb8] sm:$0x3] %vm5497_vm9, %v12502_v17  ;;  %v5736_v55 = vld [vmem:[#allocation3 + $0x20] sm:$0xff] }
 0x3bc   :  { %5522 = vst.msk [vmem:[#allocation3 + $0xd0] sm:$0x3] %vm5497_vm9, %v12502_v17  ;;  %v5862_v58 = vpack.c.bf16 %v5736_v55, %v5735_v13  ;;  %v3711_v13 = vpop.f32.mrf.mxu2  ;;  %v12002_v55 = vld [vmem:[%s16693_s0 + $0x141] sm:$0xff] }
 0x3bd   :  { %5525 = vst.msk [vmem:[#allocation3 + $0xe8] sm:$0x3] %vm5497_vm9, %v12502_v17  ;;  %v4271_v54 = vpop.f32.mrf.mxu3  ;;  %v4128_v36 = vpack.c.bf16 %v12002_v55, %v12001_v37  ;;  %v12003_v37 = vld [vmem:[%s16693_s0 + $0x151] sm:$0xff]  ;;  %v12004_v55 = vld [vmem:[%s16693_s0 + $0x159] sm:$0xff] }
 0x3be   :  { %5528 = vst.msk [vmem:[#allocation3 + $0x100] sm:$0x3] %vm5497_vm9, %v12502_v17  ;;  %12174 = vmatmul.msk.bf16.gmra.mxu1 %vm5494_vm3, %v5862_v58  ;;  %v3863_v58 = vadd.f32 %v3706_v16, %v13366_v34  ;;  %v3864_v34 = vadd.f32 %v3708_v32, %v13381_v40  ;;  %v3865_v40 = vadd.f32 %v3711_v13, %v13384_v44  ;;  %v4832_v32 = vpop.f32.mrf.mxu0 }
 0x3bf   :  { %5531 = vst.msk [vmem:[#allocation3 + $0x118] sm:$0x3] %vm5497_vm9, %v12502_v17  ;;  %12055 = vmatmul.msk.bf16.gmra.mxu3 %vm241_vm1, %v4128_v36 }
 0x3c0   :  { %5534 = vst.msk [vmem:[#allocation3 + $0x130] sm:$0x3] %vm5497_vm9, %v12502_v17  ;;  %v4421_v2 = vadd.f32 %v14387_v51, %v3863_v58  ;;  %v4422_v5 = vadd.f32 %v4266_v23, %v3864_v34  ;;  %v4423_v51 = vadd.f32 %v4269_v45, %v3865_v40 }
 0x3c1   :  { %5537 = vst.msk [vmem:[#allocation3 + $0x148] sm:$0x3] %vm5497_vm9, %v12502_v17 }
 0x3c2   :  { %5540 = vst.msk [vmem:[#allocation3 + $0x160] sm:$0x3] %vm5497_vm9, %v12502_v17  ;;  %v4979_v44 = vadd.f32 %v14373_v26, %v4421_v2  ;;  %v4981_v26 = vadd.f32 %v14422_v38, %v4423_v51 }
 0x3c3   :  { %5543 = vst.msk [vmem:[#allocation3 + $0x178] sm:$0x3] %vm5497_vm9, %v12502_v17 }
 0x3c4   :  { %5546 = vst.msk [vmem:[#allocation3 + $0x190] sm:$0x3] %vm5497_vm9, %v12502_v17  ;;  %v3713_v16 = vpop.f32.mrf.mxu2  ;;  %v5368_v36 = vmul.f32 0.01, %v4979_v44  ;;  %vm5304_vm10 = vcmp.gt.f32.partialorder %v4979_v44, 0.0  ;;  %vm5306_vm12 = vcmp.gt.f32.partialorder %v4981_v26, 0.0 }
 0x3c5   :  { %5549 = vst.msk [vmem:[#allocation3 + $0x1a8] sm:$0x3] %vm5497_vm9, %v12502_v17  ;;  %v3866_v49 = vadd.f32 %v3713_v16, %v13399_v62  ;;  %v4980_v62 = vadd.f32 %v14397_v60, %v4422_v5  ;;  %v4274_v13 = vpop.f32.mrf.mxu3  ;;  %v5370_v45 = vmul.f32 0.01, %v4981_v26  ;;  %v5178_v40 = vsel %vm14292_vm6, %v4981_v26, 0.0 }
 0x3c6   :  { %5552 = vst.msk [vmem:[#allocation3 + $0x1c0] sm:$0x3] %vm5497_vm9, %v12502_v17  ;;  %v5432_v38 = vsel %vm5304_vm10, %v4979_v44, %v5368_v36 }
 0x3c7   :  { %5555 = vst.msk [vmem:[#allocation3 + $0x1d8] sm:$0x3] %vm5497_vm9, %v12502_v17  ;;  %11958 = vmatmul.msk.bf16.gmra.mxu2 %vm241_vm1, %v3570_v4  ;;  %12152 = vmatmul.msk.bf16.gmra.mxu0 %vm241_vm1, %v4686_v33  ;;  %v4424_v23 = vadd.f32 %v4271_v54, %v3866_v49  ;;  %v4834_v33 = vpop.f32.mrf.mxu0  ;;  %v5369_v49 = vmul.f32 0.01, %v4980_v62  ;;  %vm5305_vm11 = vcmp.gt.f32.partialorder %v4980_v62, 0.0  ;;  %v5177_v7 = vsel %vm14292_vm6, %v4980_v62, 0.0 }
 0x3c8   :  { %5558 = vst.msk [vmem:[#allocation3 + $0x1f0] sm:$0x3] %vm5497_vm9, %v12502_v17  ;;  %v5434_v51 = vsel %vm5306_vm12, %v4981_v26, %v5370_v45 }
 0x3c9   :  { %5561 = vst.msk [vmem:[#allocation3 + $0x208] sm:$0x3] %vm5497_vm9, %v12502_v17  ;;  %v4982_v60 = vadd.f32 %v4829_v21, %v4424_v23  ;;  %v11907_v21 = vld [vmem:[%s16693_s0 + $0x158] sm:$0xff]  ;;  %v5433_v34 = vsel %vm5305_vm11, %v4980_v62, %v5369_v49 }
 0x3ca   :  { %5564 = vst.msk [vmem:[#allocation3 + $0x220] sm:$0x3] %vm5497_vm9, %v12502_v17 }
 0x3cb   :  { %5567 = vst.msk [vmem:[#allocation3 + $0x238] sm:$0x3] %vm5497_vm9, %v12502_v17  ;;  %v5371_v16 = vmul.f32 0.01, %v4982_v60  ;;  %vm5307_vm13 = vcmp.gt.f32.partialorder %v4982_v60, 0.0 }
 0x3cc   :  { %5570 = vst.msk [vmem:[#allocation3 + $0x250] sm:$0x3] %vm5497_vm9, %v12502_v17  ;;  %v3716_v4 = vpop.f32.mrf.mxu2 }
 0x3cd   :  { %5573 = vst.msk [vmem:[#allocation3 + $0x268] sm:$0x3] %vm5497_vm9, %v12502_v17  ;;  %v3867_v2 = vadd.f32 %v3716_v4, %v13402_v27  ;;  %v5176_v27 = vsel %vm14292_vm6, %v4979_v44, 0.0  ;;  %v4276_v50 = vpop.f32.mrf.mxu3  ;;  %v3571_v44 = vpack.c.bf16 %v11907_v21, %v11906_v35  ;;  %v4129_v4 = vpack.c.bf16 %v12004_v55, %v12003_v37 }
 0x3ce   :  { %5576 = vst.msk [vmem:[#allocation3 + $0x280] sm:$0x3] %vm5497_vm9, %v12502_v17 }
 0x3cf   :  { %5579 = vst.msk [vmem:[#allocation3 + $0x298] sm:$0x3] %vm5497_vm9, %v12502_v17  ;;  %v4425_v5 = vadd.f32 %v4274_v13, %v3867_v2  ;;  %v4837_v23 = vpop.f32.mrf.mxu0  ;;  %v5179_v13 = vsel %vm14292_vm6, %v4982_v60, 0.0  ;;  %12056 = vmatmul.msk.bf16.gmra.mxu3 %vm241_vm1, %v4129_v4 }
 0x3d0   :  { %5582 = vst.msk [vmem:[#allocation3 + $0x2b0] sm:$0x3] %vm5497_vm9, %v12502_v17 }
 0x3d1   :  { %5585 = vst.msk [vmem:[#allocation3 + $0x2c8] sm:$0x3] %vm5497_vm9, %v12502_v17  ;;  %v4983_v58 = vadd.f32 %v4832_v32, %v4425_v5  ;;  %v5435_v5 = vsel %vm5307_vm13, %v4982_v60, %v5371_v16  ;;  %v11908_v16 = vld [vmem:[%s16693_s0 + $0x168] sm:$0xff] }
 0x3d2   :  { %5588 = vst.msk [vmem:[#allocation3 + $0x2e0] sm:$0x3] %vm5497_vm9, %v12502_v17 }
 0x3d3   :  { %5591 = vst.msk [vmem:[#allocation3 + $0x2f8] sm:$0x3] %vm5497_vm9, %v12502_v17  ;;  %v5372_v62 = vmul.f32 0.01, %v4983_v58  ;;  %vm5308_vm14 = vcmp.gt.f32.partialorder %v4983_v58, 0.0 }
 0x3d4   :  { %5594 = vst.msk [vmem:[#allocation3 + $0x310] sm:$0x3] %vm5497_vm9, %v12502_v17  ;;  %v3718_v54 = vpop.f32.mrf.mxu2 }
 0x3d5   :  { %5597 = vst.msk [vmem:[#allocation3 + $0x328] sm:$0x3] %vm5497_vm9, %v12502_v17  ;;  %v3868_v32 = vadd.f32 %v3718_v54, %v13417_v53  ;;  %v5180_v53 = vsel %vm14292_vm6, %v4983_v58, 0.0  ;;  %v5436_v26 = vsel %vm5308_vm14, %v4983_v58, %v5372_v62  ;;  %v4279_v45 = vpop.f32.mrf.mxu3  ;;  %v11909_v54 = vld [vmem:[%s16693_s0 + $0x170] sm:$0xff] }
 0x3d6   :  { %5600 = vst.msk [vmem:[#allocation3 + $0x340] sm:$0x3] %vm5497_vm9, %v12502_v17  ;;  %v3572_v4 = vpack.c.bf16 %v11909_v54, %v11908_v16  ;;  %v12007_v16 = vld [vmem:[%s16693_s0 + $0x181] sm:$0xff]  ;;  %v12008_v54 = vld [vmem:[%s16693_s0 + $0x189] sm:$0xff] }
 0x3d7   :  { %5603 = vst.msk [vmem:[#allocation3 + $0x358] sm:$0x3] %vm5497_vm9, %v12502_v17  ;;  %v12100_v17 = vld [vmem:[%s16693_s0 + $0x152] sm:$0xff]  ;;  %v4426_v2 = vadd.f32 %v4276_v50, %v3868_v32  ;;  %11959 = vmatmul.msk.bf16.gmra.mxu2 %vm241_vm1, %v3571_v44  ;;  %v12102_v44 = vld [vmem:[%s16693_s0 + $0x16a] sm:$0xff] }
 0x3d8   :  { %5240 = vst [vmem:[#allocation4 + $0x10] sm:$0xff] %v5176_v27  ;;  %v4687_v36 = vpack.c.bf16 %v12101_v6, %v12100_v17  ;;  %v12005_v17 = vld [vmem:[%s16693_s0 + $0x169] sm:$0xff]  ;;  %v12006_v6 = vld [vmem:[%s16693_s0 + $0x171] sm:$0xff] }
 0x3d9   :  { %5607 = vst.msk [vmem:[#allocation3 + $0x31] sm:$0xff] %vm5494_vm3, %v5432_v38  ;;  %v4984_v49 = vadd.f32 %v4834_v33, %v4426_v2  ;;  %v4130_v2 = vpack.c.bf16 %v12006_v6, %v12005_v17  ;;  %v12104_v17 = vld [vmem:[%s16693_s0 + $0x182] sm:$0xff]  ;;  %v12105_v6 = vld [vmem:[%s16693_s0 + $0x18a] sm:$0xff] }
 0x3da   :  { %5241 = vst [vmem:[#allocation4 + $0x18] sm:$0xff] %v5177_v7  ;;  %12153 = vmatmul.msk.bf16.gmra.mxu0 %vm241_vm1, %v4687_v36  ;;  %v4839_v7 = vpop.f32.mrf.mxu0 }
 0x3db   :  { %5608 = vst.msk [vmem:[#allocation3 + $0x39] sm:$0xff] %vm5494_vm3, %v5433_v34  ;;  %v5181_v27 = vsel %vm14292_vm6, %v4984_v49, 0.0  ;;  %vm5309_vm15 = vcmp.gt.f32.partialorder %v4984_v49, 0.0  ;;  %v5373_v38 = vmul.f32 0.01, %v4984_v49 }
 0x3dc   :  { %5242 = vst [vmem:[#allocation4 + $0x20] sm:$0xff] %v5178_v40  ;;  %v3721_v60 = vpop.f32.mrf.mxu2 }
 0x3dd   :  { %5609 = vst.msk [vmem:[#allocation3 + $0x49] sm:$0xff] %vm5494_vm3, %v5434_v51  ;;  %v5437_v33 = vsel %vm5309_vm15, %v4984_v49, %v5373_v38  ;;  %v3869_v35 = vadd.f32 %v3721_v60, %v13420_v61  ;;  %v4281_v32 = vpop.f32.mrf.mxu3  ;;  %v12103_v51 = vld [vmem:[%s16693_s0 + $0x172] sm:$0xff] }
 0x3de   :  { %5243 = vst [vmem:[#allocation4 + $0x28] sm:$0xff] %v5179_v13 }
 0x3df   :  { %5610 = vst.msk [vmem:[#allocation3 + $0x51] sm:$0xff] %vm5494_vm3, %v5435_v5  ;;  %v4427_v55 = vadd.f32 %v4279_v45, %v3869_v35  ;;  %v4688_v5 = vpack.c.bf16 %v12103_v51, %v12102_v44  ;;  %12057 = vmatmul.msk.bf16.gmra.mxu3 %vm241_vm1, %v4130_v2 }
 0x3e0   :  { %5244 = vst [vmem:[#allocation4 + $0x30] sm:$0xff] %v5180_v53  ;;  %v5737_v58 = vld [vmem:[#allocation3 + $0x30] sm:$0xff] }
 0x3e1   :  { %5611 = vst.msk [vmem:[#allocation3 + $0x61] sm:$0xff] %vm5494_vm3, %v5436_v26  ;;  %v4985_v34 = vadd.f32 %v4837_v23, %v4427_v55  ;;  %v11911_v55 = vld [vmem:[%s16693_s0 + $0x188] sm:$0xff] }
 0x3e2   :  { %v5738_v21 = vld [vmem:[#allocation3 + $0x38] sm:$0xff]  ;;  %5245 = vst [vmem:[#allocation4 + $0x38] sm:$0xff] %v5181_v27  ;;  %v4842_v13 = vpop.f32.mrf.mxu0 }
 0x3e3   :  { %v5863_v37 = vpack.c.bf16 %v5738_v21, %v5737_v58  ;;  %5612 = vst.msk [vmem:[#allocation3 + $0x69] sm:$0xff] %vm5494_vm3, %v5437_v33  ;;  %v5182_v61 = vsel %vm14292_vm6, %v4985_v34, 0.0  ;;  %vm5310_vm0 = vcmp.gt.f32.partialorder %v4985_v34, 0.0  ;;  %v5374_v50 = vmul.f32 0.01, %v4985_v34 }
 0x3e4   :  { %5246 = vst [vmem:[#allocation4 + $0x40] sm:$0xff] %v5182_v61  ;;  %v3723_v40 = vpop.f32.mrf.mxu2 }
 0x3e5   :  { %12175 = vmatmul.msk.bf16.gmra.mxu1 %vm5494_vm3, %v5863_v37  ;;  %v5438_v62 = vsel %vm5310_vm0, %v4985_v34, %v5374_v50  ;;  %v3870_v23 = vadd.f32 %v3723_v40, %v13435_v57  ;;  %v5739_v57 = vld [vmem:[#allocation3 + $0x48] sm:$0xff]  ;;  %v4284_v60 = vpop.f32.mrf.mxu3  ;;  %v11910_v37 = vld [vmem:[%s16693_s0 + $0x180] sm:$0xff] }
 0x3e6   :  { %5613 = vst.msk [vmem:[#allocation3 + $0x79] sm:$0xff] %vm5494_vm3, %v5438_v62  ;;  %v5740_v49 = vld [vmem:[#allocation3 + $0x50] sm:$0xff]  ;;  %v3573_v44 = vpack.c.bf16 %v11911_v55, %v11910_v37  ;;  %v4131_v62 = vpack.c.bf16 %v12008_v54, %v12007_v16 }
 0x3e7   :  { %v4428_v36 = vadd.f32 %v4281_v32, %v3870_v23  ;;  %11960 = vmatmul.msk.bf16.gmra.mxu2 %vm241_vm1, %v3572_v4  ;;  %v5864_v45 = vpack.c.bf16 %v5740_v49, %v5739_v57  ;;  %v4689_v4 = vpack.c.bf16 %v12105_v6, %v12104_v17 }
 0x3e9   :  { %v4986_v53 = vadd.f32 %v4839_v7, %v4428_v36 }
 0x3ea   :  { %12154 = vmatmul.msk.bf16.gmra.mxu0 %vm241_vm1, %v4688_v5  ;;  %v4844_v58 = vpop.f32.mrf.mxu0  ;;  %v5742_v2 = vld [vmem:[#allocation3 + $0x68] sm:$0xff] }
 0x3eb   :  { %v5183_v26 = vsel %vm14292_vm6, %v4986_v53, 0.0  ;;  %vm5311_vm4 = vcmp.gt.f32.partialorder %v4986_v53, 0.0  ;;  %v5375_v27 = vmul.f32 0.01, %v4986_v53 }
 0x3ec   :  { %5247 = vst [vmem:[#allocation4 + $0x48] sm:$0xff] %v5183_v26  ;;  %v3726_v38 = vpop.f32.mrf.mxu2 }
 0x3ed   :  { %v5439_v33 = vsel %vm5311_vm4, %v4986_v53, %v5375_v27  ;;  %v3871_v35 = vadd.f32 %v3726_v38, %v13438_v39  ;;  %v4286_v50 = vpop.f32.mrf.mxu3 }
 0x3ee   :  { %5614 = vst.msk [vmem:[#allocation3 + $0x81] sm:$0xff] %vm5494_vm3, %v5439_v33  ;;  %v11912_v33 = vld [vmem:[%s16693_s0 + $0x198] sm:$0xff] }
 0x3ef   :  { %v4429_v21 = vadd.f32 %v4284_v60, %v3871_v35  ;;  %12058 = vmatmul.msk.bf16.gmra.mxu3 %vm241_vm1, %v4131_v62  ;;  %v11913_v35 = vld [vmem:[%s16693_s0 + $0x1a0] sm:$0xff] }
 0x3f1   :  { %v4987_v7 = vadd.f32 %v4842_v13, %v4429_v21  ;;  %v12009_v21 = vld [vmem:[%s16693_s0 + $0x199] sm:$0xff] }
 0x3f2   :  { %v4847_v51 = vpop.f32.mrf.mxu0 }
 0x3f3   :  { %v5184_v34 = vsel %vm14292_vm6, %v4987_v7, 0.0  ;;  %vm5312_vm5 = vcmp.gt.f32.partialorder %v4987_v7, 0.0  ;;  %v5376_v39 = vmul.f32 0.01, %v4987_v7 }
 0x3f4   :  { %5248 = vst [vmem:[#allocation4 + $0x50] sm:$0xff] %v5184_v34  ;;  %v3728_v61 = vpop.f32.mrf.mxu2  ;;  %v12106_v34 = vld [vmem:[%s16693_s0 + $0x19a] sm:$0xff] }
 0x3f5   :  { %12176 = vmatmul.msk.bf16.gmra.mxu1 %vm5494_vm3, %v5864_v45  ;;  %v5440_v40 = vsel %vm5312_vm5, %v4987_v7, %v5376_v39  ;;  %v3872_v32 = vadd.f32 %v3728_v61, %v13453_v19  ;;  %v5741_v19 = vld [vmem:[#allocation3 + $0x60] sm:$0xff]  ;;  %v4289_v49 = vpop.f32.mrf.mxu3  ;;  %v3574_v61 = vpack.c.bf16 %v11913_v35, %v11912_v33  ;;  %v12109_v35 = vld [vmem:[%s16693_s0 + $0x1ea] sm:$0xff] }
 0x3f6   :  { %5615 = vst.msk [vmem:[#allocation3 + $0x91] sm:$0xff] %vm5494_vm3, %v5440_v40  ;;  %v5865_v26 = vpack.c.bf16 %v5742_v2, %v5741_v19  ;;  %v12010_v7 = vld [vmem:[%s16693_s0 + $0x1a1] sm:$0xff] }
 0x3f7   :  { %v4430_v23 = vadd.f32 %v4286_v50, %v3872_v32  ;;  %11961 = vmatmul.msk.bf16.gmra.mxu2 %vm241_vm1, %v3573_v44  ;;  %v12107_v39 = vld [vmem:[%s16693_s0 + $0x1a2] sm:$0xff]  ;;  %v4132_v17 = vpack.c.bf16 %v12010_v7, %v12009_v21 }
 0x3f8   :  { %v4690_v40 = vpack.c.bf16 %v12107_v39, %v12106_v34  ;;  %v5744_v44 = vld [vmem:[#allocation3 + $0x80] sm:$0xff] }
 0x3f9   :  { %v4988_v13 = vadd.f32 %v4844_v58, %v4430_v23  ;;  %v12108_v33 = vld [vmem:[%s16693_s0 + $0x1e2] sm:$0xff] }
 0x3fa   :  { %12155 = vmatmul.msk.bf16.gmra.mxu0 %vm241_vm1, %v4689_v4  ;;  %v4849_v38 = vpop.f32.mrf.mxu0  ;;  %v4691_v34 = vpack.c.bf16 %v12109_v35, %v12108_v33 }
 0x3fb   :  { %v5185_v36 = vsel %vm14292_vm6, %v4988_v13, 0.0  ;;  %vm5313_vm7 = vcmp.gt.f32.partialorder %v4988_v13, 0.0  ;;  %v5377_v5 = vmul.f32 0.01, %v4988_v13 }
 0x3fc   :  { %5249 = vst [vmem:[#allocation4 + $0x58] sm:$0xff] %v5185_v36  ;;  %v3731_v53 = vpop.f32.mrf.mxu2 }
 0x3fd   :  { %v5441_v27 = vsel %vm5313_vm7, %v4988_v13, %v5377_v5  ;;  %v3873_v57 = vadd.f32 %v3731_v53, %v13465_v20  ;;  %v4291_v55 = vpop.f32.mrf.mxu3 }
 0x3fe   :  { %5616 = vst.msk [vmem:[#allocation3 + $0x99] sm:$0xff] %vm5494_vm3, %v5441_v27 }
 0x3ff   :  { %v4431_v60 = vadd.f32 %v4289_v49, %v3873_v57  ;;  %12059 = vmatmul.msk.bf16.gmra.mxu3 %vm241_vm1, %v4132_v17  ;;  %v11914_v49 = vld [vmem:[%s16693_s0 + $0x1e0] sm:$0xff] }
 0x400   :  { %v12011_v57 = vld [vmem:[%s16693_s0 + $0x1e1] sm:$0xff] }
 0x401   :  { %v4989_v45 = vadd.f32 %v4847_v51, %v4431_v60 }
 0x402   :  { %v4852_v50 = vpop.f32.mrf.mxu0 }
 0x403   :  { %v5186_v58 = vsel %vm14292_vm6, %v4989_v45, 0.0  ;;  %vm5314_vm8 = vcmp.gt.f32.partialorder %v4989_v45, 0.0  ;;  %v5378_v20 = vmul.f32 0.01, %v4989_v45 }
 0x404   :  { %5250 = vst [vmem:[#allocation4 + $0x60] sm:$0xff] %v5186_v58  ;;  %v3733_v37 = vpop.f32.mrf.mxu2 }
 0x405   :  { %12177 = vmatmul.msk.bf16.gmra.mxu1 %vm5494_vm3, %v5865_v26  ;;  %v5442_v16 = vsel %vm5314_vm8, %v4989_v45, %v5378_v20  ;;  %v3874_v54 = vadd.f32 %v3733_v37, %v13481_v29  ;;  %v5743_v29 = vld [vmem:[#allocation3 + $0x78] sm:$0xff]  ;;  %v4294_v4 = vpop.f32.mrf.mxu3  ;;  %v11915_v26 = vld [vmem:[%s16693_s0 + $0x1e8] sm:$0xff] }
 0x406   :  { %5617 = vst.msk [vmem:[#allocation3 + $0xa9] sm:$0xff] %vm5494_vm3, %v5442_v16  ;;  %v5866_v13 = vpack.c.bf16 %v5744_v44, %v5743_v29  ;;  %v3575_v21 = vpack.c.bf16 %v11915_v26, %v11914_v49  ;;  %v5746_v16 = vld [vmem:[#allocation3 + $0x98] sm:$0xff] }
 0x407   :  { %v4432_v6 = vadd.f32 %v4291_v55, %v3874_v54  ;;  %11962 = vmatmul.msk.bf16.gmra.mxu2 %vm241_vm1, %v3574_v61  ;;  %v11916_v29 = vld [vmem:[%s16693_s0 + $0x1f8] sm:$0xff] }
 0x409   :  { %v4990_v32 = vadd.f32 %v4849_v38, %v4432_v6  ;;  %v12012_v38 = vld [vmem:[%s16693_s0 + $0x1e9] sm:$0xff] }
 0x40a   :  { %12156 = vmatmul.msk.bf16.gmra.mxu0 %vm241_vm1, %v4690_v40  ;;  %v4854_v5 = vpop.f32.mrf.mxu0  ;;  %v4133_v37 = vpack.c.bf16 %v12012_v38, %v12011_v57 }
 0x40b   :  { %v5187_v51 = vsel %vm14292_vm6, %v4990_v32, 0.0  ;;  %vm5315_vm9 = vcmp.gt.f32.partialorder %v4990_v32, 0.0  ;;  %v5379_v62 = vmul.f32 0.01, %v4990_v32 }
 0x40c   :  { %5251 = vst [vmem:[#allocation4 + $0x68] sm:$0xff] %v5187_v51  ;;  %v3736_v23 = vpop.f32.mrf.mxu2 }
 0x40d   :  { %v5443_v2 = vsel %vm5315_vm9, %v4990_v32, %v5379_v62  ;;  %v3875_v36 = vadd.f32 %v3736_v23, %v13499_v24  ;;  %v4296_v45 = vpop.f32.mrf.mxu3  ;;  %v11917_v23 = vld [vmem:[%s16693_s0 + $0x200] sm:$0xff] }
 0x40e   :  { %5618 = vst.msk [vmem:[#allocation3 + $0xb1] sm:$0xff] %vm5494_vm3, %v5443_v2  ;;  %v12014_v2 = vld [vmem:[%s16693_s0 + $0x201] sm:$0xff] }
 0x40f   :  { %v4433_v19 = vadd.f32 %v4294_v4, %v3875_v36  ;;  %12060 = vmatmul.msk.bf16.gmra.mxu3 %vm241_vm1, %v4133_v37 }
 0x411   :  { %v4991_v53 = vadd.f32 %v4852_v50, %v4433_v19  ;;  %v12110_v19 = vld [vmem:[%s16693_s0 + $0x1fa] sm:$0xff] }
 0x412   :  { %v4857_v7 = vpop.f32.mrf.mxu0 }
 0x413   :  { %v5188_v27 = vsel %vm14292_vm6, %v4991_v53, 0.0  ;;  %vm5316_vm10 = vcmp.gt.f32.partialorder %v4991_v53, 0.0  ;;  %v5380_v24 = vmul.f32 0.01, %v4991_v53 }
 0x414   :  { %5252 = vst [vmem:[#allocation4 + $0x70] sm:$0xff] %v5188_v27  ;;  %v3738_v60 = vpop.f32.mrf.mxu2  ;;  %v3576_v27 = vpack.c.bf16 %v11917_v23, %v11916_v29 }
 0x415   :  { %12178 = vmatmul.msk.bf16.gmra.mxu1 %vm5494_vm3, %v5866_v13  ;;  %v5444_v58 = vsel %vm5316_vm10, %v4991_v53, %v5380_v24  ;;  %v3876_v20 = vadd.f32 %v3738_v60, %v13515_v22  ;;  %v5745_v22 = vld [vmem:[#allocation3 + $0x90] sm:$0xff]  ;;  %v4299_v17 = vpop.f32.mrf.mxu3  ;;  %v12013_v13 = vld [vmem:[%s16693_s0 + $0x1f9] sm:$0xff]  ;;  %v12111_v53 = vld [vmem:[%s16693_s0 + $0x202] sm:$0xff] }
 0x416   :  { %5619 = vst.msk [vmem:[#allocation3 + $0xc1] sm:$0xff] %vm5494_vm3, %v5444_v58  ;;  %v5867_v6 = vpack.c.bf16 %v5746_v16, %v5745_v22  ;;  %v4134_v57 = vpack.c.bf16 %v12014_v2, %v12013_v13  ;;  %v4692_v60 = vpack.c.bf16 %v12111_v53, %v12110_v19  ;;  %v5748_v33 = vld [vmem:[#allocation3 + $0xb0] sm:$0xff]  ;;  %v14726_v16 = vpop.f32.mrf.mxu1  ;;  %v11919_v22 = vld [vmem:[%s16693_s0 + $0x218] sm:$0xff] }
 0x417   :  { %v4434_v55 = vadd.f32 %v4296_v45, %v3876_v20  ;;  %11963 = vmatmul.msk.bf16.gmra.mxu2 %vm241_vm1, %v3575_v21 }
 0x419   :  { %v4992_v39 = vadd.f32 %v4854_v5, %v4434_v55 }
 0x41a   :  { %12157 = vmatmul.msk.bf16.gmra.mxu0 %vm241_vm1, %v4691_v34  ;;  %v4859_v44 = vpop.f32.mrf.mxu0 }
 0x41b   :  { %v5189_v54 = vsel %vm14292_vm6, %v4992_v39, 0.0  ;;  %vm5317_vm11 = vcmp.gt.f32.partialorder %v4992_v39, 0.0  ;;  %v5381_v61 = vmul.f32 0.01, %v4992_v39 }
 0x41c   :  { %5253 = vst [vmem:[#allocation4 + $0x78] sm:$0xff] %v5189_v54  ;;  %v3741_v50 = vpop.f32.mrf.mxu2 }
 0x41d   :  { %v5445_v40 = vsel %vm5317_vm11, %v4992_v39, %v5381_v61  ;;  %v3877_v32 = vadd.f32 %v3741_v50, %v13527_v14  ;;  %v4301_v5 = vpop.f32.mrf.mxu3  ;;  %v11918_v61 = vld [vmem:[%s16693_s0 + $0x210] sm:$0xff] }
 0x41e   :  { %5620 = vst.msk [vmem:[#allocation3 + $0xc9] sm:$0xff] %vm5494_vm3, %v5445_v40  ;;  %v3577_v23 = vpack.c.bf16 %v11919_v22, %v11918_v61  ;;  %v14751_v2 = vpop.f32.mrf.mxu1 }
 0x41f   :  { %v4435_v51 = vadd.f32 %v4299_v17, %v3877_v32  ;;  %12061 = vmatmul.msk.bf16.gmra.mxu3 %vm241_vm1, %v4134_v57  ;;  %v12015_v17 = vld [vmem:[%s16693_s0 + $0x211] sm:$0xff] }
 0x421   :  { %v4993_v62 = vadd.f32 %v4857_v7, %v4435_v51  ;;  %v12113_v51 = vld [vmem:[%s16693_s0 + $0x21a] sm:$0xff] }
 0x422   :  { %v4862_v24 = vpop.f32.mrf.mxu0 }
 0x423   :  { %v5190_v4 = vsel %vm14292_vm6, %v4993_v62, 0.0  ;;  %vm5318_vm12 = vcmp.gt.f32.partialorder %v4993_v62, 0.0  ;;  %v5382_v14 = vmul.f32 0.01, %v4993_v62 }
 0x424   :  { %5254 = vst [vmem:[#allocation4 + $0x80] sm:$0xff] %v5190_v4  ;;  %v3743_v36 = vpop.f32.mrf.mxu2 }
 0x425   :  { %12179 = vmatmul.msk.bf16.gmra.mxu1 %vm5494_vm3, %v5867_v6  ;;  %v5446_v49 = vsel %vm5318_vm12, %v4993_v62, %v5382_v14  ;;  %v3878_v26 = vadd.f32 %v3743_v36, %v13543_v56  ;;  %v5747_v56 = vld [vmem:[#allocation3 + $0xa8] sm:$0xff]  ;;  %v4304_v21 = vpop.f32.mrf.mxu3  ;;  %v12016_v6 = vld [vmem:[%s16693_s0 + $0x219] sm:$0xff] }
 0x426   :  { %5621 = vst.msk [vmem:[#allocation3 + $0xd9] sm:$0xff] %vm5494_vm3, %v5446_v49  ;;  %v5868_v7 = vpack.c.bf16 %v5748_v33, %v5747_v56  ;;  %v4135_v4 = vpack.c.bf16 %v12016_v6, %v12015_v17  ;;  %v5750_v19 = vld [vmem:[#allocation3 + $0xc8] sm:$0xff]  ;;  %v5749_v49 = vld [vmem:[#allocation3 + $0xc0] sm:$0xff]  ;;  %v11921_v56 = vld [vmem:[%s16693_s0 + $0x230] sm:$0xff] }
 0x427   :  { %v4436_v38 = vadd.f32 %v4301_v5, %v3878_v26  ;;  %11964 = vmatmul.msk.bf16.gmra.mxu2 %vm241_vm1, %v3576_v27  ;;  %v5869_v27 = vpack.c.bf16 %v5750_v19, %v5749_v49 }
 0x429   :  { %v4994_v45 = vadd.f32 %v4859_v44, %v4436_v38  ;;  %v12112_v44 = vld [vmem:[%s16693_s0 + $0x212] sm:$0xff] }
 0x42a   :  { %12158 = vmatmul.msk.bf16.gmra.mxu0 %vm241_vm1, %v4692_v60  ;;  %v4864_v34 = vpop.f32.mrf.mxu0  ;;  %v4693_v13 = vpack.c.bf16 %v12113_v51, %v12112_v44 }
 0x42b   :  { %v5191_v35 = vsel %vm14292_vm6, %v4994_v45, 0.0  ;;  %vm5319_vm13 = vcmp.gt.f32.partialorder %v4994_v45, 0.0  ;;  %v5383_v58 = vmul.f32 0.01, %v4994_v45 }
 0x42c   :  { %5255 = vst [vmem:[#allocation4 + $0x88] sm:$0xff] %v5191_v35  ;;  %v3746_v20 = vpop.f32.mrf.mxu2  ;;  %v14761_v35 = vpop.f32.mrf.mxu1 }
 0x42d   :  { %v5447_v37 = vsel %vm5319_vm13, %v4994_v45, %v5383_v58  ;;  %v3879_v55 = vadd.f32 %v3746_v20, %v13555_v15  ;;  %v4306_v32 = vpop.f32.mrf.mxu3  ;;  %v11920_v58 = vld [vmem:[%s16693_s0 + $0x228] sm:$0xff] }
 0x42e   :  { %5622 = vst.msk [vmem:[#allocation3 + $0xe1] sm:$0xff] %vm5494_vm3, %v5447_v37  ;;  %v3578_v22 = vpack.c.bf16 %v11921_v56, %v11920_v58 }
 0x42f   :  { %v4437_v39 = vadd.f32 %v4304_v21, %v3879_v55  ;;  %12062 = vmatmul.msk.bf16.gmra.mxu3 %vm241_vm1, %v4135_v4  ;;  %v12017_v21 = vld [vmem:[%s16693_s0 + $0x229] sm:$0xff] }
 0x430   :  { %v12114_v55 = vld [vmem:[%s16693_s0 + $0x22a] sm:$0xff] }
 0x431   :  { %v4995_v54 = vadd.f32 %v4862_v24, %v4437_v39 }
 0x433   :  { %v5192_v15 = vsel %vm14292_vm6, %v4995_v54, 0.0  ;;  %vm5320_vm14 = vcmp.gt.f32.partialorder %v4995_v54, 0.0  ;;  %v5384_v50 = vmul.f32 0.01, %v4995_v54 }
 0x434   :  { %5256 = vst [vmem:[#allocation4 + $0x90] sm:$0xff] %v5192_v15  ;;  %v3748_v40 = vpop.f32.mrf.mxu2  ;;  %v4867_v36 = vpop.f32.mrf.mxu0 }
 0x435   :  { %12180 = vmatmul.msk.bf16.gmra.mxu1 %vm5494_vm3, %v5868_v7  ;;  %v5448_v62 = vsel %vm5320_vm14, %v4995_v54, %v5384_v50  ;;  %v3880_v29 = vadd.f32 %v3748_v40, %v13571_v18  ;;  %v4309_v38 = vpop.f32.mrf.mxu3  ;;  %v12018_v7 = vld [vmem:[%s16693_s0 + $0x231] sm:$0xff]  ;;  %v5752_v44 = vld [vmem:[#allocation3 + $0xe0] sm:$0xff] }
 0x436   :  { %5623 = vst.msk [vmem:[#allocation3 + $0xf1] sm:$0xff] %vm5494_vm3, %v5448_v62  ;;  %v4136_v15 = vpack.c.bf16 %v12018_v7, %v12017_v21  ;;  %v5751_v62 = vld [vmem:[#allocation3 + $0xd8] sm:$0xff] }
 0x437   :  { %v4438_v14 = vadd.f32 %v4306_v32, %v3880_v29  ;;  %11965 = vmatmul.msk.bf16.gmra.mxu2 %vm241_vm1, %v3577_v23  ;;  %v5870_v23 = vpack.c.bf16 %v5752_v44, %v5751_v62 }
 0x439   :  { %v4996_v5 = vadd.f32 %v4864_v34, %v4438_v14  ;;  %v12115_v34 = vld [vmem:[%s16693_s0 + $0x232] sm:$0xff] }
 0x43a   :  { %12159 = vmatmul.msk.bf16.gmra.mxu0 %vm241_vm1, %v4693_v13  ;;  %v4694_v17 = vpack.c.bf16 %v12115_v34, %v12114_v55 }
 0x43b   :  { %v5193_v53 = vsel %vm14292_vm6, %v4996_v5, 0.0  ;;  %vm5321_vm15 = vcmp.gt.f32.partialorder %v4996_v5, 0.0  ;;  %v5385_v18 = vmul.f32 0.01, %v4996_v5  ;;  %v14786_v32 = vpop.f32.mrf.mxu1 }
 0x43c   :  { %5257 = vst [vmem:[#allocation4 + $0x98] sm:$0xff] %v5193_v53  ;;  %v3751_v26 = vpop.f32.mrf.mxu2  ;;  %v4869_v45 = vpop.f32.mrf.mxu0  ;;  %v11922_v53 = vld [vmem:[%s16693_s0 + $0x240] sm:$0xff] }
 0x43d   :  { %v5449_v24 = vsel %vm5321_vm15, %v4996_v5, %v5385_v18  ;;  %v3881_v57 = vadd.f32 %v3751_v26, %v13583_v41  ;;  %v4311_v61 = vpop.f32.mrf.mxu3  ;;  %v11923_v18 = vld [vmem:[%s16693_s0 + $0x248] sm:$0xff] }
 0x43e   :  { %5624 = vst.msk [vmem:[#allocation3 + $0xf9] sm:$0xff] %vm5494_vm3, %v5449_v24  ;;  %v12019_v26 = vld [vmem:[%s16693_s0 + $0x241] sm:$0xff]  ;;  %v3579_v56 = vpack.c.bf16 %v11923_v18, %v11922_v53 }
 0x43f   :  { %v4439_v60 = vadd.f32 %v4309_v38, %v3881_v57  ;;  %12063 = vmatmul.msk.bf16.gmra.mxu3 %vm241_vm1, %v4136_v15  ;;  %v12116_v38 = vld [vmem:[%s16693_s0 + $0x242] sm:$0xff] }
 0x441   :  { %v4997_v33 = vadd.f32 %v4867_v36, %v4439_v60  ;;  %v12117_v60 = vld [vmem:[%s16693_s0 + $0x24a] sm:$0xff] }
 0x442   :  { %v4695_v21 = vpack.c.bf16 %v12117_v60, %v12116_v38 }
 0x443   :  { %v5194_v41 = vsel %vm14292_vm6, %v4997_v33, 0.0  ;;  %vm5322_vm0 = vcmp.gt.f32.partialorder %v4997_v33, 0.0  ;;  %v5386_v20 = vmul.f32 0.01, %v4997_v33  ;;  %v14809_v24 = vpop.f32.mrf.mxu1 }
 0x444   :  { %5258 = vst [vmem:[#allocation4 + $0xa0] sm:$0xff] %v5194_v41  ;;  %v3753_v37 = vpop.f32.mrf.mxu2  ;;  %v4872_v6 = vpop.f32.mrf.mxu0 }
 0x445   :  { %12181 = vmatmul.msk.bf16.gmra.mxu1 %vm5494_vm3, %v5869_v27  ;;  %v5450_v39 = vsel %vm5322_vm0, %v4997_v33, %v5386_v20  ;;  %v3882_v54 = vadd.f32 %v3753_v37, %v13599_v0  ;;  %v4314_v13 = vpop.f32.mrf.mxu3  ;;  %v12020_v27 = vld [vmem:[%s16693_s0 + $0x249] sm:$0xff]  ;;  %v5754_v55 = vld [vmem:[#allocation3 + $0xf8] sm:$0xff] }
 0x446   :  { %5625 = vst.msk [vmem:[#allocation3 + $0x109] sm:$0xff] %vm5494_vm3, %v5450_v39  ;;  %v4137_v41 = vpack.c.bf16 %v12020_v27, %v12019_v26 }
 0x447   :  { %v4440_v50 = vadd.f32 %v4311_v61, %v3882_v54  ;;  %11966 = vmatmul.msk.bf16.gmra.mxu2 %vm241_vm1, %v3578_v22 }
 0x449   :  { %v4998_v40 = vadd.f32 %v4869_v45, %v4440_v50 }
 0x44a   :  { %12160 = vmatmul.msk.bf16.gmra.mxu0 %vm241_vm1, %v4694_v17 }
 0x44b   :  { %v5195_v51 = vsel %vm14292_vm6, %v4998_v40, 0.0  ;;  %vm5323_vm4 = vcmp.gt.f32.partialorder %v4998_v40, 0.0  ;;  %v5387_v0 = vmul.f32 0.01, %v4998_v40 }
 0x44c   :  { %5259 = vst [vmem:[#allocation4 + $0xa8] sm:$0xff] %v5195_v51  ;;  %v3756_v29 = vpop.f32.mrf.mxu2  ;;  %v4874_v5 = vpop.f32.mrf.mxu0  ;;  %v11924_v51 = vld [vmem:[%s16693_s0 + $0x258] sm:$0xff] }
 0x44d   :  { %v5451_v4 = vsel %vm5323_vm4, %v4998_v40, %v5387_v0  ;;  %v3883_v14 = vadd.f32 %v3756_v29, %v13611_v46  ;;  %v4316_v58 = vpop.f32.mrf.mxu3  ;;  %v11925_v0 = vld [vmem:[%s16693_s0 + $0x260] sm:$0xff] }
 0x44e   :  { %5626 = vst.msk [vmem:[#allocation3 + $0x111] sm:$0xff] %vm5494_vm3, %v5451_v4  ;;  %v12021_v29 = vld [vmem:[%s16693_s0 + $0x259] sm:$0xff]  ;;  %v3580_v53 = vpack.c.bf16 %v11925_v0, %v11924_v51 }
 0x44f   :  { %v4441_v36 = vadd.f32 %v4314_v13, %v3883_v14  ;;  %12064 = vmatmul.msk.bf16.gmra.mxu3 %vm241_vm1, %v4137_v41  ;;  %v12118_v14 = vld [vmem:[%s16693_s0 + $0x25a] sm:$0xff]  ;;  %v12119_v13 = vld [vmem:[%s16693_s0 + $0x262] sm:$0xff] }
 0x450   :  { %v4696_v26 = vpack.c.bf16 %v12119_v13, %v12118_v14 }
 0x451   :  { %v4999_v19 = vadd.f32 %v4872_v6, %v4441_v36 }
 0x453   :  { %v5196_v49 = vsel %vm14292_vm6, %v4999_v19, 0.0  ;;  %vm5324_vm5 = vcmp.gt.f32.partialorder %v4999_v19, 0.0  ;;  %v5388_v46 = vmul.f32 0.01, %v4999_v19 }
 0x454   :  { %5260 = vst [vmem:[#allocation4 + $0xb0] sm:$0xff] %v5196_v49  ;;  %v3758_v57 = vpop.f32.mrf.mxu2 }
 0x455   :  { %12182 = vmatmul.msk.bf16.gmra.mxu1 %vm5494_vm3, %v5870_v23  ;;  %v5452_v45 = vsel %vm5324_vm5, %v4999_v19, %v5388_v46  ;;  %v3884_v33 = vadd.f32 %v3758_v57, %v13627_v31  ;;  %v5753_v31 = vld [vmem:[#allocation3 + $0xf0] sm:$0xff]  ;;  %v4319_v50 = vpop.f32.mrf.mxu3  ;;  %v12022_v23 = vld [vmem:[%s16693_s0 + $0x261] sm:$0xff] }
 0x456   :  { %5627 = vst.msk [vmem:[#allocation3 + $0x121] sm:$0xff] %vm5494_vm3, %v5452_v45  ;;  %v5871_v61 = vpack.c.bf16 %v5754_v55, %v5753_v31  ;;  %v4138_v49 = vpack.c.bf16 %v12022_v23, %v12021_v29  ;;  %v5756_v38 = vld [vmem:[#allocation3 + $0x110] sm:$0xff]  ;;  %v5755_v45 = vld [vmem:[#allocation3 + $0x108] sm:$0xff] }
 0x457   :  { %v4442_v20 = vadd.f32 %v4316_v58, %v3884_v33  ;;  %v4877_v7 = vpop.f32.mrf.mxu0  ;;  %11967 = vmatmul.msk.bf16.gmra.mxu2 %vm241_vm1, %v3579_v56  ;;  %v5872_v58 = vpack.c.bf16 %v5756_v38, %v5755_v45 }
 0x459   :  { %v5000_v37 = vadd.f32 %v4874_v5, %v4442_v20 }
 0x45a   :  { %12161 = vmatmul.msk.bf16.gmra.mxu0 %vm241_vm1, %v4695_v21 }
 0x45b   :  { %v5197_v34 = vsel %vm14292_vm6, %v5000_v37, 0.0  ;;  %vm5325_vm7 = vcmp.gt.f32.partialorder %v5000_v37, 0.0  ;;  %v5389_v39 = vmul.f32 0.01, %v5000_v37 }
 0x45c   :  { %5261 = vst [vmem:[#allocation4 + $0xb8] sm:$0xff] %v5197_v34  ;;  %v3761_v54 = vpop.f32.mrf.mxu2  ;;  %v11926_v34 = vld [vmem:[%s16693_s0 + $0x270] sm:$0xff] }
 0x45d   :  { %v5453_v22 = vsel %vm5325_vm7, %v5000_v37, %v5389_v39  ;;  %v3885_v15 = vadd.f32 %v3761_v54, %v13639_v48  ;;  %v4321_v19 = vpop.f32.mrf.mxu3  ;;  %v11927_v39 = vld [vmem:[%s16693_s0 + $0x278] sm:$0xff] }
 0x45e   :  { %5628 = vst.msk [vmem:[#allocation3 + $0x129] sm:$0xff] %vm5494_vm3, %v5453_v22  ;;  %v12023_v54 = vld [vmem:[%s16693_s0 + $0x271] sm:$0xff]  ;;  %v3581_v51 = vpack.c.bf16 %v11927_v39, %v11926_v34 }
 0x45f   :  { %v4443_v6 = vadd.f32 %v4319_v50, %v3885_v15  ;;  %v4879_v40 = vpop.f32.mrf.mxu0  ;;  %12065 = vmatmul.msk.bf16.gmra.mxu3 %vm241_vm1, %v4138_v49  ;;  %v12120_v15 = vld [vmem:[%s16693_s0 + $0x272] sm:$0xff]  ;;  %v12121_v50 = vld [vmem:[%s16693_s0 + $0x27a] sm:$0xff] }
 0x460   :  { %v4697_v29 = vpack.c.bf16 %v12121_v50, %v12120_v15 }
 0x461   :  { %v5001_v44 = vadd.f32 %v4877_v7, %v4443_v6 }
 0x462   :  { %v14825_v17 = vpop.f32.mrf.mxu1 }
 0x463   :  { %v5198_v48 = vsel %vm14292_vm6, %v5001_v44, 0.0  ;;  %vm5326_vm8 = vcmp.gt.f32.partialorder %v5001_v44, 0.0  ;;  %v5390_v62 = vmul.f32 0.01, %v5001_v44 }
 0x464   :  { %5262 = vst [vmem:[#allocation4 + $0xc0] sm:$0xff] %v5198_v48  ;;  %v3763_v4 = vpop.f32.mrf.mxu2 }
 0x465   :  { %12183 = vmatmul.msk.bf16.gmra.mxu1 %vm5494_vm3, %v5871_v61  ;;  %v5454_v36 = vsel %vm5326_vm8, %v5001_v44, %v5390_v62  ;;  %v3886_v5 = vadd.f32 %v3763_v4, %v13655_v59  ;;  %v4324_v20 = vpop.f32.mrf.mxu3  ;;  %v12024_v61 = vld [vmem:[%s16693_s0 + $0x279] sm:$0xff]  ;;  %v5758_v14 = vld [vmem:[#allocation3 + $0x128] sm:$0xff] }
 0x466   :  { %5629 = vst.msk [vmem:[#allocation3 + $0x139] sm:$0xff] %vm5494_vm3, %v5454_v36  ;;  %v4139_v48 = vpack.c.bf16 %v12024_v61, %v12023_v54  ;;  %v5757_v36 = vld [vmem:[#allocation3 + $0x120] sm:$0xff] }
 0x467   :  { %v4444_v46 = vadd.f32 %v4321_v19, %v3886_v5  ;;  %v4882_v27 = vpop.f32.mrf.mxu0  ;;  %11968 = vmatmul.msk.bf16.gmra.mxu2 %vm241_vm1, %v3580_v53  ;;  %v5873_v19 = vpack.c.bf16 %v5758_v14, %v5757_v36 }
 0x469   :  { %v5002_v57 = vadd.f32 %v4879_v40, %v4444_v46 }
 0x46a   :  { %v14850_v18 = vpop.f32.mrf.mxu1  ;;  %12162 = vmatmul.msk.bf16.gmra.mxu0 %vm241_vm1, %v4696_v26 }
 0x46b   :  { %v5199_v60 = vsel %vm14292_vm6, %v5002_v57, 0.0  ;;  %vm5327_vm9 = vcmp.gt.f32.partialorder %v5002_v57, 0.0  ;;  %v5391_v59 = vmul.f32 0.01, %v5002_v57 }
 0x46c   :  { %5263 = vst [vmem:[#allocation4 + $0xc8] sm:$0xff] %v5199_v60  ;;  %v3766_v33 = vpop.f32.mrf.mxu2  ;;  %v11928_v60 = vld [vmem:[%s16693_s0 + $0x288] sm:$0xff] }
 0x46d   :  { %v5455_v56 = vsel %vm5327_vm9, %v5002_v57, %v5391_v59  ;;  %v3887_v41 = vadd.f32 %v3766_v33, %v13667_v12  ;;  %v4326_v44 = vpop.f32.mrf.mxu3  ;;  %v11929_v59 = vld [vmem:[%s16693_s0 + $0x290] sm:$0xff] }
 0x46e   :  { %5630 = vst.msk [vmem:[#allocation3 + $0x141] sm:$0xff] %vm5494_vm3, %v5455_v56  ;;  %v12025_v33 = vld [vmem:[%s16693_s0 + $0x289] sm:$0xff]  ;;  %v3582_v34 = vpack.c.bf16 %v11929_v59, %v11928_v60 }
 0x46f   :  { %v4445_v7 = vadd.f32 %v4324_v20, %v3887_v41  ;;  %v4884_v37 = vpop.f32.mrf.mxu0  ;;  %12066 = vmatmul.msk.bf16.gmra.mxu3 %vm241_vm1, %v4139_v48  ;;  %v12122_v41 = vld [vmem:[%s16693_s0 + $0x28a] sm:$0xff]  ;;  %v12123_v20 = vld [vmem:[%s16693_s0 + $0x292] sm:$0xff] }
 0x470   :  { %v4698_v54 = vpack.c.bf16 %v12123_v20, %v12122_v41 }
 0x471   :  { %v5003_v55 = vadd.f32 %v4882_v27, %v4445_v7 }
 0x472   :  { %v14859_v21 = vpop.f32.mrf.mxu1 }
 0x473   :  { %v5200_v12 = vsel %vm14292_vm6, %v5003_v55, 0.0  ;;  %vm5328_vm10 = vcmp.gt.f32.partialorder %v5003_v55, 0.0  ;;  %v5392_v31 = vmul.f32 0.01, %v5003_v55 }
 0x474   :  { %5264 = vst [vmem:[#allocation4 + $0xd0] sm:$0xff] %v5200_v12  ;;  %v3768_v22 = vpop.f32.mrf.mxu2 }
 0x475   :  { %12184 = vmatmul.msk.bf16.gmra.mxu1 %vm5494_vm3, %v5872_v58  ;;  %v5456_v6 = vsel %vm5328_vm10, %v5003_v55, %v5392_v31  ;;  %v3888_v40 = vadd.f32 %v3768_v22, %v13683_v43  ;;  %v4329_v46 = vpop.f32.mrf.mxu3  ;;  %v12026_v58 = vld [vmem:[%s16693_s0 + $0x291] sm:$0xff]  ;;  %v5760_v15 = vld [vmem:[#allocation3 + $0x140] sm:$0xff] }
 0x476   :  { %5631 = vst.msk [vmem:[#allocation3 + $0x151] sm:$0xff] %vm5494_vm3, %v5456_v6  ;;  %v4140_v12 = vpack.c.bf16 %v12026_v58, %v12025_v33  ;;  %v5759_v6 = vld [vmem:[#allocation3 + $0x138] sm:$0xff] }
 0x477   :  { %v4446_v62 = vadd.f32 %v4326_v44, %v3888_v40  ;;  %v4887_v23 = vpop.f32.mrf.mxu0  ;;  %11969 = vmatmul.msk.bf16.gmra.mxu2 %vm241_vm1, %v3581_v51  ;;  %v5874_v44 = vpack.c.bf16 %v5760_v15, %v5759_v6 }
 0x479   :  { %v5004_v4 = vadd.f32 %v4884_v37, %v4446_v62 }
 0x47a   :  { %v14884_v0 = vpop.f32.mrf.mxu1  ;;  %12163 = vmatmul.msk.bf16.gmra.mxu0 %vm241_vm1, %v4697_v29 }
 0x47b   :  { %v5201_v13 = vsel %vm14292_vm6, %v5004_v4, 0.0  ;;  %vm5329_vm11 = vcmp.gt.f32.partialorder %v5004_v4, 0.0  ;;  %v5393_v43 = vmul.f32 0.01, %v5004_v4 }
 0x47c   :  { %5265 = vst [vmem:[#allocation4 + $0xd8] sm:$0xff] %v5201_v13  ;;  %v3771_v5 = vpop.f32.mrf.mxu2  ;;  %v11930_v13 = vld [vmem:[%s16693_s0 + $0x2a0] sm:$0xff] }
 0x47d   :  { %v5457_v53 = vsel %vm5329_vm11, %v5004_v4, %v5393_v43  ;;  %v3889_v49 = vadd.f32 %v3771_v5, %v13695_v52  ;;  %v4331_v55 = vpop.f32.mrf.mxu3  ;;  %v11931_v43 = vld [vmem:[%s16693_s0 + $0x2a8] sm:$0xff] }
 0x47e   :  { %5632 = vst.msk [vmem:[#allocation3 + $0x159] sm:$0xff] %vm5494_vm3, %v5457_v53  ;;  %v12027_v5 = vld [vmem:[%s16693_s0 + $0x2a1] sm:$0xff]  ;;  %v3583_v60 = vpack.c.bf16 %v11931_v43, %v11930_v13 }
 0x47f   :  { %v4447_v27 = vadd.f32 %v4329_v46, %v3889_v49  ;;  %v4889_v57 = vpop.f32.mrf.mxu0  ;;  %12067 = vmatmul.msk.bf16.gmra.mxu3 %vm241_vm1, %v4140_v12  ;;  %v12124_v49 = vld [vmem:[%s16693_s0 + $0x2a2] sm:$0xff]  ;;  %v12125_v46 = vld [vmem:[%s16693_s0 + $0x2aa] sm:$0xff] }
 0x480   :  { %v4699_v33 = vpack.c.bf16 %v12125_v46, %v12124_v49 }
 0x481   :  { %v5005_v38 = vadd.f32 %v4887_v23, %v4447_v27 }
 0x482   :  { %v14893_v26 = vpop.f32.mrf.mxu1 }
 0x483   :  { %v5202_v52 = vsel %vm14292_vm6, %v5005_v38, 0.0  ;;  %vm5330_vm12 = vcmp.gt.f32.partialorder %v5005_v38, 0.0  ;;  %v5394_v45 = vmul.f32 0.01, %v5005_v38 }
 0x484   :  { %5266 = vst [vmem:[#allocation4 + $0xe0] sm:$0xff] %v5202_v52  ;;  %v3773_v56 = vpop.f32.mrf.mxu2 }
 0x485   :  { %12185 = vmatmul.msk.bf16.gmra.mxu1 %vm5494_vm3, %v5873_v19  ;;  %v5458_v7 = vsel %vm5330_vm12, %v5005_v38, %v5394_v45  ;;  %v3890_v37 = vadd.f32 %v3773_v56, %v13711_v8  ;;  %v4334_v62 = vpop.f32.mrf.mxu3  ;;  %v12028_v19 = vld [vmem:[%s16693_s0 + $0x2a9] sm:$0xff]  ;;  %v5762_v41 = vld [vmem:[#allocation3 + $0x158] sm:$0xff] }
 0x486   :  { %5633 = vst.msk [vmem:[#allocation3 + $0x169] sm:$0xff] %vm5494_vm3, %v5458_v7  ;;  %v4141_v52 = vpack.c.bf16 %v12028_v19, %v12027_v5  ;;  %v5761_v7 = vld [vmem:[#allocation3 + $0x150] sm:$0xff] }
 0x487   :  { %v4448_v31 = vadd.f32 %v4331_v55, %v3890_v37  ;;  %v4892_v61 = vpop.f32.mrf.mxu0  ;;  %11970 = vmatmul.msk.bf16.gmra.mxu2 %vm241_vm1, %v3582_v34  ;;  %v5875_v55 = vpack.c.bf16 %v5762_v41, %v5761_v7 }
 0x489   :  { %v5006_v22 = vadd.f32 %v4889_v57, %v4448_v31 }
 0x48a   :  { %v14918_v39 = vpop.f32.mrf.mxu1  ;;  %12164 = vmatmul.msk.bf16.gmra.mxu0 %vm241_vm1, %v4698_v54 }
 0x48b   :  { %v5203_v50 = vsel %vm14292_vm6, %v5006_v22, 0.0  ;;  %vm5331_vm13 = vcmp.gt.f32.partialorder %v5006_v22, 0.0  ;;  %v5395_v8 = vmul.f32 0.01, %v5006_v22 }
 0x48c   :  { %5267 = vst [vmem:[#allocation4 + $0xe8] sm:$0xff] %v5203_v50  ;;  %v3776_v40 = vpop.f32.mrf.mxu2  ;;  %v11932_v50 = vld [vmem:[%s16693_s0 + $0x2b8] sm:$0xff] }
 0x48d   :  { %v5459_v51 = vsel %vm5331_vm13, %v5006_v22, %v5395_v8  ;;  %v3891_v48 = vadd.f32 %v3776_v40, %v13723_v63  ;;  %v4336_v38 = vpop.f32.mrf.mxu3  ;;  %v11933_v8 = vld [vmem:[%s16693_s0 + $0x2c0] sm:$0xff] }
 0x48e   :  { %5634 = vst.msk [vmem:[#allocation3 + $0x171] sm:$0xff] %vm5494_vm3, %v5459_v51  ;;  %v12029_v40 = vld [vmem:[%s16693_s0 + $0x2b9] sm:$0xff]  ;;  %v3584_v13 = vpack.c.bf16 %v11933_v8, %v11932_v50 }
 0x48f   :  { %v4449_v23 = vadd.f32 %v4334_v62, %v3891_v48  ;;  %v4894_v4 = vpop.f32.mrf.mxu0  ;;  %12068 = vmatmul.msk.bf16.gmra.mxu3 %vm241_vm1, %v4141_v52  ;;  %v12126_v48 = vld [vmem:[%s16693_s0 + $0x2ba] sm:$0xff]  ;;  %v12127_v62 = vld [vmem:[%s16693_s0 + $0x2c2] sm:$0xff] }
 0x490   :  { %v4700_v5 = vpack.c.bf16 %v12127_v62, %v12126_v48  ;;  %v5765_v48 = vld [vmem:[#allocation3 + $0x1b0] sm:$0xff]  ;;  %v5766_v62 = vld [vmem:[#allocation3 + $0x1b8] sm:$0xff] }
 0x491   :  { %v5007_v14 = vadd.f32 %v4892_v61, %v4449_v23 }
 0x492   :  { %v14927_v29 = vpop.f32.mrf.mxu1 }
 0x493   :  { %v5204_v63 = vsel %vm14292_vm6, %v5007_v14, 0.0  ;;  %vm5332_vm14 = vcmp.gt.f32.partialorder %v5007_v14, 0.0  ;;  %v5396_v36 = vmul.f32 0.01, %v5007_v14 }
 0x494   :  { %5268 = vst [vmem:[#allocation4 + $0xf0] sm:$0xff] %v5204_v63  ;;  %v3778_v53 = vpop.f32.mrf.mxu2 }
 0x495   :  { %12186 = vmatmul.msk.bf16.gmra.mxu1 %vm5494_vm3, %v5874_v44  ;;  %v5460_v27 = vsel %vm5332_vm14, %v5007_v14, %v5396_v36  ;;  %v3892_v57 = vadd.f32 %v3778_v53, %v13739_v3  ;;  %v4339_v31 = vpop.f32.mrf.mxu3  ;;  %v12030_v44 = vld [vmem:[%s16693_s0 + $0x2c1] sm:$0xff]  ;;  %v5764_v49 = vld [vmem:[#allocation3 + $0x170] sm:$0xff] }
 0x496   :  { %5635 = vst.msk [vmem:[#allocation3 + $0x181] sm:$0xff] %vm5494_vm3, %v5460_v27  ;;  %v4142_v63 = vpack.c.bf16 %v12030_v44, %v12029_v40  ;;  %v5763_v27 = vld [vmem:[#allocation3 + $0x168] sm:$0xff] }
 0x497   :  { %v4450_v45 = vadd.f32 %v4336_v38, %v3892_v57  ;;  %v4897_v58 = vpop.f32.mrf.mxu0  ;;  %11971 = vmatmul.msk.bf16.gmra.mxu2 %vm241_vm1, %v3583_v60  ;;  %v5876_v38 = vpack.c.bf16 %v5764_v49, %v5763_v27 }
 0x499   :  { %v5008_v56 = vadd.f32 %v4894_v4, %v4450_v45 }
 0x49a   :  { %v14952_v59 = vpop.f32.mrf.mxu1  ;;  %12165 = vmatmul.msk.bf16.gmra.mxu0 %vm241_vm1, %v4699_v33 }
 0x49b   :  { %v5205_v20 = vsel %vm14292_vm6, %v5008_v56, 0.0  ;;  %vm5333_vm15 = vcmp.gt.f32.partialorder %v5008_v56, 0.0  ;;  %v5397_v3 = vmul.f32 0.01, %v5008_v56 }
 0x49c   :  { %5269 = vst [vmem:[#allocation4 + $0xf8] sm:$0xff] %v5205_v20  ;;  %v3781_v37 = vpop.f32.mrf.mxu2  ;;  %v11934_v20 = vld [vmem:[%s16693_s0 + $0x2d0] sm:$0xff] }
 0x49d   :  { %v5461_v34 = vsel %vm5333_vm15, %v5008_v56, %v5397_v3  ;;  %v3893_v12 = vadd.f32 %v3781_v37, %v13751_v30  ;;  %v4341_v14 = vpop.f32.mrf.mxu3  ;;  %v11935_v3 = vld [vmem:[%s16693_s0 + $0x2d8] sm:$0xff] }
 0x49e   :  { %5636 = vst.msk [vmem:[#allocation3 + $0x189] sm:$0xff] %vm5494_vm3, %v5461_v34  ;;  %v12031_v37 = vld [vmem:[%s16693_s0 + $0x2d1] sm:$0xff]  ;;  %v3585_v50 = vpack.c.bf16 %v11935_v3, %v11934_v20 }
 0x49f   :  { %v4451_v61 = vadd.f32 %v4339_v31, %v3893_v12  ;;  %v4899_v22 = vpop.f32.mrf.mxu0  ;;  %12069 = vmatmul.msk.bf16.gmra.mxu3 %vm241_vm1, %v4142_v63  ;;  %v12128_v12 = vld [vmem:[%s16693_s0 + $0x2d2] sm:$0xff]  ;;  %v12129_v31 = vld [vmem:[%s16693_s0 + $0x2da] sm:$0xff] }
 0x4a0   :  { %v4701_v40 = vpack.c.bf16 %v12129_v31, %v12128_v12 }
 0x4a1   :  { %v5009_v15 = vadd.f32 %v4897_v58, %v4451_v61 }
 0x4a2   :  { %v14961_v54 = vpop.f32.mrf.mxu1 }
 0x4a3   :  { %v5206_v30 = vsel %vm14292_vm6, %v5009_v15, 0.0  ;;  %vm5334_vm0 = vcmp.gt.f32.partialorder %v5009_v15, 0.0  ;;  %v5398_v6 = vmul.f32 0.01, %v5009_v15 }
 0x4a4   :  { %5270 = vst [vmem:[#allocation4 + $0x100] sm:$0xff] %v5206_v30  ;;  %v3783_v51 = vpop.f32.mrf.mxu2 }
 0x4a5   :  { %12187 = vmatmul.msk.bf16.gmra.mxu1 %vm5494_vm3, %v5875_v55  ;;  %v5462_v23 = vsel %vm5334_vm0, %v5009_v15, %v5398_v6  ;;  %v3894_v4 = vadd.f32 %v3783_v51, %v13767_v11  ;;  %v4344_v45 = vpop.f32.mrf.mxu3  ;;  %v12032_v55 = vld [vmem:[%s16693_s0 + $0x2d9] sm:$0xff] }
 0x4a6   :  { %5637 = vst.msk [vmem:[#allocation3 + $0x1c9] sm:$0xff] %vm5494_vm3, %v5462_v23  ;;  %v4143_v30 = vpack.c.bf16 %v12032_v55, %v12031_v37 }
 0x4a7   :  { %v4452_v36 = vadd.f32 %v4341_v14, %v3894_v4  ;;  %v4902_v19 = vpop.f32.mrf.mxu0  ;;  %11972 = vmatmul.msk.bf16.gmra.mxu2 %vm241_vm1, %v3584_v13  ;;  %v5877_v14 = vpack.c.bf16 %v5766_v62, %v5765_v48  ;;  %v11938_v62 = vld [vmem:[%s16693_s0 + $0x300] sm:$0xff] }
 0x4a9   :  { %v5010_v53 = vadd.f32 %v4899_v22, %v4452_v36 }
 0x4aa   :  { %v14986_v43 = vpop.f32.mrf.mxu1  ;;  %12166 = vmatmul.msk.bf16.gmra.mxu0 %vm241_vm1, %v4700_v5 }
 0x4ab   :  { %v5207_v46 = vsel %vm14292_vm6, %v5010_v53, 0.0  ;;  %vm5335_vm4 = vcmp.gt.f32.partialorder %v5010_v53, 0.0  ;;  %v5399_v11 = vmul.f32 0.01, %v5010_v53 }
 0x4ac   :  { %5271 = vst [vmem:[#allocation4 + $0x108] sm:$0xff] %v5207_v46  ;;  %v3786_v57 = vpop.f32.mrf.mxu2  ;;  %v11936_v46 = vld [vmem:[%s16693_s0 + $0x2e8] sm:$0xff] }
 0x4ad   :  { %v5463_v60 = vsel %vm5335_vm4, %v5010_v53, %v5399_v11  ;;  %v3895_v52 = vadd.f32 %v3786_v57, %v13779_v42  ;;  %v4346_v15 = vpop.f32.mrf.mxu3  ;;  %v11937_v11 = vld [vmem:[%s16693_s0 + $0x2f0] sm:$0xff] }
 0x4ae   :  { %5638 = vst.msk [vmem:[#allocation3 + $0x1d1] sm:$0xff] %vm5494_vm3, %v5463_v60  ;;  %v12033_v57 = vld [vmem:[%s16693_s0 + $0x2e9] sm:$0xff]  ;;  %v3586_v20 = vpack.c.bf16 %v11937_v11, %v11936_v46 }
 0x4af   :  { %v4453_v58 = vadd.f32 %v4344_v45, %v3895_v52  ;;  %v4904_v56 = vpop.f32.mrf.mxu0  ;;  %12070 = vmatmul.msk.bf16.gmra.mxu3 %vm241_vm1, %v4143_v30  ;;  %v12130_v52 = vld [vmem:[%s16693_s0 + $0x2ea] sm:$0xff]  ;;  %v12131_v45 = vld [vmem:[%s16693_s0 + $0x2f2] sm:$0xff] }
 0x4b0   :  { %v4702_v37 = vpack.c.bf16 %v12131_v45, %v12130_v52 }
 0x4b1   :  { %v5011_v41 = vadd.f32 %v4902_v19, %v4453_v58 }
 0x4b2   :  { %v14995_v33 = vpop.f32.mrf.mxu1 }
 0x4b3   :  { %v5208_v42 = vsel %vm14292_vm6, %v5011_v41, 0.0  ;;  %vm5336_vm5 = vcmp.gt.f32.partialorder %v5011_v41, 0.0  ;;  %v5400_v7 = vmul.f32 0.01, %v5011_v41 }
 0x4b4   :  { %5272 = vst [vmem:[#allocation4 + $0x110] sm:$0xff] %v5208_v42  ;;  %v3788_v34 = vpop.f32.mrf.mxu2 }
 0x4b5   :  { %12188 = vmatmul.msk.bf16.gmra.mxu1 %vm5494_vm3, %v5876_v38  ;;  %v5464_v61 = vsel %vm5336_vm5, %v5011_v41, %v5400_v7  ;;  %v3896_v22 = vadd.f32 %v3788_v34, %v13795_v10  ;;  %v4349_v36 = vpop.f32.mrf.mxu3  ;;  %v12034_v38 = vld [vmem:[%s16693_s0 + $0x2f1] sm:$0xff] }
 0x4b6   :  { %5639 = vst.msk [vmem:[#allocation3 + $0x1e1] sm:$0xff] %vm5494_vm3, %v5464_v61  ;;  %v4144_v42 = vpack.c.bf16 %v12034_v38, %v12033_v57  ;;  %v5768_v12 = vld [vmem:[#allocation3 + $0x1d0] sm:$0xff]  ;;  %v5767_v61 = vld [vmem:[#allocation3 + $0x1c8] sm:$0xff] }
 0x4b7   :  { %v4454_v6 = vadd.f32 %v4346_v15, %v3896_v22  ;;  %v4907_v44 = vpop.f32.mrf.mxu0  ;;  %11973 = vmatmul.msk.bf16.gmra.mxu2 %vm241_vm1, %v3585_v50  ;;  %v5878_v15 = vpack.c.bf16 %v5768_v12, %v5767_v61  ;;  %v11941_v61 = vld [vmem:[%s16693_s0 + $0x320] sm:$0xff] }
 0x4b9   :  { %v5012_v51 = vadd.f32 %v4904_v56, %v4454_v6 }
 0x4ba   :  { %v15020_v8 = vpop.f32.mrf.mxu1  ;;  %12167 = vmatmul.msk.bf16.gmra.mxu0 %vm241_vm1, %v4701_v40 }
 0x4bb   :  { %v5209_v10 = vsel %vm14292_vm6, %v5012_v51, 0.0  ;;  %vm5337_vm7 = vcmp.gt.f32.partialorder %v5012_v51, 0.0  ;;  %v5401_v23 = vmul.f32 0.01, %v5012_v51 }
 0x4bc   :  { %5273 = vst [vmem:[#allocation4 + $0x118] sm:$0xff] %v5209_v10  ;;  %v3791_v4 = vpop.f32.mrf.mxu2  ;;  %v11939_v10 = vld [vmem:[%s16693_s0 + $0x308] sm:$0xff] }
 0x4bd   :  { %v5465_v13 = vsel %vm5337_vm7, %v5012_v51, %v5401_v23  ;;  %v3897_v63 = vadd.f32 %v3791_v4, %v13807_v28  ;;  %v4351_v41 = vpop.f32.mrf.mxu3  ;;  %v12035_v4 = vld [vmem:[%s16693_s0 + $0x301] sm:$0xff]  ;;  %v3587_v46 = vpack.c.bf16 %v11939_v10, %v11938_v62 }
 0x4be   :  { %5640 = vst.msk [vmem:[#allocation3 + $0x1e9] sm:$0xff] %vm5494_vm3, %v5465_v13  ;;  %v12134_v62 = vld [vmem:[%s16693_s0 + $0x31a] sm:$0xff]  ;;  %v12135_v10 = vld [vmem:[%s16693_s0 + $0x322] sm:$0xff] }
 0x4bf   :  { %v4455_v19 = vadd.f32 %v4349_v36, %v3897_v63  ;;  %v4909_v53 = vpop.f32.mrf.mxu0  ;;  %12071 = vmatmul.msk.bf16.gmra.mxu3 %vm241_vm1, %v4144_v42  ;;  %v12132_v63 = vld [vmem:[%s16693_s0 + $0x302] sm:$0xff]  ;;  %v12133_v36 = vld [vmem:[%s16693_s0 + $0x30a] sm:$0xff] }
 0x4c0   :  { %v4703_v57 = vpack.c.bf16 %v12133_v36, %v12132_v63  ;;  %v16809_v42 = vld [vmem:[#allocation9_spill] sm:$0xff] }
 0x4c1   :  { %v5013_v49 = vadd.f32 %v4907_v44, %v4455_v19 }
 0x4c2   :  { %v15029_v5 = vpop.f32.mrf.mxu1 }
 0x4c3   :  { %v5210_v28 = vsel %vm14292_vm6, %v5013_v49, 0.0  ;;  %vm5338_vm8 = vcmp.gt.f32.partialorder %v5013_v49, 0.0  ;;  %v5402_v27 = vmul.f32 0.01, %v5013_v49 }
 0x4c4   :  { %5274 = vst [vmem:[#allocation4 + $0x120] sm:$0xff] %v5210_v28  ;;  %v3793_v60 = vpop.f32.mrf.mxu2 }
 0x4c5   :  { %12189 = vmatmul.msk.bf16.gmra.mxu1 %vm5494_vm3, %v5877_v14  ;;  %v5466_v58 = vsel %vm5338_vm8, %v5013_v49, %v5402_v27  ;;  %v3898_v56 = vadd.f32 %v3793_v60, %v13823_v1  ;;  %v4354_v6 = vpop.f32.mrf.mxu3  ;;  %v12036_v14 = vld [vmem:[%s16693_s0 + $0x309] sm:$0xff] }
 0x4c6   :  { %5641 = vst.msk [vmem:[#allocation3 + $0x1f9] sm:$0xff] %vm5494_vm3, %v5466_v58  ;;  %v4145_v28 = vpack.c.bf16 %v12036_v14, %v12035_v4  ;;  %v5770_v52 = vld [vmem:[#allocation3 + $0x1e8] sm:$0xff]  ;;  %v5769_v58 = vld [vmem:[#allocation3 + $0x1e0] sm:$0xff] }
 0x4c7   :  { %v4456_v7 = vadd.f32 %v4351_v41, %v3898_v56  ;;  %v4912_v55 = vpop.f32.mrf.mxu0  ;;  %11974 = vmatmul.msk.bf16.gmra.mxu2 %vm241_vm1, %v3586_v20  ;;  %v5879_v41 = vpack.c.bf16 %v5770_v52, %v5769_v58  ;;  %v16813_v52 = vld [vmem:[#allocation12_spill] sm:$0xff] }
 0x4c9   :  { %v5014_v34 = vadd.f32 %v4909_v53, %v4456_v7 }
 0x4ca   :  { %v15054_v3 = vpop.f32.mrf.mxu1  ;;  %12168 = vmatmul.msk.bf16.gmra.mxu0 %vm241_vm1, %v4702_v37 }
 0x4cb   :  { %v5211_v31 = vsel %vm14292_vm6, %v5014_v34, 0.0  ;;  %vm5339_vm9 = vcmp.gt.f32.partialorder %v5014_v34, 0.0  ;;  %v5403_v1 = vmul.f32 0.01, %v5014_v34 }
 0x4cc   :  { %5275 = vst [vmem:[#allocation4 + $0x128] sm:$0xff] %v5211_v31  ;;  %v3796_v22 = vpop.f32.mrf.mxu2 }
 0x4cd   :  { %v5467_v50 = vsel %vm5339_vm9, %v5014_v34, %v5403_v1  ;;  %v3899_v30 = vadd.f32 %v3796_v22, %v13835_v47  ;;  %v4356_v49 = vpop.f32.mrf.mxu3  ;;  %v11940_v1 = vld [vmem:[%s16693_s0 + $0x318] sm:$0xff]  ;;  %v16810_v22 = vld [vmem:[#allocation10_spill] sm:$0xff] }
 0x4ce   :  { %5642 = vst.msk [vmem:[#allocation3 + $0x201] sm:$0xff] %vm5494_vm3, %v5467_v50  ;;  %v3588_v14 = vpack.c.bf16 %v11941_v61, %v11940_v1  ;;  %v12039_v61 = vld [vmem:[%s16693_s0 + $0x331] sm:$0xff] }
 0x4cf   :  { %v4457_v44 = vadd.f32 %v4354_v6, %v3899_v30  ;;  %v4914_v51 = vpop.f32.mrf.mxu0  ;;  %12072 = vmatmul.msk.bf16.gmra.mxu3 %vm241_vm1, %v4145_v28 }
 0x4d1   :  { %v5015_v48 = vadd.f32 %v4912_v55, %v4457_v44  ;;  %v12037_v44 = vld [vmem:[%s16693_s0 + $0x319] sm:$0xff] }
 0x4d2   :  { %v15063_v40 = vpop.f32.mrf.mxu1 }
 0x4d3   :  { %v5212_v47 = vsel %vm14292_vm6, %v5015_v48, 0.0  ;;  %vm5340_vm10 = vcmp.gt.f32.partialorder %v5015_v48, 0.0  ;;  %v5404_v23 = vmul.f32 0.01, %v5015_v48 }
 0x4d4   :  { %5276 = vst [vmem:[#allocation4 + $0x130] sm:$0xff] %v5212_v47  ;;  %v3798_v13 = vpop.f32.mrf.mxu2 }
 0x4d5   :  { %12190 = vmatmul.msk.bf16.gmra.mxu1 %vm5494_vm3, %v5878_v15  ;;  %v5468_v19 = vsel %vm5340_vm10, %v5015_v48, %v5404_v23  ;;  %v3900_v53 = vadd.f32 %v3798_v13, %v13851_v25  ;;  %v4359_v37 = vpop.f32.mrf.mxu3  ;;  %v16811_v15 = vld [vmem:[#allocation8_spill] sm:$0xff] }
 0x4d6   :  { %5643 = vst.msk [vmem:[#allocation3 + $0x211] sm:$0xff] %vm5494_vm3, %v5468_v19  ;;  %v3343_v50 = vadd.f32 %v16811_v15, %v16810_v22  ;;  %v4704_v19 = vpack.c.bf16 %v12135_v10, %v12134_v62  ;;  %v12040_v22 = vld [vmem:[%s16693_s0 + $0x339] sm:$0xff] }
 0x4d7   :  { %v4458_v27 = vadd.f32 %v4356_v49, %v3900_v53  ;;  %v4917_v38 = vpop.f32.mrf.mxu0  ;;  %11975 = vmatmul.msk.bf16.gmra.mxu2 %vm241_vm1, %v3587_v46  ;;  %v5772_v46 = vld [vmem:[#allocation3 + $0x200] sm:$0xff]  ;;  %v4147_v10 = vpack.c.bf16 %v12040_v22, %v12039_v61  ;;  %v12138_v61 = vld [vmem:[%s16693_s0 + $0x34a] sm:$0xff]  ;;  %v12139_v22 = vld [vmem:[%s16693_s0 + $0x352] sm:$0xff] }
 0x4d9   :  { %v5016_v60 = vadd.f32 %v4914_v51, %v4458_v27  ;;  %v12038_v51 = vld [vmem:[%s16693_s0 + $0x321] sm:$0xff]  ;;  %v5771_v27 = vld [vmem:[#allocation3 + $0x1f8] sm:$0xff] }
 0x4da   :  { %v15088_v11 = vpop.f32.mrf.mxu1  ;;  %12169 = vmatmul.msk.bf16.gmra.mxu0 %vm241_vm1, %v4703_v57  ;;  %v4146_v63 = vpack.c.bf16 %v12038_v51, %v12037_v44 }
 0x4db   :  { %v5213_v45 = vsel %vm14292_vm6, %v5016_v60, 0.0  ;;  %vm5341_vm11 = vcmp.gt.f32.partialorder %v5016_v60, 0.0  ;;  %v5405_v25 = vmul.f32 0.01, %v5016_v60 }
 0x4dc   :  { %5277 = vst [vmem:[#allocation4 + $0x138] sm:$0xff] %v5213_v45  ;;  %v3801_v56 = vpop.f32.mrf.mxu2 }
 0x4dd   :  { %v5469_v20 = vsel %vm5341_vm11, %v5016_v60, %v5405_v25  ;;  %v3901_v7 = vadd.f32 %v3801_v56, %v16809_v42  ;;  %v4361_v4 = vpop.f32.mrf.mxu3  ;;  %v11942_v42 = vld [vmem:[%s16693_s0 + $0x330] sm:$0xff] }
 0x4de   :  { %5644 = vst.msk [vmem:[#allocation3 + $0x219] sm:$0xff] %vm5494_vm3, %v5469_v20 }
 0x4df   :  { %v4459_v34 = vadd.f32 %v4359_v37, %v3901_v7  ;;  %v4919_v12 = vpop.f32.mrf.mxu0  ;;  %12073 = vmatmul.msk.bf16.gmra.mxu3 %vm241_vm1, %v4146_v63  ;;  %v11943_v7 = vld [vmem:[%s16693_s0 + $0x338] sm:$0xff]  ;;  %v16814_v37 = vld [vmem:[#allocation13_spill] sm:$0xff] }
 0x4e1   :  { %v5017_v31 = vadd.f32 %v4917_v38, %v4459_v34  ;;  %v5880_v38 = vpack.c.bf16 %v5772_v46, %v5771_v27  ;;  %v16815_v34 = vld [vmem:[#allocation11_spill] sm:$0xff] }
 0x4e2   :  { %v15097_v55 = vpop.f32.mrf.mxu1  ;;  %v16817_v27 = vld [vmem:[#allocation15_spill] sm:$0xff] }
 0x4e3   :  { %v5214_v30 = vsel %vm14292_vm6, %v5017_v31, 0.0  ;;  %vm5342_vm12 = vcmp.gt.f32.partialorder %v5017_v31, 0.0  ;;  %v5406_v6 = vmul.f32 0.01, %v5017_v31 }
 0x4e4   :  { %5278 = vst [vmem:[#allocation4 + $0x140] sm:$0xff] %v5214_v30  ;;  %v3803_v48 = vpop.f32.mrf.mxu2  ;;  %v12137_v30 = vld [vmem:[%s16693_s0 + $0x33a] sm:$0xff] }
 0x4e5   :  { %12191 = vmatmul.msk.bf16.gmra.mxu1 %vm5494_vm3, %v5879_v41  ;;  %v5470_v47 = vsel %vm5342_vm12, %v5017_v31, %v5406_v6  ;;  %v3902_v23 = vadd.f32 %v3803_v48, %v3343_v50  ;;  %v4364_v25 = vpop.f32.mrf.mxu3  ;;  %v12136_v50 = vld [vmem:[%s16693_s0 + $0x332] sm:$0xff]  ;;  %v3589_v48 = vpack.c.bf16 %v11943_v7, %v11942_v42 }
 0x4e6   :  { %5645 = vst.msk [vmem:[#allocation3 + $0x229] sm:$0xff] %vm5494_vm3, %v5470_v47  ;;  %v5774_v63 = vld [vmem:[#allocation3 + $0x218] sm:$0xff]  ;;  %v16819_v42 = vld [vmem:[#allocation14_spill] sm:$0xff] }
 0x4e7   :  { %v4460_v36 = vadd.f32 %v4361_v4, %v3902_v23  ;;  %v4922_v53 = vpop.f32.mrf.mxu0  ;;  %11976 = vmatmul.msk.bf16.gmra.mxu2 %vm241_vm1, %v3588_v14  ;;  %v4705_v23 = vpack.c.bf16 %v12137_v30, %v12136_v50 }
 0x4e9   :  { %v15126_v49 = vadd.f32 %v4919_v12, %v4460_v36  ;;  %v3345_v12 = vadd.f32 %v16815_v34, %v16814_v37 }
 0x4ea   :  { %v15123_v13 = vpop.f32.mrf.mxu1  ;;  %12170 = vmatmul.msk.bf16.gmra.mxu0 %vm241_vm1, %v4704_v19  ;;  %v5773_v19 = vld [vmem:[#allocation3 + $0x210] sm:$0xff] }
 0x4eb   :  { %16812 = vst [vmem:[#allocation9_spill] sm:$0xff] %v15126_v49  ;;  %vm5343_vm13 = vcmp.gt.f32.partialorder %v15126_v49, 0.0  ;;  %v5407_v28 = vmul.f32 0.01, %v15126_v49  ;;  %v5881_v46 = vpack.c.bf16 %v5774_v63, %v5773_v19 }
 0x4ec   :  { %v3806_v57 = vpop.f32.mrf.mxu2 }
 0x4ed   :  { %v5471_v60 = vsel %vm5343_vm13, %v15126_v49, %v5407_v28  ;;  %v3903_v45 = vadd.f32 %v3806_v57, %v16813_v52  ;;  %v4366_v51 = vpop.f32.mrf.mxu3 }
 0x4ee   :  { %5646 = vst.msk [vmem:[#allocation3 + $0x231] sm:$0xff] %vm5494_vm3, %v5471_v60 }
 0x4ef   :  { %v4461_v56 = vadd.f32 %v4364_v25, %v3903_v45  ;;  %v4924_v41 = vpop.f32.mrf.mxu0  ;;  %12074 = vmatmul.msk.bf16.gmra.mxu3 %vm241_vm1, %v4147_v10  ;;  %v4706_v10 = vpack.c.bf16 %v12139_v22, %v12138_v61 }
 0x4f1   :  { %v5019_v20 = vadd.f32 %v4922_v53, %v4461_v56  ;;  %v11944_v56 = vld [vmem:[%s16693_s0 + $0x348] sm:$0xff] }
 0x4f2   :  { %v15135_v58 = vpop.f32.mrf.mxu1 }
 0x4f3   :  { %v5216_v31 = vsel %vm14292_vm6, %v5019_v20, 0.0  ;;  %vm5344_vm14 = vcmp.gt.f32.partialorder %v5019_v20, 0.0  ;;  %v5408_v1 = vmul.f32 0.01, %v5019_v20 }
 0x4f4   :  { %5280 = vst [vmem:[#allocation4 + $0x150] sm:$0xff] %v5216_v31  ;;  %v3808_v15 = vpop.f32.mrf.mxu2  ;;  %v12042_v31 = vld [vmem:[%s16693_s0 + $0x351] sm:$0xff] }
 0x4f5   :  { %12192 = vmatmul.msk.bf16.gmra.mxu1 %vm5494_vm3, %v5880_v38  ;;  %v5472_v6 = vsel %vm5344_vm14, %v5019_v20, %v5408_v1  ;;  %v3904_v44 = vadd.f32 %v3808_v15, %v3345_v12  ;;  %v4369_v38 = vpop.f32.mrf.mxu3  ;;  %v16818_v20 = vld [vmem:[#allocation16_spill] sm:$0xff]  ;;  %v12041_v12 = vld [vmem:[%s16693_s0 + $0x349] sm:$0xff] }
 0x4f6   :  { %5647 = vst.msk [vmem:[#allocation3 + $0x241] sm:$0xff] %vm5494_vm3, %v5472_v6  ;;  %v3347_v7 = vadd.f32 %v16819_v42, %v16818_v20  ;;  %v16822_v20 = vld [vmem:[#allocation19_spill] sm:$0xff]  ;;  %v16823_v42 = vld [vmem:[#allocation17_spill] sm:$0xff] }
 0x4f7   :  { %v4462_v47 = vadd.f32 %v4366_v51, %v3904_v44  ;;  %v4927_v4 = vpop.f32.mrf.mxu0  ;;  %11977 = vmatmul.msk.bf16.gmra.mxu2 %vm241_vm1, %v3589_v48  ;;  %v4148_v51 = vpack.c.bf16 %v12042_v31, %v12041_v12  ;;  %v6849_v12 = vld [vmem:[#allocation3 + $0x2] sm:$0xff]  ;;  %v6850_v31 = vld [vmem:[#allocation3 + $0xa] sm:$0xff] }
 0x4f9   :  { %v15164_v14 = vadd.f32 %v4924_v41, %v4462_v47  ;;  %v11945_v41 = vld [vmem:[%s16693_s0 + $0x350] sm:$0xff] }
 0x4fa   :  { %v15161_v62 = vpop.f32.mrf.mxu1  ;;  %12171 = vmatmul.msk.bf16.gmra.mxu0 %vm241_vm1, %v4705_v23  ;;  %v3590_v6 = vpack.c.bf16 %v11945_v41, %v11944_v56  ;;  %v6291_v56 = vld [vmem:[#allocation3 + $0x1] sm:$0xff]  ;;  %v6292_v41 = vld [vmem:[#allocation3 + $0x9] sm:$0xff] }
 0x4fb   :  { %16816 = vst [vmem:[#allocation10_spill] sm:$0xff] %v15164_v14  ;;  %vm5345_vm15 = vcmp.gt.f32.partialorder %v15164_v14, 0.0  ;;  %v5409_v36 = vmul.f32 0.01, %v15164_v14 }
 0x4fc   :  { %v3811_v53 = vpop.f32.mrf.mxu2 }
 0x4fd   :  { %v5473_v28 = vsel %vm5345_vm15, %v15164_v14, %v5409_v36  ;;  %v3905_v57 = vadd.f32 %v3811_v53, %v16817_v27  ;;  %v4371_v30 = vpop.f32.mrf.mxu3  ;;  %v5775_v36 = vld [vmem:[#allocation3 + $0x228] sm:$0xff]  ;;  %v7417_v14 = vld [vmem:[#allocation3 + $0x90] sm:$0xff] }
 0x4fe   :  { %5648 = vst.msk [vmem:[#allocation3 + $0x249] sm:$0xff] %vm5494_vm3, %v5473_v28  ;;  %v16821_v28 = vld [vmem:[#allocation18_spill] sm:$0xff] }
 0x4ff   :  { %v4463_v52 = vadd.f32 %v4369_v38, %v3905_v57  ;;  %v4929_v45 = vpop.f32.mrf.mxu0  ;;  %12075 = vmatmul.msk.bf16.gmra.mxu3 %vm241_vm1, %v4148_v51  ;;  %v7408_v51 = vld [vmem:[#allocation3 + $0x20] sm:$0xff] }
 0x501   :  { %v5021_v25 = vadd.f32 %v4927_v4, %v4463_v52  ;;  %v5776_v4 = vld [vmem:[#allocation3 + $0x230] sm:$0xff] }
 0x502   :  { %v15173_v60 = vpop.f32.mrf.mxu1  ;;  %v5882_v53 = vpack.c.bf16 %v5776_v4, %v5775_v36 }
 0x503   :  { %v5218_v37 = vsel %vm14292_vm6, %v5021_v25, 0.0  ;;  %vm5346_vm0 = vcmp.gt.f32.partialorder %v5021_v25, 0.0  ;;  %v5410_v34 = vmul.f32 0.01, %v5021_v25 }
 0x504   :  { %5282 = vst [vmem:[#allocation4 + $0x160] sm:$0xff] %v5218_v37  ;;  %v3813_v1 = vpop.f32.mrf.mxu2 }
 0x505   :  { %12193 = vmatmul.msk.bf16.gmra.mxu1 %vm5494_vm3, %v5881_v46  ;;  %v5474_v15 = vsel %vm5346_vm0, %v5021_v25, %v5410_v34  ;;  %v3906_v50 = vadd.f32 %v3813_v1, %v3347_v7  ;;  %v4374_v57 = vpop.f32.mrf.mxu3  ;;  %v3349_v7 = vadd.f32 %v16823_v42, %v16822_v20  ;;  %v5778_v36 = vld [vmem:[#allocation3 + $0x248] sm:$0xff]  ;;  %v16826_v42 = vld [vmem:[#allocation22_spill] sm:$0xff] }
 0x506   :  { %5649 = vst.msk [vmem:[#allocation3 + $0x259] sm:$0xff] %vm5494_vm3, %v5474_v15 }
 0x507   :  { %v4464_v48 = vadd.f32 %v4371_v30, %v3906_v50  ;;  %v4932_v47 = vpop.f32.mrf.mxu0  ;;  %11978 = vmatmul.msk.bf16.gmra.mxu2 %vm241_vm1, %v3590_v6  ;;  %v6419_v50 = vpack.c.bf16 %v6292_v41, %v6291_v56  ;;  %v6977_v6 = vpack.c.bf16 %v6850_v31, %v6849_v12 }
 0x509   :  { %v15202_v23 = vadd.f32 %v4929_v45, %v4464_v48 }
 0x50a   :  { %v15199_v44 = vpop.f32.mrf.mxu1  ;;  %12172 = vmatmul.msk.bf16.gmra.mxu0 %vm241_vm1, %v4706_v10 }
 0x50b   :  { %16820 = vst [vmem:[#allocation8_spill] sm:$0xff] %v15202_v23  ;;  %vm5347_vm4 = vcmp.gt.f32.partialorder %v15202_v23, 0.0  ;;  %v5411_v63 = vmul.f32 0.01, %v15202_v23 }
 0x50c   :  { %v3816_v19 = vpop.f32.mrf.mxu2 }
 0x50d   :  { %v5475_v46 = vsel %vm5347_vm4, %v15202_v23, %v5411_v63  ;;  %v3907_v27 = vadd.f32 %v3816_v19, %v16821_v28  ;;  %v4376_v15 = vpop.f32.mrf.mxu3 }
 0x50e   :  { %5650 = vst.msk [vmem:[#allocation3 + $0x261] sm:$0xff] %vm5494_vm3, %v5475_v46 }
 0x50f   :  { %v4465_v52 = vadd.f32 %v4374_v57, %v3907_v27  ;;  %v4934_v45 = vpop.f32.mrf.mxu0  ;;  %12239 = vmatmul.msk.bf16.vlgmr.msrb.gmra.mxu3 %vm5494_vm3, %v6977_v6  ;;  %v16825_v57 = vld [vmem:[#allocation21_spill] sm:$0xff] }
 0x510   :  { %v6852_v6 = vld [vmem:[#allocation3 + $0x22] sm:$0xff] }
 0x511   :  { %v5023_v25 = vadd.f32 %v4932_v47, %v4465_v52  ;;  %v7407_v47 = vld [vmem:[#allocation3 + $0x18] sm:$0xff] }
 0x512   :  { %v15211_v38 = vpop.f32.mrf.mxu1  ;;  %v7535_v63 = vpack.c.bf16 %v7408_v51, %v7407_v47 }
 0x513   :  { %v5220_v37 = vsel %vm14292_vm6, %v5023_v25, 0.0  ;;  %vm5348_vm1 = vcmp.gt.f32.partialorder %v5023_v25, 0.0  ;;  %v5412_v34 = vmul.f32 0.01, %v5023_v25 }
 0x514   :  { %5284 = vst [vmem:[#allocation4 + $0x170] sm:$0xff] %v5220_v37  ;;  %v3818_v1 = vpop.f32.mrf.mxu2 }
 0x515   :  { %12194 = vmatmul.msk.bf16.gmra.mxu1 %vm5494_vm3, %v5882_v53  ;;  %v5476_v61 = vsel %vm5348_vm1, %v5023_v25, %v5412_v34  ;;  %v3908_v22 = vadd.f32 %v3818_v1, %v3349_v7  ;;  %v5777_v53 = vld [vmem:[#allocation3 + $0x240] sm:$0xff] }
 0x516   :  { %5651 = vst.msk [vmem:[#allocation3 + $0x271] sm:$0xff] %vm5494_vm3, %v5476_v61  ;;  %v5883_v28 = vpack.c.bf16 %v5778_v36, %v5777_v53  ;;  %v16827_v7 = vld [vmem:[#allocation20_spill] sm:$0xff]  ;;  %v7409_v53 = vld [vmem:[#allocation3 + $0x30] sm:$0xff] }
 0x517   :  { %v4466_v48 = vadd.f32 %v4376_v15, %v3908_v22  ;;  %v4937_v10 = vpop.f32.mrf.mxu0  ;;  %12206 = vmatmul.msk.bf16.vlgmr.msrb.gmra.mxu2 %vm5494_vm3, %v6419_v50  ;;  %v3351_v37 = vadd.f32 %v16827_v7, %v16826_v42  ;;  %v6294_v1 = vld [vmem:[#allocation3 + $0x21] sm:$0xff] }
 0x518   :  { %v6851_v50 = vld [vmem:[#allocation3 + $0x1a] sm:$0xff] }
 0x519   :  { %v15222_v4 = vadd.f32 %v4934_v45, %v4466_v48  ;;  %v4379_v45 = vpop.f32.mrf.mxu3  ;;  %v6293_v48 = vld [vmem:[#allocation3 + $0x19] sm:$0xff] }
 0x51a   :  { %v15219_v30 = vpop.f32.mrf.mxu1  ;;  %12272 = vmatmul.msk.bf16.vlgmr.msrb.gmra.mxu0 %vm5494_vm3, %v7535_v63  ;;  %v15242_v63 = vpack.c.bf16 %v6294_v1, %v6293_v48  ;;  %v16830_v1 = vld [vmem:[#allocation24_spill] sm:$0xff] }
 0x51b   :  { %16824 = vst [vmem:[#allocation12_spill] sm:$0xff] %v15222_v4  ;;  %vm5349_vm5 = vcmp.gt.f32.partialorder %v15222_v4, 0.0  ;;  %v5413_v19 = vmul.f32 0.01, %v15222_v4  ;;  %v6296_v48 = vld [vmem:[#allocation3 + $0x39] sm:$0xff] }
 0x51c   :  { %v3821_v46 = vpop.f32.mrf.mxu2 }
 0x51d   :  { %v5477_v27 = vsel %vm5349_vm5, %v15222_v4, %v5413_v19  ;;  %v3909_v52 = vadd.f32 %v3821_v46, %v16825_v57  ;;  %v6978_v19 = vpack.c.bf16 %v6852_v6, %v6851_v50 }
 0x51e   :  { %5652 = vst.msk [vmem:[#allocation3 + $0x279] sm:$0xff] %vm5494_vm3, %v5477_v27  ;;  %v5780_v27 = vld [vmem:[#allocation3 + $0x260] sm:$0xff] }
 0x51f   :  { %v4467_v56 = vadd.f32 %v4379_v45, %v3909_v52  ;;  %v4939_v41 = vpop.f32.mrf.mxu0  ;;  %12240 = vmatmul.msk.bf16.gmra.mxu3 %vm5494_vm3, %v6978_v19  ;;  %v5779_v52 = vld [vmem:[#allocation3 + $0x258] sm:$0xff] }
 0x521   :  { %v5025_v20 = vadd.f32 %v4937_v10, %v4467_v56  ;;  %v4381_v15 = vpop.f32.mrf.mxu3  ;;  %v7410_v10 = vld [vmem:[#allocation3 + $0x38] sm:$0xff]  ;;  %v5884_v56 = vpack.c.bf16 %v5780_v27, %v5779_v52 }
 0x522   :  { %v15231_v25 = vpop.f32.mrf.mxu1 }
 0x523   :  { %v5222_v34 = vsel %vm14292_vm6, %v5025_v20, 0.0  ;;  %vm5350_vm7 = vcmp.gt.f32.partialorder %v5025_v20, 0.0  ;;  %v5414_v12 = vmul.f32 0.01, %v5025_v20 }
 0x524   :  { %5286 = vst [vmem:[#allocation4 + $0x180] sm:$0xff] %v5222_v34  ;;  %v3823_v31 = vpop.f32.mrf.mxu2 }
 0x525   :  { %12195 = vmatmul.msk.bf16.gmra.mxu1 %vm5494_vm3, %v5883_v28  ;;  %v5478_v61 = vsel %vm5350_vm7, %v5025_v20, %v5414_v12  ;;  %v3910_v22 = vadd.f32 %v3823_v31, %v3351_v37  ;;  %v7536_v28 = vpack.c.bf16 %v7410_v10, %v7409_v53  ;;  %v6853_v53 = vld [vmem:[#allocation3 + $0x32] sm:$0xff] }
 0x526   :  { %5653 = vst.msk [vmem:[#allocation3 + $0x289] sm:$0xff] %vm5494_vm3, %v5478_v61  ;;  %v16831_v61 = vld [vmem:[#allocation23_spill] sm:$0xff] }
 0x527   :  { %v4468_v47 = vadd.f32 %v4381_v15, %v3910_v22  ;;  %v4942_v36 = vpop.f32.mrf.mxu0  ;;  %12207 = vmatmul.msk.bf16.gmra.mxu2 %vm5494_vm3, %v15242_v63  ;;  %v3353_v22 = vadd.f32 %v16831_v61, %v16830_v1  ;;  %v5781_v1 = vld [vmem:[#allocation3 + $0x270] sm:$0xff] }
 0x529   :  { %v15244_v46 = vadd.f32 %v4939_v41, %v4468_v47  ;;  %v16829_v41 = vld [vmem:[#allocation37_spill] sm:$0xff]  ;;  %v4384_v7 = vpop.f32.mrf.mxu3 }
 0x52a   :  { %v15239_v51 = vpop.f32.mrf.mxu1  ;;  %12273 = vmatmul.msk.bf16.gmra.mxu0 %vm5494_vm3, %v7536_v28  ;;  %v6854_v28 = vld [vmem:[#allocation3 + $0x3a] sm:$0xff] }
 0x52b   :  { %16828 = vst [vmem:[#allocation13_spill] sm:$0xff] %v15244_v46  ;;  %vm5351_vm8 = vcmp.gt.f32.partialorder %v15244_v46, 0.0  ;;  %v5415_v57 = vmul.f32 0.01, %v15244_v46 }
 0x52c   :  { %v3826_v45 = vpop.f32.mrf.mxu2 }
 0x52d   :  { %v5479_v20 = vsel %vm5351_vm8, %v15244_v46, %v5415_v57  ;;  %v3911_v42 = vadd.f32 %v3826_v45, %v16829_v41  ;;  %v7412_v57 = vld [vmem:[#allocation3 + $0x50] sm:$0xff]  ;;  %v7411_v41 = vld [vmem:[#allocation3 + $0x48] sm:$0xff]  ;;  %v7415_v46 = vld [vmem:[#allocation3 + $0x78] sm:$0xff] }
 0x52e   :  { %5654 = vst.msk [vmem:[#allocation3 + $0x291] sm:$0xff] %vm5494_vm3, %v5479_v20  ;;  %v6979_v20 = vpack.c.bf16 %v6854_v28, %v6853_v53  ;;  %v16834_v53 = vld [vmem:[#allocation26_spill] sm:$0xff]  ;;  %v16835_v28 = vld [vmem:[#allocation25_spill] sm:$0xff] }
 0x52f   :  { %v4469_v34 = vadd.f32 %v4384_v7, %v3911_v42  ;;  %v4944_v12 = vpop.f32.mrf.mxu0  ;;  %v7537_v7 = vpack.c.bf16 %v7412_v57, %v7411_v41  ;;  %v6298_v41 = vld [vmem:[#allocation3 + $0x51] sm:$0xff] }
 0x530   :  { %12241 = vmatmul.msk.bf16.gmra.mxu3 %vm5494_vm3, %v6979_v20 }
 0x531   :  { %v5027_v31 = vadd.f32 %v4942_v36, %v4469_v34  ;;  %v4386_v19 = vpop.f32.mrf.mxu3  ;;  %v6295_v36 = vld [vmem:[#allocation3 + $0x31] sm:$0xff] }
 0x532   :  { %v15254_v37 = vpop.f32.mrf.mxu1  ;;  %v15265_v45 = vpack.c.bf16 %v6296_v48, %v6295_v36  ;;  %v5782_v34 = vld [vmem:[#allocation3 + $0x278] sm:$0xff]  ;;  %v3355_v36 = vadd.f32 %v16835_v28, %v16834_v53  ;;  %v7413_v53 = vld [vmem:[#allocation3 + $0x60] sm:$0xff] }
 0x533   :  { %v5224_v15 = vsel %vm14292_vm6, %v5027_v31, 0.0  ;;  %vm5352_vm9 = vcmp.gt.f32.partialorder %v5027_v31, 0.0  ;;  %v5416_v50 = vmul.f32 0.01, %v5027_v31 }
 0x534   :  { %5288 = vst [vmem:[#allocation4 + $0x190] sm:$0xff] %v5224_v15  ;;  %v3828_v6 = vpop.f32.mrf.mxu2 }
 0x535   :  { %12196 = vmatmul.msk.bf16.gmra.mxu1 %vm5494_vm3, %v5884_v56  ;;  %v5480_v10 = vsel %vm5352_vm9, %v5027_v31, %v5416_v50  ;;  %v3912_v47 = vadd.f32 %v3828_v6, %v3353_v22  ;;  %v5885_v22 = vpack.c.bf16 %v5782_v34, %v5781_v1  ;;  %v6855_v1 = vld [vmem:[#allocation3 + $0x4a] sm:$0xff] }
 0x536   :  { %5655 = vst.msk [vmem:[#allocation3 + $0x2a1] sm:$0xff] %vm5494_vm3, %v5480_v10 }
 0x537   :  { %v4470_v52 = vadd.f32 %v4386_v19, %v3912_v47  ;;  %v4947_v56 = vpop.f32.mrf.mxu0  ;;  %12208 = vmatmul.msk.bf16.gmra.mxu2 %vm5494_vm3, %v15265_v45 }
 0x539   :  { %v15267_v42 = vadd.f32 %v4944_v12, %v4470_v52  ;;  %v16833_v12 = vld [vmem:[#allocation38_spill] sm:$0xff]  ;;  %v4389_v6 = vpop.f32.mrf.mxu3 }
 0x53a   :  { %v15262_v27 = vpop.f32.mrf.mxu1  ;;  %12274 = vmatmul.msk.bf16.gmra.mxu0 %vm5494_vm3, %v7537_v7 }
 0x53b   :  { %16832 = vst [vmem:[#allocation11_spill] sm:$0xff] %v15267_v42  ;;  %vm5353_vm10 = vcmp.gt.f32.partialorder %v15267_v42, 0.0  ;;  %v5417_v31 = vmul.f32 0.01, %v15267_v42 }
 0x53c   :  { %v3831_v61 = vpop.f32.mrf.mxu2 }
 0x53d   :  { %v5481_v15 = vsel %vm5353_vm10, %v15267_v42, %v5417_v31  ;;  %v3913_v50 = vadd.f32 %v3831_v61, %v16833_v12  ;;  %v6856_v61 = vld [vmem:[#allocation3 + $0x52] sm:$0xff] }
 0x53e   :  { %5656 = vst.msk [vmem:[#allocation3 + $0x2a9] sm:$0xff] %vm5494_vm3, %v5481_v15 }
 0x53f   :  { %v4471_v10 = vadd.f32 %v4389_v6, %v3913_v50  ;;  %v4949_v47 = vpop.f32.mrf.mxu0 }
 0x541   :  { %v5029_v19 = vadd.f32 %v4947_v56, %v4471_v10  ;;  %v4391_v31 = vpop.f32.mrf.mxu3  ;;  %v6297_v56 = vld [vmem:[#allocation3 + $0x49] sm:$0xff]  ;;  %v6980_v10 = vpack.c.bf16 %v6856_v61, %v6855_v1 }
 0x542   :  { %v15277_v48 = vpop.f32.mrf.mxu1  ;;  %v15288_v50 = vpack.c.bf16 %v6298_v41, %v6297_v56 }
 0x543   :  { %v5226_v57 = vsel %vm14292_vm6, %v5029_v19, 0.0  ;;  %vm5354_vm11 = vcmp.gt.f32.partialorder %v5029_v19, 0.0  ;;  %v5418_v52 = vmul.f32 0.01, %v5029_v19  ;;  %12242 = vmatmul.msk.bf16.gmra.mxu3 %vm5494_vm3, %v6980_v10  ;;  %v16840_v10 = vld [vmem:[#allocation27_spill] sm:$0xff] }
 0x544   :  { %5290 = vst [vmem:[#allocation4 + $0x1a0] sm:$0xff] %v5226_v57  ;;  %v3833_v20 = vpop.f32.mrf.mxu2 }
 0x545   :  { %12197 = vmatmul.msk.bf16.gmra.mxu1 %vm5494_vm3, %v5885_v22  ;;  %v5482_v7 = vsel %vm5354_vm11, %v5029_v19, %v5418_v52  ;;  %v3914_v34 = vadd.f32 %v3833_v20, %v3355_v36  ;;  %v7414_v22 = vld [vmem:[#allocation3 + $0x68] sm:$0xff]  ;;  %v5784_v36 = vld [vmem:[#allocation3 + $0x290] sm:$0xff] }
 0x546   :  { %5657 = vst.msk [vmem:[#allocation3 + $0x2b9] sm:$0xff] %vm5494_vm3, %v5482_v7  ;;  %v7538_v19 = vpack.c.bf16 %v7414_v22, %v7413_v53  ;;  %v5783_v52 = vld [vmem:[#allocation3 + $0x288] sm:$0xff] }
 0x547   :  { %v4472_v12 = vadd.f32 %v4391_v31, %v3914_v34  ;;  %v4952_v6 = vpop.f32.mrf.mxu0  ;;  %12209 = vmatmul.msk.bf16.gmra.mxu2 %vm5494_vm3, %v15288_v50  ;;  %v5886_v41 = vpack.c.bf16 %v5784_v36, %v5783_v52  ;;  %v6300_v52 = vld [vmem:[#allocation3 + $0x69] sm:$0xff] }
 0x549   :  { %v15290_v28 = vadd.f32 %v4949_v47, %v4472_v12  ;;  %v16837_v47 = vld [vmem:[#allocation39_spill] sm:$0xff]  ;;  %v4394_v31 = vpop.f32.mrf.mxu3  ;;  %v16839_v12 = vld [vmem:[#allocation28_spill] sm:$0xff] }
 0x54a   :  { %v15285_v15 = vpop.f32.mrf.mxu1  ;;  %12275 = vmatmul.msk.bf16.gmra.mxu0 %vm5494_vm3, %v7538_v19  ;;  %v3357_v53 = vadd.f32 %v16840_v10, %v16839_v12 }
 0x54b   :  { %16836 = vst [vmem:[#allocation15_spill] sm:$0xff] %v15290_v28  ;;  %vm5355_vm12 = vcmp.gt.f32.partialorder %v15290_v28, 0.0  ;;  %v5419_v57 = vmul.f32 0.01, %v15290_v28 }
 0x54c   :  { %v3836_v20 = vpop.f32.mrf.mxu2 }
 0x54d   :  { %v5483_v7 = vsel %vm5355_vm12, %v15290_v28, %v5419_v57  ;;  %v3915_v34 = vadd.f32 %v3836_v20, %v16837_v47 }
 0x54e   :  { %5658 = vst.msk [vmem:[#allocation3 + $0x2c1] sm:$0xff] %vm5494_vm3, %v5483_v7  ;;  %v6857_v7 = vld [vmem:[#allocation3 + $0x62] sm:$0xff] }
 0x54f   :  { %v4473_v61 = vadd.f32 %v4394_v31, %v3915_v34  ;;  %v4954_v56 = vpop.f32.mrf.mxu0  ;;  %v6858_v34 = vld [vmem:[#allocation3 + $0x6a] sm:$0xff] }
 0x550   :  { %v6981_v42 = vpack.c.bf16 %v6858_v34, %v6857_v7 }
 0x551   :  { %v5031_v22 = vadd.f32 %v4952_v6, %v4473_v61  ;;  %v4396_v28 = vpop.f32.mrf.mxu3  ;;  %v6299_v6 = vld [vmem:[#allocation3 + $0x61] sm:$0xff] }
 0x552   :  { %v15300_v1 = vpop.f32.mrf.mxu1  ;;  %v15311_v12 = vpack.c.bf16 %v6300_v52, %v6299_v6 }
 0x553   :  { %16838 = vst [vmem:[#allocation16_spill] sm:$0xff] %v15300_v1  ;;  %v5228_v19 = vsel %vm14292_vm6, %v5031_v22, 0.0  ;;  %vm5356_vm13 = vcmp.gt.f32.partialorder %v5031_v22, 0.0  ;;  %v5420_v36 = vmul.f32 0.01, %v5031_v22  ;;  %12243 = vmatmul.msk.bf16.gmra.mxu3 %vm5494_vm3, %v6981_v42  ;;  %v7421_v1 = vld [vmem:[#allocation3 + $0xc0] sm:$0xff] }
 0x554   :  { %5292 = vst [vmem:[#allocation4 + $0x1b0] sm:$0xff] %v5228_v19  ;;  %v3838_v57 = vpop.f32.mrf.mxu2 }
 0x555   :  { %12198 = vmatmul.msk.bf16.gmra.mxu1 %vm5494_vm3, %v5886_v41  ;;  %v5484_v20 = vsel %vm5356_vm13, %v5031_v22, %v5420_v36  ;;  %v3916_v47 = vadd.f32 %v3838_v57, %v3357_v53  ;;  %v7416_v41 = vld [vmem:[#allocation3 + $0x80] sm:$0xff]  ;;  %v5786_v53 = vld [vmem:[#allocation3 + $0x2a8] sm:$0xff] }
 0x556   :  { %5659 = vst.msk [vmem:[#allocation3 + $0x2d1] sm:$0xff] %vm5494_vm3, %v5484_v20  ;;  %v7539_v22 = vpack.c.bf16 %v7416_v41, %v7415_v46  ;;  %v16845_v41 = vld [vmem:[#allocation30_spill] sm:$0xff] }
 0x557   :  { %v4474_v61 = vadd.f32 %v4396_v28, %v3916_v47  ;;  %v4957_v10 = vpop.f32.mrf.mxu0  ;;  %12210 = vmatmul.msk.bf16.gmra.mxu2 %vm5494_vm3, %v15311_v12  ;;  %v5785_v28 = vld [vmem:[#allocation3 + $0x2a0] sm:$0xff] }
 0x558   :  { %v5887_v52 = vpack.c.bf16 %v5786_v53, %v5785_v28 }
 0x559   :  { %v15313_v19 = vadd.f32 %v4954_v56, %v4474_v61  ;;  %v16843_v56 = vld [vmem:[#allocation40_spill] sm:$0xff]  ;;  %v4399_v7 = vpop.f32.mrf.mxu3  ;;  %v16846_v61 = vld [vmem:[#allocation29_spill] sm:$0xff] }
 0x55a   :  { %v15308_v31 = vpop.f32.mrf.mxu1  ;;  %12276 = vmatmul.msk.bf16.gmra.mxu0 %vm5494_vm3, %v7539_v22  ;;  %v3359_v22 = vadd.f32 %v16846_v61, %v16845_v41 }
 0x55b   :  { %16841 = vst [vmem:[#allocation14_spill] sm:$0xff] %v15308_v31  ;;  %vm5357_vm14 = vcmp.gt.f32.partialorder %v15313_v19, 0.0  ;;  %v5421_v36 = vmul.f32 0.01, %v15313_v19  ;;  %v7419_v31 = vld [vmem:[#allocation3 + $0xa8] sm:$0xff] }
 0x55c   :  { %16842 = vst [vmem:[#allocation18_spill] sm:$0xff] %v15313_v19  ;;  %v3841_v57 = vpop.f32.mrf.mxu2 }
 0x55d   :  { %v5485_v20 = vsel %vm5357_vm14, %v15313_v19, %v5421_v36  ;;  %v3917_v47 = vadd.f32 %v3841_v57, %v16843_v56  ;;  %v6302_v57 = vld [vmem:[#allocation3 + $0x81] sm:$0xff] }
 0x55e   :  { %5660 = vst.msk [vmem:[#allocation3 + $0x2d9] sm:$0xff] %vm5494_vm3, %v5485_v20  ;;  %v6859_v20 = vld [vmem:[#allocation3 + $0x7a] sm:$0xff] }
 0x55f   :  { %v4475_v46 = vadd.f32 %v4399_v7, %v3917_v47  ;;  %v4959_v42 = vpop.f32.mrf.mxu0  ;;  %v6860_v47 = vld [vmem:[#allocation3 + $0x82] sm:$0xff] }
 0x560   :  { %v6982_v23 = vpack.c.bf16 %v6860_v47, %v6859_v20 }
 0x561   :  { %v5033_v6 = vadd.f32 %v4957_v10, %v4475_v46  ;;  %v4401_v4 = vpop.f32.mrf.mxu3  ;;  %v6301_v10 = vld [vmem:[#allocation3 + $0x79] sm:$0xff] }
 0x562   :  { %v15323_v34 = vpop.f32.mrf.mxu1  ;;  %v15334_v41 = vpack.c.bf16 %v6302_v57, %v6301_v10 }
 0x563   :  { %16844 = vst [vmem:[#allocation19_spill] sm:$0xff] %v15323_v34  ;;  %v5230_v53 = vsel %vm14292_vm6, %v5033_v6, 0.0  ;;  %vm5358_vm15 = vcmp.gt.f32.partialorder %v5033_v6, 0.0  ;;  %v5422_v36 = vmul.f32 0.01, %v5033_v6  ;;  %12244 = vmatmul.msk.bf16.gmra.mxu3 %vm5494_vm3, %v6982_v23 }
 0x564   :  { %5294 = vst [vmem:[#allocation4 + $0x1c0] sm:$0xff] %v5230_v53  ;;  %v3843_v28 = vpop.f32.mrf.mxu2 }
 0x565   :  { %12199 = vmatmul.msk.bf16.gmra.mxu1 %vm5494_vm3, %v5887_v52  ;;  %v5486_v56 = vsel %vm5358_vm15, %v5033_v6, %v5422_v36  ;;  %v3918_v19 = vadd.f32 %v3843_v28, %v3359_v22  ;;  %v7418_v52 = vld [vmem:[#allocation3 + $0x98] sm:$0xff]  ;;  %v5788_v22 = vld [vmem:[#allocation3 + $0x2c0] sm:$0xff] }
 0x566   :  { %5661 = vst.msk [vmem:[#allocation3 + $0x2e9] sm:$0xff] %vm5494_vm3, %v5486_v56  ;;  %v7540_v6 = vpack.c.bf16 %v7418_v52, %v7417_v14  ;;  %v16851_v52 = vld [vmem:[#allocation32_spill] sm:$0xff] }
 0x567   :  { %v4476_v46 = vadd.f32 %v4401_v4, %v3918_v19  ;;  %v4962_v61 = vpop.f32.mrf.mxu0  ;;  %12211 = vmatmul.msk.bf16.gmra.mxu2 %vm5494_vm3, %v15334_v41  ;;  %v5787_v4 = vld [vmem:[#allocation3 + $0x2b8] sm:$0xff] }
 0x568   :  { %v5888_v28 = vpack.c.bf16 %v5788_v22, %v5787_v4 }
 0x569   :  { %v15336_v53 = vadd.f32 %v4959_v42, %v4476_v46  ;;  %v16849_v42 = vld [vmem:[#allocation41_spill] sm:$0xff]  ;;  %v4404_v20 = vpop.f32.mrf.mxu3  ;;  %v16852_v46 = vld [vmem:[#allocation31_spill] sm:$0xff] }
 0x56a   :  { %v15331_v7 = vpop.f32.mrf.mxu1  ;;  %12277 = vmatmul.msk.bf16.gmra.mxu0 %vm5494_vm3, %v7540_v6  ;;  %v3361_v6 = vadd.f32 %v16852_v46, %v16851_v52  ;;  %v16855_v52 = vld [vmem:[#allocation43_spill] sm:$0xff] }
 0x56b   :  { %16847 = vst [vmem:[#allocation17_spill] sm:$0xff] %v15331_v7  ;;  %vm5359_vm0 = vcmp.gt.f32.partialorder %v15336_v53, 0.0  ;;  %v5423_v36 = vmul.f32 0.01, %v15336_v53 }
 0x56c   :  { %16848 = vst [vmem:[#allocation21_spill] sm:$0xff] %v15336_v53  ;;  %v3846_v19 = vpop.f32.mrf.mxu2 }
 0x56d   :  { %v5487_v57 = vsel %vm5359_vm0, %v15336_v53, %v5423_v36  ;;  %v3919_v56 = vadd.f32 %v3846_v19, %v16849_v42  ;;  %v6304_v19 = vld [vmem:[#allocation3 + $0x99] sm:$0xff] }
 0x56e   :  { %5662 = vst.msk [vmem:[#allocation3 + $0x2f1] sm:$0xff] %vm5494_vm3, %v5487_v57  ;;  %v6861_v57 = vld [vmem:[#allocation3 + $0x92] sm:$0xff] }
 0x56f   :  { %v4477_v14 = vadd.f32 %v4404_v20, %v3919_v56  ;;  %v4964_v23 = vpop.f32.mrf.mxu0  ;;  %v6862_v56 = vld [vmem:[#allocation3 + $0x9a] sm:$0xff] }
 0x570   :  { %v6983_v34 = vpack.c.bf16 %v6862_v56, %v6861_v57 }
 0x571   :  { %v5035_v10 = vadd.f32 %v4962_v61, %v4477_v14  ;;  %v4406_v49 = vpop.f32.mrf.mxu3  ;;  %v6303_v61 = vld [vmem:[#allocation3 + $0x91] sm:$0xff] }
 0x572   :  { %v15346_v47 = vpop.f32.mrf.mxu1  ;;  %v16854_v14 = vld [vmem:[#allocation34_spill] sm:$0xff]  ;;  %v15359_v7 = vpack.c.bf16 %v6304_v19, %v6303_v61 }
 0x573   :  { %16850 = vst [vmem:[#allocation22_spill] sm:$0xff] %v15346_v47  ;;  %v5232_v22 = vsel %vm14292_vm6, %v5035_v10, 0.0  ;;  %vm5360_vm4 = vcmp.gt.f32.partialorder %v5035_v10, 0.0  ;;  %v5424_v36 = vmul.f32 0.01, %v5035_v10  ;;  %v1688_v46 = vadd.f32 %v16855_v52, %v16854_v14  ;;  %12245 = vmatmul.msk.bf16.gmra.mxu3 %vm5494_vm3, %v6983_v34  ;;  %v16860_v34 = vld [vmem:[#allocation33_spill] sm:$0xff] }
 0x574   :  { %5296 = vst [vmem:[#allocation4 + $0x1d0] sm:$0xff] %v5232_v22  ;;  %v3848_v4 = vpop.f32.mrf.mxu2 }
 0x575   :  { %12200 = vmatmul.msk.bf16.gmra.mxu1 %vm5494_vm3, %v5888_v28  ;;  %v5488_v42 = vsel %vm5360_vm4, %v5035_v10, %v5424_v36  ;;  %v3920_v53 = vadd.f32 %v3848_v4, %v3361_v6  ;;  %v7420_v28 = vld [vmem:[#allocation3 + $0xb0] sm:$0xff]  ;;  %v5790_v36 = vld [vmem:[#allocation3 + $0x2d8] sm:$0xff]  ;;  %v16857_v4 = vld [vmem:[#allocation44_spill] sm:$0xff] }
 0x576   :  { %5663 = vst.msk [vmem:[#allocation3 + $0x301] sm:$0xff] %vm5494_vm3, %v5488_v42  ;;  %v7541_v6 = vpack.c.bf16 %v7420_v28, %v7419_v31  ;;  %v2247_v42 = vadd.f32 %v16857_v4, %v1688_v46 }
 0x577   :  { %v4478_v47 = vadd.f32 %v4406_v49, %v3920_v53  ;;  %v4967_v22 = vpop.f32.mrf.mxu0  ;;  %12212 = vmatmul.msk.bf16.gmra.mxu2 %vm5494_vm3, %v15359_v7  ;;  %v5789_v53 = vld [vmem:[#allocation3 + $0x2d0] sm:$0xff] }
 0x578   :  { %v5889_v57 = vpack.c.bf16 %v5790_v36, %v5789_v53  ;;  %v2805_v28 = vadd.f32 %v16860_v34, %v2247_v42  ;;  %v6864_v42 = vld [vmem:[#allocation3 + $0xb2] sm:$0xff] }
 0x579   :  { %v15361_v10 = vadd.f32 %v4964_v23, %v4478_v47  ;;  %v16858_v23 = vld [vmem:[#allocation42_spill] sm:$0xff]  ;;  %v4409_v61 = vpop.f32.mrf.mxu3 }
 0x57a   :  { %v15354_v20 = vpop.f32.mrf.mxu1  ;;  %12278 = vmatmul.msk.bf16.gmra.mxu0 %vm5494_vm3, %v7541_v6  ;;  %v16861_v6 = vld [vmem:[#allocation45_spill] sm:$0xff]  ;;  %v16863_v34 = vld [vmem:[#allocation46_spill] sm:$0xff] }
 0x57b   :  { %16853 = vst [vmem:[#allocation20_spill] sm:$0xff] %v15354_v20  ;;  %vm5361_vm1 = vcmp.gt.f32.partialorder %v15361_v10, 0.0  ;;  %v5425_v49 = vmul.f32 0.01, %v15361_v10  ;;  %v3363_v4 = vadd.f32 %v16861_v6, %v2805_v28 }
 0x57c   :  { %16856 = vst [vmem:[#allocation37_spill] sm:$0xff] %v15361_v10  ;;  %v3851_v19 = vpop.f32.mrf.mxu2 }
 0x57d   :  { %v5489_v47 = vsel %vm5361_vm1, %v15361_v10, %v5425_v49  ;;  %v3921_v56 = vadd.f32 %v3851_v19, %v16858_v23  ;;  %v6306_v19 = vld [vmem:[#allocation3 + $0xb1] sm:$0xff] }
 0x57e   :  { %5664 = vst.msk [vmem:[#allocation3 + $0x309] sm:$0xff] %vm5494_vm3, %v5489_v47 }
 0x57f   :  { %v4479_v14 = vadd.f32 %v4409_v61, %v3921_v56  ;;  %v4969_v52 = vpop.f32.mrf.mxu0  ;;  %v16862_v61 = vld [vmem:[#allocation36_spill] sm:$0xff] }
 0x580   :  { %v1690_v28 = vadd.f32 %v16863_v34, %v16862_v61 }
 0x581   :  { %v5037_v46 = vadd.f32 %v4967_v22, %v4479_v14  ;;  %v4411_v47 = vpop.f32.mrf.mxu3  ;;  %v6305_v22 = vld [vmem:[#allocation3 + $0xa9] sm:$0xff] }
 0x582   :  { %v15372_v31 = vpop.f32.mrf.mxu1  ;;  %v15385_v6 = vpack.c.bf16 %v6306_v19, %v6305_v22  ;;  %v5791_v19 = vld [vmem:[#allocation3 + $0x2e8] sm:$0xff] }
 0x583   :  { %16859 = vst [vmem:[#allocation24_spill] sm:$0xff] %v15372_v31  ;;  %v5234_v36 = vsel %vm14292_vm6, %v5037_v46, 0.0  ;;  %vm5362_vm5 = vcmp.gt.f32.partialorder %v5037_v46, 0.0  ;;  %v5426_v49 = vmul.f32 0.01, %v5037_v46  ;;  %v6863_v31 = vld [vmem:[#allocation3 + $0xaa] sm:$0xff] }
 0x584   :  { %5298 = vst [vmem:[#allocation4 + $0x1e0] sm:$0xff] %v5234_v36  ;;  %v3853_v53 = vpop.f32.mrf.mxu2  ;;  %v6984_v20 = vpack.c.bf16 %v6864_v42, %v6863_v31  ;;  %v16866_v42 = vld [vmem:[#allocation35_spill] sm:$0xff] }
 0x585   :  { %12201 = vmatmul.msk.bf16.gmra.mxu1 %vm5494_vm3, %v5889_v57  ;;  %v5490_v23 = vsel %vm5362_vm5, %v5037_v46, %v5426_v49  ;;  %v3922_v10 = vadd.f32 %v3853_v53, %v3363_v4  ;;  %v7422_v57 = vld [vmem:[#allocation3 + $0xc8] sm:$0xff]  ;;  %v5792_v49 = vld [vmem:[#allocation3 + $0x2f0] sm:$0xff]  ;;  %v16865_v53 = vld [vmem:[#allocation47_spill] sm:$0xff] }
 0x586   :  { %5665 = vst.msk [vmem:[#allocation3 + $0x319] sm:$0xff] %vm5494_vm3, %v5490_v23  ;;  %v7542_v4 = vpack.c.bf16 %v7422_v57, %v7421_v1  ;;  %12246 = vmatmul.msk.bf16.gmra.mxu3 %vm5494_vm3, %v6984_v20  ;;  %v2249_v23 = vadd.f32 %v16865_v53, %v1690_v28  ;;  %v16867_v20 = vld [vmem:[#allocation48_spill] sm:$0xff] }
 0x587   :  { %v4480_v14 = vadd.f32 %v4411_v47, %v3922_v10  ;;  %v4972_v36 = vpop.f32.mrf.mxu0  ;;  %12213 = vmatmul.msk.bf16.gmra.mxu2 %vm5494_vm3, %v15385_v6  ;;  %v5890_v47 = vpack.c.bf16 %v5792_v49, %v5791_v19 }
 0x588   :  { %v2807_v57 = vadd.f32 %v16867_v20, %v2249_v23  ;;  %v6307_v20 = vld [vmem:[#allocation3 + $0xc1] sm:$0xff] }
 0x589   :  { %v15387_v46 = vadd.f32 %v4969_v52, %v4480_v14  ;;  %v4414_v61 = vpop.f32.mrf.mxu3 }
 0x58a   :  { %v15380_v56 = vpop.f32.mrf.mxu1  ;;  %12279 = vmatmul.msk.bf16.gmra.mxu0 %vm5494_vm3, %v7542_v4  ;;  %v12337_v4 = vld [vmem:[%s16695_s2 + $0x14] sm:$0xf]  ;;  %v3365_v53 = vadd.f32 %v14726_v16, %v2807_v57  ;;  %v7424_v16 = vld [vmem:[#allocation3 + $0xe0] sm:$0xff]  ;;  %v12370_v57 = vld [vmem:[%s16695_s2 + $0x18] sm:$0xf] }
 0x58b   :  { %16864 = vst [vmem:[#allocation23_spill] sm:$0xff] %v15387_v46  ;;  %vm5363_vm7 = vcmp.gt.f32.partialorder %v15387_v46, 0.0  ;;  %v5427_v10 = vmul.f32 0.01, %v15387_v46  ;;  %v8782_v49 = vsel %vm5990_vm2, %v12337_v4, 0 }
 0x58c   :  { %v3856_v31 = vpop.f32.mrf.mxu2  ;;  %8791 = vmatpush.bf16.msra.mxu2 %v8782_v49  ;;  %v9341_v49 = vsel %vm5990_vm2, %v12370_v57, 0 }
 0x58d   :  { %v5491_v52 = vsel %vm5363_vm7, %v15387_v46, %v5427_v10  ;;  %v3923_v22 = vadd.f32 %v3856_v31, %v16866_v42  ;;  %v6308_v31 = vld [vmem:[#allocation3 + $0xc9] sm:$0xff]  ;;  %9350 = vmatpush.bf16.msra.mxu3 %v9341_v49 }
 0x58e   :  { %5666 = vst.msk [vmem:[#allocation3 + $0x321] sm:$0xff] %vm5494_vm3, %v5491_v52  ;;  %v6865_v42 = vld [vmem:[#allocation3 + $0xc2] sm:$0xff]  ;;  %v15416_v4 = vpack.c.bf16 %v6308_v31, %v6307_v20 }
 0x58f   :  { %v4481_v34 = vadd.f32 %v4414_v61, %v3923_v22  ;;  %v4974_v28 = vpop.f32.mrf.mxu0  ;;  %v6866_v22 = vld [vmem:[#allocation3 + $0xca] sm:$0xff] }
 0x591   :  { %v5039_v14 = vadd.f32 %v4972_v36, %v4481_v34  ;;  %v4416_v36 = vpop.f32.mrf.mxu3 }
 0x592   :  { %v15398_v1 = vpop.f32.mrf.mxu1 }
 0x593   :  { %v5236_v10 = vsel %vm14292_vm6, %v5039_v14, 0.0  ;;  %vm5364_vm8 = vcmp.gt.f32.partialorder %v5039_v14, 0.0  ;;  %v5428_v19 = vmul.f32 0.01, %v5039_v14 }
 0x594   :  { %5300 = vst [vmem:[#allocation4 + $0x1f0] sm:$0xff] %v5236_v10  ;;  %v3858_v23 = vpop.f32.mrf.mxu2  ;;  %v7423_v10 = vld [vmem:[#allocation3 + $0xd8] sm:$0xff] }
 0x595   :  { %12202 = vmatmul.msk.bf16.gmra.mxu1 %vm5494_vm3, %v5890_v47  ;;  %v5492_v52 = vsel %vm5364_vm8, %v5039_v14, %v5428_v19  ;;  %v3924_v47 = vadd.f32 %v3858_v23, %v3365_v53  ;;  %v6985_v53 = vpack.c.bf16 %v6866_v22, %v6865_v42  ;;  %v7543_v23 = vpack.c.bf16 %v7424_v16, %v7423_v10  ;;  %v12403_v16 = vld [vmem:[%s16695_s2 + $0x1c] sm:$0xf] }
 0x596   :  { %5667 = vst.msk [vmem:[#allocation3 + $0x331] sm:$0xff] %vm5494_vm3, %v5492_v52  ;;  %v5794_v52 = vld [vmem:[#allocation3 + $0x308] sm:$0xff]  ;;  %v9899_v49 = vsel %vm5990_vm2, %v12403_v16, 0  ;;  %v6309_v16 = vld [vmem:[#allocation3 + $0xd9] sm:$0xff] }
 0x597   :  { %v4482_v34 = vadd.f32 %v4416_v36, %v3924_v47  ;;  %v7677_v14 = vpop.f32.mrf.mxu0  ;;  %12214 = vmatmul.msk.bf16.gmra.mxu2 %vm5494_vm3, %v15416_v4  ;;  %12247 = vmatmul.msk.bf16.gmra.mxu3 %vm5494_vm3, %v6985_v53  ;;  %v5793_v47 = vld [vmem:[#allocation3 + $0x300] sm:$0xff] }
 0x598   :  { %v5891_v42 = vpack.c.bf16 %v5794_v52, %v5793_v47  ;;  %9908 = vmatpush.bf16.msra.mxu0 %v9899_v49 }
 0x599   :  { %v15419_v19 = vadd.f32 %v4974_v28, %v4482_v34  ;;  %v7119_v20 = vpop.f32.mrf.mxu3 }
 0x59a   :  { %v15410_v61 = vpop.f32.mrf.mxu1  ;;  %12280 = vmatmul.msk.bf16.gmra.mxu0 %vm5494_vm3, %v7543_v23 }
 0x59b   :  { %16868 = vst [vmem:[#allocation38_spill] sm:$0xff] %v15419_v19  ;;  %vm5365_vm9 = vcmp.gt.f32.partialorder %v15419_v19, 0.0  ;;  %v5429_v31 = vmul.f32 0.01, %v15419_v19 }
 0x59c   :  { %v6561_v36 = vpop.f32.mrf.mxu2 }
 0x59d   :  { %v5493_v22 = vsel %vm5365_vm9, %v15419_v19, %v5429_v31  ;;  %v6721_v28 = vadd.f32 %v6561_v36, %v14751_v2  ;;  %v12436_v2 = vld [vmem:[%s16695_s2 + $0x20] sm:$0xf]  ;;  %s12503_s2 = smov 64  }
 0x59e   :  { %5668 = vst.msk [vmem:[#allocation3 + $0x339] sm:$0xff] %vm5494_vm3, %v5493_v22  ;;  %v10457_v23 = vsel %vm5990_vm2, %v12436_v2, 0  ;;  %v6310_v31 = vld [vmem:[#allocation3 + $0xe1] sm:$0xff] }
 0x59f   :  { %v7279_v34 = vadd.f32 %v7119_v20, %v6721_v28  ;;  %v7679_v53 = vpop.f32.mrf.mxu0  ;;  %10466 = vmatpush.bf16.msra.mxu1 %v10457_v23  ;;  %v6867_v22 = vld [vmem:[#allocation3 + $0xda] sm:$0xff]  ;;  %v6868_v28 = vld [vmem:[#allocation3 + $0xe2] sm:$0xff]  ;;  %v15446_v19 = vpack.c.bf16 %v6310_v31, %v6309_v16 }
 0x5a1   :  { %v15440_v10 = vadd.f32 %v7677_v14, %v7279_v34  ;;  %v7121_v36 = vpop.f32.mrf.mxu3  ;;  %v6986_v14 = vpack.c.bf16 %v6868_v28, %v6867_v22  ;;  %v7425_v34 = vld [vmem:[#allocation3 + $0xf0] sm:$0xff] }
 0x5a2   :  { %v15429_v57 = vpop.f32.mrf.mxu1 }
 0x5a3   :  { %16869 = vst [vmem:[#allocation26_spill] sm:$0xff] %v15429_v57 }
 0x5a4   :  { %v6563_v52 = vpop.f32.mrf.mxu2 }
 0x5a5   :  { %12203 = vmatmul.msk.bf16.gmra.mxu1 %vm5494_vm3, %v5891_v42  ;;  %v6722_v47 = vadd.f32 %v6563_v52, %v14761_v35  ;;  %v7426_v42 = vld [vmem:[#allocation3 + $0xf8] sm:$0xff]  ;;  %v5796_v35 = vld [vmem:[#allocation3 + $0x320] sm:$0xff] }
 0x5a6   :  { %v7544_v2 = vpack.c.bf16 %v7426_v42, %v7425_v34  ;;  %v5795_v52 = vld [vmem:[#allocation3 + $0x318] sm:$0xff] }
 0x5a7   :  { %v7280_v49 = vadd.f32 %v7121_v36, %v6722_v47  ;;  %v7682_v46 = vpop.f32.mrf.mxu0  ;;  %12215 = vmatmul.msk.bf16.gmra.mxu2 %vm5494_vm3, %v15446_v19  ;;  %12248 = vmatmul.msk.bf16.gmra.mxu3 %vm5494_vm3, %v6986_v14  ;;  %v6312_v42 = vld [vmem:[#allocation3 + $0xf9] sm:$0xff] }
 0x5a8   :  { %v6869_v34 = vld [vmem:[#allocation3 + $0xf2] sm:$0xff] }
 0x5a9   :  { %v15450_v23 = vadd.f32 %v7679_v53, %v7280_v49  ;;  %v7124_v47 = vpop.f32.mrf.mxu3 }
 0x5aa   :  { %v15444_v20 = vpop.f32.mrf.mxu1  ;;  %12281 = vmatmul.msk.bf16.gmra.mxu0 %vm5494_vm3, %v7544_v2  ;;  %v6870_v2 = vld [vmem:[#allocation3 + $0xfa] sm:$0xff] }
 0x5ab   :  { %16870 = vst [vmem:[#allocation25_spill] sm:$0xff] %v15444_v20  ;;  %v5892_v20 = vpack.c.bf16 %v5796_v35, %v5795_v52  ;;  %v6311_v35 = vld [vmem:[#allocation3 + $0xf1] sm:$0xff] }
 0x5ac   :  { %v6566_v9 = vpop.f32.mrf.mxu2  ;;  %v15463_v52 = vpack.c.bf16 %v6312_v42, %v6311_v35 }
 0x5ad   :  { %v6723_v31 = vadd.f32 %v6566_v9, %v14786_v32  ;;  %v7428_v9 = vld [vmem:[#allocation3 + $0x110] sm:$0xff] }
 0x5af   :  { %v7281_v22 = vadd.f32 %v7124_v47, %v6723_v31  ;;  %v7684_v28 = vpop.f32.mrf.mxu0  ;;  %v6987_v47 = vpack.c.bf16 %v6870_v2, %v6869_v34 }
 0x5b1   :  { %v15458_v16 = vadd.f32 %v7682_v46, %v7281_v22  ;;  %v7126_v14 = vpop.f32.mrf.mxu3 }
 0x5b2   :  { %v15455_v36 = vpop.f32.mrf.mxu1 }
 0x5b3   :  { %16871 = vst [vmem:[#allocation39_spill] sm:$0xff] %v15455_v36  ;;  %v7427_v36 = vld [vmem:[#allocation3 + $0x108] sm:$0xff] }
 0x5b4   :  { %v6568_v53 = vpop.f32.mrf.mxu2  ;;  %v7545_v46 = vpack.c.bf16 %v7428_v9, %v7427_v36  ;;  %v6871_v9 = vld [vmem:[#allocation3 + $0x10a] sm:$0xff] }
 0x5b5   :  { %12204 = vmatmul.msk.bf16.gmra.mxu1 %vm5494_vm3, %v5892_v20  ;;  %v6724_v49 = vadd.f32 %v6568_v53, %v14809_v24 }
 0x5b7   :  { %v7282_v32 = vadd.f32 %v7126_v14, %v6724_v49  ;;  %v7687_v31 = vpop.f32.mrf.mxu0  ;;  %12216 = vmatmul.msk.bf16.gmra.mxu2 %vm5494_vm3, %v15463_v52  ;;  %12249 = vmatmul.msk.bf16.gmra.mxu3 %vm5494_vm3, %v6987_v47 }
 0x5b9   :  { %v15467_v20 = vadd.f32 %v7684_v28, %v7282_v32  ;;  %v7129_v53 = vpop.f32.mrf.mxu3  ;;  %v6314_v28 = vld [vmem:[#allocation3 + $0x111] sm:$0xff] }
 0x5ba   :  { %v15461_v57 = vpop.f32.mrf.mxu1  ;;  %12282 = vmatmul.msk.bf16.gmra.mxu0 %vm5494_vm3, %v7545_v46  ;;  %v6872_v32 = vld [vmem:[#allocation3 + $0x112] sm:$0xff]  ;;  %v7430_v46 = vld [vmem:[#allocation3 + $0x128] sm:$0xff] }
 0x5bb   :  { %16872 = vst [vmem:[#allocation28_spill] sm:$0xff] %v15461_v57  ;;  %v7429_v57 = vld [vmem:[#allocation3 + $0x120] sm:$0xff] }
 0x5bc   :  { %v6571_v24 = vpop.f32.mrf.mxu2 }
 0x5bd   :  { %v6725_v22 = vadd.f32 %v6571_v24, %v14825_v17  ;;  %v6313_v17 = vld [vmem:[#allocation3 + $0x109] sm:$0xff] }
 0x5bf   :  { %v7283_v42 = vadd.f32 %v7129_v53, %v6725_v22  ;;  %v7689_v14 = vpop.f32.mrf.mxu0  ;;  %v6988_v53 = vpack.c.bf16 %v6872_v32, %v6871_v9 }
 0x5c1   :  { %v15476_v34 = vadd.f32 %v7687_v31, %v7283_v42  ;;  %v7131_v35 = vpop.f32.mrf.mxu3 }
 0x5c2   :  { %v15472_v49 = vpop.f32.mrf.mxu1 }
 0x5c3   :  { %16873 = vst [vmem:[#allocation27_spill] sm:$0xff] %v15472_v49  ;;  %v15481_v49 = vpack.c.bf16 %v6314_v28, %v6313_v17 }
 0x5c4   :  { %v6573_v36 = vpop.f32.mrf.mxu2 }
 0x5c5   :  { %12305 = vmatmul.msk.bf16.vlgmr.msrb.gmra.mxu1 %vm5494_vm3, %v15242_v63  ;;  %v6726_v2 = vadd.f32 %v6573_v36, %v14850_v18  ;;  %v7546_v63 = vpack.c.bf16 %v7430_v46, %v7429_v57  ;;  %v6873_v46 = vld [vmem:[#allocation3 + $0x122] sm:$0xff] }
 0x5c7   :  { %v7284_v24 = vadd.f32 %v7131_v35, %v6726_v2  ;;  %v7692_v22 = vpop.f32.mrf.mxu0  ;;  %12217 = vmatmul.msk.bf16.gmra.mxu2 %vm5494_vm3, %v15481_v49  ;;  %12250 = vmatmul.msk.bf16.gmra.mxu3 %vm5494_vm3, %v6988_v53 }
 0x5c9   :  { %v15485_v31 = vadd.f32 %v7689_v14, %v7284_v24  ;;  %v7134_v36 = vpop.f32.mrf.mxu3  ;;  %v6316_v14 = vld [vmem:[#allocation3 + $0x129] sm:$0xff] }
 0x5ca   :  { %v15479_v47 = vpop.f32.mrf.mxu1  ;;  %12283 = vmatmul.msk.bf16.gmra.mxu0 %vm5494_vm3, %v7546_v63  ;;  %v6874_v24 = vld [vmem:[#allocation3 + $0x12a] sm:$0xff]  ;;  %v7432_v63 = vld [vmem:[#allocation3 + $0x140] sm:$0xff] }
 0x5cb   :  { %16874 = vst [vmem:[#allocation40_spill] sm:$0xff] %v15479_v47  ;;  %v7431_v47 = vld [vmem:[#allocation3 + $0x138] sm:$0xff] }
 0x5cc   :  { %v6576_v18 = vpop.f32.mrf.mxu2 }
 0x5cd   :  { %v6727_v42 = vadd.f32 %v6576_v18, %v14859_v21  ;;  %v6315_v21 = vld [vmem:[#allocation3 + $0x121] sm:$0xff] }
 0x5cf   :  { %v7285_v28 = vadd.f32 %v7134_v36, %v6727_v42  ;;  %v7694_v35 = vpop.f32.mrf.mxu0  ;;  %v6989_v36 = vpack.c.bf16 %v6874_v24, %v6873_v46 }
 0x5d1   :  { %v15494_v9 = vadd.f32 %v7692_v22, %v7285_v28  ;;  %v7136_v17 = vpop.f32.mrf.mxu3 }
 0x5d2   :  { %v15490_v2 = vpop.f32.mrf.mxu1 }
 0x5d3   :  { %16875 = vst [vmem:[#allocation30_spill] sm:$0xff] %v15490_v2  ;;  %v15499_v2 = vpack.c.bf16 %v6316_v14, %v6315_v21 }
 0x5d4   :  { %v6578_v57 = vpop.f32.mrf.mxu2 }
 0x5d5   :  { %12306 = vmatmul.msk.bf16.gmra.mxu1 %vm5494_vm3, %v15265_v45  ;;  %v6728_v32 = vadd.f32 %v6578_v57, %v14884_v0  ;;  %v7547_v45 = vpack.c.bf16 %v7432_v63, %v7431_v47  ;;  %v6875_v63 = vld [vmem:[#allocation3 + $0x13a] sm:$0xff] }
 0x5d7   :  { %v7286_v18 = vadd.f32 %v7136_v17, %v6728_v32  ;;  %v7697_v42 = vpop.f32.mrf.mxu0  ;;  %12218 = vmatmul.msk.bf16.gmra.mxu2 %vm5494_vm3, %v15499_v2  ;;  %12251 = vmatmul.msk.bf16.gmra.mxu3 %vm5494_vm3, %v6989_v36 }
 0x5d9   :  { %v15503_v22 = vadd.f32 %v7694_v35, %v7286_v18  ;;  %v7139_v57 = vpop.f32.mrf.mxu3  ;;  %v6318_v35 = vld [vmem:[#allocation3 + $0x141] sm:$0xff] }
 0x5da   :  { %v15497_v53 = vpop.f32.mrf.mxu1  ;;  %12284 = vmatmul.msk.bf16.gmra.mxu0 %vm5494_vm3, %v7547_v45  ;;  %v6876_v18 = vld [vmem:[#allocation3 + $0x142] sm:$0xff]  ;;  %v7434_v45 = vld [vmem:[#allocation3 + $0x158] sm:$0xff] }
 0x5db   :  { %16876 = vst [vmem:[#allocation29_spill] sm:$0xff] %v15497_v53  ;;  %v7433_v53 = vld [vmem:[#allocation3 + $0x150] sm:$0xff] }
 0x5dc   :  { %v6581_v0 = vpop.f32.mrf.mxu2 }
 0x5dd   :  { %v6729_v28 = vadd.f32 %v6581_v0, %v14893_v26  ;;  %v6317_v26 = vld [vmem:[#allocation3 + $0x139] sm:$0xff] }
 0x5df   :  { %v7287_v14 = vadd.f32 %v7139_v57, %v6729_v28  ;;  %v7699_v17 = vpop.f32.mrf.mxu0  ;;  %v6990_v57 = vpack.c.bf16 %v6876_v18, %v6875_v63 }
 0x5e1   :  { %v15512_v46 = vadd.f32 %v7697_v42, %v7287_v14  ;;  %v7141_v21 = vpop.f32.mrf.mxu3 }
 0x5e2   :  { %v15508_v32 = vpop.f32.mrf.mxu1 }
 0x5e3   :  { %16877 = vst [vmem:[#allocation41_spill] sm:$0xff] %v15508_v32  ;;  %v15517_v32 = vpack.c.bf16 %v6318_v35, %v6317_v26 }
 0x5e4   :  { %v6583_v47 = vpop.f32.mrf.mxu2 }
 0x5e5   :  { %12307 = vmatmul.msk.bf16.gmra.mxu1 %vm5494_vm3, %v15288_v50  ;;  %v6730_v24 = vadd.f32 %v6583_v47, %v14918_v39  ;;  %v7548_v50 = vpack.c.bf16 %v7434_v45, %v7433_v53  ;;  %v6877_v45 = vld [vmem:[#allocation3 + $0x152] sm:$0xff] }
 0x5e7   :  { %v7288_v0 = vadd.f32 %v7141_v21, %v6730_v24  ;;  %v7702_v28 = vpop.f32.mrf.mxu0  ;;  %12219 = vmatmul.msk.bf16.gmra.mxu2 %vm5494_vm3, %v15517_v32  ;;  %12252 = vmatmul.msk.bf16.gmra.mxu3 %vm5494_vm3, %v6990_v57 }
 0x5e9   :  { %v15521_v42 = vadd.f32 %v7699_v17, %v7288_v0  ;;  %v7144_v47 = vpop.f32.mrf.mxu3  ;;  %v6320_v17 = vld [vmem:[#allocation3 + $0x159] sm:$0xff] }
 0x5ea   :  { %v15515_v36 = vpop.f32.mrf.mxu1  ;;  %12285 = vmatmul.msk.bf16.gmra.mxu0 %vm5494_vm3, %v7548_v50  ;;  %v6878_v0 = vld [vmem:[#allocation3 + $0x15a] sm:$0xff]  ;;  %v7436_v50 = vld [vmem:[#allocation3 + $0x170] sm:$0xff] }
 0x5eb   :  { %16878 = vst [vmem:[#allocation32_spill] sm:$0xff] %v15515_v36  ;;  %v7435_v36 = vld [vmem:[#allocation3 + $0x168] sm:$0xff] }
 0x5ec   :  { %v6586_v39 = vpop.f32.mrf.mxu2 }
 0x5ed   :  { %v6731_v14 = vadd.f32 %v6586_v39, %v14927_v29  ;;  %v6319_v29 = vld [vmem:[#allocation3 + $0x151] sm:$0xff] }
 0x5ef   :  { %v7289_v35 = vadd.f32 %v7144_v47, %v6731_v14  ;;  %v7704_v21 = vpop.f32.mrf.mxu0  ;;  %v6991_v47 = vpack.c.bf16 %v6878_v0, %v6877_v45 }
 0x5f1   :  { %v15530_v63 = vadd.f32 %v7702_v28, %v7289_v35  ;;  %v7146_v26 = vpop.f32.mrf.mxu3 }
 0x5f2   :  { %v15526_v24 = vpop.f32.mrf.mxu1 }
 0x5f3   :  { %16879 = vst [vmem:[#allocation31_spill] sm:$0xff] %v15526_v24  ;;  %v15535_v24 = vpack.c.bf16 %v6320_v17, %v6319_v29 }
 0x5f4   :  { %v6588_v53 = vpop.f32.mrf.mxu2 }
 0x5f5   :  { %12308 = vmatmul.msk.bf16.gmra.mxu1 %vm5494_vm3, %v15311_v12  ;;  %v6732_v18 = vadd.f32 %v6588_v53, %v14952_v59  ;;  %v7549_v12 = vpack.c.bf16 %v7436_v50, %v7435_v36  ;;  %v6879_v50 = vld [vmem:[#allocation3 + $0x16a] sm:$0xff] }
 0x5f7   :  { %v7290_v39 = vadd.f32 %v7146_v26, %v6732_v18  ;;  %v7707_v14 = vpop.f32.mrf.mxu0  ;;  %12220 = vmatmul.msk.bf16.gmra.mxu2 %vm5494_vm3, %v15535_v24  ;;  %12253 = vmatmul.msk.bf16.gmra.mxu3 %vm5494_vm3, %v6991_v47 }
 0x5f9   :  { %v15539_v28 = vadd.f32 %v7704_v21, %v7290_v39  ;;  %v7149_v53 = vpop.f32.mrf.mxu3  ;;  %v6322_v21 = vld [vmem:[#allocation3 + $0x171] sm:$0xff] }
 0x5fa   :  { %v15533_v57 = vpop.f32.mrf.mxu1  ;;  %12286 = vmatmul.msk.bf16.gmra.mxu0 %vm5494_vm3, %v7549_v12  ;;  %v6880_v39 = vld [vmem:[#allocation3 + $0x172] sm:$0xff]  ;;  %v7438_v12 = vld [vmem:[#allocation3 + $0x188] sm:$0xff] }
 0x5fb   :  { %16880 = vst [vmem:[#allocation34_spill] sm:$0xff] %v15533_v57  ;;  %v7437_v57 = vld [vmem:[#allocation3 + $0x180] sm:$0xff] }
 0x5fc   :  { %v6591_v59 = vpop.f32.mrf.mxu2 }
 0x5fd   :  { %v6733_v35 = vadd.f32 %v6591_v59, %v14961_v54  ;;  %v6321_v54 = vld [vmem:[#allocation3 + $0x169] sm:$0xff] }
 0x5ff   :  { %v7291_v17 = vadd.f32 %v7149_v53, %v6733_v35  ;;  %v7709_v26 = vpop.f32.mrf.mxu0  ;;  %v6992_v53 = vpack.c.bf16 %v6880_v39, %v6879_v50  ;;  %v6881_v39 = vld [vmem:[#allocation3 + $0x1b2] sm:$0xff] }
 0x601   :  { %v15548_v45 = vadd.f32 %v7707_v14, %v7291_v17  ;;  %v7151_v29 = vpop.f32.mrf.mxu3 }
 0x602   :  { %v15544_v18 = vpop.f32.mrf.mxu1 }
 0x603   :  { %16881 = vst [vmem:[#allocation43_spill] sm:$0xff] %v15544_v18  ;;  %v15553_v18 = vpack.c.bf16 %v6322_v21, %v6321_v54  ;;  %v6882_v54 = vld [vmem:[#allocation3 + $0x1ba] sm:$0xff] }
 0x604   :  { %v6593_v36 = vpop.f32.mrf.mxu2 }
 0x605   :  { %12309 = vmatmul.msk.bf16.gmra.mxu1 %vm5494_vm3, %v15334_v41  ;;  %v6734_v0 = vadd.f32 %v6593_v36, %v14986_v43  ;;  %v7550_v41 = vpack.c.bf16 %v7438_v12, %v7437_v57  ;;  %v6323_v57 = vld [vmem:[#allocation3 + $0x1b1] sm:$0xff] }
 0x607   :  { %v7292_v59 = vadd.f32 %v7151_v29, %v6734_v0  ;;  %v7712_v35 = vpop.f32.mrf.mxu0  ;;  %12221 = vmatmul.msk.bf16.gmra.mxu2 %vm5494_vm3, %v15553_v18  ;;  %12254 = vmatmul.msk.bf16.gmra.mxu3 %vm5494_vm3, %v6992_v53 }
 0x609   :  { %v15557_v14 = vadd.f32 %v7709_v26, %v7292_v59  ;;  %v7154_v36 = vpop.f32.mrf.mxu3  ;;  %v6324_v26 = vld [vmem:[#allocation3 + $0x1b9] sm:$0xff] }
 0x60a   :  { %v15551_v47 = vpop.f32.mrf.mxu1  ;;  %12287 = vmatmul.msk.bf16.gmra.mxu0 %vm5494_vm3, %v7550_v41  ;;  %v6435_v41 = vpack.c.bf16 %v6324_v26, %v6323_v57 }
 0x60b   :  { %16882 = vst [vmem:[#allocation44_spill] sm:$0xff] %v15551_v47  ;;  %v7439_v47 = vld [vmem:[#allocation3 + $0x1c8] sm:$0xff] }
 0x60c   :  { %v6596_v43 = vpop.f32.mrf.mxu2 }
 0x60d   :  { %v6735_v17 = vadd.f32 %v6596_v43, %v14995_v33  ;;  %v6993_v43 = vpack.c.bf16 %v6882_v54, %v6881_v39 }
 0x60f   :  { %v7293_v21 = vadd.f32 %v7154_v36, %v6735_v17  ;;  %v7714_v29 = vpop.f32.mrf.mxu0 }
 0x611   :  { %v15566_v50 = vadd.f32 %v7712_v35, %v7293_v21  ;;  %v7156_v53 = vpop.f32.mrf.mxu3 }
 0x612   :  { %v15562_v0 = vpop.f32.mrf.mxu1 }
 0x613   :  { %16883 = vst [vmem:[#allocation42_spill] sm:$0xff] %v15562_v0  ;;  %v7440_v0 = vld [vmem:[#allocation3 + $0x1d0] sm:$0xff] }
 0x614   :  { %v6598_v12 = vpop.f32.mrf.mxu2 }
 0x615   :  { %12310 = vmatmul.msk.bf16.gmra.mxu1 %vm5494_vm3, %v15359_v7  ;;  %v6736_v59 = vadd.f32 %v6598_v12, %v15020_v8  ;;  %v7551_v7 = vpack.c.bf16 %v7440_v0, %v7439_v47  ;;  %v6326_v0 = vld [vmem:[#allocation3 + $0x1d1] sm:$0xff] }
 0x617   :  { %v7294_v17 = vadd.f32 %v7156_v53, %v6736_v59  ;;  %v7717_v36 = vpop.f32.mrf.mxu0  ;;  %12222 = vmatmul.msk.bf16.gmra.mxu2 %vm5494_vm3, %v6435_v41  ;;  %12255 = vmatmul.msk.bf16.gmra.mxu3 %vm5494_vm3, %v6993_v43  ;;  %v6883_v53 = vld [vmem:[#allocation3 + $0x1ca] sm:$0xff]  ;;  %v6884_v41 = vld [vmem:[#allocation3 + $0x1d2] sm:$0xff] }
 0x619   :  { %v15572_v35 = vadd.f32 %v7714_v29, %v7294_v17  ;;  %v7442_v17 = vld [vmem:[#allocation3 + $0x1e8] sm:$0xff] }
 0x61a   :  { %v15569_v33 = vpop.f32.mrf.mxu1  ;;  %12288 = vmatmul.msk.bf16.gmra.mxu0 %vm5494_vm3, %v7551_v7  ;;  %v7159_v57 = vpop.f32.mrf.mxu3 }
 0x61c   :  { %v6601_v21 = vpop.f32.mrf.mxu2 }
 0x61d   :  { %v6737_v8 = vadd.f32 %v6601_v21, %v15029_v5  ;;  %v6325_v5 = vld [vmem:[#allocation3 + $0x1c9] sm:$0xff] }
 0x61e   :  { %v15586_v21 = vpack.c.bf16 %v6326_v0, %v6325_v5 }
 0x61f   :  { %v7295_v39 = vadd.f32 %v7159_v57, %v6737_v8  ;;  %v7719_v54 = vpop.f32.mrf.mxu0  ;;  %v6994_v57 = vpack.c.bf16 %v6884_v41, %v6883_v53 }
 0x621   :  { %v15581_v12 = vadd.f32 %v7717_v36, %v7295_v39 }
 0x622   :  { %v15577_v26 = vpop.f32.mrf.mxu1  ;;  %v7161_v59 = vpop.f32.mrf.mxu3 }
 0x623   :  { %16884 = vst [vmem:[#allocation33_spill] sm:$0xff] %v15577_v26  ;;  %v7441_v26 = vld [vmem:[#allocation3 + $0x1e0] sm:$0xff] }
 0x624   :  { %v6603_v47 = vpop.f32.mrf.mxu2 }
 0x625   :  { %12311 = vmatmul.msk.bf16.gmra.mxu1 %vm5494_vm3, %v15385_v6  ;;  %v6738_v29 = vadd.f32 %v6603_v47, %v15054_v3  ;;  %v7552_v6 = vpack.c.bf16 %v7442_v17, %v7441_v26  ;;  %v6885_v17 = vld [vmem:[#allocation3 + $0x1e2] sm:$0xff] }
 0x627   :  { %v7296_v7 = vadd.f32 %v7161_v59, %v6738_v29  ;;  %v7722_v8 = vpop.f32.mrf.mxu0  ;;  %12223 = vmatmul.msk.bf16.gmra.mxu2 %vm5494_vm3, %v15586_v21  ;;  %12256 = vmatmul.msk.bf16.gmra.mxu3 %vm5494_vm3, %v6994_v57 }
 0x629   :  { %v15590_v36 = vadd.f32 %v7719_v54, %v7296_v7  ;;  %v6328_v54 = vld [vmem:[#allocation3 + $0x1e9] sm:$0xff] }
 0x62a   :  { %v15584_v43 = vpop.f32.mrf.mxu1  ;;  %12289 = vmatmul.msk.bf16.gmra.mxu0 %vm5494_vm3, %v7552_v6  ;;  %v7164_v47 = vpop.f32.mrf.mxu3  ;;  %v6886_v7 = vld [vmem:[#allocation3 + $0x1ea] sm:$0xff]  ;;  %v7444_v6 = vld [vmem:[#allocation3 + $0x200] sm:$0xff] }
 0x62b   :  { %16885 = vst [vmem:[#allocation45_spill] sm:$0xff] %v15584_v43  ;;  %v7443_v43 = vld [vmem:[#allocation3 + $0x1f8] sm:$0xff] }
 0x62c   :  { %v6606_v3 = vpop.f32.mrf.mxu2 }
 0x62d   :  { %v6739_v39 = vadd.f32 %v6606_v3, %v15063_v40  ;;  %v6327_v40 = vld [vmem:[#allocation3 + $0x1e1] sm:$0xff] }
 0x62f   :  { %v7297_v0 = vadd.f32 %v7164_v47, %v6739_v39  ;;  %v7724_v59 = vpop.f32.mrf.mxu0  ;;  %v6995_v47 = vpack.c.bf16 %v6886_v7, %v6885_v17  ;;  %v6330_v7 = vld [vmem:[#allocation3 + $0x201] sm:$0xff] }
 0x631   :  { %v15599_v53 = vadd.f32 %v7722_v8, %v7297_v0 }
 0x632   :  { %v15595_v29 = vpop.f32.mrf.mxu1  ;;  %v7166_v5 = vpop.f32.mrf.mxu3 }
 0x633   :  { %16886 = vst [vmem:[#allocation36_spill] sm:$0xff] %v15595_v29  ;;  %v15604_v29 = vpack.c.bf16 %v6328_v54, %v6327_v40 }
 0x634   :  { %v6608_v26 = vpop.f32.mrf.mxu2 }
 0x635   :  { %12312 = vmatmul.msk.bf16.gmra.mxu1 %vm5494_vm3, %v15416_v4  ;;  %v6740_v41 = vadd.f32 %v6608_v26, %v15088_v11  ;;  %v7553_v4 = vpack.c.bf16 %v7444_v6, %v7443_v43 }
 0x637   :  { %v7298_v3 = vadd.f32 %v7166_v5, %v6740_v41  ;;  %v7727_v39 = vpop.f32.mrf.mxu0  ;;  %12224 = vmatmul.msk.bf16.gmra.mxu2 %vm5494_vm3, %v15604_v29  ;;  %12257 = vmatmul.msk.bf16.gmra.mxu3 %vm5494_vm3, %v6995_v47  ;;  %v6888_v47 = vld [vmem:[#allocation3 + $0x202] sm:$0xff] }
 0x639   :  { %v15608_v8 = vadd.f32 %v7724_v59, %v7298_v3  ;;  %v6887_v3 = vld [vmem:[#allocation3 + $0x1fa] sm:$0xff] }
 0x63a   :  { %v15602_v57 = vpop.f32.mrf.mxu1  ;;  %12290 = vmatmul.msk.bf16.gmra.mxu0 %vm5494_vm3, %v7553_v4  ;;  %v7169_v26 = vpop.f32.mrf.mxu3  ;;  %v6329_v4 = vld [vmem:[#allocation3 + $0x1f9] sm:$0xff] }
 0x63c   :  { %v6611_v11 = vpop.f32.mrf.mxu2 }
 0x63d   :  { %v6741_v0 = vadd.f32 %v6611_v11, %v15097_v55  ;;  %v7446_v11 = vld [vmem:[#allocation3 + $0x218] sm:$0xff] }
 0x63f   :  { %v7299_v5 = vadd.f32 %v7169_v26, %v6741_v0  ;;  %v7729_v17 = vpop.f32.mrf.mxu0  ;;  %v15624_v26 = vpack.c.bf16 %v6330_v7, %v6329_v4  ;;  %v6332_v4 = vld [vmem:[#allocation3 + $0x219] sm:$0xff] }
 0x641   :  { %v15618_v43 = vadd.f32 %v7727_v39, %v7299_v5  ;;  %v7445_v39 = vld [vmem:[#allocation3 + $0x210] sm:$0xff] }
 0x642   :  { %v8235_v41 = vpop.f32.mrf.mxu1  ;;  %v7171_v6 = vpop.f32.mrf.mxu3  ;;  %v7554_v5 = vpack.c.bf16 %v7446_v11, %v7445_v39  ;;  %v6890_v39 = vld [vmem:[#allocation3 + $0x21a] sm:$0xff] }
 0x643   :  { %v15614_v54 = vadd.f32 %v8235_v41, %v15440_v10 }
 0x644   :  { %v6613_v59 = vpop.f32.mrf.mxu2 }
 0x645   :  { %12313 = vmatmul.msk.bf16.gmra.mxu1 %vm5494_vm3, %v15446_v19  ;;  %v6742_v40 = vadd.f32 %v6613_v59, %v15123_v13  ;;  %v6996_v19 = vpack.c.bf16 %v6888_v47, %v6887_v3 }
 0x647   :  { %v7300_v0 = vadd.f32 %v7171_v6, %v6742_v40  ;;  %v7732_v41 = vpop.f32.mrf.mxu0  ;;  %12225 = vmatmul.msk.bf16.gmra.mxu2 %vm5494_vm3, %v15624_v26  ;;  %12258 = vmatmul.msk.bf16.gmra.mxu3 %vm5494_vm3, %v6996_v19  ;;  %v6889_v19 = vld [vmem:[#allocation3 + $0x212] sm:$0xff] }
 0x649   :  { %v15628_v13 = vadd.f32 %v7729_v17, %v7300_v0 }
 0x64a   :  { %v8237_v55 = vpop.f32.mrf.mxu1  ;;  %12291 = vmatmul.msk.bf16.gmra.mxu0 %vm5494_vm3, %v7554_v5  ;;  %v6331_v5 = vld [vmem:[#allocation3 + $0x211] sm:$0xff] }
 0x64b   :  { %v15622_v10 = vadd.f32 %v8237_v55, %v15450_v23  ;;  %v7174_v55 = vpop.f32.mrf.mxu3 }
 0x64c   :  { %v6616_v59 = vpop.f32.mrf.mxu2 }
 0x64d   :  { %v6743_v23 = vadd.f32 %v6616_v59, %v15135_v58  ;;  %v7448_v59 = vld [vmem:[#allocation3 + $0x230] sm:$0xff] }
 0x64f   :  { %v7301_v6 = vadd.f32 %v7174_v55, %v6743_v23  ;;  %v7734_v3 = vpop.f32.mrf.mxu0  ;;  %v15644_v55 = vpack.c.bf16 %v6332_v4, %v6331_v5  ;;  %v6334_v5 = vld [vmem:[#allocation3 + $0x231] sm:$0xff] }
 0x651   :  { %v15638_v47 = vadd.f32 %v7732_v41, %v7301_v6  ;;  %v7447_v41 = vld [vmem:[#allocation3 + $0x228] sm:$0xff] }
 0x652   :  { %v8240_v40 = vpop.f32.mrf.mxu1  ;;  %v7555_v6 = vpack.c.bf16 %v7448_v59, %v7447_v41  ;;  %v6892_v41 = vld [vmem:[#allocation3 + $0x232] sm:$0xff] }
 0x653   :  { %v15634_v7 = vadd.f32 %v8240_v40, %v15458_v16  ;;  %v7176_v0 = vpop.f32.mrf.mxu3 }
 0x654   :  { %v6618_v17 = vpop.f32.mrf.mxu2 }
 0x655   :  { %12314 = vmatmul.msk.bf16.gmra.mxu1 %vm5494_vm3, %v15463_v52  ;;  %v6744_v11 = vadd.f32 %v6618_v17, %v15161_v62  ;;  %v6997_v52 = vpack.c.bf16 %v6890_v39, %v6889_v19 }
 0x657   :  { %v7302_v23 = vadd.f32 %v7176_v0, %v6744_v11  ;;  %v7737_v40 = vpop.f32.mrf.mxu0  ;;  %12226 = vmatmul.msk.bf16.gmra.mxu2 %vm5494_vm3, %v15644_v55  ;;  %12259 = vmatmul.msk.bf16.gmra.mxu3 %vm5494_vm3, %v6997_v52  ;;  %v6891_v52 = vld [vmem:[#allocation3 + $0x22a] sm:$0xff] }
 0x659   :  { %v15648_v62 = vadd.f32 %v7734_v3, %v7302_v23 }
 0x65a   :  { %v8242_v58 = vpop.f32.mrf.mxu1  ;;  %12292 = vmatmul.msk.bf16.gmra.mxu0 %vm5494_vm3, %v7555_v6  ;;  %v6333_v6 = vld [vmem:[#allocation3 + $0x229] sm:$0xff] }
 0x65b   :  { %v15642_v16 = vadd.f32 %v8242_v58, %v15467_v20  ;;  %v7179_v58 = vpop.f32.mrf.mxu3 }
 0x65c   :  { %v6621_v17 = vpop.f32.mrf.mxu2 }
 0x65d   :  { %v6745_v20 = vadd.f32 %v6621_v17, %v15173_v60  ;;  %v7450_v17 = vld [vmem:[#allocation3 + $0x248] sm:$0xff] }
 0x65f   :  { %v7303_v0 = vadd.f32 %v7179_v58, %v6745_v20  ;;  %v7739_v19 = vpop.f32.mrf.mxu0  ;;  %v15664_v58 = vpack.c.bf16 %v6334_v5, %v6333_v6  ;;  %v6336_v6 = vld [vmem:[#allocation3 + $0x249] sm:$0xff] }
 0x661   :  { %v15658_v39 = vadd.f32 %v7737_v40, %v7303_v0  ;;  %v7449_v40 = vld [vmem:[#allocation3 + $0x240] sm:$0xff] }
 0x662   :  { %v8245_v11 = vpop.f32.mrf.mxu1  ;;  %v7556_v0 = vpack.c.bf16 %v7450_v17, %v7449_v40  ;;  %v6894_v40 = vld [vmem:[#allocation3 + $0x24a] sm:$0xff] }
 0x663   :  { %v15654_v4 = vadd.f32 %v8245_v11, %v15476_v34  ;;  %v7181_v23 = vpop.f32.mrf.mxu3 }
 0x664   :  { %v6623_v3 = vpop.f32.mrf.mxu2 }
 0x665   :  { %12315 = vmatmul.msk.bf16.gmra.mxu1 %vm5494_vm3, %v15481_v49  ;;  %v6746_v59 = vadd.f32 %v6623_v3, %v15199_v44  ;;  %v6998_v49 = vpack.c.bf16 %v6892_v41, %v6891_v52 }
 0x667   :  { %v7304_v20 = vadd.f32 %v7181_v23, %v6746_v59  ;;  %v7742_v11 = vpop.f32.mrf.mxu0  ;;  %12227 = vmatmul.msk.bf16.gmra.mxu2 %vm5494_vm3, %v15664_v58  ;;  %12260 = vmatmul.msk.bf16.gmra.mxu3 %vm5494_vm3, %v6998_v49  ;;  %v6893_v49 = vld [vmem:[#allocation3 + $0x242] sm:$0xff] }
 0x669   :  { %v15668_v44 = vadd.f32 %v7739_v19, %v7304_v20 }
 0x66a   :  { %v8247_v60 = vpop.f32.mrf.mxu1  ;;  %12293 = vmatmul.msk.bf16.gmra.mxu0 %vm5494_vm3, %v7556_v0  ;;  %v6335_v0 = vld [vmem:[#allocation3 + $0x241] sm:$0xff] }
 0x66b   :  { %v15662_v34 = vadd.f32 %v8247_v60, %v15485_v31  ;;  %v7184_v60 = vpop.f32.mrf.mxu3 }
 0x66c   :  { %v6626_v3 = vpop.f32.mrf.mxu2 }
 0x66d   :  { %v6747_v31 = vadd.f32 %v6626_v3, %v15211_v38  ;;  %v7452_v3 = vld [vmem:[#allocation3 + $0x260] sm:$0xff] }
 0x66f   :  { %v7305_v23 = vadd.f32 %v7184_v60, %v6747_v31  ;;  %v7744_v52 = vpop.f32.mrf.mxu0  ;;  %v15684_v60 = vpack.c.bf16 %v6336_v6, %v6335_v0  ;;  %v6338_v0 = vld [vmem:[#allocation3 + $0x261] sm:$0xff] }
 0x671   :  { %v15678_v41 = vadd.f32 %v7742_v11, %v7305_v23  ;;  %v7451_v11 = vld [vmem:[#allocation3 + $0x258] sm:$0xff] }
 0x672   :  { %v8250_v59 = vpop.f32.mrf.mxu1  ;;  %v7557_v23 = vpack.c.bf16 %v7452_v3, %v7451_v11  ;;  %v6896_v11 = vld [vmem:[#allocation3 + $0x262] sm:$0xff] }
 0x673   :  { %v15674_v5 = vadd.f32 %v8250_v59, %v15494_v9  ;;  %v7186_v20 = vpop.f32.mrf.mxu3 }
 0x674   :  { %v6628_v19 = vpop.f32.mrf.mxu2 }
 0x675   :  { %12316 = vmatmul.msk.bf16.gmra.mxu1 %vm5494_vm3, %v15499_v2  ;;  %v6748_v17 = vadd.f32 %v6628_v19, %v15219_v30  ;;  %v6999_v2 = vpack.c.bf16 %v6894_v40, %v6893_v49 }
 0x677   :  { %v7306_v31 = vadd.f32 %v7186_v20, %v6748_v17  ;;  %v7747_v59 = vpop.f32.mrf.mxu0  ;;  %12228 = vmatmul.msk.bf16.gmra.mxu2 %vm5494_vm3, %v15684_v60  ;;  %12261 = vmatmul.msk.bf16.gmra.mxu3 %vm5494_vm3, %v6999_v2  ;;  %v6895_v2 = vld [vmem:[#allocation3 + $0x25a] sm:$0xff] }
 0x679   :  { %v15688_v30 = vadd.f32 %v7744_v52, %v7306_v31 }
 0x67a   :  { %v8252_v38 = vpop.f32.mrf.mxu1  ;;  %12294 = vmatmul.msk.bf16.gmra.mxu0 %vm5494_vm3, %v7557_v23  ;;  %v6337_v23 = vld [vmem:[#allocation3 + $0x259] sm:$0xff] }
 0x67b   :  { %v15682_v9 = vadd.f32 %v8252_v38, %v15503_v22  ;;  %v7189_v38 = vpop.f32.mrf.mxu3 }
 0x67c   :  { %v6631_v19 = vpop.f32.mrf.mxu2 }
 0x67d   :  { %v6749_v22 = vadd.f32 %v6631_v19, %v15231_v25  ;;  %v7454_v19 = vld [vmem:[#allocation3 + $0x278] sm:$0xff] }
 0x67f   :  { %v7307_v20 = vadd.f32 %v7189_v38, %v6749_v22  ;;  %v7749_v49 = vpop.f32.mrf.mxu0  ;;  %v15704_v38 = vpack.c.bf16 %v6338_v0, %v6337_v23  ;;  %v6340_v23 = vld [vmem:[#allocation3 + $0x279] sm:$0xff] }
 0x681   :  { %v15698_v40 = vadd.f32 %v7747_v59, %v7307_v20  ;;  %v7453_v59 = vld [vmem:[#allocation3 + $0x270] sm:$0xff] }
 0x682   :  { %v8255_v17 = vpop.f32.mrf.mxu1  ;;  %v7558_v20 = vpack.c.bf16 %v7454_v19, %v7453_v59  ;;  %v6898_v59 = vld [vmem:[#allocation3 + $0x27a] sm:$0xff] }
 0x683   :  { %v15694_v6 = vadd.f32 %v8255_v17, %v15512_v46  ;;  %v7191_v31 = vpop.f32.mrf.mxu3 }
 0x684   :  { %v6633_v52 = vpop.f32.mrf.mxu2 }
 0x685   :  { %12317 = vmatmul.msk.bf16.gmra.mxu1 %vm5494_vm3, %v15517_v32  ;;  %v6750_v3 = vadd.f32 %v6633_v52, %v15239_v51  ;;  %v7000_v32 = vpack.c.bf16 %v6896_v11, %v6895_v2 }
 0x687   :  { %v7308_v22 = vadd.f32 %v7191_v31, %v6750_v3  ;;  %v7752_v17 = vpop.f32.mrf.mxu0  ;;  %12229 = vmatmul.msk.bf16.gmra.mxu2 %vm5494_vm3, %v15704_v38  ;;  %12262 = vmatmul.msk.bf16.gmra.mxu3 %vm5494_vm3, %v7000_v32  ;;  %v6897_v32 = vld [vmem:[#allocation3 + $0x272] sm:$0xff] }
 0x689   :  { %v15708_v51 = vadd.f32 %v7749_v49, %v7308_v22 }
 0x68a   :  { %v8257_v25 = vpop.f32.mrf.mxu1  ;;  %12295 = vmatmul.msk.bf16.gmra.mxu0 %vm5494_vm3, %v7558_v20  ;;  %v6339_v20 = vld [vmem:[#allocation3 + $0x271] sm:$0xff] }
 0x68b   :  { %v15702_v46 = vadd.f32 %v8257_v25, %v15521_v42  ;;  %v7194_v25 = vpop.f32.mrf.mxu3 }
 0x68c   :  { %v6636_v52 = vpop.f32.mrf.mxu2 }
 0x68d   :  { %16887 = vst [vmem:[#allocation46_spill] sm:$0xff] %v15702_v46  ;;  %v6751_v42 = vadd.f32 %v6636_v52, %v15254_v37  ;;  %v7456_v52 = vld [vmem:[#allocation3 + $0x290] sm:$0xff]  ;;  %v7460_v46 = vld [vmem:[#allocation3 + $0x2c0] sm:$0xff] }
 0x68f   :  { %v7309_v31 = vadd.f32 %v7194_v25, %v6751_v42  ;;  %v7754_v2 = vpop.f32.mrf.mxu0  ;;  %v15724_v25 = vpack.c.bf16 %v6340_v23, %v6339_v20 }
 0x691   :  { %v15718_v11 = vadd.f32 %v7752_v17, %v7309_v31  ;;  %v7455_v17 = vld [vmem:[#allocation3 + $0x288] sm:$0xff] }
 0x692   :  { %v8260_v3 = vpop.f32.mrf.mxu1  ;;  %v7559_v31 = vpack.c.bf16 %v7456_v52, %v7455_v17  ;;  %v6342_v52 = vld [vmem:[#allocation3 + $0x291] sm:$0xff] }
 0x693   :  { %v15714_v0 = vadd.f32 %v8260_v3, %v15530_v63  ;;  %v7196_v22 = vpop.f32.mrf.mxu3  ;;  %v6900_v17 = vld [vmem:[#allocation3 + $0x292] sm:$0xff] }
 0x694   :  { %v6638_v49 = vpop.f32.mrf.mxu2 }
 0x695   :  { %16888 = vst [vmem:[#allocation47_spill] sm:$0xff] %v15714_v0  ;;  %12318 = vmatmul.msk.bf16.gmra.mxu1 %vm5494_vm3, %v15535_v24  ;;  %v6752_v19 = vadd.f32 %v6638_v49, %v15262_v27  ;;  %v7001_v24 = vpack.c.bf16 %v6898_v59, %v6897_v32  ;;  %v6343_v0 = vld [vmem:[#allocation3 + $0x2a1] sm:$0xff] }
 0x697   :  { %v7310_v42 = vadd.f32 %v7196_v22, %v6752_v19  ;;  %v7757_v3 = vpop.f32.mrf.mxu0  ;;  %12230 = vmatmul.msk.bf16.gmra.mxu2 %vm5494_vm3, %v15724_v25  ;;  %12263 = vmatmul.msk.bf16.gmra.mxu3 %vm5494_vm3, %v7001_v24  ;;  %v6899_v24 = vld [vmem:[#allocation3 + $0x28a] sm:$0xff] }
 0x699   :  { %v15730_v27 = vadd.f32 %v7754_v2, %v7310_v42 }
 0x69a   :  { %v8262_v37 = vpop.f32.mrf.mxu1  ;;  %12296 = vmatmul.msk.bf16.gmra.mxu0 %vm5494_vm3, %v7559_v31  ;;  %v6341_v31 = vld [vmem:[#allocation3 + $0x289] sm:$0xff] }
 0x69b   :  { %v15722_v63 = vadd.f32 %v8262_v37, %v15539_v28  ;;  %v7199_v37 = vpop.f32.mrf.mxu3 }
 0x69c   :  { %v6641_v49 = vpop.f32.mrf.mxu2 }
 0x69d   :  { %16889 = vst [vmem:[#allocation35_spill] sm:$0xff] %v15722_v63  ;;  %v6753_v28 = vadd.f32 %v6641_v49, %v15277_v48  ;;  %v7458_v49 = vld [vmem:[#allocation3 + $0x2a8] sm:$0xff] }
 0x69e   :  { %v6901_v63 = vld [vmem:[#allocation3 + $0x2a2] sm:$0xff] }
 0x69f   :  { %v7311_v22 = vadd.f32 %v7199_v37, %v6753_v28  ;;  %v7759_v32 = vpop.f32.mrf.mxu0  ;;  %v15744_v37 = vpack.c.bf16 %v6342_v52, %v6341_v31 }
 0x6a1   :  { %v15738_v59 = vadd.f32 %v7757_v3, %v7311_v22  ;;  %v7457_v3 = vld [vmem:[#allocation3 + $0x2a0] sm:$0xff] }
 0x6a2   :  { %v8265_v19 = vpop.f32.mrf.mxu1  ;;  %v7560_v22 = vpack.c.bf16 %v7458_v49, %v7457_v3 }
 0x6a3   :  { %v15734_v23 = vadd.f32 %v8265_v19, %v15548_v45  ;;  %v7201_v42 = vpop.f32.mrf.mxu3 }
 0x6a4   :  { %v6643_v20 = vpop.f32.mrf.mxu2 }
 0x6a5   :  { %16890 = vst [vmem:[#allocation48_spill] sm:$0xff] %v15734_v23  ;;  %12319 = vmatmul.msk.bf16.gmra.mxu1 %vm5494_vm3, %v15553_v18  ;;  %v6754_v2 = vadd.f32 %v6643_v20, %v15285_v15  ;;  %v7002_v18 = vpack.c.bf16 %v6900_v17, %v6899_v24  ;;  %v7996_v15 = vld [vmem:[#allocation3 + $0x189] sm:$0xff] }
 0x6a7   :  { %v7312_v28 = vadd.f32 %v7201_v42, %v6754_v2  ;;  %v7762_v19 = vpop.f32.mrf.mxu0  ;;  %12231 = vmatmul.msk.bf16.gmra.mxu2 %vm5494_vm3, %v15744_v37  ;;  %12264 = vmatmul.msk.bf16.gmra.mxu3 %vm5494_vm3, %v7002_v18  ;;  %v7995_v42 = vld [vmem:[#allocation3 + $0x181] sm:$0xff]  ;;  %v6344_v18 = vld [vmem:[#allocation3 + $0x2a9] sm:$0xff] }
 0x6a8   :  { %v8108_v17 = vpack.c.bf16 %v7996_v15, %v7995_v42  ;;  %v7459_v42 = vld [vmem:[#allocation3 + $0x2b8] sm:$0xff] }
 0x6a9   :  { %v15750_v23 = vadd.f32 %v7759_v32, %v7312_v28 }
 0x6aa   :  { %v8267_v48 = vpop.f32.mrf.mxu1  ;;  %12297 = vmatmul.msk.bf16.gmra.mxu0 %vm5494_vm3, %v7560_v22  ;;  %v16893_v22 = vld [vmem:[#allocation14_spill] sm:$0xff] }
 0x6ab   :  { %v15742_v45 = vadd.f32 %v8267_v48, %v15557_v14  ;;  %v16892_v14 = vld [vmem:[#allocation16_spill] sm:$0xff]  ;;  %v7204_v2 = vpop.f32.mrf.mxu3 }
 0x6ac   :  { %v6646_v20 = vpop.f32.mrf.mxu2 }
 0x6ad   :  { %16891 = vst [vmem:[#allocation50_spill] sm:$0xff] %v15742_v45  ;;  %v6755_v48 = vadd.f32 %v6646_v20, %v16892_v14  ;;  %v6902_v20 = vld [vmem:[#allocation3 + $0x2aa] sm:$0xff] }
 0x6af   :  { %v7313_v31 = vadd.f32 %v7204_v2, %v6755_v48  ;;  %v7764_v45 = vpop.f32.mrf.mxu0  ;;  %v15763_v48 = vpack.c.bf16 %v6344_v18, %v6343_v0 }
 0x6b1   :  { %v15757_v3 = vadd.f32 %v7762_v19, %v7313_v31  ;;  %v7561_v19 = vpack.c.bf16 %v7460_v46, %v7459_v42  ;;  %v6904_v42 = vld [vmem:[#allocation3 + $0x2c2] sm:$0xff] }
 0x6b2   :  { %v8270_v52 = vpop.f32.mrf.mxu1 }
 0x6b3   :  { %v15754_v24 = vadd.f32 %v8270_v52, %v15566_v50  ;;  %v7206_v28 = vpop.f32.mrf.mxu3  ;;  %v7003_v52 = vpack.c.bf16 %v6902_v20, %v6901_v63 }
 0x6b4   :  { %v6648_v49 = vpop.f32.mrf.mxu2 }
 0x6b5   :  { %12320 = vmatmul.msk.bf16.gmra.mxu1 %vm5494_vm3, %v8108_v17  ;;  %v6756_v32 = vadd.f32 %v6648_v49, %v16893_v22  ;;  %v16894_v49 = vld [vmem:[#allocation19_spill] sm:$0xff] }
 0x6b7   :  { %v7314_v15 = vadd.f32 %v7206_v28, %v6756_v32  ;;  %v7767_v2 = vpop.f32.mrf.mxu0  ;;  %12232 = vmatmul.msk.bf16.gmra.mxu2 %vm5494_vm3, %v15763_v48  ;;  %12265 = vmatmul.msk.bf16.gmra.mxu3 %vm5494_vm3, %v7003_v52  ;;  %v6346_v28 = vld [vmem:[#allocation3 + $0x2c1] sm:$0xff] }
 0x6b9   :  { %v15769_v31 = vadd.f32 %v7764_v45, %v7314_v15  ;;  %v6903_v15 = vld [vmem:[#allocation3 + $0x2ba] sm:$0xff] }
 0x6ba   :  { %v8272_v14 = vpop.f32.mrf.mxu1  ;;  %12298 = vmatmul.msk.bf16.gmra.mxu0 %vm5494_vm3, %v7561_v19 }
 0x6bb   :  { %v15761_v50 = vadd.f32 %v8272_v14, %v15572_v35  ;;  %v7209_v22 = vpop.f32.mrf.mxu3  ;;  %v16896_v14 = vld [vmem:[#allocation17_spill] sm:$0xff] }
 0x6bc   :  { %v6651_v17 = vpop.f32.mrf.mxu2 }
 0x6bd   :  { %v6757_v35 = vadd.f32 %v6651_v17, %v16894_v49  ;;  %v6345_v17 = vld [vmem:[#allocation3 + $0x2b9] sm:$0xff] }
 0x6be   :  { %v7462_v49 = vld [vmem:[#allocation3 + $0x2d8] sm:$0xff] }
 0x6bf   :  { %v7315_v63 = vadd.f32 %v7209_v22, %v6757_v35  ;;  %v7769_v18 = vpop.f32.mrf.mxu0  ;;  %v15783_v22 = vpack.c.bf16 %v6346_v28, %v6345_v17 }
 0x6c1   :  { %v15777_v20 = vadd.f32 %v7767_v2, %v7315_v63 }
 0x6c2   :  { %v8275_v32 = vpop.f32.mrf.mxu1 }
 0x6c3   :  { %v15773_v0 = vadd.f32 %v8275_v32, %v15581_v12  ;;  %v7211_v45 = vpop.f32.mrf.mxu3 }
 0x6c4   :  { %v6653_v46 = vpop.f32.mrf.mxu2 }
 0x6c5   :  { %16895 = vst [vmem:[#allocation16_spill] sm:$0xff] %v15773_v0  ;;  %12321 = vmatmul.msk.bf16.gmra.mxu1 %vm5494_vm3, %v15586_v21  ;;  %v6758_v52 = vadd.f32 %v6653_v46, %v16896_v14  ;;  %v7004_v21 = vpack.c.bf16 %v6904_v42, %v6903_v15  ;;  %v7461_v0 = vld [vmem:[#allocation3 + $0x2d0] sm:$0xff]  ;;  %v6348_v42 = vld [vmem:[#allocation3 + $0x2d9] sm:$0xff] }
 0x6c6   :  { %v7562_v2 = vpack.c.bf16 %v7462_v49, %v7461_v0  ;;  %v16898_v14 = vld [vmem:[#allocation22_spill] sm:$0xff]  ;;  %v16900_v49 = vld [vmem:[#allocation20_spill] sm:$0xff] }
 0x6c7   :  { %v7316_v35 = vadd.f32 %v7211_v45, %v6758_v52  ;;  %v7772_v32 = vpop.f32.mrf.mxu0  ;;  %12233 = vmatmul.msk.bf16.gmra.mxu2 %vm5494_vm3, %v15783_v22  ;;  %12266 = vmatmul.msk.bf16.gmra.mxu3 %vm5494_vm3, %v7004_v21 }
 0x6c9   :  { %v15789_v46 = vadd.f32 %v7769_v18, %v7316_v35  ;;  %v6905_v35 = vld [vmem:[#allocation3 + $0x2d2] sm:$0xff] }
 0x6ca   :  { %v8277_v19 = vpop.f32.mrf.mxu1  ;;  %12299 = vmatmul.msk.bf16.gmra.mxu0 %vm5494_vm3, %v7562_v2  ;;  %v6906_v2 = vld [vmem:[#allocation3 + $0x2da] sm:$0xff] }
 0x6cb   :  { %v15781_v12 = vadd.f32 %v8277_v19, %v15590_v36  ;;  %v7214_v19 = vpop.f32.mrf.mxu3 }
 0x6cc   :  { %v6656_v63 = vpop.f32.mrf.mxu2 }
 0x6cd   :  { %16897 = vst [vmem:[#allocation14_spill] sm:$0xff] %v15781_v12  ;;  %v6759_v36 = vadd.f32 %v6656_v63, %v16898_v14  ;;  %v6347_v14 = vld [vmem:[#allocation3 + $0x2d1] sm:$0xff] }
 0x6ce   :  { %v7464_v12 = vld [vmem:[#allocation3 + $0x2f0] sm:$0xff] }
 0x6cf   :  { %v7317_v45 = vadd.f32 %v7214_v19, %v6759_v36  ;;  %v7774_v15 = vpop.f32.mrf.mxu0  ;;  %v15803_v19 = vpack.c.bf16 %v6348_v42, %v6347_v14 }
 0x6d1   :  { %v15797_v17 = vadd.f32 %v7772_v32, %v7317_v45 }
 0x6d2   :  { %v8280_v52 = vpop.f32.mrf.mxu1 }
 0x6d3   :  { %v15793_v28 = vadd.f32 %v8280_v52, %v15599_v53  ;;  %v7216_v18 = vpop.f32.mrf.mxu3 }
 0x6d4   :  { %v6658_v0 = vpop.f32.mrf.mxu2 }
 0x6d5   :  { %16899 = vst [vmem:[#allocation19_spill] sm:$0xff] %v15793_v28  ;;  %12322 = vmatmul.msk.bf16.gmra.mxu1 %vm5494_vm3, %v15604_v29  ;;  %v6760_v21 = vadd.f32 %v6658_v0, %v16900_v49  ;;  %v7005_v29 = vpack.c.bf16 %v6906_v2, %v6905_v35  ;;  %v7463_v28 = vld [vmem:[#allocation3 + $0x2e8] sm:$0xff]  ;;  %v16901_v49 = vld [vmem:[#allocation24_spill] sm:$0xff] }
 0x6d6   :  { %v7563_v32 = vpack.c.bf16 %v7464_v12, %v7463_v28  ;;  %v6350_v28 = vld [vmem:[#allocation3 + $0x2f1] sm:$0xff] }
 0x6d7   :  { %v7318_v36 = vadd.f32 %v7216_v18, %v6760_v21  ;;  %v7777_v52 = vpop.f32.mrf.mxu0  ;;  %12234 = vmatmul.msk.bf16.gmra.mxu2 %vm5494_vm3, %v15803_v19  ;;  %12267 = vmatmul.msk.bf16.gmra.mxu3 %vm5494_vm3, %v7005_v29  ;;  %v6908_v29 = vld [vmem:[#allocation3 + $0x2f2] sm:$0xff] }
 0x6d9   :  { %v15809_v0 = vadd.f32 %v7774_v15, %v7318_v36  ;;  %v6907_v36 = vld [vmem:[#allocation3 + $0x2ea] sm:$0xff] }
 0x6da   :  { %v8282_v63 = vpop.f32.mrf.mxu1  ;;  %12300 = vmatmul.msk.bf16.gmra.mxu0 %vm5494_vm3, %v7563_v32 }
 0x6db   :  { %v15801_v53 = vadd.f32 %v8282_v63, %v15608_v8  ;;  %v7219_v63 = vpop.f32.mrf.mxu3 }
 0x6dc   :  { %v6661_v45 = vpop.f32.mrf.mxu2 }
 0x6dd   :  { %v6761_v8 = vadd.f32 %v6661_v45, %v16901_v49  ;;  %v6349_v45 = vld [vmem:[#allocation3 + $0x2e9] sm:$0xff] }
 0x6de   :  { %v7466_v49 = vld [vmem:[#allocation3 + $0x308] sm:$0xff] }
 0x6df   :  { %v7319_v18 = vadd.f32 %v7219_v63, %v6761_v8  ;;  %v7779_v35 = vpop.f32.mrf.mxu0  ;;  %v15823_v63 = vpack.c.bf16 %v6350_v28, %v6349_v45 }
 0x6e1   :  { %v15817_v2 = vadd.f32 %v7777_v52, %v7319_v18 }
 0x6e2   :  { %v8285_v21 = vpop.f32.mrf.mxu1 }
 0x6e3   :  { %v15813_v42 = vadd.f32 %v8285_v21, %v15618_v43  ;;  %v7221_v15 = vpop.f32.mrf.mxu3 }
 0x6e4   :  { %v6663_v12 = vpop.f32.mrf.mxu2 }
 0x6e5   :  { %16902 = vst [vmem:[#allocation17_spill] sm:$0xff] %v15813_v42  ;;  %12323 = vmatmul.msk.bf16.gmra.mxu1 %vm5494_vm3, %v15624_v26  ;;  %v6762_v14 = vadd.f32 %v6663_v12, %v15380_v56  ;;  %v7006_v26 = vpack.c.bf16 %v6908_v29, %v6907_v36  ;;  %v7465_v42 = vld [vmem:[#allocation3 + $0x300] sm:$0xff]  ;;  %v6352_v29 = vld [vmem:[#allocation3 + $0x309] sm:$0xff] }
 0x6e6   :  { %v7564_v52 = vpack.c.bf16 %v7466_v49, %v7465_v42  ;;  %v6909_v49 = vld [vmem:[#allocation3 + $0x302] sm:$0xff] }
 0x6e7   :  { %v7320_v8 = vadd.f32 %v7221_v15, %v6762_v14  ;;  %v7782_v21 = vpop.f32.mrf.mxu0  ;;  %12235 = vmatmul.msk.bf16.gmra.mxu2 %vm5494_vm3, %v15823_v63  ;;  %12268 = vmatmul.msk.bf16.gmra.mxu3 %vm5494_vm3, %v7006_v26  ;;  %v6351_v26 = vld [vmem:[#allocation3 + $0x301] sm:$0xff] }
 0x6e9   :  { %v15829_v18 = vadd.f32 %v7779_v35, %v7320_v8  ;;  %v6910_v8 = vld [vmem:[#allocation3 + $0x30a] sm:$0xff] }
 0x6ea   :  { %v8287_v32 = vpop.f32.mrf.mxu1  ;;  %12301 = vmatmul.msk.bf16.gmra.mxu0 %vm5494_vm3, %v7564_v52  ;;  %v7468_v52 = vld [vmem:[#allocation3 + $0x320] sm:$0xff] }
 0x6eb   :  { %v15821_v43 = vadd.f32 %v8287_v32, %v15628_v13  ;;  %v7224_v12 = vpop.f32.mrf.mxu3 }
 0x6ec   :  { %v6666_v56 = vpop.f32.mrf.mxu2 }
 0x6ed   :  { %v6763_v13 = vadd.f32 %v6666_v56, %v15398_v1 }
 0x6ef   :  { %v7321_v15 = vadd.f32 %v7224_v12, %v6763_v13  ;;  %v7784_v36 = vpop.f32.mrf.mxu0  ;;  %v15843_v13 = vpack.c.bf16 %v6352_v29, %v6351_v26  ;;  %v6354_v26 = vld [vmem:[#allocation3 + $0x321] sm:$0xff] }
 0x6f1   :  { %v15837_v32 = vadd.f32 %v7782_v21, %v7321_v15 }
 0x6f2   :  { %v8290_v14 = vpop.f32.mrf.mxu1 }
 0x6f3   :  { %v15833_v28 = vadd.f32 %v8290_v14, %v15638_v47  ;;  %v7226_v35 = vpop.f32.mrf.mxu3  ;;  %v7467_v14 = vld [vmem:[#allocation3 + $0x318] sm:$0xff] }
 0x6f4   :  { %v6668_v42 = vpop.f32.mrf.mxu2  ;;  %v7565_v21 = vpack.c.bf16 %v7468_v52, %v7467_v14 }
 0x6f5   :  { %16903 = vst [vmem:[#allocation22_spill] sm:$0xff] %v15833_v28  ;;  %12324 = vmatmul.msk.bf16.gmra.mxu1 %vm5494_vm3, %v15644_v55  ;;  %v6764_v45 = vadd.f32 %v6668_v42, %v15410_v61  ;;  %v7007_v55 = vpack.c.bf16 %v6910_v8, %v6909_v49  ;;  %v16905_v42 = vld [vmem:[#allocation26_spill] sm:$0xff] }
 0x6f7   :  { %v7322_v56 = vadd.f32 %v7226_v35, %v6764_v45  ;;  %v7787_v12 = vpop.f32.mrf.mxu0  ;;  %12236 = vmatmul.msk.bf16.gmra.mxu2 %vm5494_vm3, %v15843_v13  ;;  %12269 = vmatmul.msk.bf16.gmra.mxu3 %vm5494_vm3, %v7007_v55  ;;  %v16907_v55 = vld [vmem:[#allocation25_spill] sm:$0xff] }
 0x6f9   :  { %v15849_v15 = vadd.f32 %v7784_v36, %v7322_v56  ;;  %v6911_v56 = vld [vmem:[#allocation3 + $0x31a] sm:$0xff] }
 0x6fa   :  { %v8292_v1 = vpop.f32.mrf.mxu1  ;;  %12302 = vmatmul.msk.bf16.gmra.mxu0 %vm5494_vm3, %v7565_v21  ;;  %v6912_v21 = vld [vmem:[#allocation3 + $0x322] sm:$0xff] }
 0x6fb   :  { %v15841_v47 = vadd.f32 %v8292_v1, %v15648_v62  ;;  %v7229_v1 = vpop.f32.mrf.mxu3 }
 0x6fc   :  { %v6671_v61 = vpop.f32.mrf.mxu2 }
 0x6fd   :  { %16904 = vst [vmem:[#allocation20_spill] sm:$0xff] %v15841_v47  ;;  %v6765_v62 = vadd.f32 %v6671_v61, %v16905_v42  ;;  %v6353_v42 = vld [vmem:[#allocation3 + $0x319] sm:$0xff] }
 0x6fe   :  { %v7470_v47 = vld [vmem:[#allocation3 + $0x338] sm:$0xff] }
 0x6ff   :  { %v7323_v35 = vadd.f32 %v7229_v1, %v6765_v62  ;;  %v7789_v49 = vpop.f32.mrf.mxu0  ;;  %v15863_v1 = vpack.c.bf16 %v6354_v26, %v6353_v42 }
 0x701   :  { %v15857_v52 = vadd.f32 %v7787_v12, %v7323_v35 }
 0x702   :  { %v8295_v45 = vpop.f32.mrf.mxu1 }
 0x703   :  { %v15853_v29 = vadd.f32 %v8295_v45, %v15658_v39  ;;  %v7231_v36 = vpop.f32.mrf.mxu3 }
 0x704   :  { %v6673_v8 = vpop.f32.mrf.mxu2 }
 0x705   :  { %16906 = vst [vmem:[#allocation24_spill] sm:$0xff] %v15853_v29  ;;  %12325 = vmatmul.msk.bf16.gmra.mxu1 %vm5494_vm3, %v15664_v58  ;;  %v6766_v14 = vadd.f32 %v6673_v8, %v16907_v55  ;;  %v7008_v58 = vpack.c.bf16 %v6912_v21, %v6911_v56  ;;  %v7469_v29 = vld [vmem:[#allocation3 + $0x330] sm:$0xff]  ;;  %v16909_v55 = vld [vmem:[#allocation39_spill] sm:$0xff]  ;;  %v8524_v21 = vld [vmem:[#allocation3 + $0x22] sm:$0xff] }
 0x706   :  { %v7566_v12 = vpack.c.bf16 %v7470_v47, %v7469_v29  ;;  %v8523_v29 = vld [vmem:[#allocation3 + $0x1a] sm:$0xff] }
 0x707   :  { %v7324_v62 = vadd.f32 %v7231_v36, %v6766_v14  ;;  %v7792_v45 = vpop.f32.mrf.mxu0  ;;  %12237 = vmatmul.msk.bf16.gmra.mxu2 %vm5494_vm3, %v15863_v1  ;;  %12270 = vmatmul.msk.bf16.gmra.mxu3 %vm5494_vm3, %v7008_v58  ;;  %v16911_v58 = vld [vmem:[#allocation28_spill] sm:$0xff] }
 0x709   :  { %v15869_v8 = vadd.f32 %v7789_v49, %v7324_v62 }
 0x70a   :  { %v8297_v61 = vpop.f32.mrf.mxu1  ;;  %12303 = vmatmul.msk.bf16.gmra.mxu0 %vm5494_vm3, %v7566_v12  ;;  %v9083_v12 = vld [vmem:[#allocation3 + $0x38] sm:$0xff] }
 0x70b   :  { %v15861_v39 = vadd.f32 %v8297_v61, %v15668_v44  ;;  %v7234_v61 = vpop.f32.mrf.mxu3 }
 0x70c   :  { %v6676_v35 = vpop.f32.mrf.mxu2 }
 0x70d   :  { %16908 = vst [vmem:[#allocation26_spill] sm:$0xff] %v15861_v39  ;;  %v6767_v44 = vadd.f32 %v6676_v35, %v16909_v55  ;;  %v9641_v55 = vld [vmem:[#allocation3 + $0x39] sm:$0xff] }
 0x70f   :  { %v7325_v36 = vadd.f32 %v7234_v61, %v6767_v44  ;;  %v7794_v56 = vpop.f32.mrf.mxu0  ;;  %v8651_v44 = vpack.c.bf16 %v8524_v21, %v8523_v29  ;;  %v9082_v61 = vld [vmem:[#allocation3 + $0x30] sm:$0xff] }
 0x711   :  { %v15877_v42 = vadd.f32 %v7792_v45, %v7325_v36 }
 0x712   :  { %v8300_v14 = vpop.f32.mrf.mxu1 }
 0x713   :  { %v15873_v26 = vadd.f32 %v8300_v14, %v15678_v41  ;;  %v7236_v62 = vpop.f32.mrf.mxu3 }
 0x714   :  { %v6678_v47 = vpop.f32.mrf.mxu2 }
 0x715   :  { %16910 = vst [vmem:[#allocation25_spill] sm:$0xff] %v15873_v26  ;;  %12326 = vmatmul.msk.bf16.gmra.mxu1 %vm5494_vm3, %v15684_v60  ;;  %v6768_v49 = vadd.f32 %v6678_v47, %v16911_v58  ;;  %v9210_v26 = vpack.c.bf16 %v9083_v12, %v9082_v61  ;;  %v9640_v60 = vld [vmem:[#allocation3 + $0x31] sm:$0xff] }
 0x716   :  { %v9768_v28 = vpack.c.bf16 %v9641_v55, %v9640_v60  ;;  %v16912_v47 = vld [vmem:[#allocation27_spill] sm:$0xff] }
 0x717   :  { %v7326_v41 = vadd.f32 %v7236_v62, %v6768_v49  ;;  %v7797_v14 = vpop.f32.mrf.mxu0  ;;  %12338 = vmatmul.msk.bf16.vlgmr.msra.gmra.mxu2 %vm5494_vm3, %v8651_v44  ;;  %12371 = vmatmul.msk.bf16.vlgmr.msra.gmra.mxu3 %vm5494_vm3, %v9210_v26  ;;  %v8525_v12 = vld [vmem:[#allocation3 + $0x32] sm:$0xff]  ;;  %v8526_v26 = vld [vmem:[#allocation3 + $0x3a] sm:$0xff] }
 0x718   :  { %v9085_v44 = vld [vmem:[#allocation3 + $0x50] sm:$0xff] }
 0x719   :  { %v15886_v36 = vadd.f32 %v7794_v56, %v7326_v41  ;;  %v9643_v60 = vld [vmem:[#allocation3 + $0x51] sm:$0xff] }
 0x71a   :  { %v8302_v35 = vpop.f32.mrf.mxu1  ;;  %12404 = vmatmul.msk.bf16.vlgmr.msra.gmra.mxu0 %vm5494_vm3, %v9768_v28  ;;  %v16913_v28 = vld [vmem:[#allocation40_spill] sm:$0xff] }
 0x71b   :  { %v15881_v39 = vadd.f32 %v8302_v35, %v15688_v30  ;;  %v7239_v30 = vpop.f32.mrf.mxu3 }
 0x71c   :  { %v6681_v45 = vpop.f32.mrf.mxu2 }
 0x71d   :  { %v6769_v58 = vadd.f32 %v6681_v45, %v16912_v47  ;;  %v15900_v47 = vpack.c.bf16 %v8526_v26, %v8525_v12 }
 0x71f   :  { %v7327_v21 = vadd.f32 %v7239_v30, %v6769_v58  ;;  %v7799_v49 = vpop.f32.mrf.mxu0  ;;  %v9084_v58 = vld [vmem:[#allocation3 + $0x48] sm:$0xff] }
 0x721   :  { %v15894_v55 = vadd.f32 %v7797_v14, %v7327_v21 }
 0x722   :  { %v8305_v35 = vpop.f32.mrf.mxu1 }
 0x723   :  { %v15890_v29 = vadd.f32 %v8305_v35, %v15698_v40  ;;  %v7241_v41 = vpop.f32.mrf.mxu3  ;;  %v9642_v35 = vld [vmem:[#allocation3 + $0x49] sm:$0xff] }
 0x724   :  { %v6683_v62 = vpop.f32.mrf.mxu2  ;;  %v9769_v14 = vpack.c.bf16 %v9643_v60, %v9642_v35  ;;  %v8527_v60 = vld [vmem:[#allocation3 + $0x4a] sm:$0xff] }
 0x725   :  { %12327 = vmatmul.msk.bf16.gmra.mxu1 %vm5494_vm3, %v15704_v38  ;;  %v6770_v56 = vadd.f32 %v6683_v62, %v16913_v28  ;;  %v9211_v38 = vpack.c.bf16 %v9085_v44, %v9084_v58  ;;  %v8528_v58 = vld [vmem:[#allocation3 + $0x52] sm:$0xff]  ;;  %v16917_v35 = vld [vmem:[#allocation29_spill] sm:$0xff] }
 0x727   :  { %v7328_v40 = vadd.f32 %v7241_v41, %v6770_v56  ;;  %v7802_v30 = vpop.f32.mrf.mxu0  ;;  %12339 = vmatmul.msk.bf16.gmra.mxu2 %vm5494_vm3, %v15900_v47  ;;  %12372 = vmatmul.msk.bf16.gmra.mxu3 %vm5494_vm3, %v9211_v38 }
 0x729   :  { %v15906_v62 = vadd.f32 %v7799_v49, %v7328_v40 }
 0x72a   :  { %v8307_v61 = vpop.f32.mrf.mxu1  ;;  %12405 = vmatmul.msk.bf16.gmra.mxu0 %vm5494_vm3, %v9769_v14  ;;  %v9087_v14 = vld [vmem:[#allocation3 + $0x68] sm:$0xff] }
 0x72b   :  { %v15898_v45 = vadd.f32 %v8307_v61, %v15708_v51  ;;  %v16915_v51 = vld [vmem:[#allocation30_spill] sm:$0xff]  ;;  %v7244_v56 = vpop.f32.mrf.mxu3 }
 0x72c   :  { %v6686_v21 = vpop.f32.mrf.mxu2 }
 0x72d   :  { %16914 = vst [vmem:[#allocation39_spill] sm:$0xff] %v15898_v45  ;;  %v6771_v28 = vadd.f32 %v6686_v21, %v16915_v51  ;;  %v9645_v51 = vld [vmem:[#allocation3 + $0x69] sm:$0xff] }
 0x72f   :  { %v7329_v41 = vadd.f32 %v7244_v56, %v6771_v28  ;;  %v7804_v44 = vpop.f32.mrf.mxu0  ;;  %v15920_v28 = vpack.c.bf16 %v8528_v58, %v8527_v60  ;;  %v9086_v56 = vld [vmem:[#allocation3 + $0x60] sm:$0xff] }
 0x731   :  { %v15914_v38 = vadd.f32 %v7802_v30, %v7329_v41 }
 0x732   :  { %v8310_v12 = vpop.f32.mrf.mxu1 }
 0x733   :  { %v15910_v26 = vadd.f32 %v8310_v12, %v15718_v11  ;;  %v7246_v40 = vpop.f32.mrf.mxu3 }
 0x734   :  { %v6688_v61 = vpop.f32.mrf.mxu2 }
 0x735   :  { %16916 = vst [vmem:[#allocation28_spill] sm:$0xff] %v15910_v26  ;;  %12328 = vmatmul.msk.bf16.gmra.mxu1 %vm5494_vm3, %v15724_v25  ;;  %v6772_v49 = vadd.f32 %v6688_v61, %v16917_v35  ;;  %v9212_v25 = vpack.c.bf16 %v9087_v14, %v9086_v56  ;;  %v9644_v26 = vld [vmem:[#allocation3 + $0x61] sm:$0xff] }
 0x736   :  { %v9770_v30 = vpack.c.bf16 %v9645_v51, %v9644_v26  ;;  %v8530_v51 = vld [vmem:[#allocation3 + $0x6a] sm:$0xff] }
 0x737   :  { %v7330_v11 = vadd.f32 %v7246_v40, %v6772_v49  ;;  %v7807_v12 = vpop.f32.mrf.mxu0  ;;  %12340 = vmatmul.msk.bf16.gmra.mxu2 %vm5494_vm3, %v15920_v28  ;;  %12373 = vmatmul.msk.bf16.gmra.mxu3 %vm5494_vm3, %v9212_v25  ;;  %v16921_v25 = vld [vmem:[#allocation32_spill] sm:$0xff] }
 0x739   :  { %v15926_v61 = vadd.f32 %v7804_v44, %v7330_v11 }
 0x73a   :  { %v8312_v21 = vpop.f32.mrf.mxu1  ;;  %12406 = vmatmul.msk.bf16.gmra.mxu0 %vm5494_vm3, %v9770_v30  ;;  %v9089_v30 = vld [vmem:[#allocation3 + $0x80] sm:$0xff] }
 0x73b   :  { %v15918_v45 = vadd.f32 %v8312_v21, %v15730_v27  ;;  %v16919_v27 = vld [vmem:[#allocation41_spill] sm:$0xff]  ;;  %v7249_v49 = vpop.f32.mrf.mxu3 }
 0x73c   :  { %v6691_v41 = vpop.f32.mrf.mxu2  ;;  %v8529_v21 = vld [vmem:[#allocation3 + $0x62] sm:$0xff] }
 0x73d   :  { %16918 = vst [vmem:[#allocation27_spill] sm:$0xff] %v15918_v45  ;;  %v6773_v35 = vadd.f32 %v6691_v41, %v16919_v27  ;;  %v9647_v27 = vld [vmem:[#allocation3 + $0x81] sm:$0xff] }
 0x73f   :  { %v7331_v40 = vadd.f32 %v7249_v49, %v6773_v35  ;;  %v7809_v14 = vpop.f32.mrf.mxu0  ;;  %v15940_v35 = vpack.c.bf16 %v8530_v51, %v8529_v21  ;;  %v9088_v49 = vld [vmem:[#allocation3 + $0x78] sm:$0xff] }
 0x741   :  { %v15934_v56 = vadd.f32 %v7807_v12, %v7331_v40 }
 0x742   :  { %v8315_v60 = vpop.f32.mrf.mxu1 }
 0x743   :  { %v15930_v58 = vadd.f32 %v8315_v60, %v15738_v59  ;;  %v7251_v11 = vpop.f32.mrf.mxu3 }
 0x744   :  { %v6693_v26 = vpop.f32.mrf.mxu2 }
 0x745   :  { %16920 = vst [vmem:[#allocation40_spill] sm:$0xff] %v15930_v58  ;;  %12329 = vmatmul.msk.bf16.gmra.mxu1 %vm5494_vm3, %v15744_v37  ;;  %v6774_v44 = vadd.f32 %v6693_v26, %v16921_v25  ;;  %v9213_v37 = vpack.c.bf16 %v9089_v30, %v9088_v49  ;;  %v9646_v58 = vld [vmem:[#allocation3 + $0x79] sm:$0xff] }
 0x746   :  { %v9771_v12 = vpack.c.bf16 %v9647_v27, %v9646_v58  ;;  %v8532_v27 = vld [vmem:[#allocation3 + $0x82] sm:$0xff] }
 0x747   :  { %v7332_v59 = vadd.f32 %v7251_v11, %v6774_v44  ;;  %v7812_v60 = vpop.f32.mrf.mxu0  ;;  %12341 = vmatmul.msk.bf16.gmra.mxu2 %vm5494_vm3, %v15940_v35  ;;  %12374 = vmatmul.msk.bf16.gmra.mxu3 %vm5494_vm3, %v9213_v37  ;;  %v16925_v37 = vld [vmem:[#allocation34_spill] sm:$0xff] }
 0x749   :  { %v15946_v26 = vadd.f32 %v7809_v14, %v7332_v59 }
 0x74a   :  { %v8317_v41 = vpop.f32.mrf.mxu1  ;;  %12407 = vmatmul.msk.bf16.gmra.mxu0 %vm5494_vm3, %v9771_v12  ;;  %v9091_v12 = vld [vmem:[#allocation3 + $0x98] sm:$0xff] }
 0x74b   :  { %v15938_v45 = vadd.f32 %v8317_v41, %v15750_v23  ;;  %v16923_v23 = vld [vmem:[#allocation31_spill] sm:$0xff]  ;;  %v7254_v44 = vpop.f32.mrf.mxu3 }
 0x74c   :  { %v6696_v40 = vpop.f32.mrf.mxu2  ;;  %v8531_v41 = vld [vmem:[#allocation3 + $0x7a] sm:$0xff] }
 0x74d   :  { %16922 = vst [vmem:[#allocation30_spill] sm:$0xff] %v15938_v45  ;;  %v6775_v25 = vadd.f32 %v6696_v40, %v16923_v23  ;;  %v9649_v23 = vld [vmem:[#allocation3 + $0x99] sm:$0xff] }
 0x74f   :  { %v7333_v11 = vadd.f32 %v7254_v44, %v6775_v25  ;;  %v7814_v30 = vpop.f32.mrf.mxu0  ;;  %v15960_v25 = vpack.c.bf16 %v8532_v27, %v8531_v41  ;;  %v9090_v44 = vld [vmem:[#allocation3 + $0x90] sm:$0xff] }
 0x751   :  { %v15954_v49 = vadd.f32 %v7812_v60, %v7333_v11 }
 0x752   :  { %v8320_v21 = vpop.f32.mrf.mxu1 }
 0x753   :  { %v15950_v51 = vadd.f32 %v8320_v21, %v15757_v3  ;;  %v7256_v59 = vpop.f32.mrf.mxu3 }
 0x754   :  { %v6698_v58 = vpop.f32.mrf.mxu2 }
 0x755   :  { %16924 = vst [vmem:[#allocation29_spill] sm:$0xff] %v15950_v51  ;;  %12330 = vmatmul.msk.bf16.gmra.mxu1 %vm5494_vm3, %v15763_v48  ;;  %v6776_v14 = vadd.f32 %v6698_v58, %v16925_v37  ;;  %v9214_v48 = vpack.c.bf16 %v9091_v12, %v9090_v44  ;;  %v9648_v51 = vld [vmem:[#allocation3 + $0x91] sm:$0xff] }
 0x756   :  { %v9772_v60 = vpack.c.bf16 %v9649_v23, %v9648_v51  ;;  %v8534_v23 = vld [vmem:[#allocation3 + $0x9a] sm:$0xff] }
 0x757   :  { %v7334_v3 = vadd.f32 %v7256_v59, %v6776_v14  ;;  %v7817_v21 = vpop.f32.mrf.mxu0  ;;  %12342 = vmatmul.msk.bf16.gmra.mxu2 %vm5494_vm3, %v15960_v25  ;;  %12375 = vmatmul.msk.bf16.gmra.mxu3 %vm5494_vm3, %v9214_v48  ;;  %v16929_v48 = vld [vmem:[#allocation44_spill] sm:$0xff] }
 0x759   :  { %v15966_v58 = vadd.f32 %v7814_v30, %v7334_v3 }
 0x75a   :  { %v8322_v40 = vpop.f32.mrf.mxu1  ;;  %12408 = vmatmul.msk.bf16.gmra.mxu0 %vm5494_vm3, %v9772_v60  ;;  %v9093_v60 = vld [vmem:[#allocation3 + $0xb0] sm:$0xff] }
 0x75b   :  { %v15958_v45 = vadd.f32 %v8322_v40, %v15769_v31  ;;  %v16927_v31 = vld [vmem:[#allocation43_spill] sm:$0xff]  ;;  %v7259_v14 = vpop.f32.mrf.mxu3 }
 0x75c   :  { %v6701_v11 = vpop.f32.mrf.mxu2  ;;  %v8533_v40 = vld [vmem:[#allocation3 + $0x92] sm:$0xff] }
 0x75d   :  { %16926 = vst [vmem:[#allocation41_spill] sm:$0xff] %v15958_v45  ;;  %v6777_v37 = vadd.f32 %v6701_v11, %v16927_v31  ;;  %v9651_v31 = vld [vmem:[#allocation3 + $0xb1] sm:$0xff] }
 0x75f   :  { %v7335_v59 = vadd.f32 %v7259_v14, %v6777_v37  ;;  %v7819_v12 = vpop.f32.mrf.mxu0  ;;  %v15980_v37 = vpack.c.bf16 %v8534_v23, %v8533_v40  ;;  %v9092_v14 = vld [vmem:[#allocation3 + $0xa8] sm:$0xff] }
 0x761   :  { %v15974_v44 = vadd.f32 %v7817_v21, %v7335_v59 }
 0x762   :  { %v8325_v41 = vpop.f32.mrf.mxu1 }
 0x763   :  { %v15970_v27 = vadd.f32 %v8325_v41, %v15777_v20  ;;  %v7261_v3 = vpop.f32.mrf.mxu3 }
 0x764   :  { %v6703_v51 = vpop.f32.mrf.mxu2 }
 0x765   :  { %16928 = vst [vmem:[#allocation32_spill] sm:$0xff] %v15970_v27  ;;  %12331 = vmatmul.msk.bf16.gmra.mxu1 %vm5494_vm3, %v15783_v22  ;;  %v6778_v30 = vadd.f32 %v6703_v51, %v16929_v48  ;;  %v9215_v22 = vpack.c.bf16 %v9093_v60, %v9092_v14  ;;  %v9650_v27 = vld [vmem:[#allocation3 + $0xa9] sm:$0xff] }
 0x766   :  { %v9773_v21 = vpack.c.bf16 %v9651_v31, %v9650_v27  ;;  %v8536_v31 = vld [vmem:[#allocation3 + $0xb2] sm:$0xff] }
 0x767   :  { %v7336_v20 = vadd.f32 %v7261_v3, %v6778_v30  ;;  %v7822_v41 = vpop.f32.mrf.mxu0  ;;  %12343 = vmatmul.msk.bf16.gmra.mxu2 %vm5494_vm3, %v15980_v37  ;;  %12376 = vmatmul.msk.bf16.gmra.mxu3 %vm5494_vm3, %v9215_v22  ;;  %v9095_v22 = vld [vmem:[#allocation3 + $0xc8] sm:$0xff] }
 0x769   :  { %v15986_v51 = vadd.f32 %v7819_v12, %v7336_v20 }
 0x76a   :  { %v8327_v11 = vpop.f32.mrf.mxu1  ;;  %12409 = vmatmul.msk.bf16.gmra.mxu0 %vm5494_vm3, %v9773_v21 }
 0x76b   :  { %v15978_v45 = vadd.f32 %v8327_v11, %v15789_v46  ;;  %v16930_v46 = vld [vmem:[#allocation42_spill] sm:$0xff]  ;;  %v7264_v30 = vpop.f32.mrf.mxu3 }
 0x76c   :  { %v6706_v59 = vpop.f32.mrf.mxu2  ;;  %v8535_v11 = vld [vmem:[#allocation3 + $0xaa] sm:$0xff] }
 0x76d   :  { %v6779_v48 = vadd.f32 %v6706_v59, %v16930_v46  ;;  %v9653_v59 = vld [vmem:[#allocation3 + $0xc9] sm:$0xff] }
 0x76f   :  { %v7337_v3 = vadd.f32 %v7264_v30, %v6779_v48  ;;  %v7824_v60 = vpop.f32.mrf.mxu0  ;;  %v16000_v48 = vpack.c.bf16 %v8536_v31, %v8535_v11  ;;  %v9094_v30 = vld [vmem:[#allocation3 + $0xc0] sm:$0xff] }
 0x771   :  { %v15994_v14 = vadd.f32 %v7822_v41, %v7337_v3 }
 0x772   :  { %v8330_v40 = vpop.f32.mrf.mxu1 }
 0x773   :  { %v15990_v23 = vadd.f32 %v8330_v40, %v15797_v17  ;;  %v7266_v20 = vpop.f32.mrf.mxu3 }
 0x774   :  { %v6708_v27 = vpop.f32.mrf.mxu2 }
 0x775   :  { %16931 = vst [vmem:[#allocation31_spill] sm:$0xff] %v15990_v23  ;;  %12332 = vmatmul.msk.bf16.gmra.mxu1 %vm5494_vm3, %v15803_v19  ;;  %v6780_v12 = vadd.f32 %v6708_v27, %v15569_v33  ;;  %v9216_v19 = vpack.c.bf16 %v9095_v22, %v9094_v30  ;;  %v9652_v23 = vld [vmem:[#allocation3 + $0xc1] sm:$0xff] }
 0x776   :  { %v9774_v41 = vpack.c.bf16 %v9653_v59, %v9652_v23  ;;  %v8538_v59 = vld [vmem:[#allocation3 + $0xca] sm:$0xff] }
 0x777   :  { %v7338_v17 = vadd.f32 %v7266_v20, %v6780_v12  ;;  %v7827_v40 = vpop.f32.mrf.mxu0  ;;  %12344 = vmatmul.msk.bf16.gmra.mxu2 %vm5494_vm3, %v16000_v48  ;;  %12377 = vmatmul.msk.bf16.gmra.mxu3 %vm5494_vm3, %v9216_v19  ;;  %v16935_v19 = vld [vmem:[#allocation45_spill] sm:$0xff] }
 0x779   :  { %v16006_v3 = vadd.f32 %v7824_v60, %v7338_v17 }
 0x77a   :  { %v8332_v21 = vpop.f32.mrf.mxu1  ;;  %12410 = vmatmul.msk.bf16.gmra.mxu0 %vm5494_vm3, %v9774_v41  ;;  %v9097_v41 = vld [vmem:[#allocation3 + $0xe0] sm:$0xff] }
 0x77b   :  { %v15998_v46 = vadd.f32 %v8332_v21, %v15809_v0  ;;  %v16933_v0 = vld [vmem:[#allocation33_spill] sm:$0xff]  ;;  %v7269_v12 = vpop.f32.mrf.mxu3 }
 0x77c   :  { %v6711_v33 = vpop.f32.mrf.mxu2  ;;  %v8537_v21 = vld [vmem:[#allocation3 + $0xc2] sm:$0xff] }
 0x77d   :  { %16932 = vst [vmem:[#allocation34_spill] sm:$0xff] %v15998_v46  ;;  %v6781_v27 = vadd.f32 %v6711_v33, %v16933_v0  ;;  %v9655_v0 = vld [vmem:[#allocation3 + $0xe1] sm:$0xff] }
 0x77f   :  { %v7339_v20 = vadd.f32 %v7269_v12, %v6781_v27  ;;  %v7829_v22 = vpop.f32.mrf.mxu0  ;;  %v16020_v27 = vpack.c.bf16 %v8538_v59, %v8537_v21  ;;  %v9096_v12 = vld [vmem:[#allocation3 + $0xd8] sm:$0xff] }
 0x781   :  { %v16014_v30 = vadd.f32 %v7827_v40, %v7339_v20 }
 0x782   :  { %v8335_v11 = vpop.f32.mrf.mxu1 }
 0x783   :  { %v16010_v31 = vadd.f32 %v8335_v11, %v15817_v2  ;;  %v7271_v17 = vpop.f32.mrf.mxu3 }
 0x784   :  { %v6713_v23 = vpop.f32.mrf.mxu2 }
 0x785   :  { %16934 = vst [vmem:[#allocation43_spill] sm:$0xff] %v16010_v31  ;;  %12333 = vmatmul.msk.bf16.gmra.mxu1 %vm5494_vm3, %v15823_v63  ;;  %v6782_v60 = vadd.f32 %v6713_v23, %v16935_v19  ;;  %v9217_v63 = vpack.c.bf16 %v9097_v41, %v9096_v12  ;;  %v9654_v31 = vld [vmem:[#allocation3 + $0xd9] sm:$0xff] }
 0x786   :  { %v9775_v40 = vpack.c.bf16 %v9655_v0, %v9654_v31  ;;  %v8540_v0 = vld [vmem:[#allocation3 + $0xe2] sm:$0xff] }
 0x787   :  { %v7340_v2 = vadd.f32 %v7271_v17, %v6782_v60  ;;  %v7832_v11 = vpop.f32.mrf.mxu0  ;;  %12345 = vmatmul.msk.bf16.gmra.mxu2 %vm5494_vm3, %v16020_v27  ;;  %12378 = vmatmul.msk.bf16.gmra.mxu3 %vm5494_vm3, %v9217_v63  ;;  %v9099_v63 = vld [vmem:[#allocation3 + $0xf8] sm:$0xff] }
 0x789   :  { %v16026_v23 = vadd.f32 %v7829_v22, %v7340_v2 }
 0x78a   :  { %v8337_v33 = vpop.f32.mrf.mxu1  ;;  %12411 = vmatmul.msk.bf16.gmra.mxu0 %vm5494_vm3, %v9775_v40 }
 0x78b   :  { %v16018_v46 = vadd.f32 %v8337_v33, %v15829_v18  ;;  %v16936_v18 = vld [vmem:[#allocation36_spill] sm:$0xff]  ;;  %v7274_v60 = vpop.f32.mrf.mxu3 }
 0x78c   :  { %v6716_v20 = vpop.f32.mrf.mxu2  ;;  %v8539_v33 = vld [vmem:[#allocation3 + $0xda] sm:$0xff] }
 0x78d   :  { %v6783_v19 = vadd.f32 %v6716_v20, %v16936_v18  ;;  %v9657_v20 = vld [vmem:[#allocation3 + $0xf9] sm:$0xff] }
 0x78f   :  { %v7341_v17 = vadd.f32 %v7274_v60, %v6783_v19  ;;  %v7834_v41 = vpop.f32.mrf.mxu0  ;;  %v16040_v19 = vpack.c.bf16 %v8540_v0, %v8539_v33  ;;  %v9098_v60 = vld [vmem:[#allocation3 + $0xf0] sm:$0xff] }
 0x791   :  { %v16034_v12 = vadd.f32 %v7832_v11, %v7341_v17 }
 0x792   :  { %v8340_v21 = vpop.f32.mrf.mxu1 }
 0x793   :  { %v16030_v59 = vadd.f32 %v8340_v21, %v15837_v32  ;;  %v7276_v2 = vpop.f32.mrf.mxu3 }
 0x794   :  { %v6718_v31 = vpop.f32.mrf.mxu2 }
 0x795   :  { %16937 = vst [vmem:[#allocation44_spill] sm:$0xff] %v16030_v59  ;;  %12334 = vmatmul.msk.bf16.gmra.mxu1 %vm5494_vm3, %v15843_v13  ;;  %v6784_v22 = vadd.f32 %v6718_v31, %v15602_v57  ;;  %v9218_v13 = vpack.c.bf16 %v9099_v63, %v9098_v60  ;;  %v9656_v59 = vld [vmem:[#allocation3 + $0xf1] sm:$0xff] }
 0x796   :  { %v9776_v11 = vpack.c.bf16 %v9657_v20, %v9656_v59  ;;  %v8541_v63 = vld [vmem:[#allocation3 + $0xf2] sm:$0xff] }
 0x797   :  { %v7342_v32 = vadd.f32 %v7276_v2, %v6784_v22  ;;  %v9910_v21 = vpop.f32.mrf.mxu0  ;;  %12346 = vmatmul.msk.bf16.gmra.mxu2 %vm5494_vm3, %v16040_v19  ;;  %12379 = vmatmul.msk.bf16.gmra.mxu3 %vm5494_vm3, %v9218_v13  ;;  %v9101_v60 = vld [vmem:[#allocation3 + $0x110] sm:$0xff] }
 0x798   :  { %v9659_v13 = vld [vmem:[#allocation3 + $0x111] sm:$0xff] }
 0x799   :  { %v16046_v17 = vadd.f32 %v7834_v41, %v7342_v32 }
 0x79a   :  { %v8342_v40 = vpop.f32.mrf.mxu1  ;;  %12412 = vmatmul.msk.bf16.gmra.mxu0 %vm5494_vm3, %v9776_v11 }
 0x79b   :  { %v16038_v18 = vadd.f32 %v8342_v40, %v15849_v15  ;;  %v9352_v31 = vpop.f32.mrf.mxu3  ;;  %v8542_v40 = vld [vmem:[#allocation3 + $0xfa] sm:$0xff] }
 0x79c   :  { %v8793_v57 = vpop.f32.mrf.mxu2 }
 0x79d   :  { %v8953_v15 = vadd.f32 %v8793_v57, %v15614_v54  ;;  %v16060_v57 = vpack.c.bf16 %v8542_v40, %v8541_v63 }
 0x79f   :  { %v9512_v22 = vadd.f32 %v9352_v31, %v8953_v15  ;;  %v9912_v2 = vpop.f32.mrf.mxu0  ;;  %v9100_v15 = vld [vmem:[#allocation3 + $0x108] sm:$0xff] }
 0x7a1   :  { %v16054_v20 = vadd.f32 %v9910_v21, %v9512_v22 }
 0x7a2   :  { %v8345_v33 = vpop.f32.mrf.mxu1 }
 0x7a3   :  { %v16050_v0 = vadd.f32 %v8345_v33, %v15857_v52  ;;  %v9354_v32 = vpop.f32.mrf.mxu3  ;;  %v9658_v33 = vld [vmem:[#allocation3 + $0x109] sm:$0xff] }
 0x7a4   :  { %v8795_v59 = vpop.f32.mrf.mxu2  ;;  %v9777_v21 = vpack.c.bf16 %v9659_v13, %v9658_v33  ;;  %v8544_v33 = vld [vmem:[#allocation3 + $0x112] sm:$0xff] }
 0x7a5   :  { %16938 = vst [vmem:[#allocation42_spill] sm:$0xff] %v16050_v0  ;;  %12335 = vmatmul.msk.bf16.gmra.mxu1 %vm5494_vm3, %v15863_v1  ;;  %v8954_v41 = vadd.f32 %v8795_v59, %v15622_v10  ;;  %v9219_v1 = vpack.c.bf16 %v9101_v60, %v9100_v15  ;;  %v8028_v10 = vld [vmem:[#allocation3 + $0x339] sm:$0xff] }
 0x7a7   :  { %v9513_v52 = vadd.f32 %v9354_v32, %v8954_v41  ;;  %v9915_v31 = vpop.f32.mrf.mxu0  ;;  %12347 = vmatmul.msk.bf16.gmra.mxu2 %vm5494_vm3, %v16060_v57  ;;  %12380 = vmatmul.msk.bf16.gmra.mxu3 %vm5494_vm3, %v9219_v1  ;;  %v8027_v41 = vld [vmem:[#allocation3 + $0x331] sm:$0xff] }
 0x7a8   :  { %v8124_v60 = vpack.c.bf16 %v8028_v10, %v8027_v41  ;;  %v8543_v1 = vld [vmem:[#allocation3 + $0x10a] sm:$0xff]  ;;  %v9660_v41 = vld [vmem:[#allocation3 + $0x121] sm:$0xff] }
 0x7a9   :  { %v16066_v59 = vadd.f32 %v9912_v2, %v9513_v52  ;;  %v16079_v10 = vpack.c.bf16 %v8544_v33, %v8543_v1 }
 0x7aa   :  { %v8347_v54 = vpop.f32.mrf.mxu1  ;;  %12413 = vmatmul.msk.bf16.gmra.mxu0 %vm5494_vm3, %v9777_v21 }
 0x7ab   :  { %v16058_v11 = vadd.f32 %v8347_v54, %v15869_v8  ;;  %v9357_v63 = vpop.f32.mrf.mxu3 }
 0x7ac   :  { %v8798_v22 = vpop.f32.mrf.mxu2 }
 0x7ad   :  { %16939 = vst [vmem:[#allocation33_spill] sm:$0xff] %v16058_v11  ;;  %v8955_v8 = vadd.f32 %v8798_v22, %v15634_v7  ;;  %v9103_v7 = vld [vmem:[#allocation3 + $0x128] sm:$0xff] }
 0x7ae   :  { %v9661_v11 = vld [vmem:[#allocation3 + $0x129] sm:$0xff] }
 0x7af   :  { %v9514_v54 = vadd.f32 %v9357_v63, %v8955_v8  ;;  %v9917_v15 = vpop.f32.mrf.mxu0  ;;  %v9102_v8 = vld [vmem:[#allocation3 + $0x120] sm:$0xff] }
 0x7b1   :  { %v16073_v21 = vadd.f32 %v9915_v31, %v9514_v54  ;;  %v9778_v31 = vpack.c.bf16 %v9661_v11, %v9660_v41 }
 0x7b2   :  { %v8350_v40 = vpop.f32.mrf.mxu1 }
 0x7b3   :  { %v16070_v32 = vadd.f32 %v8350_v40, %v15877_v42  ;;  %v9359_v52 = vpop.f32.mrf.mxu3  ;;  %v9220_v40 = vpack.c.bf16 %v9103_v7, %v9102_v8  ;;  %v8546_v7 = vld [vmem:[#allocation3 + $0x12a] sm:$0xff]  ;;  %v9105_v8 = vld [vmem:[#allocation3 + $0x140] sm:$0xff] }
 0x7b4   :  { %v8800_v13 = vpop.f32.mrf.mxu2 }
 0x7b5   :  { %12336 = vmatmul.msk.bf16.gmra.mxu1 %vm5494_vm3, %v8124_v60  ;;  %v8956_v2 = vadd.f32 %v8800_v13, %v15642_v16 }
 0x7b7   :  { %v9515_v42 = vadd.f32 %v9359_v52, %v8956_v2  ;;  %v9920_v63 = vpop.f32.mrf.mxu0  ;;  %12348 = vmatmul.msk.bf16.gmra.mxu2 %vm5494_vm3, %v16079_v10  ;;  %12381 = vmatmul.msk.bf16.gmra.mxu3 %vm5494_vm3, %v9220_v40  ;;  %v8545_v52 = vld [vmem:[#allocation3 + $0x122] sm:$0xff] }
 0x7b8   :  { %v9663_v40 = vld [vmem:[#allocation3 + $0x141] sm:$0xff] }
 0x7b9   :  { %v16085_v60 = vadd.f32 %v9917_v15, %v9515_v42 }
 0x7ba   :  { %v8352_v22 = vpop.f32.mrf.mxu1  ;;  %12414 = vmatmul.msk.bf16.gmra.mxu0 %vm5494_vm3, %v9778_v31  ;;  %v16099_v31 = vpack.c.bf16 %v8546_v7, %v8545_v52 }
 0x7bb   :  { %v16077_v0 = vadd.f32 %v8352_v22, %v15886_v36  ;;  %v9362_v54 = vpop.f32.mrf.mxu3 }
 0x7bc   :  { %v8803_v16 = vpop.f32.mrf.mxu2 }
 0x7bd   :  { %v8957_v36 = vadd.f32 %v8803_v16, %v15654_v4  ;;  %v9104_v16 = vld [vmem:[#allocation3 + $0x138] sm:$0xff] }
 0x7bf   :  { %v9516_v33 = vadd.f32 %v9362_v54, %v8957_v36  ;;  %v9922_v2 = vpop.f32.mrf.mxu0  ;;  %v9662_v54 = vld [vmem:[#allocation3 + $0x139] sm:$0xff] }
 0x7c1   :  { %v16093_v22 = vadd.f32 %v9920_v63, %v9516_v33  ;;  %v9779_v63 = vpack.c.bf16 %v9663_v40, %v9662_v54 }
 0x7c2   :  { %v8355_v13 = vpop.f32.mrf.mxu1 }
 0x7c3   :  { %v16089_v1 = vadd.f32 %v8355_v13, %v15894_v55  ;;  %v9364_v42 = vpop.f32.mrf.mxu3 }
 0x7c4   :  { %v8805_v11 = vpop.f32.mrf.mxu2 }
 0x7c5   :  { %12437 = vmatmul.msk.bf16.vlgmr.msra.gmra.mxu1 %vm5494_vm3, %v15900_v47  ;;  %v8958_v15 = vadd.f32 %v8805_v11, %v15662_v34  ;;  %v9221_v47 = vpack.c.bf16 %v9105_v8, %v9104_v16  ;;  %v8547_v8 = vld [vmem:[#allocation3 + $0x13a] sm:$0xff] }
 0x7c6   :  { %v9107_v16 = vld [vmem:[#allocation3 + $0x158] sm:$0xff] }
 0x7c7   :  { %v9517_v55 = vadd.f32 %v9364_v42, %v8958_v15  ;;  %v9925_v36 = vpop.f32.mrf.mxu0  ;;  %12349 = vmatmul.msk.bf16.gmra.mxu2 %vm5494_vm3, %v16099_v31  ;;  %12382 = vmatmul.msk.bf16.gmra.mxu3 %vm5494_vm3, %v9221_v47  ;;  %v9665_v47 = vld [vmem:[#allocation3 + $0x159] sm:$0xff] }
 0x7c9   :  { %v16105_v13 = vadd.f32 %v9922_v2, %v9517_v55 }
 0x7ca   :  { %v8357_v4 = vpop.f32.mrf.mxu1  ;;  %12415 = vmatmul.msk.bf16.gmra.mxu0 %vm5494_vm3, %v9779_v63 }
 0x7cb   :  { %v16097_v41 = vadd.f32 %v8357_v4, %v15906_v62  ;;  %v9367_v33 = vpop.f32.mrf.mxu3  ;;  %v8548_v4 = vld [vmem:[#allocation3 + $0x142] sm:$0xff] }
 0x7cc   :  { %v8808_v34 = vpop.f32.mrf.mxu2  ;;  %v16119_v63 = vpack.c.bf16 %v8548_v4, %v8547_v8 }
 0x7cd   :  { %v8959_v62 = vadd.f32 %v8808_v34, %v15674_v5  ;;  %v9106_v34 = vld [vmem:[#allocation3 + $0x150] sm:$0xff] }
 0x7cf   :  { %v9518_v7 = vadd.f32 %v9367_v33, %v8959_v62  ;;  %v9927_v15 = vpop.f32.mrf.mxu0  ;;  %v9664_v33 = vld [vmem:[#allocation3 + $0x151] sm:$0xff] }
 0x7d1   :  { %v16113_v40 = vadd.f32 %v9925_v36, %v9518_v7  ;;  %v9780_v36 = vpack.c.bf16 %v9665_v47, %v9664_v33  ;;  %v9667_v33 = vld [vmem:[#allocation3 + $0x171] sm:$0xff] }
 0x7d2   :  { %v8360_v11 = vpop.f32.mrf.mxu1 }
 0x7d3   :  { %v16109_v52 = vadd.f32 %v8360_v11, %v15914_v38  ;;  %v9369_v55 = vpop.f32.mrf.mxu3 }
 0x7d4   :  { %v8810_v42 = vpop.f32.mrf.mxu2 }
 0x7d5   :  { %12438 = vmatmul.msk.bf16.gmra.mxu1 %vm5494_vm3, %v15920_v28  ;;  %v8960_v2 = vadd.f32 %v8810_v42, %v15682_v9  ;;  %v9222_v28 = vpack.c.bf16 %v9107_v16, %v9106_v34  ;;  %v8549_v16 = vld [vmem:[#allocation3 + $0x152] sm:$0xff] }
 0x7d6   :  { %v16941_v34 = vld [vmem:[#allocation46_spill] sm:$0xff] }
 0x7d7   :  { %v9519_v38 = vadd.f32 %v9369_v55, %v8960_v2  ;;  %v9930_v62 = vpop.f32.mrf.mxu0  ;;  %12350 = vmatmul.msk.bf16.gmra.mxu2 %vm5494_vm3, %v16119_v63  ;;  %12383 = vmatmul.msk.bf16.gmra.mxu3 %vm5494_vm3, %v9222_v28  ;;  %v9109_v28 = vld [vmem:[#allocation3 + $0x170] sm:$0xff] }
 0x7d9   :  { %v16125_v11 = vadd.f32 %v9927_v15, %v9519_v38 }
 0x7da   :  { %v8362_v5 = vpop.f32.mrf.mxu1  ;;  %12416 = vmatmul.msk.bf16.gmra.mxu0 %vm5494_vm3, %v9780_v36 }
 0x7db   :  { %v16117_v54 = vadd.f32 %v8362_v5, %v15926_v61  ;;  %v9372_v7 = vpop.f32.mrf.mxu3  ;;  %v8550_v5 = vld [vmem:[#allocation3 + $0x15a] sm:$0xff] }
 0x7dc   :  { %v8813_v9 = vpop.f32.mrf.mxu2 }
 0x7dd   :  { %v8961_v61 = vadd.f32 %v8813_v9, %v15694_v6  ;;  %v16139_v9 = vpack.c.bf16 %v8550_v5, %v8549_v16 }
 0x7df   :  { %v9520_v4 = vadd.f32 %v9372_v7, %v8961_v61  ;;  %v9932_v2 = vpop.f32.mrf.mxu0  ;;  %v9108_v61 = vld [vmem:[#allocation3 + $0x168] sm:$0xff] }
 0x7e1   :  { %v16133_v47 = vadd.f32 %v9930_v62, %v9520_v4 }
 0x7e2   :  { %v8365_v42 = vpop.f32.mrf.mxu1 }
 0x7e3   :  { %v16129_v8 = vadd.f32 %v8365_v42, %v15934_v56  ;;  %v9374_v38 = vpop.f32.mrf.mxu3  ;;  %v9666_v42 = vld [vmem:[#allocation3 + $0x169] sm:$0xff] }
 0x7e4   :  { %v8815_v55 = vpop.f32.mrf.mxu2  ;;  %v9781_v62 = vpack.c.bf16 %v9667_v33, %v9666_v42  ;;  %v8551_v33 = vld [vmem:[#allocation3 + $0x16a] sm:$0xff]  ;;  %v16945_v42 = vld [vmem:[#allocation35_spill] sm:$0xff] }
 0x7e5   :  { %16940 = vst [vmem:[#allocation45_spill] sm:$0xff] %v16129_v8  ;;  %12439 = vmatmul.msk.bf16.gmra.mxu1 %vm5494_vm3, %v15940_v35  ;;  %v8962_v15 = vadd.f32 %v8815_v55, %v16941_v34  ;;  %v9223_v35 = vpack.c.bf16 %v9109_v28, %v9108_v61  ;;  %v8552_v61 = vld [vmem:[#allocation3 + $0x172] sm:$0xff] }
 0x7e7   :  { %v9521_v56 = vadd.f32 %v9374_v38, %v8962_v15  ;;  %v9935_v7 = vpop.f32.mrf.mxu0  ;;  %12351 = vmatmul.msk.bf16.gmra.mxu2 %vm5494_vm3, %v16139_v9  ;;  %12384 = vmatmul.msk.bf16.gmra.mxu3 %vm5494_vm3, %v9223_v35 }
 0x7e9   :  { %v16145_v55 = vadd.f32 %v9932_v2, %v9521_v56 }
 0x7ea   :  { %v8367_v6 = vpop.f32.mrf.mxu1  ;;  %12417 = vmatmul.msk.bf16.gmra.mxu0 %vm5494_vm3, %v9781_v62  ;;  %v9111_v62 = vld [vmem:[#allocation3 + $0x188] sm:$0xff] }
 0x7eb   :  { %v16137_v36 = vadd.f32 %v8367_v6, %v15946_v26  ;;  %v16943_v26 = vld [vmem:[#allocation47_spill] sm:$0xff]  ;;  %v9377_v15 = vpop.f32.mrf.mxu3 }
 0x7ec   :  { %v8818_v4 = vpop.f32.mrf.mxu2 }
 0x7ed   :  { %16942 = vst [vmem:[#allocation36_spill] sm:$0xff] %v16137_v36  ;;  %v8963_v34 = vadd.f32 %v8818_v4, %v16943_v26  ;;  %v9669_v26 = vld [vmem:[#allocation3 + $0x189] sm:$0xff] }
 0x7ef   :  { %v9522_v38 = vadd.f32 %v9377_v15, %v8963_v34  ;;  %v9937_v28 = vpop.f32.mrf.mxu0  ;;  %v16159_v34 = vpack.c.bf16 %v8552_v61, %v8551_v33  ;;  %v9110_v15 = vld [vmem:[#allocation3 + $0x180] sm:$0xff] }
 0x7f1   :  { %v16153_v35 = vadd.f32 %v9935_v7, %v9522_v38 }
 0x7f2   :  { %v8370_v16 = vpop.f32.mrf.mxu1 }
 0x7f3   :  { %v16149_v5 = vadd.f32 %v8370_v16, %v15954_v49  ;;  %v9379_v56 = vpop.f32.mrf.mxu3 }
 0x7f4   :  { %v8820_v6 = vpop.f32.mrf.mxu2 }
 0x7f5   :  { %16944 = vst [vmem:[#allocation46_spill] sm:$0xff] %v16149_v5  ;;  %12440 = vmatmul.msk.bf16.gmra.mxu1 %vm5494_vm3, %v15960_v25  ;;  %v8964_v2 = vadd.f32 %v8820_v6, %v16945_v42  ;;  %v9224_v25 = vpack.c.bf16 %v9111_v62, %v9110_v15  ;;  %v9668_v5 = vld [vmem:[#allocation3 + $0x181] sm:$0xff] }
 0x7f6   :  { %v9782_v7 = vpack.c.bf16 %v9669_v26, %v9668_v5  ;;  %v8553_v5 = vld [vmem:[#allocation3 + $0x182] sm:$0xff] }
 0x7f7   :  { %v9523_v49 = vadd.f32 %v9379_v56, %v8964_v2  ;;  %v9940_v16 = vpop.f32.mrf.mxu0  ;;  %12352 = vmatmul.msk.bf16.gmra.mxu2 %vm5494_vm3, %v16159_v34  ;;  %12385 = vmatmul.msk.bf16.gmra.mxu3 %vm5494_vm3, %v9224_v25  ;;  %v9113_v26 = vld [vmem:[#allocation3 + $0x1a0] sm:$0xff]  ;;  %v8554_v25 = vld [vmem:[#allocation3 + $0x18a] sm:$0xff] }
 0x7f9   :  { %v16165_v6 = vadd.f32 %v9937_v28, %v9523_v49  ;;  %v9671_v28 = vld [vmem:[#allocation3 + $0x1a1] sm:$0xff] }
 0x7fa   :  { %v8372_v4 = vpop.f32.mrf.mxu1  ;;  %12418 = vmatmul.msk.bf16.gmra.mxu0 %vm5494_vm3, %v9782_v7  ;;  %v9670_v7 = vld [vmem:[#allocation3 + $0x199] sm:$0xff] }
 0x7fb   :  { %v16157_v36 = vadd.f32 %v8372_v4, %v15966_v58  ;;  %v16947_v58 = vld [vmem:[#allocation48_spill] sm:$0xff]  ;;  %v9382_v2 = vpop.f32.mrf.mxu3  ;;  %v9112_v4 = vld [vmem:[#allocation3 + $0x198] sm:$0xff] }
 0x7fc   :  { %v8823_v38 = vpop.f32.mrf.mxu2 }
 0x7fd   :  { %16946 = vst [vmem:[#allocation47_spill] sm:$0xff] %v16157_v36  ;;  %v8965_v42 = vadd.f32 %v8823_v38, %v16947_v58  ;;  %v16949_v38 = vld [vmem:[#allocation50_spill] sm:$0xff] }
 0x7ff   :  { %v9524_v56 = vadd.f32 %v9382_v2, %v8965_v42  ;;  %v9942_v62 = vpop.f32.mrf.mxu0 }
 0x801   :  { %v16173_v49 = vadd.f32 %v9940_v16, %v9524_v56 }
 0x802   :  { %v8375_v33 = vpop.f32.mrf.mxu1 }
 0x803   :  { %v16169_v61 = vadd.f32 %v8375_v33, %v15974_v44  ;;  %v9384_v36 = vpop.f32.mrf.mxu3  ;;  %v9225_v44 = vpack.c.bf16 %v9113_v26, %v9112_v4  ;;  %v16179_v33 = vpack.c.bf16 %v8554_v25, %v8553_v5  ;;  %v8555_v25 = vld [vmem:[#allocation3 + $0x1ca] sm:$0xff] }
 0x804   :  { %v8825_v15 = vpop.f32.mrf.mxu2 }
 0x805   :  { %16948 = vst [vmem:[#allocation35_spill] sm:$0xff] %v16169_v61  ;;  %12441 = vmatmul.msk.bf16.gmra.mxu1 %vm5494_vm3, %v15980_v37  ;;  %v8966_v58 = vadd.f32 %v8825_v15, %v16949_v38  ;;  %v9783_v37 = vpack.c.bf16 %v9671_v28, %v9670_v7  ;;  %v8556_v7 = vld [vmem:[#allocation3 + $0x1d2] sm:$0xff] }
 0x807   :  { %v9525_v2 = vadd.f32 %v9384_v36, %v8966_v58  ;;  %v9945_v61 = vpop.f32.mrf.mxu0  ;;  %12353 = vmatmul.msk.bf16.gmra.mxu2 %vm5494_vm3, %v16179_v33  ;;  %12386 = vmatmul.msk.bf16.gmra.mxu3 %vm5494_vm3, %v9225_v44  ;;  %v9115_v58 = vld [vmem:[#allocation3 + $0x1e8] sm:$0xff] }
 0x808   :  { %v9673_v44 = vld [vmem:[#allocation3 + $0x1e9] sm:$0xff] }
 0x809   :  { %v16185_v56 = vadd.f32 %v9942_v62, %v9525_v2 }
 0x80a   :  { %v8377_v8 = vpop.f32.mrf.mxu1  ;;  %12419 = vmatmul.msk.bf16.gmra.mxu0 %vm5494_vm3, %v9783_v37  ;;  %v8667_v37 = vpack.c.bf16 %v8556_v7, %v8555_v25 }
 0x80b   :  { %v16177_v42 = vadd.f32 %v8377_v8, %v15986_v51  ;;  %v9387_v26 = vpop.f32.mrf.mxu3 }
 0x80c   :  { %v8828_v16 = vpop.f32.mrf.mxu2 }
 0x80d   :  { %16950 = vst [vmem:[#allocation48_spill] sm:$0xff] %v16177_v42  ;;  %v8967_v4 = vadd.f32 %v8828_v16, %v15754_v24  ;;  %v9114_v16 = vld [vmem:[#allocation3 + $0x1e0] sm:$0xff] }
 0x80e   :  { %v9682_v42 = vld [vmem:[#allocation3 + $0x259] sm:$0xff] }
 0x80f   :  { %v9526_v36 = vadd.f32 %v9387_v26, %v8967_v4  ;;  %v9947_v5 = vpop.f32.mrf.mxu0  ;;  %v9226_v26 = vpack.c.bf16 %v9115_v58, %v9114_v16  ;;  %v8557_v58 = vld [vmem:[#allocation3 + $0x1e2] sm:$0xff]  ;;  %v16955_v16 = vld [vmem:[#allocation14_spill] sm:$0xff] }
 0x811   :  { %v16193_v28 = vadd.f32 %v9945_v61, %v9526_v36  ;;  %v16953_v36 = vld [vmem:[#allocation16_spill] sm:$0xff] }
 0x812   :  { %v8380_v51 = vpop.f32.mrf.mxu1 }
 0x813   :  { %v16189_v8 = vadd.f32 %v8380_v51, %v15994_v14  ;;  %v9389_v38 = vpop.f32.mrf.mxu3 }
 0x814   :  { %v8830_v15 = vpop.f32.mrf.mxu2 }
 0x815   :  { %16951 = vst [vmem:[#allocation50_spill] sm:$0xff] %v16189_v8  ;;  %12442 = vmatmul.msk.bf16.gmra.mxu1 %vm5494_vm3, %v16000_v48  ;;  %v8968_v62 = vadd.f32 %v8830_v15, %v15761_v50  ;;  %v9672_v48 = vld [vmem:[#allocation3 + $0x1e1] sm:$0xff] }
 0x816   :  { %v9784_v51 = vpack.c.bf16 %v9673_v44, %v9672_v48  ;;  %v8558_v44 = vld [vmem:[#allocation3 + $0x1ea] sm:$0xff] }
 0x817   :  { %v9527_v14 = vadd.f32 %v9389_v38, %v8968_v62  ;;  %v9950_v4 = vpop.f32.mrf.mxu0  ;;  %12354 = vmatmul.msk.bf16.gmra.mxu2 %vm5494_vm3, %v8667_v37  ;;  %12387 = vmatmul.msk.bf16.gmra.mxu3 %vm5494_vm3, %v9226_v26  ;;  %v9117_v26 = vld [vmem:[#allocation3 + $0x200] sm:$0xff] }
 0x819   :  { %v16202_v61 = vadd.f32 %v9947_v5, %v9527_v14 }
 0x81a   :  { %v8382_v24 = vpop.f32.mrf.mxu1  ;;  %12420 = vmatmul.msk.bf16.gmra.mxu0 %vm5494_vm3, %v9784_v51  ;;  %v9675_v51 = vld [vmem:[#allocation3 + $0x201] sm:$0xff] }
 0x81b   :  { %v16197_v2 = vadd.f32 %v8382_v24, %v16006_v3  ;;  %v9392_v3 = vpop.f32.mrf.mxu3 }
 0x81c   :  { %v8833_v50 = vpop.f32.mrf.mxu2 }
 0x81d   :  { %16952 = vst [vmem:[#allocation51_spill] sm:$0xff] %v16197_v2  ;;  %v8969_v15 = vadd.f32 %v8833_v50, %v16953_v36  ;;  %v16216_v36 = vpack.c.bf16 %v8558_v44, %v8557_v58  ;;  %v9683_v2 = vld [vmem:[#allocation3 + $0x261] sm:$0xff] }
 0x81f   :  { %v9528_v7 = vadd.f32 %v9392_v3, %v8969_v15  ;;  %v9952_v62 = vpop.f32.mrf.mxu0  ;;  %v9116_v15 = vld [vmem:[#allocation3 + $0x1f8] sm:$0xff] }
 0x821   :  { %v16210_v37 = vadd.f32 %v9950_v4, %v9528_v7 }
 0x822   :  { %v8385_v24 = vpop.f32.mrf.mxu1 }
 0x823   :  { %v16206_v25 = vadd.f32 %v8385_v24, %v16014_v30  ;;  %v9394_v14 = vpop.f32.mrf.mxu3  ;;  %v9674_v24 = vld [vmem:[#allocation3 + $0x1f9] sm:$0xff] }
 0x824   :  { %v8835_v38 = vpop.f32.mrf.mxu2  ;;  %v9785_v4 = vpack.c.bf16 %v9675_v51, %v9674_v24  ;;  %v8559_v51 = vld [vmem:[#allocation3 + $0x1fa] sm:$0xff] }
 0x825   :  { %16954 = vst [vmem:[#allocation16_spill] sm:$0xff] %v16206_v25  ;;  %12443 = vmatmul.msk.bf16.gmra.mxu1 %vm5494_vm3, %v16020_v27  ;;  %v8970_v5 = vadd.f32 %v8835_v38, %v16955_v16  ;;  %v9227_v27 = vpack.c.bf16 %v9117_v26, %v9116_v15  ;;  %v8560_v15 = vld [vmem:[#allocation3 + $0x202] sm:$0xff]  ;;  %v9119_v24 = vld [vmem:[#allocation3 + $0x218] sm:$0xff] }
 0x827   :  { %v9529_v30 = vadd.f32 %v9394_v14, %v8970_v5  ;;  %v9955_v3 = vpop.f32.mrf.mxu0  ;;  %12355 = vmatmul.msk.bf16.gmra.mxu2 %vm5494_vm3, %v16216_v36  ;;  %12388 = vmatmul.msk.bf16.gmra.mxu3 %vm5494_vm3, %v9227_v27 }
 0x829   :  { %v16222_v38 = vadd.f32 %v9952_v62, %v9529_v30 }
 0x82a   :  { %v8387_v48 = vpop.f32.mrf.mxu1  ;;  %12421 = vmatmul.msk.bf16.gmra.mxu0 %vm5494_vm3, %v9785_v4 }
 0x82b   :  { %v16214_v50 = vadd.f32 %v8387_v48, %v16026_v23  ;;  %v16957_v23 = vld [vmem:[#allocation19_spill] sm:$0xff]  ;;  %v9397_v5 = vpop.f32.mrf.mxu3 }
 0x82c   :  { %v8838_v7 = vpop.f32.mrf.mxu2 }
 0x82d   :  { %16956 = vst [vmem:[#allocation14_spill] sm:$0xff] %v16214_v50  ;;  %v8971_v16 = vadd.f32 %v8838_v7, %v16957_v23  ;;  %v9677_v7 = vld [vmem:[#allocation3 + $0x219] sm:$0xff] }
 0x82f   :  { %v9530_v14 = vadd.f32 %v9397_v5, %v8971_v16  ;;  %v9957_v26 = vpop.f32.mrf.mxu0  ;;  %v16236_v16 = vpack.c.bf16 %v8560_v15, %v8559_v51  ;;  %v9118_v5 = vld [vmem:[#allocation3 + $0x210] sm:$0xff] }
 0x831   :  { %v16230_v27 = vadd.f32 %v9955_v3, %v9530_v14 }
 0x832   :  { %v8390_v58 = vpop.f32.mrf.mxu1 }
 0x833   :  { %v16226_v44 = vadd.f32 %v8390_v58, %v16034_v12  ;;  %v9399_v30 = vpop.f32.mrf.mxu3 }
 0x834   :  { %v8840_v48 = vpop.f32.mrf.mxu2 }
 0x835   :  { %16958 = vst [vmem:[#allocation19_spill] sm:$0xff] %v16226_v44  ;;  %12444 = vmatmul.msk.bf16.gmra.mxu1 %vm5494_vm3, %v16040_v19  ;;  %v8972_v62 = vadd.f32 %v8840_v48, %v15801_v53  ;;  %v9228_v19 = vpack.c.bf16 %v9119_v24, %v9118_v5  ;;  %v9676_v44 = vld [vmem:[#allocation3 + $0x211] sm:$0xff] }
 0x836   :  { %v9786_v3 = vpack.c.bf16 %v9677_v7, %v9676_v44  ;;  %v10756_v44 = vld [vmem:[#allocation4] sm:$0xff] }
 0x837   :  { %v9531_v12 = vadd.f32 %v9399_v30, %v8972_v62  ;;  %v9960_v58 = vpop.f32.mrf.mxu0  ;;  %12356 = vmatmul.msk.bf16.gmra.mxu2 %vm5494_vm3, %v16236_v16  ;;  %12389 = vmatmul.msk.bf16.gmra.mxu3 %vm5494_vm3, %v9228_v19 }
 0x839   :  { %v16242_v14 = vadd.f32 %v9957_v26, %v9531_v12  ;;  %v8562_v26 = vld [vmem:[#allocation3 + $0x21a] sm:$0xff] }
 0x83a   :  { %v8392_v4 = vpop.f32.mrf.mxu1  ;;  %12422 = vmatmul.msk.bf16.gmra.mxu0 %vm5494_vm3, %v9786_v3  ;;  %v8561_v3 = vld [vmem:[#allocation3 + $0x212] sm:$0xff] }
 0x83b   :  { %v16234_v23 = vadd.f32 %v8392_v4, %v16046_v17  ;;  %v16960_v17 = vld [vmem:[#allocation17_spill] sm:$0xff]  ;;  %v9402_v62 = vpop.f32.mrf.mxu3  ;;  %v16252_v50 = vpack.c.bf16 %v8562_v26, %v8561_v3  ;;  %v16961_v3 = vld [vmem:[#allocation22_spill] sm:$0xff] }
 0x83c   :  { %v8843_v53 = vpop.f32.mrf.mxu2 }
 0x83d   :  { %16959 = vst [vmem:[#allocation52_spill] sm:$0xff] %v16234_v23  ;;  %v8973_v48 = vadd.f32 %v8843_v53, %v16960_v17  ;;  %v9121_v23 = vld [vmem:[#allocation3 + $0x230] sm:$0xff] }
 0x83f   :  { %v9532_v30 = vadd.f32 %v9402_v62, %v8973_v48  ;;  %v9962_v24 = vpop.f32.mrf.mxu0  ;;  %v9679_v48 = vld [vmem:[#allocation3 + $0x231] sm:$0xff] }
 0x841   :  { %v16248_v12 = vadd.f32 %v9960_v58, %v9532_v30  ;;  %v10757_v58 = vld [vmem:[#allocation4 + $0x8] sm:$0xff] }
 0x842   :  { %v10468_v51 = vpop.f32.mrf.mxu1 }
 0x843   :  { %v10628_v15 = vadd.f32 %v10468_v51, %v16054_v20  ;;  %v9404_v17 = vpop.f32.mrf.mxu3 }
 0x844   :  { %v8845_v19 = vpop.f32.mrf.mxu2 }
 0x845   :  { %vm10884_vm2 = vcmp.gt.f32.partialorder %v10628_v15, 0.0  ;;  %v10948_v4 = vmul.f32 0.01, %v10628_v15  ;;  %12445 = vmatmul.msk.bf16.gmra.mxu1 %vm5494_vm3, %v16060_v57  ;;  %v8974_v53 = vadd.f32 %v8845_v19, %v15821_v43  ;;  %v9120_v57 = vld [vmem:[#allocation3 + $0x228] sm:$0xff] }
 0x847   :  { %v11012_v7 = vsel %vm10884_vm2, %v10628_v15, %v10948_v4  ;;  %v9533_v51 = vadd.f32 %v9404_v17, %v8974_v53  ;;  %v9965_v15 = vpop.f32.mrf.mxu0  ;;  %v9229_v4 = vpack.c.bf16 %v9121_v23, %v9120_v57  ;;  %12357 = vmatmul.msk.bf16.gmra.mxu2 %vm5494_vm3, %v16252_v50 }
 0x848   :  { %v11076_v5 = vadd.f32 %v11012_v7, %v10756_v44  ;;  %v9678_v44 = vld [vmem:[#allocation3 + $0x229] sm:$0xff] }
 0x849   :  { %v9787_v43 = vpack.c.bf16 %v9679_v48, %v9678_v44  ;;  %12390 = vmatmul.msk.bf16.gmra.mxu3 %vm5494_vm3, %v9229_v4  ;;  %v16258_v19 = vadd.f32 %v9962_v24, %v9533_v51  ;;  %v8563_v24 = vld [vmem:[#allocation3 + $0x22a] sm:$0xff]  ;;  %v8564_v51 = vld [vmem:[#allocation3 + $0x232] sm:$0xff] }
 0x84a   :  { %11140 = vst [vmem:[#allocation4] sm:$0xff] %v11076_v5  ;;  %v10470_v20 = vpop.f32.mrf.mxu1 }
 0x84b   :  { %v10629_v62 = vadd.f32 %v10470_v20, %v16066_v59  ;;  %12423 = vmatmul.msk.bf16.gmra.mxu0 %vm5494_vm3, %v9787_v43  ;;  %v9407_v23 = vpop.f32.mrf.mxu3 }
 0x84c   :  { %v8848_v5 = vpop.f32.mrf.mxu2 }
 0x84d   :  { %vm10885_vm10 = vcmp.gt.f32.partialorder %v10629_v62, 0.0  ;;  %v10949_v7 = vmul.f32 0.01, %v10629_v62  ;;  %v8975_v26 = vadd.f32 %v8848_v5, %v16961_v3  ;;  %v9123_v5 = vld [vmem:[#allocation3 + $0x248] sm:$0xff] }
 0x84e   :  { %v9681_v3 = vld [vmem:[#allocation3 + $0x249] sm:$0xff] }
 0x84f   :  { %v11013_v30 = vsel %vm10885_vm10, %v10629_v62, %v10949_v7  ;;  %v9534_v20 = vadd.f32 %v9407_v23, %v8975_v26  ;;  %v9967_v57 = vpop.f32.mrf.mxu0  ;;  %v10758_v62 = vld [vmem:[#allocation4 + $0x10] sm:$0xff] }
 0x850   :  { %v11077_v59 = vadd.f32 %v11013_v30, %v10757_v58  ;;  %v16962_v58 = vld [vmem:[#allocation20_spill] sm:$0xff] }
 0x851   :  { %v16264_v43 = vadd.f32 %v9965_v15, %v9534_v20  ;;  %v10759_v20 = vld [vmem:[#allocation4 + $0x18] sm:$0xff] }
 0x852   :  { %11141 = vst [vmem:[#allocation4 + $0x8] sm:$0xff] %v11077_v59  ;;  %v10473_v53 = vpop.f32.mrf.mxu1 }
 0x853   :  { %v10630_v17 = vadd.f32 %v10473_v53, %v16073_v21  ;;  %v9409_v59 = vpop.f32.mrf.mxu3  ;;  %v16268_v53 = vpack.c.bf16 %v8564_v51, %v8563_v24  ;;  %v16963_v51 = vld [vmem:[#allocation24_spill] sm:$0xff] }
 0x854   :  { %v8850_v7 = vpop.f32.mrf.mxu2 }
 0x855   :  { %vm10886_vm11 = vcmp.gt.f32.partialorder %v10630_v17, 0.0  ;;  %v10950_v48 = vmul.f32 0.01, %v10630_v17  ;;  %12446 = vmatmul.msk.bf16.gmra.mxu1 %vm5494_vm3, %v16079_v10  ;;  %v8976_v30 = vadd.f32 %v8850_v7, %v16962_v58  ;;  %v9122_v10 = vld [vmem:[#allocation3 + $0x240] sm:$0xff] }
 0x857   :  { %v11014_v4 = vsel %vm10886_vm11, %v10630_v17, %v10950_v48  ;;  %v9535_v23 = vadd.f32 %v9409_v59, %v8976_v30  ;;  %v9970_v17 = vpop.f32.mrf.mxu0  ;;  %v9230_v48 = vpack.c.bf16 %v9123_v5, %v9122_v10  ;;  %12358 = vmatmul.msk.bf16.gmra.mxu2 %vm5494_vm3, %v16268_v53 }
 0x858   :  { %v11078_v44 = vadd.f32 %v11014_v4, %v10758_v62  ;;  %v9680_v62 = vld [vmem:[#allocation3 + $0x241] sm:$0xff] }
 0x859   :  { %v9788_v15 = vpack.c.bf16 %v9681_v3, %v9680_v62  ;;  %12391 = vmatmul.msk.bf16.gmra.mxu3 %vm5494_vm3, %v9230_v48  ;;  %v16274_v24 = vadd.f32 %v9967_v57, %v9535_v23  ;;  %v11204_v62 = vld [vmem:[#allocation4] ss:$2 sm:$0xff] }
 0x85a   :  { %11142 = vst [vmem:[#allocation4 + $0x10] sm:$0xff] %v11078_v44  ;;  %v10475_v21 = vpop.f32.mrf.mxu1 }
 0x85b   :  { %v10631_v26 = vadd.f32 %v10475_v21, %v16085_v60  ;;  %12424 = vmatmul.msk.bf16.gmra.mxu0 %vm5494_vm3, %v9788_v15  ;;  %v9412_v30 = vpop.f32.mrf.mxu3  ;;  %v8565_v15 = vld [vmem:[#allocation3 + $0x242] sm:$0xff] }
 0x85c   :  { %v8853_v7 = vpop.f32.mrf.mxu2 }
 0x85d   :  { %vm10887_vm12 = vcmp.gt.f32.partialorder %v10631_v26, 0.0  ;;  %v10951_v4 = vmul.f32 0.01, %v10631_v26  ;;  %v8977_v58 = vadd.f32 %v8853_v7, %v16963_v51 }
 0x85f   :  { %v11015_v44 = vsel %vm10887_vm12, %v10631_v26, %v10951_v4  ;;  %v9536_v21 = vadd.f32 %v9412_v30, %v8977_v58  ;;  %v9972_v10 = vpop.f32.mrf.mxu0  ;;  %v10760_v26 = vld [vmem:[#allocation4 + $0x20] sm:$0xff] }
 0x860   :  { %v11079_v60 = vadd.f32 %v11015_v44, %v10759_v20  ;;  %v11268_v4 = vld [vmem:[#allocation4 + $0x1] ss:$2 sm:$0xff] }
 0x861   :  { %v8566_v20 = vld [vmem:[#allocation3 + $0x24a] sm:$0xff]  ;;  %v16280_v44 = vadd.f32 %v9970_v17, %v9536_v21  ;;  %v9125_v30 = vld [vmem:[#allocation3 + $0x260] sm:$0xff]  ;;  %v11331_v25 = vmax.f32 %v11204_v62, %v11268_v4 }
 0x862   :  { %11143 = vst [vmem:[#allocation4 + $0x18] sm:$0xff] %v11079_v60  ;;  %v10478_v59 = vpop.f32.mrf.mxu1 }
 0x863   :  { %v10632_v5 = vadd.f32 %v10478_v59, %v16093_v22  ;;  %v16964_v22 = vld [vmem:[#allocation26_spill] sm:$0xff]  ;;  %v9414_v58 = vpop.f32.mrf.mxu3 }
 0x864   :  { %v8855_v23 = vpop.f32.mrf.mxu2 }
 0x865   :  { %vm10888_vm13 = vcmp.gt.f32.partialorder %v10632_v5, 0.0  ;;  %v10952_v3 = vmul.f32 0.01, %v10632_v5  ;;  %12447 = vmatmul.msk.bf16.gmra.mxu1 %vm5494_vm3, %v16099_v31  ;;  %v8978_v51 = vadd.f32 %v8855_v23, %v16964_v22 }
 0x867   :  { %v11016_v48 = vsel %vm10888_vm13, %v10632_v5, %v10952_v3  ;;  %v9537_v3 = vadd.f32 %v9414_v58, %v8978_v51  ;;  %v9975_v17 = vpop.f32.mrf.mxu0 }
 0x868   :  { %v11080_v57 = vadd.f32 %v11016_v48, %v10760_v26  ;;  %v16284_v26 = vpack.c.bf16 %v8566_v20, %v8565_v15  ;;  %v9124_v48 = vld [vmem:[#allocation3 + $0x258] sm:$0xff]  ;;  %v16965_v20 = vld [vmem:[#allocation25_spill] sm:$0xff] }
 0x869   :  { %v11206_v60 = vld [vmem:[#allocation4 + $0x10] ss:$2 sm:$0xff]  ;;  %v11270_v7 = vld [vmem:[#allocation4 + $0x11] ss:$2 sm:$0xff]  ;;  %v9231_v21 = vpack.c.bf16 %v9125_v30, %v9124_v48  ;;  %v16294_v15 = vadd.f32 %v9972_v10, %v9537_v3  ;;  %v8568_v3 = vld [vmem:[#allocation3 + $0x262] sm:$0xff] }
 0x86a   :  { %11144 = vst [vmem:[#allocation4 + $0x20] sm:$0xff] %v11080_v57  ;;  %v10480_v59 = vpop.f32.mrf.mxu1  ;;  %v11332_v31 = vmax.f32 %v11206_v60, %v11270_v7  ;;  %12359 = vmatmul.msk.bf16.gmra.mxu2 %vm5494_vm3, %v16284_v26  ;;  %v9789_v57 = vpack.c.bf16 %v9683_v2, %v9682_v42  ;;  %v10762_v30 = vld [vmem:[#allocation4 + $0x30] sm:$0xff]  ;;  %v8567_v10 = vld [vmem:[#allocation3 + $0x25a] sm:$0xff] }
 0x86b   :  { %v10633_v5 = vadd.f32 %v10480_v59, %v16105_v13  ;;  %12392 = vmatmul.msk.bf16.gmra.mxu3 %vm5494_vm3, %v9231_v21  ;;  %v10761_v13 = vld [vmem:[#allocation4 + $0x28] sm:$0xff]  ;;  %v9417_v7 = vpop.f32.mrf.mxu3 }
 0x86c   :  { %v16286_v8 = vmax.f32 %v11331_v25, %v11332_v31  ;;  %12425 = vmatmul.msk.bf16.gmra.mxu0 %vm5494_vm3, %v9789_v57  ;;  %v8858_v4 = vpop.f32.mrf.mxu2  ;;  %v9127_v57 = vld [vmem:[#allocation3 + $0x278] sm:$0xff] }
 0x86d   :  { %vm10889_vm14 = vcmp.gt.f32.partialorder %v10633_v5, 0.0  ;;  %v10953_v23 = vmul.f32 0.01, %v10633_v5  ;;  %v8979_v60 = vadd.f32 %v8858_v4, %v16965_v20  ;;  %v16304_v4 = vpack.c.bf16 %v8568_v3, %v8567_v10 }
 0x86e   :  { %11395 = vrot.lane.b32.xlu0 %v16286_v8, %s12503_s2 }
 0x86f   :  { %v11017_v62 = vsel %vm10889_vm14, %v10633_v5, %v10953_v23  ;;  %v9538_v2 = vadd.f32 %v9417_v7, %v8979_v60  ;;  %v9977_v51 = vpop.f32.mrf.mxu0  ;;  %v9684_v7 = vld [vmem:[#allocation3 + $0x271] sm:$0xff] }
 0x870   :  { %v11081_v25 = vadd.f32 %v11017_v62, %v10761_v13  ;;  %v9685_v13 = vld [vmem:[#allocation3 + $0x279] sm:$0xff] }
 0x871   :  { %v16300_v48 = vadd.f32 %v9975_v17, %v9538_v2  ;;  %v10763_v17 = vld [vmem:[#allocation4 + $0x38] sm:$0xff] }
 0x872   :  { %11145 = vst [vmem:[#allocation4 + $0x28] sm:$0xff] %v11081_v25  ;;  %v10483_v22 = vpop.f32.mrf.mxu1 }
 0x873   :  { %v10634_v42 = vadd.f32 %v10483_v22, %v16113_v40  ;;  %v9419_v23 = vpop.f32.mrf.mxu3 }
 0x874   :  { %v8860_v5 = vpop.f32.mrf.mxu2 }
 0x875   :  { %vm10890_vm15 = vcmp.gt.f32.partialorder %v10634_v42, 0.0  ;;  %v10954_v58 = vmul.f32 0.01, %v10634_v42  ;;  %12448 = vmatmul.msk.bf16.gmra.mxu1 %vm5494_vm3, %v16119_v63  ;;  %v8980_v21 = vadd.f32 %v8860_v5, %v15881_v39  ;;  %v9126_v63 = vld [vmem:[#allocation3 + $0x270] sm:$0xff]  ;;  %v9790_v39 = vpack.c.bf16 %v9685_v13, %v9684_v7 }
 0x876   :  { %v9232_v60 = vpack.c.bf16 %v9127_v57, %v9126_v63 }
 0x877   :  { %v11018_v59 = vsel %vm10890_vm15, %v10634_v42, %v10954_v58  ;;  %v9539_v25 = vadd.f32 %v9419_v23, %v8980_v21  ;;  %v9980_v20 = vpop.f32.mrf.mxu0  ;;  %v10764_v23 = vld [vmem:[#allocation4 + $0x40] sm:$0xff] }
 0x878   :  { %v11082_v31 = vadd.f32 %v11018_v59, %v10762_v30 }
 0x879   :  { %v16310_v58 = vadd.f32 %v9977_v51, %v9539_v25  ;;  %v11272_v13 = vld [vmem:[#allocation4 + $0x21] ss:$2 sm:$0xff]  ;;  %v8569_v25 = vld [vmem:[#allocation3 + $0x272] sm:$0xff] }
 0x87a   :  { %11146 = vst [vmem:[#allocation4 + $0x30] sm:$0xff] %v11082_v31  ;;  %v10485_v40 = vpop.f32.mrf.mxu1  ;;  %12360 = vmatmul.msk.bf16.gmra.mxu2 %vm5494_vm3, %v16304_v4 }
 0x87b   :  { %v10635_v62 = vadd.f32 %v10485_v40, %v16125_v11  ;;  %12393 = vmatmul.msk.bf16.gmra.mxu3 %vm5494_vm3, %v9232_v60  ;;  %v9422_v59 = vpop.f32.mrf.mxu3  ;;  %v11208_v40 = vld [vmem:[#allocation4 + $0x20] ss:$2 sm:$0xff] }
 0x87c   :  { %12426 = vmatmul.msk.bf16.gmra.mxu0 %vm5494_vm3, %v9790_v39  ;;  %v8863_v2 = vpop.f32.mrf.mxu2 }
 0x87d   :  { %vm10891_vm0 = vcmp.gt.f32.partialorder %v10635_v62, 0.0  ;;  %v10955_v22 = vmul.f32 0.01, %v10635_v62  ;;  %v8981_v30 = vadd.f32 %v8863_v2, %v15890_v29  ;;  %v8570_v29 = vld [vmem:[#allocation3 + $0x27a] sm:$0xff]  ;;  %v9687_v2 = vld [vmem:[#allocation3 + $0x291] sm:$0xff] }
 0x87f   :  { %v11019_v42 = vsel %vm10891_vm0, %v10635_v62, %v10955_v22  ;;  %v9540_v10 = vadd.f32 %v9422_v59, %v8981_v30  ;;  %v9982_v3 = vpop.f32.mrf.mxu0 }
 0x880   :  { %v11083_v11 = vadd.f32 %v11019_v42, %v10763_v17  ;;  %v9129_v17 = vld [vmem:[#allocation3 + $0x290] sm:$0xff] }
 0x881   :  { %v16316_v63 = vadd.f32 %v9980_v20, %v9540_v10 }
 0x882   :  { %11147 = vst [vmem:[#allocation4 + $0x38] sm:$0xff] %v11083_v11  ;;  %v10488_v31 = vpop.f32.mrf.mxu1  ;;  %v11333_v11 = vmax.f32 %v11208_v40, %v11272_v13 }
 0x883   :  { %v10636_v5 = vadd.f32 %v10488_v31, %v16133_v47  ;;  %v16966_v47 = vld [vmem:[#allocation39_spill] sm:$0xff]  ;;  %v9424_v39 = vpop.f32.mrf.mxu3  ;;  %v16320_v31 = vpack.c.bf16 %v8570_v29, %v8569_v25  ;;  %v16967_v29 = vld [vmem:[#allocation28_spill] sm:$0xff] }
 0x884   :  { %v8865_v62 = vpop.f32.mrf.mxu2 }
 0x885   :  { %vm10892_vm4 = vcmp.gt.f32.partialorder %v10636_v5, 0.0  ;;  %v10956_v21 = vmul.f32 0.01, %v10636_v5  ;;  %12449 = vmatmul.msk.bf16.gmra.mxu1 %vm5494_vm3, %v16139_v9  ;;  %v8982_v22 = vadd.f32 %v8865_v62, %v16966_v47 }
 0x887   :  { %v11020_v57 = vsel %vm10892_vm4, %v10636_v5, %v10956_v21  ;;  %v9541_v59 = vadd.f32 %v9424_v39, %v8982_v22  ;;  %v9128_v5 = vld [vmem:[#allocation3 + $0x288] sm:$0xff]  ;;  %v9985_v20 = vpop.f32.mrf.mxu0 }
 0x888   :  { %v11084_v51 = vadd.f32 %v11020_v57, %v10764_v23  ;;  %v9233_v10 = vpack.c.bf16 %v9129_v17, %v9128_v5  ;;  %v9686_v23 = vld [vmem:[#allocation3 + $0x289] sm:$0xff] }
 0x889   :  { %v11210_v60 = vld [vmem:[#allocation4 + $0x30] ss:$2 sm:$0xff]  ;;  %v11274_v7 = vld [vmem:[#allocation4 + $0x31] ss:$2 sm:$0xff]  ;;  %v16330_v25 = vadd.f32 %v9982_v3, %v9541_v59 }
 0x88a   :  { %11148 = vst [vmem:[#allocation4 + $0x40] sm:$0xff] %v11084_v51  ;;  %v10490_v42 = vpop.f32.mrf.mxu1  ;;  %v11334_v9 = vmax.f32 %v11210_v60, %v11274_v7  ;;  %12361 = vmatmul.msk.bf16.gmra.mxu2 %vm5494_vm3, %v16320_v31  ;;  %v9791_v51 = vpack.c.bf16 %v9687_v2, %v9686_v23  ;;  %v8571_v3 = vld [vmem:[#allocation3 + $0x28a] sm:$0xff]  ;;  %v8572_v59 = vld [vmem:[#allocation3 + $0x292] sm:$0xff] }
 0x88b   :  { %v10637_v30 = vadd.f32 %v10490_v42, %v16145_v55  ;;  %12394 = vmatmul.msk.bf16.gmra.mxu3 %vm5494_vm3, %v9233_v10  ;;  %v10765_v55 = vld [vmem:[#allocation4 + $0x48] sm:$0xff]  ;;  %v9427_v7 = vpop.f32.mrf.mxu3  ;;  %v16968_v10 = vld [vmem:[#allocation27_spill] sm:$0xff] }
 0x88c   :  { %v16322_v21 = vmax.f32 %v11333_v11, %v11334_v9  ;;  %12427 = vmatmul.msk.bf16.gmra.mxu0 %vm5494_vm3, %v9791_v51  ;;  %v8868_v62 = vpop.f32.mrf.mxu2  ;;  %v10766_v11 = vld [vmem:[#allocation4 + $0x50] sm:$0xff]  ;;  %v9131_v51 = vld [vmem:[#allocation3 + $0x2a8] sm:$0xff] }
 0x88d   :  { %vm10893_vm1 = vcmp.gt.f32.partialorder %v10637_v30, 0.0  ;;  %v10957_v57 = vmul.f32 0.01, %v10637_v30  ;;  %v8983_v60 = vadd.f32 %v8868_v62, %v16967_v29  ;;  %v16340_v62 = vpack.c.bf16 %v8572_v59, %v8571_v3 }
 0x88e   :  { %11397 = vrot.lane.b32.xlu0 %v16322_v21, %s12503_s2 }
 0x88f   :  { %v11021_v40 = vsel %vm10893_vm1, %v10637_v30, %v10957_v57  ;;  %v9542_v39 = vadd.f32 %v9427_v7, %v8983_v60  ;;  %v9987_v17 = vpop.f32.mrf.mxu0  ;;  %v9688_v7 = vld [vmem:[#allocation3 + $0x2a1] sm:$0xff] }
 0x890   :  { %v11085_v13 = vadd.f32 %v11021_v40, %v10765_v55  ;;  %v9689_v55 = vld [vmem:[#allocation3 + $0x2a9] sm:$0xff] }
 0x891   :  { %v16336_v5 = vadd.f32 %v9985_v20, %v9542_v39  ;;  %v9792_v20 = vpack.c.bf16 %v9689_v55, %v9688_v7 }
 0x892   :  { %11149 = vst [vmem:[#allocation4 + $0x48] sm:$0xff] %v11085_v13  ;;  %v10493_v47 = vpop.f32.mrf.mxu1 }
 0x893   :  { %v10638_v22 = vadd.f32 %v10493_v47, %v16153_v35  ;;  %v9429_v57 = vpop.f32.mrf.mxu3 }
 0x894   :  { %v8870_v30 = vpop.f32.mrf.mxu2 }
 0x895   :  { %vm10894_vm5 = vcmp.gt.f32.partialorder %v10638_v22, 0.0  ;;  %v10958_v42 = vmul.f32 0.01, %v10638_v22  ;;  %12450 = vmatmul.msk.bf16.gmra.mxu1 %vm5494_vm3, %v16159_v34  ;;  %v8984_v23 = vadd.f32 %v8870_v30, %v16968_v10  ;;  %v9130_v34 = vld [vmem:[#allocation3 + $0x2a0] sm:$0xff] }
 0x896   :  { %v9234_v60 = vpack.c.bf16 %v9131_v51, %v9130_v34  ;;  %v10768_v51 = vld [vmem:[#allocation4 + $0x60] sm:$0xff] }
 0x897   :  { %v11022_v9 = vsel %vm10894_vm5, %v10638_v22, %v10958_v42  ;;  %v9543_v13 = vadd.f32 %v9429_v57, %v8984_v23  ;;  %v9990_v29 = vpop.f32.mrf.mxu0  ;;  %v10767_v22 = vld [vmem:[#allocation4 + $0x58] sm:$0xff]  ;;  %v8573_v34 = vld [vmem:[#allocation3 + $0x2a2] sm:$0xff] }
 0x898   :  { %v11086_v2 = vadd.f32 %v11022_v9, %v10766_v11  ;;  %v16969_v9 = vld [vmem:[#allocation40_spill] sm:$0xff] }
 0x899   :  { %v16346_v11 = vadd.f32 %v9987_v17, %v9543_v13  ;;  %v11212_v55 = vld [vmem:[#allocation4 + $0x40] ss:$2 sm:$0xff] }
 0x89a   :  { %11150 = vst [vmem:[#allocation4 + $0x50] sm:$0xff] %v11086_v2  ;;  %v10495_v35 = vpop.f32.mrf.mxu1  ;;  %12362 = vmatmul.msk.bf16.gmra.mxu2 %vm5494_vm3, %v16340_v62 }
 0x89b   :  { %v10639_v40 = vadd.f32 %v10495_v35, %v16165_v6  ;;  %12395 = vmatmul.msk.bf16.gmra.mxu3 %vm5494_vm3, %v9234_v60  ;;  %v9432_v30 = vpop.f32.mrf.mxu3  ;;  %v8574_v60 = vld [vmem:[#allocation3 + $0x2aa] sm:$0xff] }
 0x89c   :  { %12428 = vmatmul.msk.bf16.gmra.mxu0 %vm5494_vm3, %v9792_v20  ;;  %v8873_v42 = vpop.f32.mrf.mxu2 }
 0x89d   :  { %vm10895_vm7 = vcmp.gt.f32.partialorder %v10639_v40, 0.0  ;;  %v10959_v47 = vmul.f32 0.01, %v10639_v40  ;;  %v8985_v2 = vadd.f32 %v8873_v42, %v16969_v9 }
 0x89f   :  { %v11023_v39 = vsel %vm10895_vm7, %v10639_v40, %v10959_v47  ;;  %v9544_v10 = vadd.f32 %v9432_v30, %v8985_v2  ;;  %v9992_v23 = vpop.f32.mrf.mxu0  ;;  %v11276_v40 = vld [vmem:[#allocation4 + $0x41] ss:$2 sm:$0xff] }
 0x8a0   :  { %v11087_v6 = vadd.f32 %v11023_v39, %v10767_v22  ;;  %v11335_v9 = vmax.f32 %v11212_v55, %v11276_v40  ;;  %v9691_v2 = vld [vmem:[#allocation3 + $0x2c1] sm:$0xff] }
 0x8a1   :  { %v16352_v7 = vadd.f32 %v9990_v29, %v9544_v10  ;;  %v9690_v10 = vld [vmem:[#allocation3 + $0x2b9] sm:$0xff]  ;;  %v10769_v40 = vld [vmem:[#allocation4 + $0x68] sm:$0xff] }
 0x8a2   :  { %11151 = vst [vmem:[#allocation4 + $0x58] sm:$0xff] %v11087_v6  ;;  %v10498_v3 = vpop.f32.mrf.mxu1  ;;  %v9133_v6 = vld [vmem:[#allocation3 + $0x2c0] sm:$0xff] }
 0x8a3   :  { %v10640_v59 = vadd.f32 %v10498_v3, %v16173_v49  ;;  %v16970_v49 = vld [vmem:[#allocation30_spill] sm:$0xff]  ;;  %v9434_v39 = vpop.f32.mrf.mxu3  ;;  %v10228_v55 = vld [vmem:[#allocation3 + $0x19a] sm:$0xff] }
 0x8a4   :  { %v8875_v13 = vpop.f32.mrf.mxu2 }
 0x8a5   :  { %vm10896_vm8 = vcmp.gt.f32.partialorder %v10640_v59, 0.0  ;;  %v10960_v57 = vmul.f32 0.01, %v10640_v59  ;;  %12451 = vmatmul.msk.bf16.gmra.mxu1 %vm5494_vm3, %v16179_v33  ;;  %v8986_v22 = vadd.f32 %v8875_v13, %v16970_v49 }
 0x8a7   :  { %v11024_v35 = vsel %vm10896_vm8, %v10640_v59, %v10960_v57  ;;  %v9545_v3 = vadd.f32 %v9434_v39, %v8986_v22  ;;  %v16356_v59 = vpack.c.bf16 %v8574_v60, %v8573_v34  ;;  %v9132_v57 = vld [vmem:[#allocation3 + $0x2b8] sm:$0xff]  ;;  %v9995_v13 = vpop.f32.mrf.mxu0  ;;  %v16971_v22 = vld [vmem:[#allocation29_spill] sm:$0xff] }
 0x8a8   :  { %v11088_v17 = vadd.f32 %v11024_v35, %v10768_v51  ;;  %v9235_v29 = vpack.c.bf16 %v9133_v6, %v9132_v57 }
 0x8a9   :  { %v11214_v47 = vld [vmem:[#allocation4 + $0x50] ss:$2 sm:$0xff]  ;;  %v11278_v20 = vld [vmem:[#allocation4 + $0x51] ss:$2 sm:$0xff] }
 0x8aa   :  { %11152 = vst [vmem:[#allocation4 + $0x60] sm:$0xff] %v11088_v17  ;;  %v10500_v42 = vpop.f32.mrf.mxu1  ;;  %v11336_v33 = vmax.f32 %v11214_v47, %v11278_v20  ;;  %12363 = vmatmul.msk.bf16.gmra.mxu2 %vm5494_vm3, %v16356_v59  ;;  %v9793_v17 = vpack.c.bf16 %v9691_v2, %v9690_v10  ;;  %v16366_v20 = vadd.f32 %v9992_v23, %v9545_v3  ;;  %v8575_v23 = vld [vmem:[#allocation3 + $0x2ba] sm:$0xff]  ;;  %v8576_v3 = vld [vmem:[#allocation3 + $0x2c2] sm:$0xff] }
 0x8ab   :  { %v10641_v30 = vadd.f32 %v10500_v42, %v16185_v56  ;;  %v10229_v56 = vld [vmem:[#allocation3 + $0x1a2] sm:$0xff]  ;;  %12396 = vmatmul.msk.bf16.gmra.mxu3 %vm5494_vm3, %v9235_v29  ;;  %v9437_v6 = vpop.f32.mrf.mxu3 }
 0x8ac   :  { %v16358_v51 = vmax.f32 %v11335_v9, %v11336_v33  ;;  %12429 = vmatmul.msk.bf16.gmra.mxu0 %vm5494_vm3, %v9793_v17  ;;  %v8878_v47 = vpop.f32.mrf.mxu2  ;;  %v10341_v49 = vpack.c.bf16 %v10229_v56, %v10228_v55  ;;  %v16972_v55 = vld [vmem:[#allocation41_spill] sm:$0xff] }
 0x8ad   :  { %vm10897_vm9 = vcmp.gt.f32.partialorder %v10641_v30, 0.0  ;;  %v10961_v35 = vmul.f32 0.01, %v10641_v30  ;;  %v8987_v39 = vadd.f32 %v8878_v47, %v16971_v22 }
 0x8ae   :  { %11399 = vrot.lane.b32.xlu1 %v16358_v51, %s12503_s2 }
 0x8af   :  { %v11025_v34 = vsel %vm10897_vm9, %v10641_v30, %v10961_v35  ;;  %v9546_v33 = vadd.f32 %v9437_v6, %v8987_v39  ;;  %v10770_v30 = vld [vmem:[#allocation4 + $0x70] sm:$0xff]  ;;  %v9997_v29 = vpop.f32.mrf.mxu0 }
 0x8b0   :  { %v11089_v60 = vadd.f32 %v11025_v34, %v10769_v40  ;;  %v9135_v34 = vld [vmem:[#allocation3 + $0x2d8] sm:$0xff]  ;;  %v9134_v39 = vld [vmem:[#allocation3 + $0x2d0] sm:$0xff] }
 0x8b1   :  { %v16371_v17 = vadd.f32 %v9995_v13, %v9546_v33  ;;  %v9236_v6 = vpack.c.bf16 %v9135_v34, %v9134_v39  ;;  %v10771_v33 = vld [vmem:[#allocation4 + $0x78] sm:$0xff] }
 0x8b2   :  { %11153 = vst [vmem:[#allocation4 + $0x68] sm:$0xff] %v11089_v60  ;;  %v10503_v42 = vpop.f32.mrf.mxu1  ;;  %v9693_v60 = vld [vmem:[#allocation3 + $0x2d9] sm:$0xff] }
 0x8b3   :  { %v10642_v9 = vadd.f32 %v10503_v42, %v16193_v28  ;;  %v9439_v40 = vpop.f32.mrf.mxu3  ;;  %v9692_v42 = vld [vmem:[#allocation3 + $0x2d1] sm:$0xff] }
 0x8b4   :  { %v8880_v35 = vpop.f32.mrf.mxu2  ;;  %v9794_v13 = vpack.c.bf16 %v9693_v60, %v9692_v42  ;;  %v8578_v42 = vld [vmem:[#allocation3 + $0x2da] sm:$0xff] }
 0x8b5   :  { %vm10898_vm2 = vcmp.gt.f32.partialorder %v10642_v9, 0.0  ;;  %v10962_v2 = vmul.f32 0.01, %v10642_v9  ;;  %12452 = vmatmul.msk.bf16.gmra.mxu1 %vm5494_vm3, %v10341_v49  ;;  %v8988_v56 = vadd.f32 %v8880_v35, %v16972_v55  ;;  %v16375_v49 = vpack.c.bf16 %v8576_v3, %v8575_v23  ;;  %v16973_v35 = vld [vmem:[#allocation32_spill] sm:$0xff] }
 0x8b7   :  { %v11026_v57 = vsel %vm10898_vm2, %v10642_v9, %v10962_v2  ;;  %v9547_v22 = vadd.f32 %v9439_v40, %v8988_v56 }
 0x8b8   :  { %v11090_v10 = vadd.f32 %v11026_v57, %v10770_v30 }
 0x8b9   :  { %v16381_v57 = vadd.f32 %v9997_v29, %v9547_v22  ;;  %v11280_v39 = vld [vmem:[#allocation4 + $0x61] ss:$2 sm:$0xff] }
 0x8ba   :  { %11154 = vst [vmem:[#allocation4 + $0x70] sm:$0xff] %v11090_v10  ;;  %v10505_v28 = vpop.f32.mrf.mxu1  ;;  %12364 = vmatmul.msk.bf16.gmra.mxu2 %vm5494_vm3, %v16375_v49  ;;  %v10000_v10 = vpop.f32.mrf.mxu0 }
 0x8bb   :  { %v10643_v47 = vadd.f32 %v10505_v28, %v16202_v61  ;;  %12397 = vmatmul.msk.bf16.gmra.mxu3 %vm5494_vm3, %v9236_v6  ;;  %v9442_v3 = vpop.f32.mrf.mxu3  ;;  %v10772_v28 = vld [vmem:[#allocation4 + $0x80] sm:$0xff]  ;;  %v8577_v6 = vld [vmem:[#allocation3 + $0x2d2] sm:$0xff] }
 0x8bc   :  { %12430 = vmatmul.msk.bf16.gmra.mxu0 %vm5494_vm3, %v9794_v13  ;;  %v8883_v61 = vpop.f32.mrf.mxu2 }
 0x8bd   :  { %vm10899_vm10 = vcmp.gt.f32.partialorder %v10643_v47, 0.0  ;;  %v10963_v9 = vmul.f32 0.01, %v10643_v47  ;;  %v8989_v23 = vadd.f32 %v8883_v61, %v16973_v35 }
 0x8bf   :  { %v11027_v2 = vsel %vm10899_vm10, %v10643_v47, %v10963_v9  ;;  %v9548_v40 = vadd.f32 %v9442_v3, %v8989_v23  ;;  %v11216_v47 = vld [vmem:[#allocation4 + $0x60] ss:$2 sm:$0xff]  ;;  %v9695_v23 = vld [vmem:[#allocation3 + $0x2f1] sm:$0xff] }
 0x8c0   :  { %v11091_v30 = vadd.f32 %v11027_v2, %v10771_v33  ;;  %v11337_v35 = vmax.f32 %v11216_v47, %v11280_v39 }
 0x8c1   :  { %v16387_v9 = vadd.f32 %v10000_v10, %v9548_v40 }
 0x8c2   :  { %11155 = vst [vmem:[#allocation4 + $0x78] sm:$0xff] %v11091_v30  ;;  %v10508_v55 = vpop.f32.mrf.mxu1  ;;  %v9137_v30 = vld [vmem:[#allocation3 + $0x2f0] sm:$0xff] }
 0x8c3   :  { %v10644_v56 = vadd.f32 %v10508_v55, %v16210_v37  ;;  %v9444_v2 = vpop.f32.mrf.mxu3  ;;  %v10002_v55 = vpop.f32.mrf.mxu0 }
 0x8c4   :  { %v8885_v22 = vpop.f32.mrf.mxu2 }
 0x8c5   :  { %vm10900_vm11 = vcmp.gt.f32.partialorder %v10644_v56, 0.0  ;;  %v10964_v34 = vmul.f32 0.01, %v10644_v56  ;;  %12453 = vmatmul.msk.bf16.gmra.mxu1 %vm5494_vm3, %v16216_v36  ;;  %v8990_v37 = vadd.f32 %v8885_v22, %v15978_v45 }
 0x8c7   :  { %v11028_v60 = vsel %vm10900_vm11, %v10644_v56, %v10964_v34  ;;  %v9549_v56 = vadd.f32 %v9444_v2, %v8990_v37  ;;  %v16391_v34 = vpack.c.bf16 %v8578_v42, %v8577_v6  ;;  %v16974_v42 = vld [vmem:[#allocation31_spill] sm:$0xff] }
 0x8c8   :  { %v11092_v29 = vadd.f32 %v11028_v60, %v10772_v28  ;;  %v9136_v28 = vld [vmem:[#allocation3 + $0x2e8] sm:$0xff] }
 0x8c9   :  { %v11218_v13 = vld [vmem:[#allocation4 + $0x70] ss:$2 sm:$0xff]  ;;  %v11282_v33 = vld [vmem:[#allocation4 + $0x71] ss:$2 sm:$0xff]  ;;  %v9237_v40 = vpack.c.bf16 %v9137_v30, %v9136_v28  ;;  %v16401_v6 = vadd.f32 %v10002_v55, %v9549_v56 }
 0x8ca   :  { %11156 = vst [vmem:[#allocation4 + $0x80] sm:$0xff] %v11092_v29  ;;  %v10510_v61 = vpop.f32.mrf.mxu1  ;;  %v11338_v36 = vmax.f32 %v11218_v13, %v11282_v33  ;;  %v9694_v60 = vld [vmem:[#allocation3 + $0x2e9] sm:$0xff]  ;;  %12365 = vmatmul.msk.bf16.gmra.mxu2 %vm5494_vm3, %v16391_v34  ;;  %v8580_v56 = vld [vmem:[#allocation3 + $0x2f2] sm:$0xff] }
 0x8cb   :  { %v10645_v3 = vadd.f32 %v10510_v61, %v16222_v38  ;;  %v9795_v29 = vpack.c.bf16 %v9695_v23, %v9694_v60  ;;  %12398 = vmatmul.msk.bf16.gmra.mxu3 %vm5494_vm3, %v9237_v40  ;;  %v10773_v38 = vld [vmem:[#allocation4 + $0x88] sm:$0xff]  ;;  %v16975_v60 = vld [vmem:[#allocation34_spill] sm:$0xff] }
 0x8cc   :  { %v16393_v10 = vmax.f32 %v11337_v35, %v11338_v36  ;;  %v8888_v22 = vpop.f32.mrf.mxu2  ;;  %v9447_v33 = vpop.f32.mrf.mxu3  ;;  %v10774_v36 = vld [vmem:[#allocation4 + $0x90] sm:$0xff] }
 0x8cd   :  { %vm10901_vm12 = vcmp.gt.f32.partialorder %v10645_v3, 0.0  ;;  %v10965_v45 = vmul.f32 0.01, %v10645_v3  ;;  %12431 = vmatmul.msk.bf16.gmra.mxu0 %vm5494_vm3, %v9795_v29  ;;  %v8991_v13 = vadd.f32 %v8888_v22, %v16974_v42  ;;  %v10005_v35 = vpop.f32.mrf.mxu0  ;;  %v8579_v55 = vld [vmem:[#allocation3 + $0x2ea] sm:$0xff]  ;;  %v9138_v42 = vld [vmem:[#allocation3 + $0x300] sm:$0xff] }
 0x8ce   :  { %11401 = vrot.lane.b32.xlu1 %v16393_v10, %s12503_s2  ;;  %v9139_v29 = vld [vmem:[#allocation3 + $0x308] sm:$0xff] }
 0x8cf   :  { %v11029_v47 = vsel %vm10901_vm12, %v10645_v3, %v10965_v45  ;;  %v9550_v30 = vadd.f32 %v9447_v33, %v8991_v13  ;;  %v9238_v13 = vpack.c.bf16 %v9139_v29, %v9138_v42  ;;  %v9696_v33 = vld [vmem:[#allocation3 + $0x301] sm:$0xff] }
 0x8d0   :  { %v11093_v39 = vadd.f32 %v11029_v47, %v10773_v38  ;;  %v9697_v47 = vld [vmem:[#allocation3 + $0x309] sm:$0xff] }
 0x8d1   :  { %v16407_v40 = vadd.f32 %v10005_v35, %v9550_v30  ;;  %v10775_v30 = vld [vmem:[#allocation4 + $0x98] sm:$0xff] }
 0x8d2   :  { %11157 = vst [vmem:[#allocation4 + $0x88] sm:$0xff] %v11093_v39  ;;  %v10513_v37 = vpop.f32.mrf.mxu1 }
 0x8d3   :  { %v10646_v2 = vadd.f32 %v10513_v37, %v16230_v27 }
 0x8d4   :  { %v8890_v28 = vpop.f32.mrf.mxu2  ;;  %v9449_v38 = vpop.f32.mrf.mxu3 }
 0x8d5   :  { %vm10902_vm13 = vcmp.gt.f32.partialorder %v10646_v2, 0.0  ;;  %v10966_v61 = vmul.f32 0.01, %v10646_v2  ;;  %12454 = vmatmul.msk.bf16.gmra.mxu1 %vm5494_vm3, %v16236_v16  ;;  %v8992_v45 = vadd.f32 %v8890_v28, %v16975_v60  ;;  %v16411_v16 = vpack.c.bf16 %v8580_v56, %v8579_v55  ;;  %v10007_v35 = vpop.f32.mrf.mxu0  ;;  %v10776_v60 = vld [vmem:[#allocation4 + $0xa0] sm:$0xff] }
 0x8d7   :  { %v11030_v23 = vsel %vm10902_vm13, %v10646_v2, %v10966_v61  ;;  %v9551_v22 = vadd.f32 %v9449_v38, %v8992_v45  ;;  %v9796_v2 = vpack.c.bf16 %v9697_v47, %v9696_v33  ;;  %v8581_v47 = vld [vmem:[#allocation3 + $0x302] sm:$0xff] }
 0x8d8   :  { %v11094_v3 = vadd.f32 %v11030_v23, %v10774_v36 }
 0x8d9   :  { %v16417_v23 = vadd.f32 %v10007_v35, %v9551_v22  ;;  %v11220_v29 = vld [vmem:[#allocation4 + $0x80] ss:$2 sm:$0xff] }
 0x8da   :  { %11158 = vst [vmem:[#allocation4 + $0x90] sm:$0xff] %v11094_v3  ;;  %v10515_v27 = vpop.f32.mrf.mxu1  ;;  %12366 = vmatmul.msk.bf16.gmra.mxu2 %vm5494_vm3, %v16411_v16 }
 0x8db   :  { %v10647_v39 = vadd.f32 %v10515_v27, %v16242_v14  ;;  %12399 = vmatmul.msk.bf16.gmra.mxu3 %vm5494_vm3, %v9238_v13  ;;  %v11284_v27 = vld [vmem:[#allocation4 + $0x81] ss:$2 sm:$0xff] }
 0x8dc   :  { %v11339_v33 = vmax.f32 %v11220_v29, %v11284_v27  ;;  %v10778_v29 = vld [vmem:[#allocation4 + $0xb0] sm:$0xff] }
 0x8dd   :  { %vm10903_vm14 = vcmp.gt.f32.partialorder %v10647_v39, 0.0  ;;  %v10967_v37 = vmul.f32 0.01, %v10647_v39  ;;  %12432 = vmatmul.msk.bf16.gmra.mxu0 %vm5494_vm3, %v9796_v2 }
 0x8df   :  { %v11031_v61 = vsel %vm10903_vm14, %v10647_v39, %v10967_v37  ;;  %v8582_v39 = vld [vmem:[#allocation3 + $0x30a] sm:$0xff] }
 0x8e0   :  { %v11095_v14 = vadd.f32 %v11031_v61, %v10775_v30  ;;  %v11396_v36 = vpop.permute.xlu0 %11395  ;;  %v16424_v30 = vpack.c.bf16 %v8582_v39, %v8581_v47  ;;  %v8583_v47 = vld [vmem:[#allocation3 + $0x31a] sm:$0xff]  ;;  %v8584_v39 = vld [vmem:[#allocation3 + $0x322] sm:$0xff] }
 0x8e1   :  { %v11443_v3 = vadd.f32 %v11396_v36, %v16286_v8  ;;  %v9141_v8 = vld [vmem:[#allocation3 + $0x320] sm:$0xff] }
 0x8e2   :  { %11159 = vst [vmem:[#allocation4 + $0x98] sm:$0xff] %v11095_v14  ;;  %v10518_v28 = vpop.f32.mrf.mxu1  ;;  %v9698_v14 = vld [vmem:[#allocation3 + $0x319] sm:$0xff] }
 0x8e3   :  { %11459 = vst [vmem:[#allocation5] sm:$0xff] %v11443_v3  ;;  %v10648_v55 = vadd.f32 %v10518_v28, %v16248_v12  ;;  %v9699_v12 = vld [vmem:[#allocation3 + $0x321] sm:$0xff] }
 0x8e4   :  { %v9797_v3 = vpack.c.bf16 %v9699_v12, %v9698_v14  ;;  %v10777_v28 = vld [vmem:[#allocation4 + $0xa8] sm:$0xff]  ;;  %v9700_v12 = vld [vmem:[#allocation3 + $0x331] sm:$0xff] }
 0x8e5   :  { %vm10904_vm15 = vcmp.gt.f32.partialorder %v10648_v55, 0.0  ;;  %v10968_v56 = vmul.f32 0.01, %v10648_v55  ;;  %12455 = vmatmul.msk.bf16.gmra.mxu1 %vm5494_vm3, %v16252_v50  ;;  %v9140_v50 = vld [vmem:[#allocation3 + $0x318] sm:$0xff] }
 0x8e6   :  { %v9239_v35 = vpack.c.bf16 %v9141_v8, %v9140_v50  ;;  %v9701_v8 = vld [vmem:[#allocation3 + $0x339] sm:$0xff] }
 0x8e7   :  { %v11032_v45 = vsel %vm10904_vm15, %v10648_v55, %v10968_v56  ;;  %v10779_v50 = vld [vmem:[#allocation4 + $0xb8] sm:$0xff] }
 0x8e8   :  { %v11096_v38 = vadd.f32 %v11032_v45, %v10776_v60 }
 0x8e9   :  { %v11222_v22 = vld [vmem:[#allocation4 + $0x90] ss:$2 sm:$0xff]  ;;  %v11286_v42 = vld [vmem:[#allocation4 + $0x91] ss:$2 sm:$0xff] }
 0x8ea   :  { %11160 = vst [vmem:[#allocation4 + $0xa0] sm:$0xff] %v11096_v38  ;;  %v10520_v13 = vpop.f32.mrf.mxu1  ;;  %v11340_v37 = vmax.f32 %v11222_v22, %v11286_v42  ;;  %12367 = vmatmul.msk.bf16.gmra.mxu2 %vm5494_vm3, %v16424_v30  ;;  %v9143_v22 = vld [vmem:[#allocation3 + $0x338] sm:$0xff] }
 0x8eb   :  { %v10649_v2 = vadd.f32 %v10520_v13, %v16258_v19  ;;  %12400 = vmatmul.msk.bf16.gmra.mxu3 %vm5494_vm3, %v9239_v35 }
 0x8ec   :  { %v16426_v61 = vmax.f32 %v11339_v33, %v11340_v37  ;;  %v16438_v33 = vpack.c.bf16 %v8584_v39, %v8583_v47  ;;  %v9142_v37 = vld [vmem:[#allocation3 + $0x330] sm:$0xff] }
 0x8ed   :  { %vm10905_vm0 = vcmp.gt.f32.partialorder %v10649_v2, 0.0  ;;  %v10969_v36 = vmul.f32 0.01, %v10649_v2  ;;  %12433 = vmatmul.msk.bf16.gmra.mxu0 %vm5494_vm3, %v9797_v3 }
 0x8ee   :  { %11403 = vrot.lane.b32.xlu2 %v16426_v61, %s12503_s2 }
 0x8ef   :  { %v11033_v19 = vsel %vm10905_vm0, %v10649_v2, %v10969_v36 }
 0x8f0   :  { %v11097_v55 = vadd.f32 %v11033_v19, %v10777_v28 }
 0x8f2   :  { %11161 = vst [vmem:[#allocation4 + $0xa8] sm:$0xff] %v11097_v55  ;;  %v10523_v56 = vpop.f32.mrf.mxu1  ;;  %v10780_v55 = vld [vmem:[#allocation4 + $0xc0] sm:$0xff] }
 0x8f3   :  { %v10650_v60 = vadd.f32 %v10523_v56, %v16264_v43  ;;  %v9240_v43 = vpack.c.bf16 %v9143_v22, %v9142_v37 }
 0x8f5   :  { %vm10906_vm4 = vcmp.gt.f32.partialorder %v10650_v60, 0.0  ;;  %v10970_v45 = vmul.f32 0.01, %v10650_v60  ;;  %12456 = vmatmul.msk.bf16.gmra.mxu1 %vm5494_vm3, %v16268_v53  ;;  %v9798_v53 = vpack.c.bf16 %v9701_v8, %v9700_v12  ;;  %v9144_v8 = vld [vmem:[#allocation3 + $0x348] sm:$0xff] }
 0x8f7   :  { %v11034_v27 = vsel %vm10906_vm4, %v10650_v60, %v10970_v45 }
 0x8f8   :  { %v11098_v38 = vadd.f32 %v11034_v27, %v10778_v29  ;;  %v8585_v27 = vld [vmem:[#allocation3 + $0x332] sm:$0xff] }
 0x8f9   :  { %v11224_v60 = vld [vmem:[#allocation4 + $0xa0] ss:$2 sm:$0xff]  ;;  %v11288_v45 = vld [vmem:[#allocation4 + $0xa1] ss:$2 sm:$0xff] }
 0x8fa   :  { %11162 = vst [vmem:[#allocation4 + $0xb0] sm:$0xff] %v11098_v38  ;;  %v10525_v42 = vpop.f32.mrf.mxu1  ;;  %12368 = vmatmul.msk.bf16.gmra.mxu2 %vm5494_vm3, %v16438_v33  ;;  %v8586_v38 = vld [vmem:[#allocation3 + $0x33a] sm:$0xff]  ;;  %v11341_v22 = vmax.f32 %v11224_v60, %v11288_v45 }
 0x8fb   :  { %v10651_v13 = vadd.f32 %v10525_v42, %v16274_v24  ;;  %12401 = vmatmul.msk.bf16.gmra.mxu3 %vm5494_vm3, %v9240_v43  ;;  %v16449_v37 = vpack.c.bf16 %v8586_v38, %v8585_v27 }
 0x8fd   :  { %vm10907_vm1 = vcmp.gt.f32.partialorder %v10651_v13, 0.0  ;;  %v10971_v2 = vmul.f32 0.01, %v10651_v13  ;;  %12434 = vmatmul.msk.bf16.gmra.mxu0 %vm5494_vm3, %v9798_v53 }
 0x8ff   :  { %v11035_v35 = vsel %vm10907_vm1, %v10651_v13, %v10971_v2  ;;  %v10781_v2 = vld [vmem:[#allocation4 + $0xc8] sm:$0xff] }
 0x900   :  { %v11099_v14 = vadd.f32 %v11035_v35, %v10779_v50  ;;  %v11398_v36 = vpop.permute.xlu0 %11397  ;;  %v9702_v35 = vld [vmem:[#allocation3 + $0x349] sm:$0xff] }
 0x901   :  { %v11444_v24 = vadd.f32 %v11398_v36, %v16322_v21 }
 0x902   :  { %11163 = vst [vmem:[#allocation4 + $0xb8] sm:$0xff] %v11099_v14  ;;  %v10528_v3 = vpop.f32.mrf.mxu1  ;;  %v9703_v14 = vld [vmem:[#allocation3 + $0x351] sm:$0xff] }
 0x903   :  { %11460 = vst [vmem:[#allocation5 + $0x8] sm:$0xff] %v11444_v24  ;;  %v10652_v28 = vadd.f32 %v10528_v3, %v16280_v44  ;;  %v9145_v44 = vld [vmem:[#allocation3 + $0x350] sm:$0xff]  ;;  %v9799_v24 = vpack.c.bf16 %v9703_v14, %v9702_v35 }
 0x905   :  { %vm10908_vm5 = vcmp.gt.f32.partialorder %v10652_v28, 0.0  ;;  %v10972_v19 = vmul.f32 0.01, %v10652_v28  ;;  %12457 = vmatmul.msk.bf16.gmra.mxu1 %vm5494_vm3, %v16284_v26  ;;  %v9241_v26 = vpack.c.bf16 %v9145_v44, %v9144_v8 }
 0x907   :  { %v11036_v56 = vsel %vm10908_vm5, %v10652_v28, %v10972_v19  ;;  %v10782_v28 = vld [vmem:[#allocation4 + $0xd0] sm:$0xff] }
 0x908   :  { %v11100_v29 = vadd.f32 %v11036_v56, %v10780_v55 }
 0x909   :  { %v11226_v47 = vld [vmem:[#allocation4 + $0xb0] ss:$2 sm:$0xff]  ;;  %v11290_v39 = vld [vmem:[#allocation4 + $0xb1] ss:$2 sm:$0xff] }
 0x90a   :  { %11164 = vst [vmem:[#allocation4 + $0xc0] sm:$0xff] %v11100_v29  ;;  %v10530_v21 = vpop.f32.mrf.mxu1  ;;  %v11342_v42 = vmax.f32 %v11226_v47, %v11290_v39  ;;  %12369 = vmatmul.msk.bf16.gmra.mxu2 %vm5494_vm3, %v16449_v37  ;;  %v10783_v29 = vld [vmem:[#allocation4 + $0xd8] sm:$0xff] }
 0x90b   :  { %v10653_v13 = vadd.f32 %v10530_v21, %v16294_v15  ;;  %12402 = vmatmul.msk.bf16.gmra.mxu3 %vm5494_vm3, %v9241_v26 }
 0x90c   :  { %v16451_v43 = vmax.f32 %v11341_v22, %v11342_v42  ;;  %v10784_v22 = vld [vmem:[#allocation4 + $0xe0] sm:$0xff] }
 0x90d   :  { %vm10909_vm7 = vcmp.gt.f32.partialorder %v10653_v13, 0.0  ;;  %v10973_v12 = vmul.f32 0.01, %v10653_v13  ;;  %12435 = vmatmul.msk.bf16.gmra.mxu0 %vm5494_vm3, %v9799_v24 }
 0x90e   :  { %11405 = vrot.lane.b32.xlu2 %v16451_v43, %s12503_s2 }
 0x90f   :  { %v11037_v53 = vsel %vm10909_vm7, %v10653_v13, %v10973_v12 }
 0x910   :  { %v11101_v50 = vadd.f32 %v11037_v53, %v10781_v2 }
 0x912   :  { %11165 = vst [vmem:[#allocation4 + $0xc8] sm:$0xff] %v11101_v50  ;;  %v10533_v15 = vpop.f32.mrf.mxu1 }
 0x913   :  { %v10654_v36 = vadd.f32 %v10533_v15, %v16300_v48 }
 0x915   :  { %vm10910_vm8 = vcmp.gt.f32.partialorder %v10654_v36, 0.0  ;;  %v10974_v3 = vmul.f32 0.01, %v10654_v36  ;;  %12458 = vmatmul.msk.bf16.gmra.mxu1 %vm5494_vm3, %v16304_v4 }
 0x917   :  { %v11038_v19 = vsel %vm10910_vm8, %v10654_v36, %v10974_v3 }
 0x918   :  { %v11102_v55 = vadd.f32 %v11038_v19, %v10782_v28 }
 0x919   :  { %v11228_v42 = vld [vmem:[#allocation4 + $0xc0] ss:$2 sm:$0xff]  ;;  %v11292_v8 = vld [vmem:[#allocation4 + $0xc1] ss:$2 sm:$0xff] }
 0x91a   :  { %11166 = vst [vmem:[#allocation4 + $0xd0] sm:$0xff] %v11102_v55  ;;  %v10535_v56 = vpop.f32.mrf.mxu1 }
 0x91b   :  { %v10655_v60 = vadd.f32 %v10535_v56, %v16310_v58 }
 0x91d   :  { %vm10911_vm9 = vcmp.gt.f32.partialorder %v10655_v60, 0.0  ;;  %v10975_v45 = vmul.f32 0.01, %v10655_v60 }
 0x91f   :  { %v11039_v27 = vsel %vm10911_vm9, %v10655_v60, %v10975_v45  ;;  %v10787_v60 = vld [vmem:[#allocation4 + $0xf8] sm:$0xff] }
 0x920   :  { %v11103_v48 = vadd.f32 %v11039_v27, %v10783_v29  ;;  %v11400_v38 = vpop.permute.xlu1 %11399 }
 0x921   :  { %v11445_v47 = vadd.f32 %v11400_v38, %v16358_v51  ;;  %v11343_v51 = vmax.f32 %v11228_v42, %v11292_v8 }
 0x922   :  { %11167 = vst [vmem:[#allocation4 + $0xd8] sm:$0xff] %v11103_v48  ;;  %v10538_v39 = vpop.f32.mrf.mxu1 }
 0x923   :  { %11461 = vst [vmem:[#allocation5 + $0x10] sm:$0xff] %v11445_v47  ;;  %v10656_v4 = vadd.f32 %v10538_v39, %v16316_v63  ;;  %v10788_v47 = vld [vmem:[#allocation4 + $0x100] sm:$0xff] }
 0x925   :  { %vm10912_vm2 = vcmp.gt.f32.partialorder %v10656_v4, 0.0  ;;  %v10976_v21 = vmul.f32 0.01, %v10656_v4  ;;  %12459 = vmatmul.msk.bf16.gmra.mxu1 %vm5494_vm3, %v16320_v31  ;;  %v10785_v31 = vld [vmem:[#allocation4 + $0xe8] sm:$0xff] }
 0x927   :  { %v11040_v58 = vsel %vm10912_vm2, %v10656_v4, %v10976_v21  ;;  %v16480_v21 = vpop.f32.mrf.mxu2 }
 0x928   :  { %v11104_v44 = vadd.f32 %v11040_v58, %v10784_v22 }
 0x929   :  { %v11230_v13 = vld [vmem:[#allocation4 + $0xd0] ss:$2 sm:$0xff]  ;;  %v11294_v26 = vld [vmem:[#allocation4 + $0xd1] ss:$2 sm:$0xff] }
 0x92a   :  { %11168 = vst [vmem:[#allocation4 + $0xe0] sm:$0xff] %v11104_v44  ;;  %v10540_v12 = vpop.f32.mrf.mxu1  ;;  %v11344_v2 = vmax.f32 %v11230_v13, %v11294_v26 }
 0x92b   :  { %v10657_v53 = vadd.f32 %v10540_v12, %v16330_v25  ;;  %v10786_v25 = vld [vmem:[#allocation4 + $0xf0] sm:$0xff] }
 0x92c   :  { %v16468_v50 = vmax.f32 %v11343_v51, %v11344_v2  ;;  %v16486_v51 = vpop.f32.mrf.mxu3  ;;  %v10789_v2 = vld [vmem:[#allocation4 + $0x108] sm:$0xff] }
 0x92d   :  { %vm10913_vm10 = vcmp.gt.f32.partialorder %v10657_v53, 0.0  ;;  %v10977_v63 = vmul.f32 0.01, %v10657_v53 }
 0x92e   :  { %11407 = vrot.lane.b32.xlu0 %v16468_v50, %s12503_s2 }
 0x92f   :  { %v11041_v15 = vsel %vm10913_vm10, %v10657_v53, %v10977_v63  ;;  %v16490_v63 = vpop.f32.mrf.mxu0 }
 0x930   :  { %v11105_v35 = vadd.f32 %v11041_v15, %v10785_v31  ;;  %v16492_v31 = vpop.f32.mrf.mxu2 }
 0x932   :  { %11169 = vst [vmem:[#allocation4 + $0xe8] sm:$0xff] %v11105_v35  ;;  %v10543_v14 = vpop.f32.mrf.mxu1 }
 0x933   :  { %v10658_v36 = vadd.f32 %v10543_v14, %v16336_v5  ;;  %v10790_v14 = vld [vmem:[#allocation4 + $0x110] sm:$0xff] }
 0x935   :  { %vm10914_vm11 = vcmp.gt.f32.partialorder %v10658_v36, 0.0  ;;  %v10978_v24 = vmul.f32 0.01, %v10658_v36  ;;  %12460 = vmatmul.msk.bf16.gmra.mxu1 %vm5494_vm3, %v16340_v62 }
 0x937   :  { %v11042_v3 = vsel %vm10914_vm11, %v10658_v36, %v10978_v24  ;;  %v16497_v24 = vpop.f32.mrf.mxu3 }
 0x938   :  { %v11106_v28 = vadd.f32 %v11042_v3, %v10786_v25 }
 0x939   :  { %v11232_v39 = vld [vmem:[#allocation4 + $0xe0] ss:$2 sm:$0xff]  ;;  %v11296_v4 = vld [vmem:[#allocation4 + $0xe1] ss:$2 sm:$0xff] }
 0x93a   :  { %11170 = vst [vmem:[#allocation4 + $0xf0] sm:$0xff] %v11106_v28  ;;  %v10545_v19 = vpop.f32.mrf.mxu1  ;;  %v16499_v28 = vpop.f32.mrf.mxu0 }
 0x93b   :  { %v10659_v55 = vadd.f32 %v10545_v19, %v16346_v11 }
 0x93d   :  { %vm10915_vm12 = vcmp.gt.f32.partialorder %v10659_v55, 0.0  ;;  %v10979_v56 = vmul.f32 0.01, %v10659_v55 }
 0x93f   :  { %v11043_v45 = vsel %vm10915_vm12, %v10659_v55, %v10979_v56  ;;  %v16502_v55 = vpop.f32.mrf.mxu2  ;;  %v10791_v56 = vld [vmem:[#allocation4 + $0x118] sm:$0xff] }
 0x940   :  { %v11107_v29 = vadd.f32 %v11043_v45, %v10787_v60  ;;  %v11402_v27 = vpop.permute.xlu1 %11401 }
 0x941   :  { %v11446_v5 = vadd.f32 %v11402_v27, %v16393_v10 }
 0x942   :  { %11171 = vst [vmem:[#allocation4 + $0xf8] sm:$0xff] %v11107_v29  ;;  %v10548_v48 = vpop.f32.mrf.mxu1  ;;  %v16504_v29 = vpop.f32.mrf.mxu3 }
 0x943   :  { %11462 = vst [vmem:[#allocation5 + $0x18] sm:$0xff] %v11446_v5  ;;  %v10660_v62 = vadd.f32 %v10548_v48, %v16352_v7  ;;  %v11345_v7 = vmax.f32 %v11232_v39, %v11296_v4  ;;  %v16507_v5 = vpop.f32.mrf.mxu0 }
 0x945   :  { %vm10916_vm13 = vcmp.gt.f32.partialorder %v10660_v62, 0.0  ;;  %v10980_v38 = vmul.f32 0.01, %v10660_v62  ;;  %12461 = vmatmul.msk.bf16.gmra.mxu1 %vm5494_vm3, %v16356_v59 }
 0x947   :  { %v11044_v11 = vsel %vm10916_vm13, %v10660_v62, %v10980_v38  ;;  %v10792_v62 = vld [vmem:[#allocation4 + $0x120] sm:$0xff] }
 0x948   :  { %v11108_v22 = vadd.f32 %v11044_v11, %v10788_v47  ;;  %v11404_v58 = vpop.permute.xlu2 %11403 }
 0x949   :  { %v11447_v10 = vadd.f32 %v11404_v58, %v16426_v61  ;;  %v11234_v42 = vld [vmem:[#allocation4 + $0xf0] ss:$2 sm:$0xff]  ;;  %v11298_v8 = vld [vmem:[#allocation4 + $0xf1] ss:$2 sm:$0xff] }
 0x94a   :  { %11172 = vst [vmem:[#allocation4 + $0x100] sm:$0xff] %v11108_v22  ;;  %v10550_v44 = vpop.f32.mrf.mxu1  ;;  %v11346_v13 = vmax.f32 %v11234_v42, %v11298_v8 }
 0x94b   :  { %11463 = vst [vmem:[#allocation5 + $0x20] sm:$0xff] %v11447_v10  ;;  %v10661_v26 = vadd.f32 %v10550_v44, %v16366_v20 }
 0x94c   :  { %v16484_v59 = vmax.f32 %v11345_v7, %v11346_v13 }
 0x94d   :  { %vm10917_vm14 = vcmp.gt.f32.partialorder %v10661_v26, 0.0  ;;  %v10981_v12 = vmul.f32 0.01, %v10661_v26 }
 0x94e   :  { %11409 = vrot.lane.b32.xlu1 %v16484_v59, %s12503_s2 }
 0x94f   :  { %v11045_v61 = vsel %vm10917_vm14, %v10661_v26, %v10981_v12  ;;  %v16521_v26 = vpop.f32.mrf.mxu0 }
 0x950   :  { %v11109_v53 = vadd.f32 %v11045_v61, %v10789_v2 }
 0x952   :  { %11173 = vst [vmem:[#allocation4 + $0x108] sm:$0xff] %v11109_v53  ;;  %v10553_v15 = vpop.f32.mrf.mxu1 }
 0x953   :  { %v10662_v20 = vadd.f32 %v10553_v15, %v16371_v17 }
 0x955   :  { %vm10918_vm15 = vcmp.gt.f32.partialorder %v10662_v20, 0.0  ;;  %v10982_v35 = vmul.f32 0.01, %v10662_v20  ;;  %12462 = vmatmul.msk.bf16.gmra.mxu1 %vm5494_vm3, %v16375_v49 }
 0x957   :  { %v11046_v36 = vsel %vm10918_vm15, %v10662_v20, %v10982_v35  ;;  %v10794_v35 = vld [vmem:[#allocation4 + $0x130] sm:$0xff] }
 0x958   :  { %v11110_v25 = vadd.f32 %v11046_v36, %v10790_v14 }
 0x959   :  { %v11236_v47 = vld [vmem:[#allocation4 + $0x100] ss:$2 sm:$0xff]  ;;  %v11300_v11 = vld [vmem:[#allocation4 + $0x101] ss:$2 sm:$0xff] }
 0x95a   :  { %11174 = vst [vmem:[#allocation4 + $0x110] sm:$0xff] %v11110_v25  ;;  %v10555_v3 = vpop.f32.mrf.mxu1  ;;  %v11347_v42 = vmax.f32 %v11236_v47, %v11300_v11  ;;  %v16976_v25 = vld [vmem:[#allocation43_spill] sm:$0xff] }
 0x95b   :  { %v10663_v19 = vadd.f32 %v10555_v3, %v16381_v57  ;;  %v16511_v57 = vpop.f32.mrf.mxu2  ;;  %v8993_v3 = vadd.f32 %v16480_v21, %v16976_v25  ;;  %v8994_v21 = vadd.f32 %v16492_v31, %v16018_v46 }
 0x95c   :  { %v8996_v25 = vadd.f32 %v16511_v57, %v16038_v18 }
 0x95d   :  { %vm10919_vm0 = vcmp.gt.f32.partialorder %v10663_v19, 0.0  ;;  %v10983_v17 = vmul.f32 0.01, %v10663_v19 }
 0x95f   :  { %v11047_v60 = vsel %vm10919_vm0, %v10663_v19, %v10983_v17  ;;  %v16532_v19 = vpop.f32.mrf.mxu0 }
 0x960   :  { %v11111_v45 = vadd.f32 %v11047_v60, %v10791_v56  ;;  %v9552_v60 = vadd.f32 %v16486_v51, %v8993_v3  ;;  %v9553_v51 = vadd.f32 %v16497_v24, %v8994_v21 }
 0x962   :  { %11175 = vst [vmem:[#allocation4 + $0x118] sm:$0xff] %v11111_v45  ;;  %v10558_v49 = vpop.f32.mrf.mxu1  ;;  %v10795_v45 = vld [vmem:[#allocation4 + $0x138] sm:$0xff] }
 0x963   :  { %v10664_v27 = vadd.f32 %v10558_v49, %v16387_v9  ;;  %v16523_v2 = vpop.f32.mrf.mxu2 }
 0x965   :  { %vm10920_vm4 = vcmp.gt.f32.partialorder %v10664_v27, 0.0  ;;  %v10984_v48 = vmul.f32 0.01, %v10664_v27  ;;  %12463 = vmatmul.msk.bf16.gmra.mxu1 %vm5494_vm3, %v16391_v34  ;;  %v16515_v34 = vpop.f32.mrf.mxu3 }
 0x967   :  { %v11048_v38 = vsel %vm10920_vm4, %v10664_v27, %v10984_v48  ;;  %v16543_v47 = vpop.f32.mrf.mxu0 }
 0x968   :  { %v11112_v39 = vadd.f32 %v11048_v38, %v10792_v62  ;;  %v11406_v4 = vpop.permute.xlu2 %11405  ;;  %v10110_v62 = vadd.f32 %v16490_v63, %v9552_v60  ;;  %v16977_v63 = vld [vmem:[#allocation44_spill] sm:$0xff]  ;;  %v9555_v60 = vadd.f32 %v16515_v34, %v8996_v25 }
 0x969   :  { %v11448_v22 = vadd.f32 %v11406_v4, %v16451_v43  ;;  %v11238_v58 = vld [vmem:[#allocation4 + $0x110] ss:$2 sm:$0xff]  ;;  %v11302_v10 = vld [vmem:[#allocation4 + $0x111] ss:$2 sm:$0xff]  ;;  %v10793_v43 = vld [vmem:[#allocation4 + $0x128] sm:$0xff] }
 0x96a   :  { %11176 = vst [vmem:[#allocation4 + $0x120] sm:$0xff] %v11112_v39  ;;  %v10560_v9 = vpop.f32.mrf.mxu1  ;;  %v11348_v8 = vmax.f32 %v11238_v58, %v11302_v10  ;;  %v10796_v4 = vld [vmem:[#allocation4 + $0x140] sm:$0xff]  ;;  %v8995_v10 = vadd.f32 %v16502_v55, %v16977_v63 }
 0x96b   :  { %11464 = vst [vmem:[#allocation5 + $0x28] sm:$0xff] %v11448_v22  ;;  %v10665_v44 = vadd.f32 %v10560_v9, %v16401_v6  ;;  %v16534_v17 = vpop.f32.mrf.mxu2  ;;  %v10111_v9 = vadd.f32 %v16499_v28, %v9553_v51  ;;  %v16978_v28 = vld [vmem:[#allocation9_spill] sm:$0xff] }
 0x96c   :  { %v16517_v7 = vmax.f32 %v11347_v42, %v11348_v8 }
 0x96d   :  { %vm10921_vm1 = vcmp.gt.f32.partialorder %v10665_v44, 0.0  ;;  %v10985_v13 = vmul.f32 0.01, %v10665_v44  ;;  %v16528_v20 = vpop.f32.mrf.mxu3 }
 0x96e   :  { %11411 = vrot.lane.b32.xlu2 %v16517_v7, %s12503_s2 }
 0x96f   :  { %v11049_v12 = vsel %vm10921_vm1, %v10665_v44, %v10985_v13 }
 0x970   :  { %v11113_v61 = vadd.f32 %v11049_v12, %v10793_v43 }
 0x972   :  { %11177 = vst [vmem:[#allocation4 + $0x128] sm:$0xff] %v11113_v61  ;;  %v10563_v53 = vpop.f32.mrf.mxu1  ;;  %v9554_v61 = vadd.f32 %v16504_v29, %v8995_v10 }
 0x973   :  { %v10666_v6 = vadd.f32 %v10563_v53, %v16407_v40  ;;  %v16558_v53 = vpop.f32.mrf.mxu0 }
 0x974   :  { %v10112_v29 = vadd.f32 %v16507_v5, %v9554_v61  ;;  %v16980_v5 = vld [vmem:[#allocation42_spill] sm:$0xff] }
 0x975   :  { %vm10922_vm5 = vcmp.gt.f32.partialorder %v10666_v6, 0.0  ;;  %v10986_v15 = vmul.f32 0.01, %v10666_v6  ;;  %12464 = vmatmul.msk.bf16.gmra.mxu1 %vm5494_vm3, %v16411_v16  ;;  %v16538_v27 = vpop.f32.mrf.mxu3  ;;  %v8997_v57 = vadd.f32 %v16523_v2, %v16980_v5 }
 0x977   :  { %v11050_v14 = vsel %vm10922_vm5, %v10666_v6, %v10986_v15 }
 0x978   :  { %v11114_v36 = vadd.f32 %v11050_v14, %v10794_v35  ;;  %v5215_v35 = vsel %vm14292_vm6, %v16978_v28, 0.0 }
 0x979   :  { %v11240_v58 = vld [vmem:[#allocation4 + $0x120] ss:$2 sm:$0xff]  ;;  %v11304_v46 = vld [vmem:[#allocation4 + $0x121] ss:$2 sm:$0xff] }
 0x97a   :  { %11178 = vst [vmem:[#allocation4 + $0x130] sm:$0xff] %v11114_v36  ;;  %v10565_v56 = vpop.f32.mrf.mxu1  ;;  %v11349_v13 = vmax.f32 %v11240_v58, %v11304_v46 }
 0x97b   :  { %v10667_v40 = vadd.f32 %v10565_v56, %v16417_v23  ;;  %v16545_v23 = vpop.f32.mrf.mxu2 }
 0x97d   :  { %vm10923_vm7 = vcmp.gt.f32.partialorder %v10667_v40, 0.0  ;;  %v10987_v16 = vmul.f32 0.01, %v10667_v40  ;;  %v16553_v44 = vpop.f32.mrf.mxu3 }
 0x97f   :  { %v11051_v49 = vsel %vm10923_vm7, %v10667_v40, %v10987_v16 }
 0x980   :  { %v11115_v48 = vadd.f32 %v11051_v49, %v10795_v45  ;;  %v16575_v45 = vpop.f32.mrf.mxu0  ;;  %v10798_v49 = vld [vmem:[#allocation4 + $0x150] sm:$0xff] }
 0x982   :  { %11179 = vst [vmem:[#allocation4 + $0x138] sm:$0xff] %v11115_v48  ;;  %v10568_v38 = vpop.f32.mrf.mxu1 }
 0x983   :  { %v10668_v11 = vadd.f32 %v10568_v38, %v10110_v62  ;;  %v16560_v55 = vpop.f32.mrf.mxu2  ;;  %v10113_v62 = vadd.f32 %v16521_v26, %v9555_v60 }
 0x985   :  { %vm10924_vm8 = vcmp.gt.f32.partialorder %v10668_v11, 0.0  ;;  %v10988_v39 = vmul.f32 0.01, %v10668_v11  ;;  %12465 = vmatmul.msk.bf16.gmra.mxu1 %vm5494_vm3, %v16424_v30  ;;  %v16570_v40 = vpop.f32.mrf.mxu3 }
 0x987   :  { %v11052_v22 = vsel %vm10924_vm8, %v10668_v11, %v10988_v39  ;;  %v9556_v11 = vadd.f32 %v16528_v20, %v8997_v57  ;;  %v16981_v39 = vld [vmem:[#allocation10_spill] sm:$0xff] }
 0x988   :  { %v11116_v31 = vadd.f32 %v11052_v22, %v10796_v4  ;;  %v5217_v4 = vsel %vm14292_vm6, %v16981_v39, 0.0  ;;  %v16590_v26 = vpop.f32.mrf.mxu0 }
 0x989   :  { %v11242_v42 = vld [vmem:[#allocation4 + $0x130] ss:$2 sm:$0xff]  ;;  %v11306_v8 = vld [vmem:[#allocation4 + $0x131] ss:$2 sm:$0xff]  ;;  %v10114_v20 = vadd.f32 %v16532_v19, %v9556_v11  ;;  %v8999_v19 = vadd.f32 %v16545_v23, %v16070_v32  ;;  %v16983_v23 = vld [vmem:[#allocation8_spill] sm:$0xff] }
 0x98a   :  { %11180 = vst [vmem:[#allocation4 + $0x140] sm:$0xff] %v11116_v31  ;;  %v10570_v24 = vpop.f32.mrf.mxu1  ;;  %v11350_v43 = vmax.f32 %v11242_v42, %v11306_v8  ;;  %v16982_v31 = vld [vmem:[#allocation33_spill] sm:$0xff] }
 0x98b   :  { %v10669_v12 = vadd.f32 %v10570_v24, %v10111_v9  ;;  %v16577_v21 = vpop.f32.mrf.mxu2  ;;  %v8998_v2 = vadd.f32 %v16534_v17, %v16982_v31  ;;  %v10800_v17 = vld [vmem:[#allocation4 + $0x160] sm:$0xff]  ;;  %v10260_v32 = vld [vmem:[#allocation3 + $0x34a] sm:$0xff] }
 0x98c   :  { %v16555_v30 = vmax.f32 %v11349_v13, %v11350_v43 }
 0x98d   :  { %vm10925_vm9 = vcmp.gt.f32.partialorder %v10669_v12, 0.0  ;;  %v10989_v6 = vmul.f32 0.01, %v10669_v12  ;;  %v9557_v8 = vadd.f32 %v16538_v27, %v8998_v2 }
 0x98e   :  { %11413 = vrot.lane.b32.xlu0 %v16555_v30, %s12503_s2 }
 0x98f   :  { %v11053_v14 = vsel %vm10925_vm9, %v10669_v12, %v10989_v6  ;;  %v10115_v6 = vadd.f32 %v16543_v47, %v9557_v8  ;;  %v10261_v47 = vld [vmem:[#allocation3 + $0x352] sm:$0xff] }
 0x990   :  { %v11117_v36 = vadd.f32 %v11053_v14, %v5215_v35  ;;  %v16602_v25 = vpop.f32.mrf.mxu0  ;;  %v10357_v57 = vpack.c.bf16 %v10261_v47, %v10260_v32 }
 0x992   :  { %11181 = vst [vmem:[#allocation4 + $0x148] sm:$0xff] %v11117_v36  ;;  %v10573_v3 = vpop.f32.mrf.mxu1 }
 0x993   :  { %v10670_v56 = vadd.f32 %v10573_v3, %v10112_v29  ;;  %v16594_v10 = vpop.f32.mrf.mxu2 }
 0x995   :  { %vm10926_vm2 = vcmp.gt.f32.partialorder %v10670_v56, 0.0  ;;  %v10990_v16 = vmul.f32 0.01, %v10670_v56  ;;  %12466 = vmatmul.msk.bf16.gmra.mxu1 %vm5494_vm3, %v16438_v33  ;;  %v16583_v33 = vpop.f32.mrf.mxu3 }
 0x997   :  { %v11054_v48 = vsel %vm10926_vm2, %v10670_v56, %v10990_v16  ;;  %v9558_v56 = vadd.f32 %v16553_v44, %v8999_v19  ;;  %v5219_v16 = vsel %vm14292_vm6, %v16983_v23, 0.0  ;;  %v10804_v19 = vld [vmem:[#allocation4 + $0x180] sm:$0xff] }
 0x998   :  { %v11118_v18 = vadd.f32 %v11054_v48, %v10798_v49  ;;  %v16616_v11 = vpop.f32.mrf.mxu0 }
 0x999   :  { %v11244_v43 = vld [vmem:[#allocation4 + $0x140] ss:$2 sm:$0xff]  ;;  %v11308_v12 = vld [vmem:[#allocation4 + $0x141] ss:$2 sm:$0xff]  ;;  %v10116_v5 = vadd.f32 %v16558_v53, %v9558_v56 }
 0x99a   :  { %11182 = vst [vmem:[#allocation4 + $0x150] sm:$0xff] %v11118_v18  ;;  %v10575_v38 = vpop.f32.mrf.mxu1  ;;  %v11351_v14 = vmax.f32 %v11244_v43, %v11308_v12  ;;  %v9000_v18 = vadd.f32 %v16560_v55, %v16077_v0  ;;  %v9001_v0 = vadd.f32 %v16577_v21, %v16089_v1  ;;  %v9002_v1 = vadd.f32 %v16594_v10, %v16097_v41 }
 0x99b   :  { %v10671_v34 = vadd.f32 %v10575_v38, %v10113_v62  ;;  %v8918_v29 = vpop.f32.mrf.mxu2 }
 0x99c   :  { %v9003_v41 = vadd.f32 %v8918_v29, %v16109_v52  ;;  %v16985_v52 = vld [vmem:[#allocation13_spill] sm:$0xff] }
 0x99d   :  { %vm10927_vm10 = vcmp.gt.f32.partialorder %v10671_v34, 0.0  ;;  %v10991_v51 = vmul.f32 0.01, %v10671_v34 }
 0x99f   :  { %v11055_v22 = vsel %vm10927_vm10, %v10671_v34, %v10991_v51  ;;  %v9559_v34 = vadd.f32 %v16570_v40, %v9000_v18  ;;  %v9560_v40 = vadd.f32 %v16583_v33, %v9001_v0  ;;  %v16986_v0 = vld [vmem:[#allocation45_spill] sm:$0xff] }
 0x9a0   :  { %v11119_v58 = vadd.f32 %v11055_v22, %v5217_v4  ;;  %v11408_v46 = vpop.permute.xlu0 %11407  ;;  %v10802_v4 = vld [vmem:[#allocation4 + $0x170] sm:$0xff] }
 0x9a1   :  { %v11449_v63 = vadd.f32 %v11408_v46, %v16468_v50  ;;  %v9474_v50 = vpop.f32.mrf.mxu3  ;;  %v10117_v53 = vadd.f32 %v16575_v45, %v9559_v34  ;;  %v10118_v21 = vadd.f32 %v16590_v26, %v9560_v40 }
 0x9a2   :  { %11183 = vst [vmem:[#allocation4 + $0x158] sm:$0xff] %v11119_v58  ;;  %v10578_v9 = vpop.f32.mrf.mxu1  ;;  %v9561_v43 = vadd.f32 %v9474_v50, %v9002_v1 }
 0x9a3   :  { %11465 = vst [vmem:[#allocation5 + $0x30] sm:$0xff] %v11449_v63  ;;  %v10672_v42 = vadd.f32 %v10578_v9, %v10114_v20  ;;  %v8920_v39 = vpop.f32.mrf.mxu2  ;;  %v10037_v63 = vpop.f32.mrf.mxu0  ;;  %v16984_v20 = vld [vmem:[#allocation12_spill] sm:$0xff] }
 0x9a4   :  { %v5221_v9 = vsel %vm14292_vm6, %v16984_v20, 0.0  ;;  %v10119_v26 = vadd.f32 %v16602_v25, %v9561_v43  ;;  %v9004_v18 = vadd.f32 %v8920_v39, %v16117_v54 }
 0x9a5   :  { %vm10928_vm11 = vcmp.gt.f32.partialorder %v10672_v42, 0.0  ;;  %v10992_v24 = vmul.f32 0.01, %v10672_v42  ;;  %12467 = vmatmul.msk.bf16.gmra.mxu1 %vm5494_vm3, %v16449_v37 }
 0x9a7   :  { %v11056_v13 = vsel %vm10928_vm11, %v10672_v42, %v10992_v24 }
 0x9a8   :  { %v11120_v61 = vadd.f32 %v11056_v13, %v10800_v17 }
 0x9a9   :  { %v11246_v28 = vld [vmem:[#allocation4 + $0x150] ss:$2 sm:$0xff]  ;;  %v11310_v35 = vld [vmem:[#allocation4 + $0x151] ss:$2 sm:$0xff]  ;;  %v9477_v44 = vpop.f32.mrf.mxu3 }
 0x9aa   :  { %11184 = vst [vmem:[#allocation4 + $0x160] sm:$0xff] %v11120_v61  ;;  %v10580_v27 = vpop.f32.mrf.mxu1  ;;  %v11352_v36 = vmax.f32 %v11246_v28, %v11310_v35 }
 0x9ab   :  { %v10673_v37 = vadd.f32 %v10580_v27, %v10115_v6  ;;  %v8923_v8 = vpop.f32.mrf.mxu2  ;;  %v10040_v10 = vpop.f32.mrf.mxu0 }
 0x9ac   :  { %v16604_v3 = vmax.f32 %v11351_v14, %v11352_v36 }
 0x9ad   :  { %vm10929_vm12 = vcmp.gt.f32.partialorder %v10673_v37, 0.0  ;;  %v10993_v60 = vmul.f32 0.01, %v10673_v37 }
 0x9ae   :  { %11415 = vrot.lane.b32.xlu1 %v16604_v3, %s12503_s2 }
 0x9af   :  { %v11057_v49 = vsel %vm10929_vm12, %v10673_v37, %v10993_v60 }
 0x9b0   :  { %v11121_v48 = vadd.f32 %v11057_v49, %v5219_v16  ;;  %v9562_v16 = vadd.f32 %v9477_v44, %v9003_v41 }
 0x9b1   :  { %v9479_v31 = vpop.f32.mrf.mxu3 }
 0x9b2   :  { %11185 = vst [vmem:[#allocation4 + $0x168] sm:$0xff] %v11121_v48  ;;  %v10583_v62 = vpop.f32.mrf.mxu1  ;;  %v9563_v34 = vadd.f32 %v9479_v31, %v9004_v18 }
 0x9b3   :  { %v10674_v38 = vadd.f32 %v10583_v62, %v10116_v5  ;;  %v8925_v56 = vpop.f32.mrf.mxu2  ;;  %v10120_v5 = vadd.f32 %v16616_v11, %v9562_v16  ;;  %v10042_v62 = vpop.f32.mrf.mxu0  ;;  %v16990_v16 = vld [vmem:[#allocation15_spill] sm:$0xff] }
 0x9b5   :  { %vm10930_vm13 = vcmp.gt.f32.partialorder %v10674_v38, 0.0  ;;  %v10994_v51 = vmul.f32 0.01, %v10674_v38  ;;  %12468 = vmatmul.msk.bf16.gmra.mxu1 %vm5494_vm3, %v10357_v57 }
 0x9b7   :  { %v11058_v22 = vsel %vm10930_vm13, %v10674_v38, %v10994_v51 }
 0x9b8   :  { %v11122_v58 = vadd.f32 %v11058_v22, %v10802_v4  ;;  %v10806_v4 = vld [vmem:[#allocation4 + $0x190] sm:$0xff] }
 0x9b9   :  { %v9482_v61 = vpop.f32.mrf.mxu3  ;;  %v11248_v28 = vld [vmem:[#allocation4 + $0x160] ss:$2 sm:$0xff]  ;;  %v11312_v35 = vld [vmem:[#allocation4 + $0x161] ss:$2 sm:$0xff] }
 0x9ba   :  { %11186 = vst [vmem:[#allocation4 + $0x170] sm:$0xff] %v11122_v58  ;;  %v10585_v55 = vpop.f32.mrf.mxu1  ;;  %v11353_v60 = vmax.f32 %v11248_v28, %v11312_v35 }
 0x9bb   :  { %v10675_v46 = vadd.f32 %v10585_v55, %v10117_v53  ;;  %v8928_v38 = vpop.f32.mrf.mxu2  ;;  %v9005_v53 = vadd.f32 %v8923_v8, %v16986_v0  ;;  %v10121_v55 = vadd.f32 %v10037_v63, %v9563_v34  ;;  %v10045_v11 = vpop.f32.mrf.mxu0  ;;  %v10810_v34 = vld [vmem:[#allocation4 + $0x1b0] sm:$0xff] }
 0x9bd   :  { %vm10931_vm14 = vcmp.gt.f32.partialorder %v10675_v46, 0.0  ;;  %v10995_v2 = vmul.f32 0.01, %v10675_v46  ;;  %v9564_v39 = vadd.f32 %v9482_v61, %v9005_v53 }
 0x9bf   :  { %v11059_v42 = vsel %vm10931_vm14, %v10675_v46, %v10995_v2 }
 0x9c0   :  { %v11123_v24 = vadd.f32 %v11059_v42, %v5221_v9  ;;  %v11410_v17 = vpop.permute.xlu1 %11409  ;;  %v16987_v9 = vld [vmem:[#allocation11_spill] sm:$0xff] }
 0x9c1   :  { %v11450_v45 = vadd.f32 %v11410_v17, %v16484_v59  ;;  %v9484_v29 = vpop.f32.mrf.mxu3  ;;  %v5225_v31 = vsel %vm14292_vm6, %v16987_v9, 0.0  ;;  %v16988_v17 = vld [vmem:[#allocation36_spill] sm:$0xff] }
 0x9c2   :  { %11187 = vst [vmem:[#allocation4 + $0x178] sm:$0xff] %v11123_v24  ;;  %v10588_v33 = vpop.f32.mrf.mxu1  ;;  %v9006_v1 = vadd.f32 %v8925_v56, %v16988_v17 }
 0x9c3   :  { %11466 = vst [vmem:[#allocation5 + $0x38] sm:$0xff] %v11450_v45  ;;  %v10676_v13 = vadd.f32 %v10588_v33, %v10118_v21  ;;  %v8930_v20 = vpop.f32.mrf.mxu2  ;;  %v10122_v45 = vadd.f32 %v10040_v10, %v9564_v39  ;;  %v10047_v43 = vpop.f32.mrf.mxu0 }
 0x9c4   :  { %v9565_v33 = vadd.f32 %v9484_v29, %v9006_v1 }
 0x9c5   :  { %vm10932_vm3 = vcmp.gt.f32.partialorder %v10676_v13, 0.0  ;;  %v10996_v12 = vmul.f32 0.01, %v10676_v13 }
 0x9c6   :  { %v10123_v41 = vadd.f32 %v10042_v62, %v9565_v33 }
 0x9c7   :  { %v11060_v6 = vsel %vm10932_vm3, %v10676_v13, %v10996_v12  ;;  %v10808_v12 = vld [vmem:[#allocation4 + $0x1a0] sm:$0xff] }
 0x9c8   :  { %v11124_v27 = vadd.f32 %v11060_v6, %v10804_v19  ;;  %v11412_v14 = vpop.permute.xlu2 %11411 }
 0x9c9   :  { %v11451_v59 = vadd.f32 %v11412_v14, %v16517_v7  ;;  %v11250_v36 = vld [vmem:[#allocation4 + $0x170] ss:$2 sm:$0xff]  ;;  %v11314_v37 = vld [vmem:[#allocation4 + $0x171] ss:$2 sm:$0xff]  ;;  %v5223_v7 = vsel %vm14292_vm6, %v16985_v52, 0.0  ;;  %v9487_v46 = vpop.f32.mrf.mxu3 }
 0x9ca   :  { %11188 = vst [vmem:[#allocation4 + $0x180] sm:$0xff] %v11124_v27  ;;  %v10590_v50 = vpop.f32.mrf.mxu1  ;;  %v11354_v32 = vmax.f32 %v11250_v36, %v11314_v37  ;;  %v16989_v27 = vld [vmem:[#allocation46_spill] sm:$0xff] }
 0x9cb   :  { %11467 = vst [vmem:[#allocation5 + $0x40] sm:$0xff] %v11451_v59  ;;  %v10677_v47 = vadd.f32 %v10590_v50, %v10119_v26  ;;  %v8933_v28 = vpop.f32.mrf.mxu2  ;;  %v9007_v14 = vadd.f32 %v8928_v38, %v16989_v27  ;;  %v16995_v27 = vld [vmem:[#allocation50_spill] sm:$0xff] }
 0x9cc   :  { %v16633_v23 = vmax.f32 %v11353_v60, %v11354_v32 }
 0x9cd   :  { %vm10933_vm15 = vcmp.gt.f32.partialorder %v10677_v47, 0.0  ;;  %v10997_v49 = vmul.f32 0.01, %v10677_v47  ;;  %v9566_v60 = vadd.f32 %v9487_v46, %v9007_v14 }
 0x9ce   :  { %11417 = vrot.lane.b32.xlu2 %v16633_v23, %s12503_s2 }
 0x9cf   :  { %v11061_v25 = vsel %vm10933_vm15, %v10677_v47, %v10997_v49  ;;  %v5227_v49 = vsel %vm14292_vm6, %v16990_v16, 0.0  ;;  %v10124_v18 = vadd.f32 %v10045_v11, %v9566_v60 }
 0x9d0   :  { %v11125_v48 = vadd.f32 %v11061_v25, %v5223_v7  ;;  %v16991_v25 = vld [vmem:[#allocation47_spill] sm:$0xff] }
 0x9d1   :  { %v9489_v21 = vpop.f32.mrf.mxu3  ;;  %v9008_v29 = vadd.f32 %v8930_v20, %v16991_v25 }
 0x9d2   :  { %11189 = vst [vmem:[#allocation4 + $0x188] sm:$0xff] %v11125_v48  ;;  %v10593_v57 = vpop.f32.mrf.mxu1  ;;  %v10050_v48 = vpop.f32.mrf.mxu0 }
 0x9d3   :  { %v10678_v44 = vadd.f32 %v10593_v57, %v10120_v5  ;;  %v8935_v5 = vpop.f32.mrf.mxu2 }
 0x9d5   :  { %vm10934_vm0 = vcmp.gt.f32.partialorder %v10678_v44, 0.0  ;;  %v10998_v51 = vmul.f32 0.01, %v10678_v44 }
 0x9d7   :  { %v11062_v22 = vsel %vm10934_vm0, %v10678_v44, %v10998_v51  ;;  %v9567_v44 = vadd.f32 %v9489_v21, %v9008_v29 }
 0x9d8   :  { %v11126_v58 = vadd.f32 %v11062_v22, %v10806_v4 }
 0x9d9   :  { %v11252_v19 = vld [vmem:[#allocation4 + $0x180] ss:$2 sm:$0xff]  ;;  %v11316_v6 = vld [vmem:[#allocation4 + $0x181] ss:$2 sm:$0xff]  ;;  %v9492_v47 = vpop.f32.mrf.mxu3  ;;  %v10125_v53 = vadd.f32 %v10047_v43, %v9567_v44 }
 0x9da   :  { %11190 = vst [vmem:[#allocation4 + $0x190] sm:$0xff] %v11126_v58  ;;  %v10595_v40 = vpop.f32.mrf.mxu1  ;;  %v11355_v36 = vmax.f32 %v11252_v19, %v11316_v6  ;;  %v16992_v58 = vld [vmem:[#allocation35_spill] sm:$0xff]  ;;  %v10052_v46 = vpop.f32.mrf.mxu0 }
 0x9db   :  { %v10679_v54 = vadd.f32 %v10595_v40, %v10121_v55  ;;  %v9009_v0 = vadd.f32 %v8933_v28, %v16992_v58 }
 0x9dd   :  { %vm10935_vm4 = vcmp.gt.f32.partialorder %v10679_v54, 0.0  ;;  %v10999_v2 = vmul.f32 0.01, %v10679_v54  ;;  %v9568_v39 = vadd.f32 %v9492_v47, %v9009_v0  ;;  %v16998_v0 = vld [vmem:[#allocation16_spill] sm:$0xff] }
 0x9df   :  { %v11063_v42 = vsel %vm10935_vm4, %v10679_v54, %v10999_v2  ;;  %v8938_v54 = vpop.f32.mrf.mxu2  ;;  %v16993_v2 = vld [vmem:[#allocation18_spill] sm:$0xff] }
 0x9e0   :  { %v11127_v24 = vadd.f32 %v11063_v42, %v5225_v31  ;;  %v5229_v20 = vsel %vm14292_vm6, %v16993_v2, 0.0  ;;  %v9011_v14 = vadd.f32 %v8938_v54, %v16995_v27  ;;  %v16999_v2 = vld [vmem:[#allocation37_spill] sm:$0xff] }
 0x9e1   :  { %v9494_v4 = vpop.f32.mrf.mxu3 }
 0x9e2   :  { %11191 = vst [vmem:[#allocation4 + $0x198] sm:$0xff] %v11127_v24  ;;  %v10598_v63 = vpop.f32.mrf.mxu1  ;;  %v16994_v24 = vld [vmem:[#allocation48_spill] sm:$0xff] }
 0x9e3   :  { %v10680_v8 = vadd.f32 %v10598_v63, %v10122_v45  ;;  %v9010_v17 = vadd.f32 %v8935_v5, %v16994_v24  ;;  %v10126_v45 = vadd.f32 %v10050_v48, %v9568_v39  ;;  %v16997_v48 = vld [vmem:[#allocation51_spill] sm:$0xff] }
 0x9e5   :  { %vm10936_vm1 = vcmp.gt.f32.partialorder %v10680_v8, 0.0  ;;  %v11000_v13 = vmul.f32 0.01, %v10680_v8  ;;  %v9569_v33 = vadd.f32 %v9494_v4, %v9010_v17  ;;  %v17000_v17 = vld [vmem:[#allocation14_spill] sm:$0xff] }
 0x9e7   :  { %v11064_v61 = vsel %vm10936_vm1, %v10680_v8, %v11000_v13  ;;  %v10055_v13 = vpop.f32.mrf.mxu0 }
 0x9e8   :  { %v11128_v35 = vadd.f32 %v11064_v61, %v10808_v12  ;;  %v8940_v12 = vpop.f32.mrf.mxu2  ;;  %v10812_v61 = vld [vmem:[#allocation4 + $0x1c0] sm:$0xff] }
 0x9e9   :  { %v11254_v59 = vld [vmem:[#allocation4 + $0x190] ss:$2 sm:$0xff]  ;;  %v11318_v26 = vld [vmem:[#allocation4 + $0x191] ss:$2 sm:$0xff]  ;;  %v9497_v63 = vpop.f32.mrf.mxu3 }
 0x9ea   :  { %11192 = vst [vmem:[#allocation4 + $0x1a0] sm:$0xff] %v11128_v35  ;;  %v10600_v10 = vpop.f32.mrf.mxu1  ;;  %v11356_v37 = vmax.f32 %v11254_v59, %v11318_v26 }
 0x9eb   :  { %v10681_v56 = vadd.f32 %v10600_v10, %v10123_v41  ;;  %v10127_v41 = vadd.f32 %v10052_v46, %v9569_v33 }
 0x9ec   :  { %v16648_v50 = vmax.f32 %v11355_v36, %v11356_v37 }
 0x9ed   :  { %vm10937_vm5 = vcmp.gt.f32.partialorder %v10681_v56, 0.0  ;;  %v11001_v32 = vmul.f32 0.01, %v10681_v56 }
 0x9ee   :  { %11419 = vrot.lane.b32.xlu0 %v16648_v50, %s12503_s2 }
 0x9ef   :  { %v11065_v52 = vsel %vm10937_vm5, %v10681_v56, %v11001_v32  ;;  %v9570_v32 = vadd.f32 %v9497_v63, %v9011_v14  ;;  %v10057_v16 = vpop.f32.mrf.mxu0 }
 0x9f0   :  { %v11129_v7 = vadd.f32 %v11065_v52, %v5227_v49  ;;  %v16996_v49 = vld [vmem:[#allocation21_spill] sm:$0xff]  ;;  %v8943_v25 = vpop.f32.mrf.mxu2 }
 0x9f1   :  { %v9499_v56 = vpop.f32.mrf.mxu3  ;;  %v5231_v52 = vsel %vm14292_vm6, %v16996_v49, 0.0  ;;  %v10128_v5 = vadd.f32 %v10055_v13, %v9570_v32 }
 0x9f2   :  { %11193 = vst [vmem:[#allocation4 + $0x1a8] sm:$0xff] %v11129_v7  ;;  %v10603_v57 = vpop.f32.mrf.mxu1 }
 0x9f3   :  { %v10682_v62 = vadd.f32 %v10603_v57, %v10124_v18  ;;  %v9012_v18 = vadd.f32 %v8940_v12, %v16997_v48 }
 0x9f5   :  { %vm10938_vm7 = vcmp.gt.f32.partialorder %v10682_v62, 0.0  ;;  %v11002_v38 = vmul.f32 0.01, %v10682_v62  ;;  %v9571_v44 = vadd.f32 %v9499_v56, %v9012_v18 }
 0x9f7   :  { %v11066_v51 = vsel %vm10938_vm7, %v10682_v62, %v11002_v38  ;;  %v10060_v58 = vpop.f32.mrf.mxu0 }
 0x9f8   :  { %v11130_v22 = vadd.f32 %v11066_v51, %v10810_v34  ;;  %v10814_v51 = vld [vmem:[#allocation4 + $0x1d0] sm:$0xff]  ;;  %v8945_v46 = vpop.f32.mrf.mxu2 }
 0x9f9   :  { %v11256_v6 = vld [vmem:[#allocation4 + $0x1a0] ss:$2 sm:$0xff]  ;;  %v11320_v28 = vld [vmem:[#allocation4 + $0x1a1] ss:$2 sm:$0xff]  ;;  %v9502_v34 = vpop.f32.mrf.mxu3 }
 0x9fa   :  { %11194 = vst [vmem:[#allocation4 + $0x1b0] sm:$0xff] %v11130_v22  ;;  %v10605_v55 = vpop.f32.mrf.mxu1  ;;  %v11357_v10 = vmax.f32 %v11256_v6, %v11320_v28 }
 0x9fb   :  { %v10683_v40 = vadd.f32 %v10605_v55, %v10125_v53  ;;  %v9013_v53 = vadd.f32 %v8943_v25, %v16998_v0  ;;  %v10129_v55 = vadd.f32 %v10057_v16, %v9571_v44  ;;  %v17002_v25 = vld [vmem:[#allocation23_spill] sm:$0xff] }
 0x9fd   :  { %vm10939_vm8 = vcmp.gt.f32.partialorder %v10683_v40, 0.0  ;;  %v11003_v11 = vmul.f32 0.01, %v10683_v40  ;;  %v9572_v39 = vadd.f32 %v9502_v34, %v9013_v53 }
 0x9ff   :  { %v11067_v9 = vsel %vm10939_vm8, %v10683_v40, %v11003_v11  ;;  %v10130_v63 = vadd.f32 %v10060_v58, %v9572_v39  ;;  %v10062_v33 = vpop.f32.mrf.mxu0 }
 0xa00   :  { %v11131_v31 = vadd.f32 %v11067_v9, %v5229_v20  ;;  %v11414_v42 = vpop.permute.xlu0 %11413  ;;  %v5233_v20 = vsel %vm14292_vm6, %v16999_v2, 0.0  ;;  %v8948_v13 = vpop.f32.mrf.mxu2 }
 0xa01   :  { %v11452_v1 = vadd.f32 %v11414_v42, %v16555_v30 }
 0xa02   :  { %11195 = vst [vmem:[#allocation4 + $0x1b8] sm:$0xff] %v11131_v31  ;;  %v10608_v8 = vpop.f32.mrf.mxu1  ;;  %v9504_v31 = vpop.f32.mrf.mxu3 }
 0xa03   :  { %11468 = vst [vmem:[#allocation5 + $0x48] sm:$0xff] %v11452_v1  ;;  %v10684_v21 = vadd.f32 %v10608_v8, %v10126_v45  ;;  %v9014_v1 = vadd.f32 %v8945_v46, %v17000_v17 }
 0xa05   :  { %vm10940_vm9 = vcmp.gt.f32.partialorder %v10684_v21, 0.0  ;;  %v11004_v43 = vmul.f32 0.01, %v10684_v21 }
 0xa07   :  { %v11068_v19 = vsel %vm10940_vm9, %v10684_v21, %v11004_v43  ;;  %v9573_v43 = vadd.f32 %v9504_v31, %v9014_v1 }
 0xa08   :  { %v11132_v35 = vadd.f32 %v11068_v19, %v10812_v61  ;;  %v10816_v61 = vld [vmem:[#allocation4 + $0x1e0] sm:$0xff] }
 0xa09   :  { %v11258_v30 = vld [vmem:[#allocation4 + $0x1b0] ss:$2 sm:$0xff]  ;;  %v11322_v59 = vld [vmem:[#allocation4 + $0x1b1] ss:$2 sm:$0xff] }
 0xa0a   :  { %11196 = vst [vmem:[#allocation4 + $0x1c0] sm:$0xff] %v11132_v35  ;;  %v10610_v26 = vpop.f32.mrf.mxu1  ;;  %v11358_v36 = vmax.f32 %v11258_v30, %v11322_v59  ;;  %v9507_v35 = vpop.f32.mrf.mxu3  ;;  %v10131_v59 = vadd.f32 %v10062_v33, %v9573_v43 }
 0xa0b   :  { %v10685_v37 = vadd.f32 %v10610_v26, %v10127_v41  ;;  %v17001_v41 = vld [vmem:[#allocation19_spill] sm:$0xff] }
 0xa0c   :  { %v16663_v60 = vmax.f32 %v11357_v10, %v11358_v36  ;;  %v9015_v30 = vadd.f32 %v8948_v13, %v17001_v41 }
 0xa0d   :  { %vm10941_vm2 = vcmp.gt.f32.partialorder %v10685_v37, 0.0  ;;  %v11005_v47 = vmul.f32 0.01, %v10685_v37 }
 0xa0e   :  { %11421 = vrot.lane.b32.xlu1 %v16663_v60, %s12503_s2  ;;  %v9574_v49 = vadd.f32 %v9507_v35, %v9015_v30 }
 0xa0f   :  { %v11069_v7 = vsel %vm10941_vm2, %v10685_v37, %v11005_v47  ;;  %v10065_v47 = vpop.f32.mrf.mxu0 }
 0xa10   :  { %v11133_v29 = vadd.f32 %v11069_v7, %v5231_v52  ;;  %v8950_v7 = vpop.f32.mrf.mxu2  ;;  %v10132_v18 = vadd.f32 %v10065_v47, %v9574_v49 }
 0xa12   :  { %11197 = vst [vmem:[#allocation4 + $0x1c8] sm:$0xff] %v11133_v29  ;;  %v10613_v57 = vpop.f32.mrf.mxu1 }
 0xa13   :  { %v10686_v62 = vadd.f32 %v10613_v57, %v10128_v5  ;;  %v17003_v5 = vld [vmem:[#allocation52_spill] sm:$0xff] }
 0xa14   :  { %v9016_v57 = vadd.f32 %v8950_v7, %v17003_v5 }
 0xa15   :  { %vm10942_vm10 = vcmp.gt.f32.partialorder %v10686_v62, 0.0  ;;  %v11006_v38 = vmul.f32 0.01, %v10686_v62 }
 0xa17   :  { %v11070_v4 = vsel %vm10942_vm10, %v10686_v62, %v11006_v38  ;;  %v9509_v62 = vpop.f32.mrf.mxu3 }
 0xa18   :  { %v11134_v22 = vadd.f32 %v11070_v4, %v10814_v51  ;;  %v9575_v34 = vadd.f32 %v9509_v62, %v9016_v57  ;;  %v10067_v4 = vpop.f32.mrf.mxu0 }
 0xa19   :  { %v11260_v6 = vld [vmem:[#allocation4 + $0x1c0] ss:$2 sm:$0xff]  ;;  %v11324_v28 = vld [vmem:[#allocation4 + $0x1c1] ss:$2 sm:$0xff] }
 0xa1a   :  { %11198 = vst [vmem:[#allocation4 + $0x1d0] sm:$0xff] %v11134_v22  ;;  %v10615_v40 = vpop.f32.mrf.mxu1  ;;  %v11359_v37 = vmax.f32 %v11260_v6, %v11324_v28  ;;  %v10818_v22 = vld [vmem:[#allocation4 + $0x1f0] sm:$0xff]  ;;  %v10133_v53 = vadd.f32 %v10067_v4, %v9575_v34 }
 0xa1b   :  { %v10687_v54 = vadd.f32 %v10615_v40, %v10129_v55 }
 0xa1d   :  { %vm10943_vm11 = vcmp.gt.f32.partialorder %v10687_v54, 0.0  ;;  %v11007_v11 = vmul.f32 0.01, %v10687_v54 }
 0xa1f   :  { %v11071_v9 = vsel %vm10943_vm11, %v10687_v54, %v11007_v11  ;;  %v17004_v54 = vld [vmem:[#allocation38_spill] sm:$0xff] }
 0xa20   :  { %v11135_v42 = vadd.f32 %v11071_v9, %v5233_v20  ;;  %v11416_v24 = vpop.permute.xlu1 %11415  ;;  %v5237_v39 = vsel %vm14292_vm6, %v17004_v54, 0.0 }
 0xa21   :  { %v11453_v45 = vadd.f32 %v11416_v24, %v16604_v3 }
 0xa22   :  { %11199 = vst [vmem:[#allocation4 + $0x1d8] sm:$0xff] %v11135_v42  ;;  %v10618_v8 = vpop.f32.mrf.mxu1 }
 0xa23   :  { %11469 = vst [vmem:[#allocation5 + $0x50] sm:$0xff] %v11453_v45  ;;  %v10688_v21 = vadd.f32 %v10618_v8, %v10130_v63 }
 0xa25   :  { %vm10944_vm12 = vcmp.gt.f32.partialorder %v10688_v21, 0.0  ;;  %v11008_v12 = vmul.f32 0.01, %v10688_v21 }
 0xa27   :  { %v11072_v19 = vsel %vm10944_vm12, %v10688_v21, %v11008_v12 }
 0xa28   :  { %v11136_v27 = vadd.f32 %v11072_v19, %v10816_v61  ;;  %v11418_v14 = vpop.permute.xlu2 %11417 }
 0xa29   :  { %v11454_v3 = vadd.f32 %v11418_v14, %v16633_v23  ;;  %v11262_v26 = vld [vmem:[#allocation4 + $0x1d0] ss:$2 sm:$0xff]  ;;  %v11326_v10 = vld [vmem:[#allocation4 + $0x1d1] ss:$2 sm:$0xff]  ;;  %v5235_v23 = vsel %vm14292_vm6, %v17002_v25, 0.0 }
 0xa2a   :  { %11200 = vst [vmem:[#allocation4 + $0x1e0] sm:$0xff] %v11136_v27  ;;  %v10620_v36 = vpop.f32.mrf.mxu1  ;;  %v11360_v56 = vmax.f32 %v11262_v26, %v11326_v10 }
 0xa2b   :  { %11470 = vst [vmem:[#allocation5 + $0x58] sm:$0xff] %v11454_v3  ;;  %v10689_v32 = vadd.f32 %v10620_v36, %v10131_v59 }
 0xa2c   :  { %v11377_v16 = vmax.f32 %v11359_v37, %v11360_v56 }
 0xa2d   :  { %vm10945_vm13 = vcmp.gt.f32.partialorder %v10689_v32, 0.0  ;;  %v11009_v52 = vmul.f32 0.01, %v10689_v32 }
 0xa2e   :  { %11423 = vrot.lane.b32.xlu2 %v11377_v16, %s12503_s2 }
 0xa2f   :  { %v11073_v29 = vsel %vm10945_vm13, %v10689_v32, %v11009_v52 }
 0xa30   :  { %v11137_v48 = vadd.f32 %v11073_v29, %v5235_v23 }
 0xa32   :  { %11201 = vst [vmem:[#allocation4 + $0x1e8] sm:$0xff] %v11137_v48  ;;  %v10623_v44 = vpop.f32.mrf.mxu1 }
 0xa33   :  { %v10690_v38 = vadd.f32 %v10623_v44, %v10132_v18 }
 0xa35   :  { %vm10946_vm14 = vcmp.gt.f32.partialorder %v10690_v38, 0.0  ;;  %v11010_v51 = vmul.f32 0.01, %v10690_v38 }
 0xa37   :  { %v11074_v58 = vsel %vm10946_vm14, %v10690_v38, %v11010_v51 }
 0xa38   :  { %v11138_v0 = vadd.f32 %v11074_v58, %v10818_v22 }
 0xa39   :  { %v11264_v20 = vld [vmem:[#allocation4 + $0x1e0] ss:$2 sm:$0xff]  ;;  %v11328_v9 = vld [vmem:[#allocation4 + $0x1e1] ss:$2 sm:$0xff] }
 0xa3a   :  { %11202 = vst [vmem:[#allocation4 + $0x1f0] sm:$0xff] %v11138_v0  ;;  %v10625_v55 = vpop.f32.mrf.mxu1  ;;  %v11361_v24 = vmax.f32 %v11264_v20, %v11328_v9 }
 0xa3b   :  { %v10691_v46 = vadd.f32 %v10625_v55, %v10133_v53 }
 0xa3d   :  { %vm10947_vm3 = vcmp.gt.f32.partialorder %v10691_v46, 0.0  ;;  %v11011_v40 = vmul.f32 0.01, %v10691_v46 }
 0xa3f   :  { %v11075_v11 = vsel %vm10947_vm3, %v10691_v46, %v11011_v40 }
 0xa40   :  { %v11139_v2 = vadd.f32 %v11075_v11, %v5237_v39 }
 0xa42   :  { %11203 = vst [vmem:[#allocation4 + $0x1f8] sm:$0xff] %v11139_v2 }
 0xa49   :  { %v11266_v31 = vld [vmem:[#allocation4 + $0x1f0] ss:$2 sm:$0xff]  ;;  %v11330_v42 = vld [vmem:[#allocation4 + $0x1f1] ss:$2 sm:$0xff] }
 0xa4a   :  { %v11362_v17 = vmax.f32 %v11266_v31, %v11330_v42 }
 0xa4c   :  { %v11378_v1 = vmax.f32 %v11361_v24, %v11362_v17 }
 0xa4e   :  { %11425 = vrot.lane.b32.xlu0 %v11378_v1, %s12503_s2 }
 0xa60   :  { %v11420_v45 = vpop.permute.xlu0 %11419 }
 0xa61   :  { %v11455_v63 = vadd.f32 %v11420_v45, %v16648_v50 }
 0xa63   :  { %11471 = vst [vmem:[#allocation5 + $0x60] sm:$0xff] %v11455_v63 }
 0xa80   :  { %v11422_v8 = vpop.permute.xlu1 %11421 }
 0xa81   :  { %v11456_v15 = vadd.f32 %v11422_v8, %v16663_v60 }
 0xa83   :  { %11472 = vst [vmem:[#allocation5 + $0x68] sm:$0xff] %v11456_v15 }
 0xa88   :  { %v11424_v21 = vpop.permute.xlu2 %11423 }
 0xa89   :  { %v11457_v33 = vadd.f32 %v11424_v21, %v11377_v16 }
 0xa8b   :  { %11473 = vst [vmem:[#allocation5 + $0x70] sm:$0xff] %v11457_v33 }
 0xac0   :  { %v11426_v13 = vpop.permute.xlu0 %11425 }
 0xac1   :  { %v11458_v43 = vadd.f32 %v11426_v13, %v11378_v1 }
 0xac3   :  { %11474 = vst [vmem:[#allocation5 + $0x78] sm:$0xff] %v11458_v43 }
 0xac4   :  { %11487 = dma.vmem_to_hbm [thread:$0]  %s11480_s17, 2048, %s11482_s20, [#allocation6], %s12505_s21, %s12505_s21, %s12506_s22  }
 0xac5   :  { %12500 = dma.done.wait [#allocation6], 2048  }
 0xac6   :  { %12501 = vsyncadd [#allocation6], 4294965248 }
 0xac7   :  { %11492 = vsyncpa [#allocation6], 1 }

</bundles_post_ra>
